<compile_context>
chip_gen: v6e
topology: v6e:2x2x1
jax: 0.10.0
libtpu: 0.0.40
codegen_flags: <defaults>
</compile_context>

<pallas_src>
import functools

import jax
import jax.numpy as jnp
from jax import lax
from jax.experimental import pallas as pl
from jax.experimental.pallas import tpu as pltpu

EPS = 1e-5


def _shift_lanes(v, s):
    """t[:, l] = v[:, l + s] if 0 <= l + s < L else 0 (zero fill at the ends)."""
    if s == 0:
        return v
    L = v.shape[-1]
    pad = jnp.zeros((v.shape[0], abs(s)), v.dtype)
    if s > 0:
        return jnp.concatenate([v[:, s:], pad], axis=-1)
    return jnp.concatenate([pad, v[:, :L + s]], axis=-1)


def _bn_relu_dwconv_kernel(x_ref, p_ref, o_ref, *, H, W):
    # x_ref: (N, CB, H*W)  channel block, flattened NCHW (lanes = H*W)
    # p_ref: (CB, 11)      packed params: [gamma, beta, w00..w22 (kh*3+kw)]
    # o_ref: (N, CB, H*W)
    N, CB, HW = x_ref.shape

    # ---- packed per-channel parameters (read once per grid step) -----------
    gamma = p_ref[:, 0:1]                            # (CB, 1)
    beta = p_ref[:, 1:2]                             # (CB, 1)
    wk = [p_ref[:, 2 + t:3 + t] for t in range(9)]   # 9 x (CB, 1), hoisted

    # ---- train-mode BatchNorm statistics (two-pass, per channel) -----------
    inv_cnt = 1.0 / float(N * H * W)
    tot = jnp.zeros((CB, 1), jnp.float32)
    for n in range(N):                               # N is small & static
        tot = tot + jnp.sum(x_ref[n].astype(jnp.float32), axis=1, keepdims=True)
    mean = tot * inv_cnt
    totsq = jnp.zeros((CB, 1), jnp.float32)
    for n in range(N):
        d = x_ref[n].astype(jnp.float32) - mean
        totsq = totsq + jnp.sum(d * d, axis=1, keepdims=True)
    var = totsq * inv_cnt
    scale = gamma * lax.rsqrt(var + EPS)             # (CB, 1)
    shift = beta - mean * scale                      # (CB, 1)

    # ---- column-validity masks for the dw = +/-1 taps (built once) ---------
    # Float trick is exact here: pos <= 3135 is exact in f32 and the 0.5/W
    # floor margin dwarfs rounding error (safe for this fixed H*W = 3136).
    pos = lax.broadcasted_iota(jnp.int32, (1, HW), 1).astype(jnp.float32)
    row = jnp.floor((pos + 0.5) * (1.0 / W))
    col = pos - row * W
    ok_left = col >= 0.5                             # w >= 1   (may read w-1)
    ok_right = col <= (W - 1.5)                      # w <= W-2 (may read w+1)

    for n in range(N):
        xn = x_ref[n].astype(jnp.float32)
        # BN + ReLU (per-channel scale/shift broadcast along lanes).
        y0 = jnp.maximum(xn * scale + shift, 0.0)    # (CB, HW)

        # Column-shifted variants (value at (h, w-1) / (h, w+1)), masked once.
        ym = jnp.where(ok_left, _shift_lanes(y0, -1), 0.0)
        yp = jnp.where(ok_right, _shift_lanes(y0, +1), 0.0)

        # Pre-combine the three column taps of each kernel row; weights are
        # constant along lanes so they commute with the +/-W row shift.
        t_top = wk[0] * ym + wk[1] * y0 + wk[2] * yp   # kh = 0 (dh = -1)
        t_mid = wk[3] * ym + wk[4] * y0 + wk[5] * yp   # kh = 1 (dh =  0)
        t_bot = wk[6] * ym + wk[7] * y0 + wk[8] * yp   # kh = 2 (dh = +1)

        # Row shifts are +/-W lanes with zero fill (handles h = 0 / H-1 edges).
        acc = t_mid + _shift_lanes(t_top, -W) + _shift_lanes(t_bot, +W)
        o_ref[n] = acc.astype(o_ref.dtype)


@functools.partial(jax.jit, static_argnames=("channel_block",))
def bn_relu_dwconv(x_nchw, gamma, beta, w_oihw, *, channel_block=24):
    """x_nchw: (N, C, H, W); gamma/beta: (C,); w_oihw: (C, 1, 3, 3)."""
    N, C, H, W = x_nchw.shape
    HW = H * W

    # CB=24 -> grid=2: one block per TensorCore on v7x; fine on v5e/v6e too.
    # (Single-TC parts may prefer CB=16; sweep channel_block if needed.)
    CB = channel_block
    if C % CB != 0 or CB % 8 != 0:
        CB = C                                       # full-channel fallback

    x2 = x_nchw.reshape(N, C, HW)                    # contiguous -> free
    params = jnp.concatenate(
        [gamma.reshape(C, 1), beta.reshape(C, 1), w_oihw.reshape(C, 9)],
        axis=1).astype(jnp.float32)                  # (C, 11) packed params

    kernel = functools.partial(_bn_relu_dwconv_kernel, H=H, W=W)
    out = pl.pallas_call(
        kernel,
        out_shape=jax.ShapeDtypeStruct((N, C, HW), x_nchw.dtype),
        grid=(C // CB,),
        in_specs=[
            pl.BlockSpec((N, CB, HW), lambda j: (0, j, 0)),   # x
            pl.BlockSpec((CB, 11), lambda j: (j, 0)),         # packed params
        ],
        out_specs=pl.BlockSpec((N, CB, HW), lambda j: (0, j, 0)),
        compiler_params=pltpu.CompilerParams(
            dimension_semantics=("parallel",)),
    )(x2, params)
    return out.reshape(N, C, H, W)


def reference(x_nchw, gamma, beta, w_oihw):
    """Plain-JAX reference reproducing the PyTorch forward (train-mode BN)."""
    mean = jnp.mean(x_nchw, axis=(0, 2, 3), keepdims=True)
    var = jnp.mean((x_nchw - mean) ** 2, axis=(0, 2, 3), keepdims=True)
    y = (x_nchw - mean) * lax.rsqrt(var + EPS)
    y = y * gamma[None, :, None, None] + beta[None, :, None, None]
    y = jnp.maximum(y, 0.0)
    return lax.conv_general_dilated(
        y, w_oihw, window_strides=(1, 1), padding=((1, 1), (1, 1)),
        feature_group_count=x_nchw.shape[1],
        dimension_numbers=("NCHW", "OIHW", "NCHW"))


if __name__ == "__main__":
    # Channels fixed at 48 by the module; the module's own input is (1,48,56,56).
    N, C, H, W = 1, 48, 56, 56

    key = jax.random.PRNGKey(0)
    k1, k2, k3, k4 = jax.random.split(key, 4)
    x = jax.random.normal(k1, (N, C, H, W), jnp.float32)
    gamma = 1.0 + 0.1 * jax.random.normal(k2, (C,), jnp.float32)
    beta = 0.1 * jax.random.normal(k3, (C,), jnp.float32)
    w = jax.random.normal(k4, (C, 1, 3, 3), jnp.float32) / 3.0

    out = jax.block_until_ready(bn_relu_dwconv(x, gamma, beta, w))

    ref = reference(x, gamma, beta, w)
    assert out.shape == (N, C, H, W), out.shape
    err = float(jnp.max(jnp.abs(out - ref)))
    if err < 2e-3:
        print("KERNEL_OK")
    else:
        raise SystemExit(f"mismatch vs reference: max abs err = {err}")
</pallas_src>

<mosaic_0001>
module attributes {stable_mosaic.version = 11 : i64} {
  func.func @_bn_relu_dwconv_kernel(%arg0: i32, %arg1: memref<1x24x3136xf32, #tpu.memory_space<vmem>>, %arg2: memref<24x11xf32, #tpu.memory_space<vmem>>, %arg3: memref<1x24x3136xf32, #tpu.memory_space<vmem>>) attributes {dimension_semantics = [#tpu.dimension_semantics<parallel>], iteration_bounds = array<i64: 2>, scalar_prefetch = 0 : i64, scratch_operands = 0 : i64, tpu.core_type = #tpu.core_type<tc>, window_params = [{transform_indices = @transform_0, window_bounds = array<i64: 1, 24, 3136>}, {transform_indices = @transform_1, window_bounds = array<i64: 24, 11>}, {transform_indices = @transform_2, window_bounds = array<i64: 1, 24, 3136>}]} {
    %c0 = arith.constant 0 : index
    %c0_0 = arith.constant 0 : index
    %0 = vector.load %arg2[%c0, %c0_0] : memref<24x11xf32, #tpu.memory_space<vmem>>, vector<24x1xf32>
    %c0_1 = arith.constant 0 : index
    %c1 = arith.constant 1 : index
    %1 = vector.load %arg2[%c0_1, %c1] : memref<24x11xf32, #tpu.memory_space<vmem>>, vector<24x1xf32>
    %c0_2 = arith.constant 0 : index
    %c2 = arith.constant 2 : index
    %2 = vector.load %arg2[%c0_2, %c2] : memref<24x11xf32, #tpu.memory_space<vmem>>, vector<24x1xf32>
    %c0_3 = arith.constant 0 : index
    %c3 = arith.constant 3 : index
    %3 = vector.load %arg2[%c0_3, %c3] : memref<24x11xf32, #tpu.memory_space<vmem>>, vector<24x1xf32>
    %c0_4 = arith.constant 0 : index
    %c4 = arith.constant 4 : index
    %4 = vector.load %arg2[%c0_4, %c4] : memref<24x11xf32, #tpu.memory_space<vmem>>, vector<24x1xf32>
    %c0_5 = arith.constant 0 : index
    %c5 = arith.constant 5 : index
    %5 = vector.load %arg2[%c0_5, %c5] : memref<24x11xf32, #tpu.memory_space<vmem>>, vector<24x1xf32>
    %c0_6 = arith.constant 0 : index
    %c6 = arith.constant 6 : index
    %6 = vector.load %arg2[%c0_6, %c6] : memref<24x11xf32, #tpu.memory_space<vmem>>, vector<24x1xf32>
    %c0_7 = arith.constant 0 : index
    %c7 = arith.constant 7 : index
    %7 = vector.load %arg2[%c0_7, %c7] : memref<24x11xf32, #tpu.memory_space<vmem>>, vector<24x1xf32>
    %c0_8 = arith.constant 0 : index
    %c8 = arith.constant 8 : index
    %8 = vector.load %arg2[%c0_8, %c8] : memref<24x11xf32, #tpu.memory_space<vmem>>, vector<24x1xf32>
    %c0_9 = arith.constant 0 : index
    %c9 = arith.constant 9 : index
    %9 = vector.load %arg2[%c0_9, %c9] : memref<24x11xf32, #tpu.memory_space<vmem>>, vector<24x1xf32>
    %c0_10 = arith.constant 0 : index
    %c10 = arith.constant 10 : index
    %10 = vector.load %arg2[%c0_10, %c10] : memref<24x11xf32, #tpu.memory_space<vmem>>, vector<24x1xf32>
    %cst = arith.constant 0.000000e+00 : f32
    %11 = vector.broadcast %cst : f32 to vector<24x1xf32>
    %c0_11 = arith.constant 0 : index
    %c0_12 = arith.constant 0 : index
    %c0_13 = arith.constant 0 : index
    %12 = vector.load %arg1[%c0_11, %c0_12, %c0_13] : memref<1x24x3136xf32, #tpu.memory_space<vmem>>, vector<1x24x3136xf32>
    %13 = vector.shape_cast %12 : vector<1x24x3136xf32> to vector<24x3136xf32>
    %cst_14 = arith.constant dense<0.000000e+00> : vector<24xf32>
    %14 = vector.multi_reduction <add>, %13, %cst_14 [1] : vector<24x3136xf32> to vector<24xf32>
    %15 = vector.shape_cast %14 : vector<24xf32> to vector<24x1xf32>
    %16 = arith.addf %11, %15 : vector<24x1xf32>
    %cst_15 = arith.constant 3.18877544E-4 : f32
    %17 = vector.broadcast %cst_15 : f32 to vector<24x1xf32>
    %18 = arith.mulf %16, %17 : vector<24x1xf32>
    %cst_16 = arith.constant 0.000000e+00 : f32
    %19 = vector.broadcast %cst_16 : f32 to vector<24x1xf32>
    %c0_17 = arith.constant 0 : index
    %c0_18 = arith.constant 0 : index
    %c0_19 = arith.constant 0 : index
    %20 = vector.load %arg1[%c0_17, %c0_18, %c0_19] : memref<1x24x3136xf32, #tpu.memory_space<vmem>>, vector<1x24x3136xf32>
    %21 = vector.shape_cast %20 : vector<1x24x3136xf32> to vector<24x3136xf32>
    %22 = vector.broadcast %18 : vector<24x1xf32> to vector<24x3136xf32>
    %23 = arith.subf %21, %22 : vector<24x3136xf32>
    %24 = arith.mulf %23, %23 : vector<24x3136xf32>
    %cst_20 = arith.constant dense<0.000000e+00> : vector<24xf32>
    %25 = vector.multi_reduction <add>, %24, %cst_20 [1] : vector<24x3136xf32> to vector<24xf32>
    %26 = vector.shape_cast %25 : vector<24xf32> to vector<24x1xf32>
    %27 = arith.addf %19, %26 : vector<24x1xf32>
    %cst_21 = arith.constant 3.18877544E-4 : f32
    %28 = vector.broadcast %cst_21 : f32 to vector<24x1xf32>
    %29 = arith.mulf %27, %28 : vector<24x1xf32>
    %cst_22 = arith.constant 9.99999974E-6 : f32
    %30 = vector.broadcast %cst_22 : f32 to vector<24x1xf32>
    %31 = arith.addf %29, %30 : vector<24x1xf32>
    %32 = math.rsqrt %31 : vector<24x1xf32>
    %33 = arith.mulf %0, %32 : vector<24x1xf32>
    %34 = arith.mulf %18, %33 : vector<24x1xf32>
    %35 = arith.subf %1, %34 : vector<24x1xf32>
    %36 = tpu.iota {dimensions = array<i32: 1>} : vector<1x3136xi32>
    %37 = arith.sitofp %36 : vector<1x3136xi32> to vector<1x3136xf32>
    %cst_23 = arith.constant 5.000000e-01 : f32
    %38 = vector.broadcast %cst_23 : f32 to vector<1x3136xf32>
    %39 = arith.addf %37, %38 : vector<1x3136xf32>
    %cst_24 = arith.constant 0.0178571437 : f32
    %40 = vector.broadcast %cst_24 : f32 to vector<1x3136xf32>
    %41 = arith.mulf %39, %40 : vector<1x3136xf32>
    %42 = math.floor %41 : vector<1x3136xf32>
    %cst_25 = arith.constant 5.600000e+01 : f32
    %43 = vector.broadcast %cst_25 : f32 to vector<1x3136xf32>
    %44 = arith.mulf %42, %43 : vector<1x3136xf32>
    %45 = arith.subf %37, %44 : vector<1x3136xf32>
    %cst_26 = arith.constant 5.000000e-01 : f32
    %46 = vector.broadcast %cst_26 : f32 to vector<1x3136xf32>
    %47 = arith.cmpf oge, %45, %46 : vector<1x3136xf32>
    %cst_27 = arith.constant 5.450000e+01 : f32
    %48 = vector.broadcast %cst_27 : f32 to vector<1x3136xf32>
    %49 = arith.cmpf ole, %45, %48 : vector<1x3136xf32>
    %c0_28 = arith.constant 0 : index
    %c0_29 = arith.constant 0 : index
    %c0_30 = arith.constant 0 : index
    %50 = vector.load %arg1[%c0_28, %c0_29, %c0_30] : memref<1x24x3136xf32, #tpu.memory_space<vmem>>, vector<1x24x3136xf32>
    %51 = vector.shape_cast %50 : vector<1x24x3136xf32> to vector<24x3136xf32>
    %52 = vector.broadcast %33 : vector<24x1xf32> to vector<24x3136xf32>
    %53 = arith.mulf %51, %52 : vector<24x3136xf32>
    %54 = vector.broadcast %35 : vector<24x1xf32> to vector<24x3136xf32>
    %55 = arith.addf %53, %54 : vector<24x3136xf32>
    %cst_31 = arith.constant 0.000000e+00 : f32
    %56 = vector.broadcast %cst_31 : f32 to vector<24x3136xf32>
    %57 = arith.maximumf %55, %56 : vector<24x3136xf32>
    %cst_32 = arith.constant 0.000000e+00 : f32
    %58 = vector.broadcast %cst_32 : f32 to vector<24x1xf32>
    %59 = vector.extract_strided_slice %57 {offsets = [0, 0], sizes = [24, 3135], strides = [1, 1]} : vector<24x3136xf32> to vector<24x3135xf32>
    %60 = tpu.concatenate %58, %59 in 1 : vector<24x1xf32>, vector<24x3135xf32> -> vector<24x3136xf32>
    %cst_33 = arith.constant 0.000000e+00 : f32
    %61 = vector.shape_cast %47 : vector<1x3136xi1> to vector<1x3136xi1>
    %62 = vector.broadcast %61 : vector<1x3136xi1> to vector<24x3136xi1>
    %63 = vector.broadcast %cst_33 : f32 to vector<24x3136xf32>
    %64 = arith.select %62, %60, %63 : vector<24x3136xi1>, vector<24x3136xf32>
    %cst_34 = arith.constant 0.000000e+00 : f32
    %65 = vector.broadcast %cst_34 : f32 to vector<24x1xf32>
    %66 = vector.extract_strided_slice %57 {offsets = [0, 1], sizes = [24, 3135], strides = [1, 1]} : vector<24x3136xf32> to vector<24x3135xf32>
    %67 = tpu.concatenate %66, %65 in 1 : vector<24x3135xf32>, vector<24x1xf32> -> vector<24x3136xf32>
    %cst_35 = arith.constant 0.000000e+00 : f32
    %68 = vector.shape_cast %49 : vector<1x3136xi1> to vector<1x3136xi1>
    %69 = vector.broadcast %68 : vector<1x3136xi1> to vector<24x3136xi1>
    %70 = vector.broadcast %cst_35 : f32 to vector<24x3136xf32>
    %71 = arith.select %69, %67, %70 : vector<24x3136xi1>, vector<24x3136xf32>
    %72 = vector.broadcast %2 : vector<24x1xf32> to vector<24x3136xf32>
    %73 = arith.mulf %72, %64 : vector<24x3136xf32>
    %74 = vector.broadcast %3 : vector<24x1xf32> to vector<24x3136xf32>
    %75 = arith.mulf %74, %57 : vector<24x3136xf32>
    %76 = arith.addf %73, %75 : vector<24x3136xf32>
    %77 = vector.broadcast %4 : vector<24x1xf32> to vector<24x3136xf32>
    %78 = arith.mulf %77, %71 : vector<24x3136xf32>
    %79 = arith.addf %76, %78 : vector<24x3136xf32>
    %80 = vector.broadcast %5 : vector<24x1xf32> to vector<24x3136xf32>
    %81 = arith.mulf %80, %64 : vector<24x3136xf32>
    %82 = vector.broadcast %6 : vector<24x1xf32> to vector<24x3136xf32>
    %83 = arith.mulf %82, %57 : vector<24x3136xf32>
    %84 = arith.addf %81, %83 : vector<24x3136xf32>
    %85 = vector.broadcast %7 : vector<24x1xf32> to vector<24x3136xf32>
    %86 = arith.mulf %85, %71 : vector<24x3136xf32>
    %87 = arith.addf %84, %86 : vector<24x3136xf32>
    %88 = vector.broadcast %8 : vector<24x1xf32> to vector<24x3136xf32>
    %89 = arith.mulf %88, %64 : vector<24x3136xf32>
    %90 = vector.broadcast %9 : vector<24x1xf32> to vector<24x3136xf32>
    %91 = arith.mulf %90, %57 : vector<24x3136xf32>
    %92 = arith.addf %89, %91 : vector<24x3136xf32>
    %93 = vector.broadcast %10 : vector<24x1xf32> to vector<24x3136xf32>
    %94 = arith.mulf %93, %71 : vector<24x3136xf32>
    %95 = arith.addf %92, %94 : vector<24x3136xf32>
    %cst_36 = arith.constant 0.000000e+00 : f32
    %96 = vector.broadcast %cst_36 : f32 to vector<24x56xf32>
    %97 = vector.extract_strided_slice %79 {offsets = [0, 0], sizes = [24, 3080], strides = [1, 1]} : vector<24x3136xf32> to vector<24x3080xf32>
    %98 = tpu.concatenate %96, %97 in 1 : vector<24x56xf32>, vector<24x3080xf32> -> vector<24x3136xf32>
    %99 = arith.addf %87, %98 : vector<24x3136xf32>
    %cst_37 = arith.constant 0.000000e+00 : f32
    %100 = vector.broadcast %cst_37 : f32 to vector<24x56xf32>
    %101 = vector.extract_strided_slice %95 {offsets = [0, 56], sizes = [24, 3080], strides = [1, 1]} : vector<24x3136xf32> to vector<24x3080xf32>
    %102 = tpu.concatenate %101, %100 in 1 : vector<24x3080xf32>, vector<24x56xf32> -> vector<24x3136xf32>
    %103 = arith.addf %99, %102 : vector<24x3136xf32>
    %c0_38 = arith.constant 0 : index
    %c0_39 = arith.constant 0 : index
    %c0_40 = arith.constant 0 : index
    %104 = vector.load %arg3[%c0_38, %c0_39, %c0_40] : memref<1x24x3136xf32, #tpu.memory_space<vmem>>, vector<1x24x3136xf32>
    %105 = vector.shape_cast %104 : vector<1x24x3136xf32> to vector<24x3136xf32>
    %106 = vector.shape_cast %103 : vector<24x3136xf32> to vector<1x24x3136xf32>
    tpu.vector_store %arg3[%c0_38, %c0_39, %c0_40], %106 {strides = array<i32>} : memref<1x24x3136xf32, #tpu.memory_space<vmem>>, vector<1x24x3136xf32>,
    return
  }
  func.func @transform_0(%arg0: i32) -> (i32, i32, i32) {
    %c0_i32 = arith.constant 0 : i32
    %c0_i32_0 = arith.constant 0 : i32
    %c0_i32_1 = arith.constant 0 : i32
    return %c0_i32, %arg0, %c0_i32_0 : i32, i32, i32
  }
  func.func @transform_1(%arg0: i32) -> (i32, i32) {
    %c0_i32 = arith.constant 0 : i32
    %c0_i32_0 = arith.constant 0 : i32
    return %arg0, %c0_i32 : i32, i32
  }
  func.func @transform_2(%arg0: i32) -> (i32, i32, i32) {
    %c0_i32 = arith.constant 0 : i32
    %c0_i32_0 = arith.constant 0 : i32
    %c0_i32_1 = arith.constant 0 : i32
    return %c0_i32, %arg0, %c0_i32_0 : i32, i32, i32
  }
}

</mosaic_0001>

<bundles_post_ra>
// kernel: bn_relu_dwconv.1
= control target key start
LH: loop header
LB: loop body
LE: loop exit
PB: predicated region body
PF: predicated region fallthrough
CT: control target
= control target key end

     0   :  { %s4418_s9 = smov 0   ;;  %s10725_s0 = inlined_call_operand.vmem [shape: f32[1,48,3136], index: 0, kind: input, shape index: {}]   ;;  %s10726_s1 = inlined_call_operand.vmem [shape: f32[48,11], index: 1, kind: input, shape index: {}]   ;;  %s10727_s2 = inlined_call_operand.vmem [shape: f32[1,48,3136], index: 2, kind: output, shape index: {}]  }
   0x1 LB: > { %s4297_s10 = sadd.s32 4294967295, %s4386_s9   ;;  %p4301_p0 = scmp.ge.s32.totalorder %s4386_s9, 1  ;;  %s4386_s9 = sphi %s4418_s9, %s12_s9  }
   0x2   : > { %p125_p1 = scmp.lt.s32.totalorder %s4386_s9, 3 }
   0x4   : > { %p126_p2 = pnand %p4301_p0, %p125_p1 }
   0x6   : > { %129 = sbr.rel (%p126_p2) target bundleno = 1470 (0x5be), region = 28 }
   0xb   : > { %s154_s11 = smul.u32 3, %s4297_s10  ;;  %v4388_v0 = vmov 2   ;;  %v4389_v10 = vmov 3   ;;  %v4390_v18 = vmov 4   ;;  %v4391_v30 = vmov 5   ;;  %s4398_s20 = smov 1  }
   0xc   : > { %4332 = vset.pattern.permute.xlu0 %v4388_v0  ;;  %4331 = vset.pattern.permute.xlu1 %v4388_v0  ;;  %v4392_v45 = vmov 6   ;;  %v10729_v61 = vmov 7   ;;  %vm11000_vm0 = vcmask 523264   ;;  %vm1310_vm1 = vcmask 7168   ;;  %s4400_s21 = smov 127   ;;  %s4401_s22 = smov 56  }
   0xd   : > { %p155_p3 = scmp.lt.s32.totalorder %s154_s11, 5  ;;  %s4402_s23 = smov 72  }
   0xf   : > { %s12912_s11 = smov (!%p155_p3, %s154_s11), 5 }
  0x10   : > { %s4303_s12 = sshll.u32 %s12912_s11, 3  ;;  %s4307_s13 = smul.u32 200, %s12912_s11 }
  0x11   : > { %s165_s16 = scalar_lea.vmem %s10726_s1, %s4303_s12 }
  0x12   : > { %v4433_v1 = vld [vmem:[%s165_s16 + $0x8] sm:$0xff]  ;;  %s4440_s19 = scalar_lea.vmem %s10725_s0, %s4307_s13  ;;  %v4442_v2 = vld [vmem:[%s165_s16] sm:$0xff]  ;;  %v4455_v6 = vld [vmem:[%s165_s16 + $0x10] sm:$0xff]  ;;  %s10314_s26 = scalar_lea.vmem %s10727_s2, %s4307_s13 }
  0x13   : > { %11122 = vst [vmem:[#allocation2_spill] sm:$0xff] %v4433_v1  ;;  %11123 = vst [vmem:[#allocation3_spill] sm:$0xff] %v4442_v2  ;;  %2020 = vperm.xlu0 %4332, %v4433_v1   ;;  %2015 = vperm.xlu1 %4331, %v4442_v2   ;;  %v4447_v3 = vld [vmem:[%s4440_s19] sm:$0xff]  ;;  %v4450_v4 = vld [vmem:[%s4440_s19 + $0x8] sm:$0xff] }
  0x14   : > { %11124 = vst [vmem:[#allocation4_spill] sm:$0xff] %v4450_v4  ;;  %v4453_v5 = vld [vmem:[%s4440_s19 + $0x10] sm:$0xff]  ;;  %11125 = vst [vmem:[#allocation5_spill] sm:$0xff] %v4455_v6  ;;  %v252_v7 = vadd.f32 %v4450_v4, %v4447_v3  ;;  %v4460_v8 = vld [vmem:[%s4440_s19 + $0x18] sm:$0xff] }
  0x15   : > { %11126 = vst [vmem:[#allocation6_spill] sm:$0xff] %v4460_v8  ;;  %v4465_v11 = vld [vmem:[%s4440_s19 + $0x20] sm:$0xff]  ;;  %v4470_v13 = vld [vmem:[%s4440_s19 + $0x28] sm:$0xff]  ;;  %v4474_v15 = vld [vmem:[%s4440_s19 + $0x30] sm:$0xff] }
  0x16   : > { %v253_v9 = vadd.f32 %v252_v7, %v4453_v5  ;;  %11127 = vst [vmem:[#allocation7_spill] sm:$0xff] %v4465_v11  ;;  %v4477_v16 = vld [vmem:[%s4440_s19 + $0xc8] sm:$0xff]  ;;  %v4480_v17 = vld [vmem:[%s4440_s19 + $0xd0] sm:$0xff]  ;;  %v4485_v20 = vld [vmem:[%s4440_s19 + $0xd8] sm:$0xff] }
  0x17   : > { %4334 = vset.pattern.permute.xlu0 %v4389_v10  ;;  %2025 = vperm.xlu1 %4331, %v4455_v6   ;;  %v280_v21 = vadd.f32 %v4480_v17, %v4477_v16  ;;  %v4491_v22 = vld [vmem:[%s4440_s19 + $0x38] sm:$0xff]  ;;  %v4494_v23 = vld [vmem:[%s4440_s19 + $0xe0] sm:$0xff]  ;;  %v4502_v27 = vld [vmem:[%s4440_s19 + $0xe8] sm:$0xff] }
  0x18   : > { %2108 = vperm.xlu0 %4334, %v4433_v1   ;;  %v254_v12 = vadd.f32 %v253_v9, %v4460_v8  ;;  %v4499_v26 = vld [vmem:[%s4440_s19 + $0x40] sm:$0xff]  ;;  %v4508_v31 = vld [vmem:[%s4440_s19 + $0x48] sm:$0xff]  ;;  %v4511_v32 = vld [vmem:[%s4440_s19 + $0xf0] sm:$0xff] }
  0x19   : > { %v281_v25 = vadd.f32 %v280_v21, %v4485_v20  ;;  %v4517_v35 = vld [vmem:[%s4440_s19 + $0x50] sm:$0xff]  ;;  %v4520_v36 = vld [vmem:[%s4440_s19 + $0xf8] sm:$0xff]  ;;  %v4531_v41 = vld [vmem:[%s4440_s19 + $0x1a0] sm:$0xff] }
  0x1a   : > { %v255_v14 = vadd.f32 %v254_v12, %v4465_v11  ;;  %v4523_v37 = vld [vmem:[%s4440_s19 + $0x190] sm:$0xff]  ;;  %v4528_v40 = vld [vmem:[%s4440_s19 + $0x198] sm:$0xff]  ;;  %v4538_v43 = vld [vmem:[%s4440_s19 + $0x100] sm:$0xff] }
  0x1b   : > { %4333 = vset.pattern.permute.xlu1 %v4389_v10  ;;  %v282_v29 = vadd.f32 %v281_v25, %v4494_v23  ;;  %v4535_v42 = vld [vmem:[%s4440_s19 + $0x58] sm:$0xff]  ;;  %v307_v44 = vadd.f32 %v4528_v40, %v4523_v37  ;;  %v4545_v48 = vld [vmem:[%s4440_s19 + $0x1a8] sm:$0xff]  ;;  %v4549_v49 = vld [vmem:[%s4440_s19 + $0x60] sm:$0xff] }
  0x1c   : > { %4336 = vset.pattern.permute.xlu0 %v4390_v18  ;;  %2104 = vperm.xlu1 %4333, %v4442_v2   ;;  %v256_v19 = vadd.f32 %v255_v14, %v4470_v13  ;;  %v4552_v50 = vld [vmem:[%s4440_s19 + $0x108] sm:$0xff]  ;;  %v4558_v54 = vld [vmem:[%s4440_s19 + $0x1b0] sm:$0xff]  ;;  %v4571_v60 = vld [vmem:[%s4440_s19 + $0x1b8] sm:$0xff] }
  0x1d   : > { %2270 = vperm.xlu0 %4336, %v4433_v1   ;;  %v283_v34 = vadd.f32 %v282_v29, %v4502_v27  ;;  %v308_v51 = vadd.f32 %v307_v44, %v4531_v41  ;;  %11128 = vst [vmem:[#allocation8_spill] sm:$0xff] %v4558_v54  ;;  %v4562_v55 = vld [vmem:[%s4440_s19 + $0x68] sm:$0xff]  ;;  %v4565_v56 = vld [vmem:[%s4440_s19 + $0x110] sm:$0xff]  ;;  %11129 = vst [vmem:[#allocation9_spill] sm:$0xff] %v4571_v60 }
  0x1e   : > { %v257_v24 = vadd.f32 %v256_v19, %v4474_v15  ;;  %v4575_v62 = vld [vmem:[%s4440_s19 + $0x70] sm:$0xff]  ;;  %v4578_v63 = vld [vmem:[%s4440_s19 + $0x118] sm:$0xff]  ;;  %v4585_v10 = vld [vmem:[%s4440_s19 + $0x1c0] sm:$0xff] }
  0x1f   : > { %v284_v39 = vadd.f32 %v283_v34, %v4511_v32  ;;  %v309_v57 = vadd.f32 %v308_v51, %v4545_v48  ;;  %11130 = vst [vmem:[#allocation10_spill] sm:$0xff] %v4585_v10  ;;  %v4588_v12 = vld [vmem:[%s4440_s19 + $0x78] sm:$0xff]  ;;  %v4591_v14 = vld [vmem:[%s4440_s19 + $0x120] sm:$0xff]  ;;  %v4610_v34 = vld [vmem:[%s4440_s19 + $0x1d0] sm:$0xff] }
  0x20   : > { %2112 = vperm.xlu1 %4333, %v4455_v6   ;;  %v258_v28 = vadd.f32 %v257_v24, %v4491_v22  ;;  %v4598_v24 = vld [vmem:[%s4440_s19 + $0x1c8] sm:$0xff]  ;;  %v4601_v25 = vld [vmem:[%s4440_s19 + $0x80] sm:$0xff]  ;;  %11132 = vst [vmem:[#allocation12_spill] sm:$0xff] %v4610_v34  ;;  %v4617_v44 = vld [vmem:[%s4440_s19 + $0x130] sm:$0xff] }
  0x21   : > { %4338 = vset.pattern.permute.xlu0 %v4391_v30  ;;  %v285_v47 = vadd.f32 %v284_v39, %v4520_v36  ;;  %v310_v0 = vadd.f32 %v309_v57, %v4558_v54  ;;  %11131 = vst [vmem:[#allocation11_spill] sm:$0xff] %v4598_v24  ;;  %v4614_v39 = vld [vmem:[%s4440_s19 + $0x88] sm:$0xff]  ;;  %11133 = vst [vmem:[#allocation13_spill] sm:$0xff] %v4617_v44  ;;  %v4630_v57 = vld [vmem:[%s4440_s19 + $0x138] sm:$0xff]  ;;  %v11151_v54 = vmov 8  }
  0x22   : > { %2432 = vperm.xlu0 %4338, %v4433_v1   ;;  %v259_v33 = vadd.f32 %v258_v28, %v4499_v26  ;;  %v4604_v28 = vld [vmem:[%s4440_s19 + $0x128] sm:$0xff]  ;;  %11135 = vst [vmem:[#allocation15_spill] sm:$0xff] %v4630_v57 }
  0x23   : > { %v286_v53 = vadd.f32 %v285_v47, %v4538_v43 }
  0x24   : > { %4335 = vset.pattern.permute.xlu1 %v4390_v18  ;;  %v260_v38 = vadd.f32 %v259_v33, %v4508_v31  ;;  %v311_v18 = vadd.f32 %v310_v0, %v4571_v60  ;;  %v4712_v60 = vld [vmem:[%s4440_s19 + $0x178] sm:$0xff] }
  0x25   : > { %2266 = vperm.xlu1 %4335, %v4442_v2   ;;  %v287_v59 = vadd.f32 %v286_v53, %v4552_v50  ;;  %v4627_v53 = vld [vmem:[%s4440_s19 + $0x90] sm:$0xff] }
  0x26   : > { %4340 = vset.pattern.permute.xlu0 %v4392_v45  ;;  %v261_v46 = vadd.f32 %v260_v38, %v4517_v35  ;;  %v312_v29 = vadd.f32 %v311_v18, %v4585_v10  ;;  %v10728_v38 = vmov 8   ;;  %v4642_v18 = vld [vmem:[%s4440_s19 + $0x140] sm:$0xff]  ;;  %v4692_v10 = vld [vmem:[%s4440_s19 + $0x168] sm:$0xff] }
  0x27   : > { %2519 = vperm.xlu0 %4340, %v4433_v1   ;;  %v288_v9 = vadd.f32 %v287_v59, %v4565_v56  ;;  %11137 = vst [vmem:[#allocation17_spill] sm:$0xff] %v4642_v18  ;;  %11146 = vst [vmem:[#allocation25_spill] sm:$0xff] %v4692_v10 }
  0x28   : > { %v262_v52 = vadd.f32 %v261_v46, %v4535_v42  ;;  %v313_v46 = vadd.f32 %v312_v29, %v4598_v24 }
  0x29   : > { %2274 = vperm.xlu1 %4335, %v4455_v6   ;;  %v289_v21 = vadd.f32 %v288_v9, %v4578_v63  ;;  %v4639_v9 = vld [vmem:[%s4440_s19 + $0x98] sm:$0xff] }
  0x2a   : > { %v263_v58 = vadd.f32 %v262_v52, %v4549_v49  ;;  %v4624_v52 = vld [vmem:[%s4440_s19 + $0x1d8] sm:$0xff] }
  0x2b   : > { %4342 = vset.pattern.permute.xlu0 %v10729_v61  ;;  %v290_v33 = vadd.f32 %v289_v21, %v4591_v14  ;;  %11134 = vst [vmem:[#allocation14_spill] sm:$0xff] %v4624_v52 }
  0x2c   : > { %2681 = vperm.xlu0 %4342, %v4433_v1   ;;  %v264_v7 = vadd.f32 %v263_v58, %v4562_v55  ;;  %v314_v58 = vadd.f32 %v313_v46, %v4610_v34  ;;  %v4655_v46 = vld [vmem:[%s4440_s19 + $0x148] sm:$0xff]  ;;  %v11145_v34 = vmov 7  }
  0x2d   : > { %4337 = vset.pattern.permute.xlu1 %v4391_v30  ;;  %v291_v51 = vadd.f32 %v290_v33, %v4604_v28  ;;  %v4652_v33 = vld [vmem:[%s4440_s19 + $0xa0] sm:$0xff]  ;;  %11139 = vst [vmem:[#allocation19_spill] sm:$0xff] %v4655_v46 }
  0x2e   : > { %2428 = vperm.xlu1 %4337, %v4442_v2   ;;  %v265_v19 = vadd.f32 %v264_v7, %v4575_v62  ;;  %v4636_v7 = vld [vmem:[%s4440_s19 + $0x1e0] sm:$0xff] }
  0x2f   : > { %v292_v0 = vadd.f32 %v291_v51, %v4617_v44  ;;  %11136 = vst [vmem:[#allocation16_spill] sm:$0xff] %v4636_v7 }
  0x30   : > { %v266_v30 = vadd.f32 %v265_v19, %v4588_v12  ;;  %4344 = vset.pattern.permute.xlu0 %v10728_v38  ;;  %v315_v19 = vadd.f32 %v314_v58, %v4624_v52  ;;  %v4661_v58 = vld [vmem:[%s4440_s19 + $0xa8] sm:$0xff]  ;;  %v4670_v52 = vld [vmem:[%s4440_s19 + $0x1f0] sm:$0xff] }
  0x31   : > { %v293_v29 = vadd.f32 %v292_v0, %v4630_v57  ;;  %11141 = vst [vmem:[#allocation21_spill] sm:$0xff] %v4670_v52 }
  0x32   : > { %2436 = vperm.xlu1 %4337, %v4455_v6   ;;  %v267_v47 = vadd.f32 %v266_v30, %v4601_v25  ;;  %v4648_v30 = vld [vmem:[%s4440_s19 + $0x1e8] sm:$0xff] }
  0x33   : > { %11138 = vst [vmem:[#allocation18_spill] sm:$0xff] %v4648_v30 }
  0x34   : > { %v268_v59 = vadd.f32 %v267_v47, %v4614_v39  ;;  %v316_v47 = vadd.f32 %v315_v19, %v4636_v7  ;;  %v4674_v19 = vld [vmem:[%s4440_s19 + $0x158] sm:$0xff] }
  0x35   : > { %11142 = vst [vmem:[#allocation22_spill] sm:$0xff] %v4674_v19 }
  0x36   : > { %4339 = vset.pattern.permute.xlu1 %v4392_v45  ;;  %v269_v21 = vadd.f32 %v268_v59, %v4627_v53  ;;  %v294_v45 = vadd.f32 %v293_v29, %v4642_v18  ;;  %v4664_v59 = vld [vmem:[%s4440_s19 + $0x150] sm:$0xff]  ;;  %v317_v0 = vadd.f32 %v316_v47, %v4648_v30  ;;  %v4682_v47 = vld [vmem:[%s4440_s19 + $0x160] sm:$0xff]  ;;  %v4687_v30 = vld [vmem:[%s4440_s19 + $0x1f8] sm:$0xff] }
  0x37   : > { %2515 = vperm.xlu1 %4339, %v4442_v2   ;;  %11140 = vst [vmem:[#allocation20_spill] sm:$0xff] %v4664_v59  ;;  %11143 = vst [vmem:[#allocation23_spill] sm:$0xff] %v4682_v47 }
  0x38   : > { %v270_v51 = vadd.f32 %v269_v21, %v4639_v9  ;;  %v295_v61 = vadd.f32 %v294_v45, %v4655_v46  ;;  %v4677_v21 = vld [vmem:[%s4440_s19 + $0xb0] sm:$0xff]  ;;  %11144 = vst [vmem:[#allocation24_spill] sm:$0xff] %v4687_v30 }
  0x3a   : > { %v271_v38 = vadd.f32 %v270_v51, %v4652_v33  ;;  %v296_v7 = vadd.f32 %v295_v61, %v4664_v59  ;;  %v318_v51 = vadd.f32 %v317_v0, %v4670_v52  ;;  %v4696_v61 = vld [vmem:[%s4440_s19 + $0xb8] sm:$0xff]  ;;  %v4700_v0 = vld [vmem:[%s4440_s19 + $0xc0] sm:$0xff] }
  0x3b   : > { %2523 = vperm.xlu1 %4339, %v4455_v6   ;;  %v4708_v52 = vld [vmem:[%s4440_s19 + $0x200] sm:$0xff] }
  0x3c   : > { %v272_v29 = vadd.f32 %v271_v38, %v4661_v58  ;;  %v297_v45 = vadd.f32 %v296_v7, %v4674_v19  ;;  %v4703_v7 = vld [vmem:[%s4440_s19 + $0x170] sm:$0xff]  ;;  %11148 = vst [vmem:[#allocation27_spill] sm:$0xff] %v4708_v52  ;;  %v4719_v59 = vld [vmem:[%s4440_s19 + $0x180] sm:$0xff] }
  0x3d   : > { %11147 = vst [vmem:[#allocation26_spill] sm:$0xff] %v4703_v7  ;;  %11149 = vst [vmem:[#allocation28_spill] sm:$0xff] %v4719_v59 }
  0x3e   : > { %v273_v24 = vadd.f32 %v272_v29, %v4677_v21  ;;  %v298_v38 = vadd.f32 %v297_v45, %v4682_v47  ;;  %v276_v45 = vsel %vm11000_vm0, %v4700_v0, 0.0 }
  0x3f   : > { %4341 = vset.pattern.permute.xlu1 %v11145_v34  ;;  %v319_v34 = vadd.f32 %v318_v51, %v4687_v30  ;;  %v4722_v51 = vld [vmem:[%s4440_s19 + $0x188] sm:$0xff] }
  0x40   : > { %2677 = vperm.xlu1 %4341, %v4442_v2   ;;  %v299_v29 = vadd.f32 %v298_v38, %v4692_v10  ;;  %v274_v19 = vadd.f32 %v273_v24, %v4696_v61  ;;  %v4727_v24 = vld [vmem:[%s4440_s19 + $0x208] sm:$0xff] }
  0x41   : > { %v320_v38 = vadd.f32 %v319_v34, %v4708_v52  ;;  %11150 = vst [vmem:[#allocation29_spill] sm:$0xff] %v4727_v24  ;;  %v4736_v34 = vld [vmem:[%s4440_s19 + $0x210] sm:$0xff]  ;;  %v4761_v52 = vld [vmem:[%s4440_s19 + $0x240] sm:$0xff] }
  0x42   : > { %v300_v47 = vadd.f32 %v299_v29, %v4703_v7  ;;  %v277_v10 = vadd.f32 %v276_v45, %v274_v19  ;;  %v303_v29 = vsel %vm11000_vm0, %v4722_v51, 0.0  ;;  %11152 = vst [vmem:[#allocation30_spill] sm:$0xff] %v4736_v34  ;;  %v4741_v19 = vld [vmem:[%s4440_s19 + $0x218] sm:$0xff]  ;;  %v4745_v45 = vld [vmem:[%s4440_s19 + $0x220] sm:$0xff]  ;;  %11156 = vst [vmem:[#allocation34_spill] sm:$0xff] %v4761_v52 }
  0x43   : > { %v321_v7 = vadd.f32 %v320_v38, %v4727_v24  ;;  %11153 = vst [vmem:[#allocation31_spill] sm:$0xff] %v4745_v45  ;;  %v4749_v24 = vld [vmem:[%s4440_s19 + $0x228] sm:$0xff] }
  0x44   : > { %2685 = vperm.xlu1 %4341, %v4455_v6   ;;  %v301_v30 = vadd.f32 %v300_v47, %v4712_v60 }
  0x46   : > { %v302_v46 = vadd.f32 %v301_v30, %v4719_v59 }
  0x48   : > { %4343 = vset.pattern.permute.xlu1 %v11151_v54  ;;  %v304_v47 = vadd.f32 %v303_v29, %v302_v46  ;;  %v322_v54 = vadd.f32 %v321_v7, %v4736_v34  ;;  %v4395_v46 = vmov 9   ;;  %v4753_v29 = vld [vmem:[%s4440_s19 + $0x230] sm:$0xff]  ;;  %v4757_v34 = vld [vmem:[%s4440_s19 + $0x238] sm:$0xff] }
  0x49   : > { %2839 = vperm.xlu1 %4343, %v4442_v2   ;;  %11154 = vst [vmem:[#allocation32_spill] sm:$0xff] %v4753_v29  ;;  %11155 = vst [vmem:[#allocation33_spill] sm:$0xff] %v4757_v34 }
  0x4a   : > { %v323_v30 = vadd.f32 %v322_v54, %v4741_v19 }
  0x4b   : > { %278 = vadd.xlane.f32.xlu0 %v277_v10 }
  0x4c   : > { %v324_v38 = vadd.f32 %v323_v30, %v4745_v45  ;;  %v4766_v30 = vld [vmem:[%s4440_s19 + $0x248] sm:$0xff]  ;;  %v4769_v45 = vld [vmem:[%s4440_s19 + $0x250] sm:$0xff] }
  0x4d   : > { %2847 = vperm.xlu1 %4343, %v4455_v6   ;;  %11157 = vst [vmem:[#allocation35_spill] sm:$0xff] %v4766_v30  ;;  %11158 = vst [vmem:[#allocation36_spill] sm:$0xff] %v4769_v45 }
  0x4e   : > { %v325_v10 = vadd.f32 %v324_v38, %v4749_v24 }
  0x4f   : > { %305 = vadd.xlane.f32.xlu0 %v304_v47 }
  0x50   : > { %v326_v7 = vadd.f32 %v325_v10, %v4753_v29  ;;  %v330_v10 = vsel %vm11000_vm0, %v4769_v45, 0.0 }
  0x51   : > { %4345 = vset.pattern.permute.xlu1 %v4395_v46 }
  0x52   : > { %v327_v47 = vadd.f32 %v326_v7, %v4757_v34  ;;  %v10770_v7 = vmov 10  }
  0x54   : > { %v328_v54 = vadd.f32 %v327_v47, %v4761_v52 }
  0x56   : > { %v329_v38 = vadd.f32 %v328_v54, %v4766_v30 }
  0x58   : > { %v331_v29 = vadd.f32 %v330_v10, %v329_v38 }
  0x65   : > { %2843 = vperm.xlu0 %4344, %v4433_v1  }
  0x69   : > { %4346 = vset.pattern.permute.xlu0 %v4395_v46 }
  0x6a   : > { %2930 = vperm.xlu0 %4346, %v4433_v1  }
  0x6e   : > { %4348 = vset.pattern.permute.xlu0 %v10770_v7 }
  0x6f   : > { %3092 = vperm.xlu0 %4348, %v4433_v1  }
  0x71   : > { %332 = vadd.xlane.f32.xlu1 %v331_v29 }
  0x82   : > { %2926 = vperm.xlu1 %4345, %v4442_v2  }
  0x86   : > { %2934 = vperm.xlu1 %4345, %v4455_v6  }
  0x8a   : > { %4347 = vset.pattern.permute.xlu1 %v10770_v7 }
  0x8b   : > { %3088 = vperm.xlu1 %4347, %v4442_v2  }
  0x8e   : > { %v4782_v46 = vpop.permute.xlu1 %2015  ;;  %v4784_v47 = vpop.permute.xlu0 %2020 }
  0x8f   : > { %3096 = vperm.xlu1 %4347, %v4455_v6   ;;  %11159 = vst [vmem:[#allocation37_spill] sm:$0xff] %v4782_v46  ;;  %11160 = vst [vmem:[#allocation38_spill] sm:$0xff] %v4784_v47 }
  0x92   : > { %v4786_v54 = vpop.permute.xlu1 %2025 }
  0x93   : > { %11161 = vst [vmem:[#allocation39_spill] sm:$0xff] %v4786_v54  ;;  %v4788_v38 = vpop.permute.xlu0 %2108 }
  0x94   : > { %11162 = vst [vmem:[#allocation40_spill] sm:$0xff] %v4788_v38 }
  0x97   : > { %v4790_v10 = vpop.permute.xlu1 %2104 }
  0x98   : > { %11163 = vst [vmem:[#allocation41_spill] sm:$0xff] %v4790_v10  ;;  %v4792_v29 = vpop.permute.xlu0 %2270 }
  0x99   : > { %11164 = vst [vmem:[#allocation42_spill] sm:$0xff] %v4792_v29 }
  0x9b   : > { %v4794_v1 = vpop.permute.xlu1 %2112 }
  0x9c   : > { %11165 = vst [vmem:[#allocation43_spill] sm:$0xff] %v4794_v1 }
  0x9d   : > { %v4796_v30 = vpop.permute.xlu0 %2432 }
  0x9e   : > { %11166 = vst [vmem:[#allocation44_spill] sm:$0xff] %v4796_v30 }
  0xa0   : > { %v4798_v7 = vpop.permute.xlu1 %2266 }
  0xa1   : > { %11167 = vst [vmem:[#allocation45_spill] sm:$0xff] %v4798_v7 }
  0xa2   : > { %v4800_v2 = vpop.permute.xlu0 %2519 }
  0xa3   : > { %11168 = vst [vmem:[#allocation46_spill] sm:$0xff] %v4800_v2 }
  0xa4   : > { %v4802_v6 = vpop.permute.xlu1 %2274 }
  0xa5   : > { %11169 = vst [vmem:[#allocation47_spill] sm:$0xff] %v4802_v6 }
  0xa7   : > { %v4804_v46 = vpop.permute.xlu0 %2681 }
  0xa8   : > { %11170 = vst [vmem:[#allocation48_spill] sm:$0xff] %v4804_v46 }
  0xa9   : > { %v4806_v47 = vpop.permute.xlu1 %2428 }
  0xaa   : > { %11171 = vst [vmem:[#allocation49_spill] sm:$0xff] %v4806_v47 }
  0xad   : > { %v4808_v38 = vpop.permute.xlu1 %2436 }
  0xae   : > { %11172 = vst [vmem:[#allocation50_spill] sm:$0xff] %v4808_v38 }
  0xb2   : > { %v4816_v7 = vpop.permute.xlu1 %2515 }
  0xb3   : > { %11173 = vst [vmem:[#allocation51_spill] sm:$0xff] %v4816_v7 }
  0xb6   : > { %v4822_v1 = vpop.permute.xlu1 %2523 }
  0xb7   : > { %11174 = vst [vmem:[#allocation52_spill] sm:$0xff] %v4822_v1 }
  0xd4   : > { %v279_v54 = vpop.xlane.xlu0 %278 }
  0xd5   : > { %v4810_v10 = vmul.f32 0.00031887754, %v279_v54 }
  0xd7   : > { %v340_v29 = vsub.f32 %v4447_v3, %v4810_v10  ;;  %v341_v30 = vsub.f32 %v4450_v4, %v4810_v10  ;;  %v342_v6 = vsub.f32 %v4453_v5, %v4810_v10  ;;  %v343_v47 = vsub.f32 %v4460_v8, %v4810_v10  ;;  %v4832_v8 = vpop.permute.xlu1 %2677 }
  0xd8   : > { %v306_v54 = vpop.xlane.xlu0 %305  ;;  %v344_v38 = vsub.f32 %v4465_v11, %v4810_v10  ;;  %v345_v4 = vsub.f32 %v4470_v13, %v4810_v10  ;;  %v346_v5 = vsub.f32 %v4474_v15, %v4810_v10  ;;  %11175 = vst [vmem:[#allocation53_spill] sm:$0xff] %v4832_v8  ;;  %v347_v1 = vsub.f32 %v4491_v22, %v4810_v10 }
  0xd9   : > { %v415_v2 = vmul.f32 %v340_v29, %v340_v29  ;;  %v416_v46 = vmul.f32 %v341_v30, %v341_v30  ;;  %v417_v3 = vmul.f32 %v342_v6, %v342_v6  ;;  %v418_v7 = vmul.f32 %v343_v47, %v343_v47 }
  0xda   : > { %v4828_v34 = vmul.f32 0.00031887754, %v306_v54  ;;  %v419_v30 = vmul.f32 %v344_v38, %v344_v38  ;;  %v420_v11 = vmul.f32 %v345_v4, %v345_v4  ;;  %v421_v47 = vmul.f32 %v346_v5, %v346_v5 }
  0xdb   : > { %v490_v45 = vadd.f32 %v416_v46, %v415_v2  ;;  %v348_v46 = vsub.f32 %v4499_v26, %v4810_v10  ;;  %v351_v5 = vsub.f32 %v4535_v42, %v4810_v10 }
  0xdc   : > { %v365_v2 = vsub.f32 %v4477_v16, %v4828_v34  ;;  %v367_v4 = vsub.f32 %v4485_v20, %v4828_v34 }
  0xdd   : > { %v491_v52 = vadd.f32 %v490_v45, %v417_v3  ;;  %v366_v45 = vsub.f32 %v4480_v17, %v4828_v34  ;;  %v4844_v3 = vpop.permute.xlu1 %2685  ;;  %v350_v17 = vsub.f32 %v4517_v35, %v4810_v10 }
  0xde   : > { %11176 = vst [vmem:[#allocation54_spill] sm:$0xff] %v4844_v3 }
  0xdf   : > { %v492_v29 = vadd.f32 %v491_v52, %v418_v7  ;;  %v349_v52 = vsub.f32 %v4508_v31, %v4810_v10  ;;  %v422_v7 = vmul.f32 %v347_v1, %v347_v1  ;;  %v441_v16 = vmul.f32 %v366_v45, %v366_v45 }
  0xe0   : > { %v425_v45 = vmul.f32 %v350_v17, %v350_v17 }
  0xe1   : > { %v493_v6 = vadd.f32 %v492_v29, %v419_v30  ;;  %v440_v30 = vmul.f32 %v365_v2, %v365_v2  ;;  %v423_v29 = vmul.f32 %v348_v46, %v348_v46  ;;  %v424_v1 = vmul.f32 %v349_v52, %v349_v52  ;;  %v4858_v46 = vpop.permute.xlu1 %2839 }
  0xe2   : > { %v352_v2 = vsub.f32 %v4549_v49, %v4810_v10  ;;  %11177 = vst [vmem:[#allocation55_spill] sm:$0xff] %v4858_v46  ;;  %v426_v52 = vmul.f32 %v351_v5, %v351_v5  ;;  %v11179_v46 = vld [vmem:[#allocation19_spill] sm:$0xff] }
  0xe3   : > { %v494_v54 = vadd.f32 %v493_v6, %v420_v11  ;;  %v368_v11 = vsub.f32 %v4494_v23, %v4828_v34  ;;  %v517_v20 = vadd.f32 %v441_v16, %v440_v30  ;;  %v370_v23 = vsub.f32 %v4511_v32, %v4828_v34 }
  0xe4   : > { %v354_v16 = vsub.f32 %v4575_v62, %v4810_v10  ;;  %v427_v17 = vmul.f32 %v352_v2, %v352_v2  ;;  %v372_v32 = vsub.f32 %v4538_v43, %v4828_v34  ;;  %v356_v2 = vsub.f32 %v4601_v25, %v4810_v10 }
  0xe5   : > { %v495_v38 = vadd.f32 %v494_v54, %v421_v47  ;;  %v369_v47 = vsub.f32 %v4502_v27, %v4828_v34  ;;  %v442_v54 = vmul.f32 %v367_v4, %v367_v4  ;;  %v371_v27 = vsub.f32 %v4520_v36, %v4828_v34 }
  0xe6   : > { %v373_v36 = vsub.f32 %v4552_v50, %v4828_v34  ;;  %v374_v43 = vsub.f32 %v4565_v56, %v4828_v34 }
  0xe7   : > { %v496_v8 = vadd.f32 %v495_v38, %v422_v7  ;;  %v443_v7 = vmul.f32 %v368_v11, %v368_v11  ;;  %v518_v38 = vadd.f32 %v517_v20, %v442_v54  ;;  %v444_v4 = vmul.f32 %v369_v47, %v369_v47  ;;  %v4872_v20 = vpop.permute.xlu1 %2847 }
  0xe8   : > { %v445_v11 = vmul.f32 %v370_v23, %v370_v23  ;;  %v355_v54 = vsub.f32 %v4588_v12, %v4810_v10  ;;  %11178 = vst [vmem:[#allocation56_spill] sm:$0xff] %v4872_v20  ;;  %v446_v47 = vmul.f32 %v371_v27, %v371_v27  ;;  %v447_v23 = vmul.f32 %v372_v32, %v372_v32 }
  0xe9   : > { %v497_v6 = vadd.f32 %v496_v8, %v423_v29  ;;  %v353_v8 = vsub.f32 %v4562_v55, %v4810_v10  ;;  %v519_v30 = vadd.f32 %v518_v38, %v443_v7  ;;  %v429_v7 = vmul.f32 %v354_v16, %v354_v16 }
  0xea   : > { %v375_v27 = vsub.f32 %v4578_v63, %v4828_v34  ;;  %v358_v16 = vsub.f32 %v4627_v53, %v4810_v10  ;;  %v376_v32 = vsub.f32 %v4591_v14, %v4828_v34 }
  0xeb   : > { %v498_v3 = vadd.f32 %v497_v6, %v424_v1  ;;  %v520_v6 = vadd.f32 %v519_v30, %v444_v4  ;;  %v428_v5 = vmul.f32 %v353_v8, %v353_v8  ;;  %v357_v8 = vsub.f32 %v4614_v39, %v4810_v10 }
  0xed   : > { %v499_v29 = vadd.f32 %v498_v3, %v425_v45  ;;  %v521_v45 = vadd.f32 %v520_v6, %v445_v11  ;;  %v431_v11 = vmul.f32 %v356_v2, %v356_v2  ;;  %v360_v2 = vsub.f32 %v4652_v33, %v4810_v10 }
  0xef   : > { %v500_v1 = vadd.f32 %v499_v29, %v426_v52  ;;  %v522_v52 = vadd.f32 %v521_v45, %v446_v47  ;;  %v430_v29 = vmul.f32 %v355_v54, %v355_v54  ;;  %v359_v54 = vsub.f32 %v4639_v9, %v4810_v10 }
  0xf0   : > { %v432_v45 = vmul.f32 %v357_v8, %v357_v8  ;;  %v378_v8 = vsub.f32 %v4617_v44, %v4828_v34 }
  0xf1   : > { %v501_v3 = vadd.f32 %v500_v1, %v427_v17  ;;  %v448_v17 = vmul.f32 %v373_v36, %v373_v36  ;;  %v523_v1 = vadd.f32 %v522_v52, %v447_v23  ;;  %v377_v36 = vsub.f32 %v4604_v28, %v4828_v34 }
  0xf2   : > { %v361_v52 = vsub.f32 %v4661_v58, %v4810_v10 }
  0xf3   : > { %v502_v38 = vadd.f32 %v501_v3, %v428_v5  ;;  %v449_v5 = vmul.f32 %v374_v43, %v374_v43  ;;  %v524_v3 = vadd.f32 %v523_v1, %v448_v17  ;;  %v433_v43 = vmul.f32 %v358_v16, %v358_v16 }
  0xf4   : > { %v434_v1 = vmul.f32 %v359_v54, %v359_v54  ;;  %v363_v16 = vsub.f32 %v4696_v61, %v4810_v10 }
  0xf5   : > { %v503_v4 = vadd.f32 %v502_v38, %v429_v7  ;;  %v450_v38 = vmul.f32 %v375_v27, %v375_v27  ;;  %v525_v23 = vadd.f32 %v524_v3, %v449_v5  ;;  %v379_v5 = vsub.f32 %v4630_v57, %v4828_v34 }
  0xf6   : > { %v452_v3 = vmul.f32 %v377_v36, %v377_v36  ;;  %v438_v44 = vmul.f32 %v363_v16, %v363_v16 }
  0xf7   : > { %v504_v6 = vadd.f32 %v503_v4, %v430_v29  ;;  %v362_v4 = vsub.f32 %v4677_v21, %v4810_v10  ;;  %v526_v17 = vadd.f32 %v525_v23, %v450_v38  ;;  %v453_v23 = vmul.f32 %v378_v8, %v378_v8 }
  0xf9   : > { %v505_v7 = vadd.f32 %v504_v6, %v431_v11 }
  0xfa   : > { %v333_v30 = vpop.xlane.xlu1 %332 }
  0xfb   : > { %v4888_v47 = vmul.f32 0.00031887754, %v333_v30  ;;  %v506_v29 = vadd.f32 %v505_v7, %v432_v45  ;;  %v451_v30 = vmul.f32 %v376_v32, %v376_v32  ;;  %v364_v32 = vsub.f32 %v4700_v0, %v4810_v10 }
  0xfc   : > { %v435_v7 = vmul.f32 %v360_v2, %v360_v2  ;;  %v381_v2 = vsub.f32 %v11179_v46, %v4828_v34 }
  0xfd   : > { %v507_v11 = vadd.f32 %v506_v29, %v433_v43  ;;  %v390_v27 = vsub.f32 %v4523_v37, %v4888_v47  ;;  %v391_v6 = vsub.f32 %v4528_v40, %v4888_v47  ;;  %v527_v45 = vadd.f32 %v526_v17, %v451_v30 }
  0xfe   : > { %v392_v38 = vsub.f32 %v4531_v41, %v4888_v47  ;;  %v436_v37 = vmul.f32 %v361_v52, %v361_v52  ;;  %v380_v40 = vsub.f32 %v4642_v18, %v4828_v34  ;;  %v393_v20 = vsub.f32 %v4545_v48, %v4888_v47  ;;  %v11180_v52 = vld [vmem:[#allocation8_spill] sm:$0xff] }
  0xff   : > { %v508_v54 = vadd.f32 %v507_v11, %v434_v1  ;;  %v528_v43 = vadd.f32 %v527_v45, %v452_v3  ;;  %v465_v36 = vmul.f32 %v390_v27, %v390_v27  ;;  %v466_v30 = vmul.f32 %v391_v6, %v391_v6  ;;  %v11181_v3 = vld [vmem:[#allocation20_spill] sm:$0xff] }
 0x100   : > { %v437_v17 = vmul.f32 %v362_v4, %v362_v4  ;;  %v454_v1 = vmul.f32 %v379_v5, %v379_v5  ;;  %v394_v57 = vsub.f32 %v11180_v52, %v4888_v47  ;;  %v467_v18 = vmul.f32 %v392_v38, %v392_v38  ;;  %v11182_v4 = vld [vmem:[#allocation9_spill] sm:$0xff]  ;;  %v11183_v5 = vld [vmem:[#allocation22_spill] sm:$0xff] }
 0x101   : > { %v509_v29 = vadd.f32 %v508_v54, %v435_v7  ;;  %v529_v11 = vadd.f32 %v528_v43, %v453_v23  ;;  %v439_v8 = vmul.f32 %v364_v32, %v364_v32  ;;  %v382_v45 = vsub.f32 %v11181_v3, %v4828_v34  ;;  %v11184_v38 = vld [vmem:[#allocation10_spill] sm:$0xff] }
 0x102   : > { %v455_v7 = vmul.f32 %v380_v40, %v380_v40  ;;  %v395_v6 = vsub.f32 %v11182_v4, %v4888_v47  ;;  %v468_v54 = vmul.f32 %v393_v20, %v393_v20  ;;  %v544_v46 = vadd.f32 %v466_v30, %v465_v36  ;;  %v11186_v36 = vld [vmem:[#allocation11_spill] sm:$0xff] }
 0x103   : > { %v510_v41 = vadd.f32 %v509_v29, %v436_v37  ;;  %v530_v48 = vadd.f32 %v529_v11, %v454_v1  ;;  %v383_v16 = vsub.f32 %v11183_v5, %v4828_v34  ;;  %v456_v37 = vmul.f32 %v381_v2, %v381_v2 }
 0x104   : > { %v396_v32 = vsub.f32 %v11184_v38, %v4888_v47  ;;  %v469_v29 = vmul.f32 %v394_v57, %v394_v57  ;;  %v545_v52 = vadd.f32 %v544_v46, %v467_v18  ;;  %v513_v40 = vsel %vm11000_vm0, %v439_v8, 0.0  ;;  %v11188_v57 = vld [vmem:[#allocation12_spill] sm:$0xff] }
 0x105   : > { %v511_v27 = vadd.f32 %v510_v41, %v437_v17  ;;  %v531_v23 = vadd.f32 %v530_v48, %v455_v7  ;;  %v11185_v17 = vld [vmem:[#allocation23_spill] sm:$0xff]  ;;  %v457_v11 = vmul.f32 %v382_v45, %v382_v45  ;;  %v397_v30 = vsub.f32 %v11186_v36, %v4888_v47  ;;  %v11189_v45 = vld [vmem:[#allocation26_spill] sm:$0xff] }
 0x106   : > { %v384_v1 = vsub.f32 %v11185_v17, %v4828_v34  ;;  %v470_v4 = vmul.f32 %v395_v6, %v395_v6  ;;  %v546_v2 = vadd.f32 %v545_v52, %v468_v54  ;;  %v458_v48 = vmul.f32 %v383_v16, %v383_v16 }
 0x107   : > { %v512_v43 = vadd.f32 %v511_v27, %v438_v44  ;;  %v532_v41 = vadd.f32 %v531_v23, %v456_v37  ;;  %v11187_v44 = vld [vmem:[#allocation25_spill] sm:$0xff]  ;;  %v398_v18 = vsub.f32 %v11188_v57, %v4888_v47  ;;  %v471_v46 = vmul.f32 %v396_v32, %v396_v32  ;;  %v11192_v57 = vld [vmem:[#allocation18_spill] sm:$0xff] }
 0x108   : > { %v385_v7 = vsub.f32 %v11187_v44, %v4828_v34  ;;  %v547_v8 = vadd.f32 %v546_v2, %v469_v29  ;;  %v386_v37 = vsub.f32 %v11189_v45, %v4828_v34  ;;  %v459_v23 = vmul.f32 %v384_v1, %v384_v1 }
 0x109   : > { %v514_v20 = vadd.f32 %v513_v40, %v512_v43  ;;  %v533_v27 = vadd.f32 %v532_v41, %v457_v11  ;;  %v472_v38 = vmul.f32 %v397_v30, %v397_v30  ;;  %v387_v6 = vsub.f32 %v4712_v60, %v4828_v34  ;;  %v11190_v11 = vld [vmem:[#allocation14_spill] sm:$0xff]  ;;  %v11191_v30 = vld [vmem:[#allocation16_spill] sm:$0xff] }
 0x10a   : > { %v548_v40 = vadd.f32 %v547_v8, %v470_v4  ;;  %v460_v54 = vmul.f32 %v385_v7, %v385_v7  ;;  %v389_v16 = vsub.f32 %v4722_v51, %v4828_v34  ;;  %v399_v41 = vsub.f32 %v11190_v11, %v4888_v47 }
 0x10b   : > { %515 = vadd.xlane.f32.xlu1 %v514_v20  ;;  %v534_v43 = vadd.f32 %v533_v27, %v458_v48  ;;  %v473_v32 = vmul.f32 %v398_v18, %v398_v18  ;;  %v388_v20 = vsub.f32 %v4719_v59, %v4828_v34  ;;  %v461_v1 = vmul.f32 %v386_v37, %v386_v37 }
 0x10c   : > { %v549_v29 = vadd.f32 %v548_v40, %v471_v46  ;;  %v400_v4 = vsub.f32 %v11191_v30, %v4888_v47  ;;  %v462_v48 = vmul.f32 %v387_v6, %v387_v6  ;;  %v464_v27 = vmul.f32 %v389_v16, %v389_v16  ;;  %v11193_v46 = vld [vmem:[#allocation21_spill] sm:$0xff] }
 0x10d   : > { %v535_v52 = vadd.f32 %v534_v43, %v459_v23  ;;  %v401_v8 = vsub.f32 %v11192_v57, %v4888_v47  ;;  %v474_v23 = vmul.f32 %v399_v41, %v399_v41  ;;  %v463_v11 = vmul.f32 %v388_v20, %v388_v20  ;;  %v11196_v30 = vld [vmem:[#allocation29_spill] sm:$0xff] }
 0x10e   : > { %v550_v2 = vadd.f32 %v549_v29, %v472_v38  ;;  %v402_v40 = vsub.f32 %v11193_v46, %v4888_v47  ;;  %v475_v59 = vmul.f32 %v400_v4, %v400_v4  ;;  %v11194_v38 = vld [vmem:[#allocation24_spill] sm:$0xff] }
 0x10f   : > { %v536_v36 = vadd.f32 %v535_v52, %v460_v54  ;;  %v540_v52 = vsel %vm11000_vm0, %v464_v27, 0.0  ;;  %v403_v6 = vsub.f32 %v11194_v38, %v4888_v47  ;;  %v476_v29 = vmul.f32 %v401_v8, %v401_v8 }
 0x110   : > { %v551_v43 = vadd.f32 %v550_v2, %v473_v32  ;;  %v477_v32 = vmul.f32 %v402_v40, %v402_v40  ;;  %v405_v2 = vsub.f32 %v11196_v30, %v4888_v47 }
 0x111   : > { %v537_v7 = vadd.f32 %v536_v36, %v461_v1  ;;  %v11195_v36 = vld [vmem:[#allocation27_spill] sm:$0xff]  ;;  %v478_v4 = vmul.f32 %v403_v6, %v403_v6 }
 0x112   : > { %v552_v37 = vadd.f32 %v551_v43, %v474_v23  ;;  %v404_v41 = vsub.f32 %v11195_v36, %v4888_v47  ;;  %v480_v8 = vmul.f32 %v405_v2, %v405_v2 }
 0x113   : > { %v538_v18 = vadd.f32 %v537_v7, %v462_v48 }
 0x114   : > { %v553_v16 = vadd.f32 %v552_v37, %v475_v59  ;;  %v479_v27 = vmul.f32 %v404_v41, %v404_v41  ;;  %v407_v59 = vsub.f32 %v4741_v19, %v4888_v47 }
 0x115   : > { %v539_v54 = vadd.f32 %v538_v18, %v463_v11  ;;  %v11197_v11 = vld [vmem:[#allocation30_spill] sm:$0xff]  ;;  %v11198_v18 = vld [vmem:[#allocation31_spill] sm:$0xff] }
 0x116   : > { %v554_v20 = vadd.f32 %v553_v16, %v476_v29  ;;  %v406_v7 = vsub.f32 %v11197_v11, %v4888_v47  ;;  %v408_v40 = vsub.f32 %v11198_v18, %v4888_v47  ;;  %v482_v6 = vmul.f32 %v407_v59, %v407_v59  ;;  %v11199_v16 = vld [vmem:[#allocation32_spill] sm:$0xff] }
 0x117   : > { %v541_v1 = vadd.f32 %v540_v52, %v539_v54  ;;  %v409_v52 = vsub.f32 %v4749_v24, %v4888_v47  ;;  %v11202_v59 = vld [vmem:[#allocation36_spill] sm:$0xff] }
 0x118   : > { %v555_v48 = vadd.f32 %v554_v20, %v477_v32  ;;  %v481_v37 = vmul.f32 %v406_v7, %v406_v7  ;;  %v483_v41 = vmul.f32 %v408_v40, %v408_v40  ;;  %v11200_v20 = vld [vmem:[#allocation33_spill] sm:$0xff] }
 0x119   : > { %542 = vadd.xlane.f32.xlu0 %v541_v1  ;;  %v410_v1 = vsub.f32 %v11199_v16, %v4888_v47  ;;  %v484_v2 = vmul.f32 %v409_v52, %v409_v52 }
 0x11a   : > { %v556_v23 = vadd.f32 %v555_v48, %v478_v4  ;;  %v411_v4 = vsub.f32 %v11200_v20, %v4888_v47 }
 0x11b   : > { %v485_v7 = vmul.f32 %v410_v1, %v410_v1 }
 0x11c   : > { %v557_v43 = vadd.f32 %v556_v23, %v479_v27  ;;  %v11201_v27 = vld [vmem:[#allocation34_spill] sm:$0xff] }
 0x11d   : > { %v412_v23 = vsub.f32 %v11201_v27, %v4888_v47 }
 0x11e   : > { %v558_v54 = vadd.f32 %v557_v43, %v480_v8  ;;  %v4397_v43 = vmov 0  }
 0x11f   : > { %4349 = vset.pattern.permute.xlu1 %v4397_v43  ;;  %4350 = vset.pattern.permute.xlu0 %v4397_v43  ;;  %v487_v16 = vmul.f32 %v412_v23, %v412_v23 }
 0x120   : > { %v559_v29 = vadd.f32 %v558_v54, %v481_v37  ;;  %v414_v37 = vsub.f32 %v11202_v59, %v4888_v47  ;;  %v11203_v54 = vld [vmem:[#allocation35_spill] sm:$0xff] }
 0x121   : > { %v413_v40 = vsub.f32 %v11203_v54, %v4888_v47 }
 0x122   : > { %v560_v32 = vadd.f32 %v559_v29, %v482_v6  ;;  %v486_v6 = vmul.f32 %v411_v4, %v411_v4  ;;  %v489_v52 = vmul.f32 %v414_v37, %v414_v37  ;;  %v4989_v4 = vpop.permute.xlu0 %2843 }
 0x123   : > { %11207 = vst [vmem:[#allocation22_spill] sm:$0xff] %v4989_v4 }
 0x124   : > { %v561_v48 = vadd.f32 %v560_v32, %v483_v41  ;;  %v488_v41 = vmul.f32 %v413_v40, %v413_v40  ;;  %v567_v1 = vsel %vm11000_vm0, %v489_v52, 0.0 }
 0x126   : > { %v562_v8 = vadd.f32 %v561_v48, %v484_v2  ;;  %v4981_v48 = vpop.permute.xlu1 %2926  ;;  %v4991_v37 = vpop.permute.xlu0 %2930 }
 0x127   : > { %11208 = vst [vmem:[#allocation10_spill] sm:$0xff] %v4991_v37 }
 0x128   : > { %v563_v29 = vadd.f32 %v562_v8, %v485_v7 }
 0x12a   : > { %v564_v20 = vadd.f32 %v563_v29, %v486_v6  ;;  %v4983_v43 = vpop.permute.xlu1 %2934  ;;  %v11210_v29 = vld [vmem:[#allocation3_spill] sm:$0xff] }
 0x12b   : > { %11204 = vst [vmem:[#allocation8_spill] sm:$0xff] %v4983_v43  ;;  %v4368_v43 = vld [vmem:[%s4440_s19 + $0xf0] sm:$0xff] }
 0x12c   : > { %v565_v32 = vadd.f32 %v564_v20, %v487_v16  ;;  %v4993_v16 = vpop.permute.xlu0 %3092 }
 0x12d   : > { %11209 = vst [vmem:[#allocation23_spill] sm:$0xff] %v4993_v16  ;;  %v4361_v16 = vld [vmem:[%s4440_s19 + $0x10] sm:$0xff] }
 0x12e   : > { %v566_v18 = vadd.f32 %v565_v32, %v488_v41  ;;  %v4985_v59 = vpop.permute.xlu1 %3088  ;;  %v11211_v32 = vld [vmem:[#allocation2_spill] sm:$0xff] }
 0x12f   : > { %11205 = vst [vmem:[#allocation20_spill] sm:$0xff] %v4985_v59 }
 0x130   : > { %v568_v2 = vadd.f32 %v567_v1, %v566_v18 }
 0x132   : > { %569 = vadd.xlane.f32.xlu1 %v568_v2  ;;  %v4987_v27 = vpop.permute.xlu1 %3096 }
 0x133   : > { %11206 = vst [vmem:[#allocation9_spill] sm:$0xff] %v4987_v27  ;;  %v11212_v27 = vld [vmem:[#allocation5_spill] sm:$0xff] }
 0x194   : > { %v516_v23 = vpop.xlane.xlu1 %515 }
 0x195   : > { %v574_v7 = vmul.f32 0.00031887754, %v516_v23  ;;  %v4399_v23 = vmov 1  }
 0x197   : > { %v577_v8 = vadd.f32 1e-05, %v574_v7 }
 0x199   : > { %4354 = vrsqrt.f32 %v577_v8 }
 0x1a2   : > { %v543_v18 = vpop.xlane.xlu0 %542 }
 0x1a3   : > { %v575_v20 = vmul.f32 0.00031887754, %v543_v18 }
 0x1a5   : > { %v578_v6 = vadd.f32 1e-05, %v575_v20 }
 0x1a6   : > { %v4355_v40 = vpop.eup %4354 }
 0x1a7   : > { %v583_v52 = vmul.f32 %v4355_v40, %v11210_v29  ;;  %4356 = vrsqrt.f32 %v578_v6 }
 0x1a9   : > { %832 = vperm.xlu1 %4349, %v583_v52   ;;  %v586_v2 = vmul.f32 %v583_v52, %v4810_v10 }
 0x1b4   : > { %v4357_v41 = vpop.eup %4356 }
 0x1b5   : > { %v584_v1 = vmul.f32 %v4357_v41, %v11211_v32 }
 0x1b7   : > { %837 = vperm.xlu0 %4350, %v584_v1   ;;  %v587_v6 = vmul.f32 %v584_v1, %v4828_v34 }
 0x1bb   : > { %592 = vrot.lane.b32.xlu0 %v586_v2, %s4398_s20  ;;  %v570_v7 = vpop.xlane.xlu1 %569 }
 0x1bc   : > { %4352 = vset.pattern.permute.xlu0 %v4399_v23  ;;  %v576_v8 = vmul.f32 0.00031887754, %v570_v7 }
 0x1be   : > { %v579_v18 = vadd.f32 1e-05, %v576_v8 }
 0x1c0   : > { %4358 = vrsqrt.f32 %v579_v18 }
 0x1cd   : > { %v4359_v20 = vpop.eup %4358 }
 0x1ce   : > { %v585_v40 = vmul.f32 %v4359_v20, %v11212_v27  ;;  %v11214_v20 = vld [vmem:[#allocation4_spill] sm:$0xff] }
 0x1d0   : > { %842 = vperm.xlu1 %4349, %v585_v40   ;;  %v588_v10 = vmul.f32 %v585_v40, %v4888_v47 }
 0x1d4   : > { %594 = vrot.lane.b32.xlu1 %v587_v6, %s4398_s20  ;;  %v4360_v6 = vld [vmem:[%s4440_s19] sm:$0xff] }
 0x1d5   : > { %4351 = vset.pattern.permute.xlu1 %v4399_v23  ;;  %v11213_v23 = vmov 10  }
 0x1d8   : > { %596 = vrot.lane.b32.xlu1 %v588_v10, %s4398_s20 }
 0x224   : > { %v833_v7 = vpop.permute.xlu1 %832 }
 0x225   : > { %v846_v40 = vmul.f32 %v833_v7, %v11214_v20  ;;  %v845_v10 = vmul.f32 %v4360_v6, %v833_v7  ;;  %v847_v59 = vmul.f32 %v4361_v16, %v833_v7  ;;  %v850_v4 = vmul.f32 %v833_v7, %v4470_v13 }
 0x226   : > { %v5028_v20 = vmul.f32 %v833_v7, %v4499_v26  ;;  %v5031_v16 = vmul.f32 %v833_v7, %v4535_v42  ;;  %v5034_v13 = vmul.f32 %v833_v7, %v4517_v35  ;;  %v5046_v26 = vmul.f32 %v833_v7, %v4549_v49 }
 0x227   : > { %v5049_v42 = vmul.f32 %v833_v7, %v4588_v12  ;;  %v5052_v35 = vmul.f32 %v833_v7, %v4575_v62  ;;  %v5065_v49 = vmul.f32 %v833_v7, %v4639_v9  ;;  %v5068_v12 = vmul.f32 %v833_v7, %v4627_v53 }
 0x228   : > { %v5071_v62 = vmul.f32 %v833_v7, %v4661_v58  ;;  %v5086_v58 = vmul.f32 %v833_v7, %v4677_v21  ;;  %v4364_v21 = vld [vmem:[%s4440_s19 + $0xd0] sm:$0xff] }
 0x232   : > { %v5004_v52 = vpop.permute.xlu0 %837 }
 0x236   : > { %v593_v41 = vpop.permute.xlu0 %592 }
 0x237   : > { %v601_v2 = vsub.f32 %v11210_v29, %v593_v41  ;;  %v11215_v41 = vld [vmem:[#allocation6_spill] sm:$0xff] }
 0x239   : > { %922 = vperm.xlu1 %4351, %v601_v2   ;;  %v848_v2 = vmul.f32 %v833_v7, %v11215_v41 }
 0x24b   : > { %v5007_v8 = vpop.permute.xlu1 %842 }
 0x24f   : > { %v595_v18 = vpop.permute.xlu1 %594 }
 0x250   : > { %v602_v34 = vsub.f32 %v11211_v32, %v595_v18  ;;  %v11216_v32 = vld [vmem:[#allocation7_spill] sm:$0xff] }
 0x251   : > { %v849_v18 = vmul.f32 %v833_v7, %v11216_v32  ;;  %v604_v32 = vlaneseq }
 0x252   : > { %927 = vperm.xlu0 %4352, %v602_v34  }
 0x253   : > { %v597_v1 = vpop.permute.xlu1 %596 }
 0x254   : > { %v603_v47 = vsub.f32 %v11212_v27, %v597_v1  ;;  %v852_v1 = vmul.f32 %v833_v7, %v4491_v22 }
 0x256   : > { %932 = vperm.xlu1 %4351, %v603_v47   ;;  %4353 = vset.pattern.permute.xlu0 %v11213_v23  ;;  %v851_v47 = vmul.f32 %v833_v7, %v4474_v15  ;;  %v5025_v23 = vmul.f32 %v833_v7, %v4508_v31  ;;  %v5043_v31 = vmul.f32 %v833_v7, %v4562_v55 }
 0x257   : > { %v5062_v55 = vmul.f32 %v833_v7, %v4601_v25 }
 0x2b4   : > { %v5014_v29 = vpop.permute.xlu1 %922 }
 0x2b5   : > { %v936_v34 = vadd.f32 %v5014_v29, %v846_v40  ;;  %v935_v27 = vadd.f32 %v5014_v29, %v845_v10  ;;  %v938_v22 = vadd.f32 %v5014_v29, %v848_v2  ;;  %v937_v15 = vadd.f32 %v5014_v29, %v847_v59  ;;  %v4362_v2 = vld [vmem:[%s4440_s19 + $0xc8] sm:$0xff] }
 0x2b6   : > { %v5059_v59 = vmul.f32 %v833_v7, %v4614_v39  ;;  %v5074_v10 = vmul.f32 %v833_v7, %v4652_v33  ;;  %v5077_v39 = vmul.f32 %v833_v7, %v4696_v61  ;;  %v940_v9 = vadd.f32 %v5014_v29, %v850_v4  ;;  %v4363_v4 = vld [vmem:[%s4440_s19 + $0xd8] sm:$0xff] }
 0x2b7   : > { %v5036_v6 = vmax.f32 %v936_v34, 0.0  ;;  %v5038_v40 = vmax.f32 %v935_v27, 0.0  ;;  %v5079_v25 = vmax.f32 %v938_v22, 0.0  ;;  %v5081_v41 = vmax.f32 %v937_v15, 0.0  ;;  %v4365_v27 = vld [vmem:[%s4440_s19 + $0xe8] sm:$0xff]  ;;  %v4367_v15 = vld [vmem:[%s4440_s19 + $0xf8] sm:$0xff] }
 0x2b8   : > { %v939_v53 = vadd.f32 %v5014_v29, %v849_v18  ;;  %v5090_v33 = vmul.f32 %v4362_v2, %v5004_v52  ;;  %v5093_v61 = vmul.f32 %v833_v7, %v4700_v0  ;;  %v5101_v18 = vmul.f32 %v4363_v4, %v5004_v52  ;;  %v4366_v7 = vld [vmem:[%s4440_s19 + $0xe0] sm:$0xff] }
 0x2b9   : > { %11217 = vst [vmem:[#allocation11_spill] sm:$0xff] %v5036_v6  ;;  %11218 = vst [vmem:[#allocation25_spill] sm:$0xff] %v5038_v40  ;;  %1162 = vrot.lane.b32.xlu0 %v5036_v6, %s4398_s20  ;;  %1160 = vrot.lane.b32.xlu1 %v5038_v40, %s4398_s20  ;;  %v5105_v34 = vmul.f32 %v4364_v21, %v5004_v52  ;;  %v5109_v0 = vmul.f32 %v4365_v27, %v5004_v52  ;;  %v5127_v37 = vmax.f32 %v940_v9, 0.0 }
 0x2ba   : > { %11219 = vst [vmem:[#allocation12_spill] sm:$0xff] %v5079_v25  ;;  %11220 = vst [vmem:[#allocation26_spill] sm:$0xff] %v5081_v41  ;;  %v5113_v22 = vmul.f32 %v4366_v7, %v5004_v52  ;;  %v5117_v2 = vmul.f32 %v4367_v15, %v5004_v52  ;;  %v5121_v4 = vmul.f32 %v4368_v43, %v5004_v52  ;;  %v5129_v27 = vmax.f32 %v939_v53, 0.0  ;;  %v11229_v53 = vld [vmem:[#allocation13_spill] sm:$0xff] }
 0x2bb   : > { %11221 = vst [vmem:[#allocation16_spill] sm:$0xff] %v5109_v0  ;;  %v5125_v21 = vmul.f32 %v5004_v52, %v4552_v50  ;;  %11223 = vst [vmem:[#allocation21_spill] sm:$0xff] %v5127_v37  ;;  %v942_v0 = vadd.f32 %v5014_v29, %v852_v1  ;;  %v941_v7 = vadd.f32 %v5014_v29, %v851_v47  ;;  %v5145_v9 = vand.u32 127, %v604_v32  ;;  %v11228_v47 = vld [vmem:[#allocation15_spill] sm:$0xff] }
 0x2bc   : > { %11222 = vst [vmem:[#allocation18_spill] sm:$0xff] %v5113_v22  ;;  %11224 = vst [vmem:[#allocation24_spill] sm:$0xff] %v5129_v27  ;;  %v4369_v22 = vld [vmem:[%s4440_s19 + $0x100] sm:$0xff]  ;;  %v5139_v43 = vmul.f32 %v5004_v52, %v4578_v63  ;;  %v5143_v50 = vmul.f32 %v5004_v52, %v4565_v56  ;;  %v5153_v1 = vmul.f32 %v5004_v52, %v4604_v28 }
 0x2bd   : > { %1166 = vrot.lane.b32.xlu0 %v5079_v25, %s4398_s20  ;;  %1164 = vrot.lane.b32.xlu1 %v5081_v41, %s4398_s20  ;;  %v5135_v15 = vmul.f32 %v4369_v22, %v5004_v52  ;;  %v5157_v63 = vmul.f32 %v5004_v52, %v4591_v14  ;;  %v5161_v56 = vmul.f32 %v5004_v52, %v11228_v47  ;;  %v11230_v22 = vld [vmem:[#allocation19_spill] sm:$0xff]  ;;  %v5181_v47 = vmax.f32 %v941_v7, 0.0  ;;  %v4370_v7 = vld [vmem:[%s4440_s19 + $0x198] sm:$0xff] }
 0x2be   : > { %11225 = vst [vmem:[#allocation27_spill] sm:$0xff] %v5139_v43  ;;  %11226 = vst [vmem:[#allocation29_spill] sm:$0xff] %v5143_v50  ;;  %v5165_v32 = vmul.f32 %v5004_v52, %v11229_v53  ;;  %v5169_v50 = vmul.f32 %v5004_v52, %v11230_v22  ;;  %v11231_v43 = vld [vmem:[#allocation17_spill] sm:$0xff]  ;;  %v5177_v14 = vmul.f32 %v5004_v52, %v11183_v5 }
 0x2bf   : > { %11227 = vst [vmem:[#allocation30_spill] sm:$0xff] %v5157_v63  ;;  %v5173_v28 = vmul.f32 %v5004_v52, %v11231_v43  ;;  %v5179_v63 = vmax.f32 %v942_v0, 0.0  ;;  %11234 = vst [vmem:[#allocation2_spill] sm:$0xff] %v5181_v47  ;;  %v944_v53 = vadd.f32 %v5014_v29, %v5025_v23  ;;  %v943_v22 = vadd.f32 %v5014_v29, %v5028_v20  ;;  %v11240_v23 = vld [vmem:[#allocation28_spill] sm:$0xff] }
 0x2c0   : > { %v5189_v43 = vmul.f32 %v5004_v52, %v11181_v3  ;;  %v5197_v5 = vmul.f32 %v5004_v52, %v11185_v17  ;;  %v5200_v0 = vadd.s32 128, %v5145_v9  ;;  %v5208_v3 = vmul.f32 %v5004_v52, %v4712_v60 }
 0x2c1   : > { %1170 = vrot.lane.b32.xlu0 %v5127_v37, %s4398_s20  ;;  %1168 = vrot.lane.b32.xlu1 %v5129_v27, %s4398_s20  ;;  %11232 = vst [vmem:[#allocation35_spill] sm:$0xff] %v5173_v28  ;;  %11233 = vst [vmem:[#allocation3_spill] sm:$0xff] %v5179_v63  ;;  %v5193_v28 = vmul.f32 %v5004_v52, %v11187_v44  ;;  %v5212_v44 = vmul.f32 %v5004_v52, %v11189_v45  ;;  %v4376_v45 = vld [vmem:[%s4440_s19 + $0x1c8] sm:$0xff] }
 0x2c2   : > { %11236 = vst [vmem:[#allocation4_spill] sm:$0xff] %v5197_v5  ;;  %11237 = vst [vmem:[#allocation6_spill] sm:$0xff] %v5208_v3  ;;  %v5216_v17 = vmul.f32 %v5004_v52, %v4722_v51  ;;  %v5220_v20 = vmul.f32 %v5004_v52, %v11240_v23  ;;  %v5224_v5 = vmul.f32 %v4370_v7, %v5007_v8  ;;  %v5233_v51 = vmax.f32 %v943_v22, 0.0  ;;  %v4372_v7 = vld [vmem:[%s4440_s19 + $0x1a8] sm:$0xff]  ;;  %v11253_v3 = vld [vmem:[#allocation14_spill] sm:$0xff] }
 0x2c3   : > { %11235 = vst [vmem:[#allocation5_spill] sm:$0xff] %v5193_v28  ;;  %11238 = vst [vmem:[#allocation7_spill] sm:$0xff] %v5212_v44  ;;  %v4371_v28 = vld [vmem:[%s4440_s19 + $0x190] sm:$0xff]  ;;  %v5231_v44 = vmax.f32 %v944_v53, 0.0  ;;  %v946_v52 = vadd.f32 %v5014_v29, %v5031_v16  ;;  %v945_v23 = vadd.f32 %v5014_v29, %v5034_v13  ;;  %v5249_v22 = vadd.s32 256, %v5145_v9  ;;  %v4374_v16 = vld [vmem:[%s4440_s19 + $0x1b8] sm:$0xff] }
 0x2c4   : > { %11239 = vst [vmem:[#allocation15_spill] sm:$0xff] %v5216_v17  ;;  %11241 = vst [vmem:[#allocation13_spill] sm:$0xff] %v5220_v20  ;;  %v5228_v60 = vmul.f32 %v4371_v28, %v5007_v8  ;;  %v4373_v28 = vld [vmem:[%s4440_s19 + $0x1a0] sm:$0xff]  ;;  %v5257_v13 = vmul.f32 %v4374_v16, %v5007_v8  ;;  %v5265_v53 = vmul.f32 %v4376_v45, %v5007_v8  ;;  %v11252_v20 = vcvt.s32.f32 %v5145_v9 }
 0x2c5   : > { %1174 = vrot.lane.b32.xlu0 %v5179_v63, %s4398_s20  ;;  %1172 = vrot.lane.b32.xlu1 %v5181_v47, %s4398_s20  ;;  %11242 = vst [vmem:[#allocation19_spill] sm:$0xff] %v5224_v5  ;;  %11244 = vst [vmem:[#allocation28_spill] sm:$0xff] %v5231_v44  ;;  %v5241_v5 = vmul.f32 %v4372_v7, %v5007_v8  ;;  %v4375_v7 = vld [vmem:[%s4440_s19 + $0x1b0] sm:$0xff]  ;;  %v5275_v16 = vmul.f32 %v5007_v8, %v11253_v3 }
 0x2c6   : > { %11243 = vst [vmem:[#allocation17_spill] sm:$0xff] %v5228_v60  ;;  %11245 = vst [vmem:[#allocation57_spill] sm:$0xff] %v5233_v51  ;;  %v5245_v60 = vmul.f32 %v4373_v28, %v5007_v8  ;;  %v5261_v28 = vmul.f32 %v4375_v7, %v5007_v8  ;;  %v655_v17 = vadd.f32 0.5, %v11252_v20  ;;  %v5280_v7 = vmax.f32 %v946_v52, 0.0 }
 0x2c7   : > { %11246 = vst [vmem:[#allocation58_spill] sm:$0xff] %v5241_v5  ;;  %11248 = vst [vmem:[#allocation60_spill] sm:$0xff] %v5257_v13  ;;  %v5278_v13 = vadd.s32 384, %v5145_v9  ;;  %v948_v45 = vadd.f32 %v5014_v29, %v5043_v31  ;;  %v5297_v52 = vmul.f32 %v5007_v8, %v11192_v57  ;;  %v4379_v31 = vld [vmem:[%s4440_s19 + $0x1e0] sm:$0xff]  ;;  %v5316_v57 = vmul.f32 %v5007_v8, %v11193_v46 }
 0x2c8   : > { %11247 = vst [vmem:[#allocation59_spill] sm:$0xff] %v5245_v60  ;;  %11249 = vst [vmem:[#allocation61_spill] sm:$0xff] %v5261_v28  ;;  %v4377_v60 = vld [vmem:[%s4440_s19 + $0x1c0] sm:$0xff]  ;;  %v5282_v28 = vmax.f32 %v945_v23, 0.0  ;;  %v5312_v23 = vmul.f32 %v5007_v8, %v11194_v38  ;;  %v950_v38 = vadd.f32 %v5014_v29, %v5049_v42  ;;  %v949_v46 = vadd.f32 %v5014_v29, %v5052_v35  ;;  %v11270_v42 = vld [vmem:[#allocation32_spill] sm:$0xff] }
 0x2c9   : > { %1178 = vrot.lane.b32.xlu0 %v5231_v44, %s4398_s20  ;;  %1176 = vrot.lane.b32.xlu1 %v5233_v51, %s4398_s20  ;;  %11250 = vst [vmem:[#allocation62_spill] sm:$0xff] %v5265_v53  ;;  %v5269_v5 = vmul.f32 %v4377_v60, %v5007_v8  ;;  %11254 = vst [vmem:[#allocation14_spill] sm:$0xff] %v5275_v16  ;;  %v947_v60 = vadd.f32 %v5014_v29, %v5046_v26  ;;  %v4378_v53 = vld [vmem:[%s4440_s19 + $0x1d0] sm:$0xff]  ;;  %v11262_v16 = vcvt.s32.f32 %v5249_v22 }
 0x2ca   : > { %11255 = vst [vmem:[#allocation64_spill] sm:$0xff] %v5280_v7  ;;  %11256 = vst [vmem:[#allocation65_spill] sm:$0xff] %v5282_v28  ;;  %v5292_v3 = vmul.f32 %v4378_v53, %v5007_v8  ;;  %v5305_v26 = vmul.f32 %v4379_v31, %v5007_v8  ;;  %v680_v53 = vmul.f32 0.017857144, %v655_v17  ;;  %v5325_v31 = vmul.f32 %v5007_v8, %v11195_v36 }
 0x2cb   : > { %11251 = vst [vmem:[#allocation63_spill] sm:$0xff] %v5269_v5  ;;  %v11257_v5 = vcvt.s32.f32 %v5200_v0  ;;  %11259 = vst [vmem:[#allocation67_spill] sm:$0xff] %v5316_v57  ;;  %v657_v57 = vadd.f32 0.5, %v11262_v16  ;;  %v5342_v36 = vmul.f32 %v5007_v8, %v4741_v19  ;;  %v5351_v35 = vmul.f32 %v5007_v8, %v11197_v11 }
 0x2cc   : > { %11258 = vst [vmem:[#allocation66_spill] sm:$0xff] %v5305_v26  ;;  %v5329_v26 = vmax.f32 %v947_v60, 0.0  ;;  %v5355_v16 = vmul.f32 %v5007_v8, %v4749_v24  ;;  %v705_v60 = vfloor.f32 %v680_v53  ;;  %v5369_v11 = vmul.f32 %v5007_v8, %v11270_v42 }
 0x2cd   : > { %v656_v20 = vadd.f32 0.5, %v11257_v5  ;;  %1182 = vrot.lane.b32.xlu0 %v5280_v7, %s4398_s20  ;;  %1180 = vrot.lane.b32.xlu1 %v5282_v28, %s4398_s20  ;;  %v5308_v5 = vadd.s32 512, %v5145_v9  ;;  %v5321_v7 = vmul.f32 %v5007_v8, %v11196_v30  ;;  %v5327_v28 = vmax.f32 %v948_v45, 0.0  ;;  %11263 = vst [vmem:[#allocation70_spill] sm:$0xff] %v5342_v36  ;;  %11264 = vst [vmem:[#allocation71_spill] sm:$0xff] %v5351_v35  ;;  %v11266_v45 = vld [vmem:[#allocation31_spill] sm:$0xff] }
 0x2ce   : > { %11261 = vst [vmem:[#allocation69_spill] sm:$0xff] %v5329_v26  ;;  %v5338_v30 = vadd.s32 640, %v5145_v9  ;;  %11265 = vst [vmem:[#allocation72_spill] sm:$0xff] %v5355_v16  ;;  %v5359_v19 = vmul.f32 %v5007_v8, %v11266_v45  ;;  %v11269_v36 = vld [vmem:[#allocation33_spill] sm:$0xff]  ;;  %v5371_v35 = vmax.f32 %v950_v38, 0.0  ;;  %v5373_v24 = vmax.f32 %v949_v46, 0.0 }
 0x2cf   : > { %11260 = vst [vmem:[#allocation68_spill] sm:$0xff] %v5327_v28  ;;  %v681_v17 = vmul.f32 0.017857144, %v656_v20  ;;  %v11268_v20 = vcvt.s32.f32 %v5278_v13  ;;  %11271 = vst [vmem:[#allocation33_spill] sm:$0xff] %v5369_v11  ;;  %v952_v45 = vadd.f32 %v5014_v29, %v5059_v59  ;;  %v951_v53 = vadd.f32 %v5014_v29, %v5062_v55  ;;  %v11276_v46 = vld [vmem:[#allocation34_spill] sm:$0xff]  ;;  %v11281_v11 = vld [vmem:[#allocation36_spill] sm:$0xff] }
 0x2d0   : > { %11267 = vst [vmem:[#allocation31_spill] sm:$0xff] %v5359_v19  ;;  %11272 = vst [vmem:[#allocation32_spill] sm:$0xff] %v5371_v35  ;;  %v954_v59 = vadd.f32 %v5014_v29, %v5065_v49  ;;  %v953_v55 = vadd.f32 %v5014_v29, %v5068_v12  ;;  %v955_v42 = vadd.f32 %v5014_v29, %v5074_v10  ;;  %v730_v16 = vmul.f32 56.0, %v705_v60 }
 0x2d1   : > { %1186 = vrot.lane.b32.xlu0 %v5327_v28, %s4398_s20  ;;  %1184 = vrot.lane.b32.xlu1 %v5329_v26, %s4398_s20  ;;  %v658_v28 = vadd.f32 0.5, %v11268_v20  ;;  %v5365_v26 = vmul.f32 %v5007_v8, %v11269_v36  ;;  %11273 = vst [vmem:[#allocation73_spill] sm:$0xff] %v5373_v24  ;;  %v706_v19 = vfloor.f32 %v681_v17  ;;  %v682_v20 = vmul.f32 0.017857144, %v657_v57 }
 0x2d2   : > { %v5382_v36 = vmul.f32 %v5007_v8, %v11203_v54  ;;  %v11275_v57 = vcvt.s32.f32 %v5308_v5  ;;  %v5396_v17 = vmul.f32 %v5007_v8, %v11276_v46  ;;  %v956_v54 = vadd.f32 %v5014_v29, %v5071_v62 }
 0x2d3   : > { %v5404_v49 = vmax.f32 %v951_v53, 0.0  ;;  %v958_v12 = vadd.f32 %v5014_v29, %v5077_v39  ;;  %v731_v46 = vmul.f32 56.0, %v706_v19  ;;  %v5414_v10 = vmul.f32 %v5007_v8, %v11281_v11 }
 0x2d4   : > { %11274 = vst [vmem:[#allocation74_spill] sm:$0xff] %v5382_v36  ;;  %v659_v38 = vadd.f32 0.5, %v11275_v57  ;;  %11277 = vst [vmem:[#allocation34_spill] sm:$0xff] %v5396_v17  ;;  %v683_v36 = vmul.f32 0.017857144, %v658_v28  ;;  %v957_v57 = vadd.f32 %v5014_v29, %v5086_v58  ;;  %v707_v17 = vfloor.f32 %v682_v20 }
 0x2d5   : > { %1190 = vrot.lane.b32.xlu0 %v5371_v35, %s4398_s20  ;;  %1188 = vrot.lane.b32.xlu1 %v5373_v24, %s4398_s20  ;;  %v5402_v35 = vmax.f32 %v952_v45, 0.0  ;;  %11279 = vst [vmem:[#allocation76_spill] sm:$0xff] %v5404_v49  ;;  %v11280_v24 = vcvt.s32.f32 %v5338_v30  ;;  %11282 = vst [vmem:[#allocation36_spill] sm:$0xff] %v5414_v10  ;;  %v5420_v28 = vmax.f32 %v954_v59, 0.0  ;;  %v5422_v39 = vmax.f32 %v953_v55, 0.0 }
 0x2d6   : > { %v684_v58 = vmul.f32 0.017857144, %v659_v38  ;;  %v5425_v19 = vadd.s32 768, %v5145_v9  ;;  %v5427_v60 = vmax.f32 %v956_v54, 0.0  ;;  %v959_v8 = vadd.f32 %v5014_v29, %v5093_v61  ;;  %v11293_v29 = vld [vmem:[#allocation41_spill] sm:$0xff] }
 0x2d7   : > { %11278 = vst [vmem:[#allocation75_spill] sm:$0xff] %v5402_v35  ;;  %v660_v62 = vadd.f32 0.5, %v11280_v24  ;;  %11283 = vst [vmem:[#allocation77_spill] sm:$0xff] %v5420_v28  ;;  %v708_v11 = vfloor.f32 %v683_v36  ;;  %v5432_v24 = vadd.s32 896, %v5145_v9  ;;  %v5434_v45 = vmax.f32 %v955_v42, 0.0 }
 0x2d8   : > { %11284 = vst [vmem:[#allocation78_spill] sm:$0xff] %v5422_v39  ;;  %11285 = vst [vmem:[#allocation79_spill] sm:$0xff] %v5427_v60  ;;  %v5436_v53 = vmax.f32 %v958_v12, 0.0  ;;  %v5438_v20 = vmax.f32 %v957_v57, 0.0  ;;  %v11289_v59 = vcvt.s32.f32 %v5145_v9  ;;  %v11291_v38 = vcvt.s32.f32 %v5200_v0  ;;  %v5488_v12 = vpop.permute.xlu0 %927 }
 0x2d9   : > { %1194 = vrot.lane.b32.xlu0 %v5402_v35, %s4398_s20  ;;  %1192 = vrot.lane.b32.xlu1 %v5404_v49, %s4398_s20  ;;  %11286 = vst [vmem:[#allocation80_spill] sm:$0xff] %v5434_v45  ;;  %v5450_v61 = vmul.f32 %v11293_v29, %v5038_v40  ;;  %v732_v36 = vmul.f32 56.0, %v707_v17  ;;  %v685_v10 = vmul.f32 0.017857144, %v660_v62  ;;  %v5462_v0 = vmul.f32 %v4981_v48, %v5038_v40 }
 0x2da   : > { %11287 = vst [vmem:[#allocation81_spill] sm:$0xff] %v5436_v53  ;;  %11288 = vst [vmem:[#allocation82_spill] sm:$0xff] %v5438_v20  ;;  %v5442_v55 = vsub.f32 %v11289_v59, %v730_v16  ;;  %v5446_v54 = vsub.f32 %v11291_v38, %v731_v46  ;;  %v5458_v16 = vmul.f32 %v11293_v29, %v5036_v6  ;;  %v709_v42 = vfloor.f32 %v684_v58 }
 0x2db   : > { %11294 = vst [vmem:[#allocation41_spill] sm:$0xff] %v5450_v61  ;;  %11296 = vst [vmem:[#allocation86_spill] sm:$0xff] %v5462_v0  ;;  %v5465_v57 = vmax.f32 %v959_v8, 0.0  ;;  %v5469_v17 = vmul.f32 %v4981_v48, %v5036_v6  ;;  %v733_v46 = vmul.f32 56.0, %v708_v11  ;;  %v5474_v59 = vmul.f32 %v11293_v29, %v5081_v41 }
 0x2dc   : > { %11290 = vst [vmem:[#allocation83_spill] sm:$0xff] %v5442_v55  ;;  %11292 = vst [vmem:[#allocation84_spill] sm:$0xff] %v5446_v54  ;;  %v5478_v38 = vmul.f32 %v11293_v29, %v5079_v25  ;;  %v5482_v58 = vmul.f32 %v4981_v48, %v5081_v41  ;;  %v5486_v8 = vmul.f32 %v4981_v48, %v5079_v25  ;;  %v11303_v11 = vcvt.s32.f32 %v5249_v22  ;;  %v11360_v55 = vld [vmem:[#allocation59_spill] sm:$0xff] }
 0x2dd   : > { %1198 = vrot.lane.b32.xlu0 %v5420_v28, %s4398_s20  ;;  %1196 = vrot.lane.b32.xlu1 %v5422_v39, %s4398_s20  ;;  %11295 = vst [vmem:[#allocation85_spill] sm:$0xff] %v5458_v16  ;;  %11297 = vst [vmem:[#allocation87_spill] sm:$0xff] %v5465_v57  ;;  %v710_v6 = vfloor.f32 %v685_v10  ;;  %v5496_v40 = vmul.f32 %v11293_v29, %v5129_v27  ;;  %v734_v25 = vmul.f32 56.0, %v709_v42  ;;  %v11307_v10 = vcvt.s32.f32 %v5425_v19 }
 0x2de   : > { %11298 = vst [vmem:[#allocation88_spill] sm:$0xff] %v5469_v17  ;;  %11299 = vst [vmem:[#allocation89_spill] sm:$0xff] %v5474_v59  ;;  %v5492_v62 = vsub.f32 %v11303_v11, %v732_v36  ;;  %v5507_v22 = vmul.f32 %v11293_v29, %v5127_v37  ;;  %v5512_v11 = vadd.s32 1152, %v5145_v9  ;;  %v11308_v41 = vcvt.s32.f32 %v5278_v13 }
 0x2df   : > { %11300 = vst [vmem:[#allocation90_spill] sm:$0xff] %v5478_v38  ;;  %11301 = vst [vmem:[#allocation91_spill] sm:$0xff] %v5482_v58  ;;  %v5499_v38 = vadd.s32 1024, %v5145_v9  ;;  %v661_v36 = vadd.f32 0.5, %v11307_v10  ;;  %v5524_v42 = vmul.f32 %v4981_v48, %v5127_v37  ;;  %v960_v10 = vadd.f32 %v5488_v12, %v5090_v33 }
 0x2e0   : > { %11302 = vst [vmem:[#allocation92_spill] sm:$0xff] %v5486_v8  ;;  %11304 = vst [vmem:[#allocation93_spill] sm:$0xff] %v5492_v62  ;;  %v5520_v8 = vmul.f32 %v4981_v48, %v5129_v27  ;;  %v5532_v59 = vmul.f32 %v11293_v29, %v5181_v47  ;;  %v5540_v13 = vmul.f32 %v4981_v48, %v5181_v47  ;;  %v11318_v47 = vcvt.s32.f32 %v5308_v5  ;;  %v11359_v62 = vld [vmem:[#allocation58_spill] sm:$0xff] }
 0x2e1   : > { %11305 = vst [vmem:[#allocation94_spill] sm:$0xff] %v5496_v40  ;;  %1202 = vrot.lane.b32.xlu0 %v5427_v60, %s4398_s20  ;;  %1200 = vrot.lane.b32.xlu1 %v5434_v45, %s4398_s20  ;;  %11306 = vst [vmem:[#allocation95_spill] sm:$0xff] %v5507_v22  ;;  %v5516_v40 = vsub.f32 %v11308_v41, %v733_v46  ;;  %v11312_v22 = vcvt.s32.f32 %v5432_v24  ;;  %v5536_v41 = vmul.f32 %v11293_v29, %v5179_v63 }
 0x2e2   : > { %11310 = vst [vmem:[#allocation97_spill] sm:$0xff] %v5520_v8  ;;  %11311 = vst [vmem:[#allocation98_spill] sm:$0xff] %v5524_v42  ;;  %v735_v46 = vmul.f32 56.0, %v710_v6  ;;  %v5544_v37 = vmul.f32 %v4981_v48, %v5179_v63  ;;  %v5549_v33 = vmul.f32 %v11293_v29, %v5233_v51  ;;  %v5557_v27 = vsub.f32 %v11318_v47, %v734_v25 }
 0x2e3   : > { %11309 = vst [vmem:[#allocation96_spill] sm:$0xff] %v5516_v40  ;;  %v662_v58 = vadd.f32 0.5, %v11312_v22  ;;  %11313 = vst [vmem:[#allocation99_spill] sm:$0xff] %v5532_v59  ;;  %v5559_v6 = vmul.f32 0.017857144, %v661_v36  ;;  %v5564_v22 = vmul.f32 %v11293_v29, %v5231_v44  ;;  %v5576_v25 = vmul.f32 %v4981_v48, %v5231_v44  ;;  %v11324_v36 = vld [vmem:[#allocation16_spill] sm:$0xff] }
 0x2e4   : > { %11314 = vst [vmem:[#allocation100_spill] sm:$0xff] %v5536_v41  ;;  %11315 = vst [vmem:[#allocation101_spill] sm:$0xff] %v5540_v13  ;;  %v5572_v13 = vmul.f32 %v4981_v48, %v5233_v51  ;;  %v5578_v47 = vmax.f32 %v960_v10, 0.0  ;;  %v961_v5 = vadd.f32 %v5488_v12, %v5105_v34  ;;  %v964_v63 = vadd.f32 %v5488_v12, %v11324_v36  ;;  %v11332_v36 = vld [vmem:[#allocation29_spill] sm:$0xff]  ;;  %v11333_v59 = vld [vmem:[#allocation30_spill] sm:$0xff] }
 0x2e5   : > { %11316 = vst [vmem:[#allocation102_spill] sm:$0xff] %v5544_v37  ;;  %11317 = vst [vmem:[#allocation103_spill] sm:$0xff] %v5549_v33  ;;  %1206 = vrot.lane.b32.xlu0 %v5436_v53, %s4398_s20  ;;  %1204 = vrot.lane.b32.xlu1 %v5438_v20, %s4398_s20  ;;  %v962_v33 = vadd.f32 %v5488_v12, %v5101_v18  ;;  %v5568_v37 = vmul.f32 0.017857144, %v662_v58  ;;  %v966_v58 = vadd.f32 %v5488_v12, %v5117_v2 }
 0x2e6   : > { %11319 = vst [vmem:[#allocation104_spill] sm:$0xff] %v5557_v27  ;;  %11320 = vst [vmem:[#allocation105_spill] sm:$0xff] %v5564_v22  ;;  %v11325_v22 = vld [vmem:[#allocation18_spill] sm:$0xff]  ;;  %v965_v51 = vadd.f32 %v5488_v12, %v5121_v4  ;;  %v11326_v44 = vcvt.s32.f32 %v5338_v30  ;;  %v11328_v10 = vcvt.s32.f32 %v5499_v38  ;;  %v968_v34 = vadd.f32 %v5488_v12, %v5125_v21  ;;  %v11329_v4 = vld [vmem:[#allocation27_spill] sm:$0xff] }
 0x2e7   : > { %11321 = vst [vmem:[#allocation106_spill] sm:$0xff] %v5572_v13  ;;  %11322 = vst [vmem:[#allocation107_spill] sm:$0xff] %v5576_v25  ;;  %v963_v18 = vadd.f32 %v5488_v12, %v11325_v22  ;;  %v967_v2 = vadd.f32 %v5488_v12, %v5135_v15  ;;  %v11330_v30 = vcvt.s32.f32 %v5512_v11  ;;  %v5612_v22 = vmax.f32 %v962_v33, 0.0 }
 0x2e8   : > { %11323 = vst [vmem:[#allocation108_spill] sm:$0xff] %v5578_v47  ;;  %v5592_v25 = vsub.f32 %v11326_v44, %v735_v46  ;;  %v5596_v13 = vadd.f32 0.5, %v11328_v10  ;;  %v970_v44 = vadd.f32 %v5488_v12, %v11329_v4  ;;  %v969_v10 = vadd.f32 %v5488_v12, %v11332_v36 }
 0x2e9   : > { %1210 = vrot.lane.b32.xlu0 %v5578_v47, %s4398_s20  ;;  %1208 = vrot.lane.b32.xlu1 %v5465_v57, %s4398_s20  ;;  %v5610_v46 = vadd.f32 0.5, %v11330_v30  ;;  %11331 = vst [vmem:[#allocation18_spill] sm:$0xff] %v5612_v22  ;;  %v972_v41 = vadd.f32 %v5488_v12, %v5153_v1  ;;  %v971_v21 = vadd.f32 %v5488_v12, %v11333_v59  ;;  %v5620_v42 = vmax.f32 %v961_v5, 0.0 }
 0x2ea   : > { %11327 = vst [vmem:[#allocation16_spill] sm:$0xff] %v5592_v25  ;;  %v5622_v15 = vmax.f32 %v964_v63, 0.0  ;;  %v5624_v4 = vmax.f32 %v963_v18, 0.0  ;;  %v974_v30 = vadd.f32 %v5488_v12, %v5161_v56  ;;  %v5628_v33 = vmax.f32 %v966_v58, 0.0  ;;  %v5648_v18 = vpop.permute.xlu1 %932  ;;  %v11352_v25 = vld [vmem:[#allocation7_spill] sm:$0xff] }
 0x2eb   : > { %11334 = vst [vmem:[#allocation27_spill] sm:$0xff] %v5620_v42  ;;  %v5630_v8 = vmax.f32 %v965_v51, 0.0  ;;  %v973_v36 = vadd.f32 %v5488_v12, %v5165_v32  ;;  %v976_v1 = vadd.f32 %v5488_v12, %v5169_v50  ;;  %v5640_v63 = vmax.f32 %v968_v34, 0.0  ;;  %v11342_v51 = vld [vmem:[#allocation35_spill] sm:$0xff] }
 0x2ec   : > { %11335 = vst [vmem:[#allocation29_spill] sm:$0xff] %v5622_v15  ;;  %11336 = vst [vmem:[#allocation30_spill] sm:$0xff] %v5624_v4  ;;  %v5642_v59 = vmax.f32 %v967_v2, 0.0  ;;  %v5644_v56 = vmax.f32 %v970_v44, 0.0  ;;  %v975_v5 = vadd.f32 %v5488_v12, %v11342_v51  ;;  %v5650_v32 = vmax.f32 %v969_v10, 0.0  ;;  %v11347_v44 = vld [vmem:[#allocation5_spill] sm:$0xff] }
 0x2ed   : > { %11337 = vst [vmem:[#allocation109_spill] sm:$0xff] %v5628_v33  ;;  %11338 = vst [vmem:[#allocation110_spill] sm:$0xff] %v5630_v8  ;;  %1214 = vrot.lane.b32.xlu0 %v5612_v22, %s4398_s20  ;;  %1212 = vrot.lane.b32.xlu1 %v5620_v42, %s4398_s20  ;;  %v5652_v50 = vmax.f32 %v972_v41, 0.0  ;;  %v5654_v58 = vmax.f32 %v971_v21, 0.0  ;;  %v978_v17 = vadd.f32 %v5488_v12, %v5177_v14  ;;  %v5658_v34 = vmax.f32 %v974_v30, 0.0  ;;  %v11348_v51 = vld [vmem:[#allocation4_spill] sm:$0xff] }
 0x2ee   : > { %11339 = vst [vmem:[#allocation111_spill] sm:$0xff] %v5640_v63  ;;  %11340 = vst [vmem:[#allocation112_spill] sm:$0xff] %v5642_v59  ;;  %v977_v2 = vadd.f32 %v5488_v12, %v5189_v43  ;;  %v980_v0 = vadd.f32 %v5488_v12, %v11347_v44  ;;  %v979_v16 = vadd.f32 %v5488_v12, %v11348_v51  ;;  %v5666_v10 = vmax.f32 %v973_v36, 0.0  ;;  %v11351_v21 = vld [vmem:[#allocation6_spill] sm:$0xff]  ;;  %v11354_v30 = vld [vmem:[#allocation15_spill] sm:$0xff] }
 0x2ef   : > { %11341 = vst [vmem:[#allocation113_spill] sm:$0xff] %v5644_v56  ;;  %11343 = vst [vmem:[#allocation35_spill] sm:$0xff] %v5650_v32  ;;  %v5668_v41 = vmax.f32 %v976_v1, 0.0  ;;  %v982_v61 = vadd.f32 %v5488_v12, %v11351_v21  ;;  %v981_v14 = vadd.f32 %v5488_v12, %v11352_v25  ;;  %v5678_v43 = vmax.f32 %v975_v5, 0.0  ;;  %v11355_v44 = vld [vmem:[#allocation13_spill] sm:$0xff]  ;;  %v11356_v51 = vld [vmem:[#allocation19_spill] sm:$0xff] }
 0x2f0   : > { %11344 = vst [vmem:[#allocation114_spill] sm:$0xff] %v5652_v50  ;;  %11345 = vst [vmem:[#allocation115_spill] sm:$0xff] %v5654_v58  ;;  %v984_v36 = vadd.f32 %v5488_v12, %v11354_v30  ;;  %v983_v1 = vadd.f32 %v5488_v12, %v11355_v44  ;;  %v986_v21 = vadd.f32 %v5648_v18, %v11356_v51  ;;  %v5686_v27 = vmax.f32 %v978_v17, 0.0  ;;  %v11358_v25 = vld [vmem:[#allocation17_spill] sm:$0xff]  ;;  %v11364_v12 = vld [vmem:[#allocation60_spill] sm:$0xff] }
 0x2f1   : > { %11346 = vst [vmem:[#allocation116_spill] sm:$0xff] %v5658_v34  ;;  %11349 = vst [vmem:[#allocation5_spill] sm:$0xff] %v5666_v10  ;;  %1218 = vrot.lane.b32.xlu0 %v5622_v15, %s4398_s20  ;;  %1216 = vrot.lane.b32.xlu1 %v5624_v4, %s4398_s20  ;;  %v985_v40 = vadd.f32 %v5648_v18, %v11358_v25  ;;  %v988_v54 = vadd.f32 %v5648_v18, %v11359_v62  ;;  %v5694_v15 = vmax.f32 %v977_v2, 0.0  ;;  %v11367_v25 = vld [vmem:[#allocation61_spill] sm:$0xff]  ;;  %v11375_v42 = vld [vmem:[#allocation63_spill] sm:$0xff] }
 0x2f2   : > { %11350 = vst [vmem:[#allocation4_spill] sm:$0xff] %v5668_v41  ;;  %11353 = vst [vmem:[#allocation6_spill] sm:$0xff] %v5678_v43  ;;  %v987_v5 = vadd.f32 %v5648_v18, %v11360_v55  ;;  %v5696_v30 = vmax.f32 %v980_v0, 0.0  ;;  %v5698_v4 = vmax.f32 %v979_v16, 0.0  ;;  %v990_v44 = vadd.f32 %v5648_v18, %v11364_v12  ;;  %v11371_v0 = vld [vmem:[#allocation62_spill] sm:$0xff] }
 0x2f3   : > { %11357 = vst [vmem:[#allocation7_spill] sm:$0xff] %v5686_v27  ;;  %11361 = vst [vmem:[#allocation15_spill] sm:$0xff] %v5694_v15  ;;  %v5702_v17 = vmax.f32 %v982_v61, 0.0  ;;  %v5704_v51 = vmax.f32 %v981_v14, 0.0  ;;  %v989_v22 = vadd.f32 %v5648_v18, %v11367_v25  ;;  %v5709_v62 = vadd.s32 1280, %v5145_v9 }
 0x2f4   : > { %11362 = vst [vmem:[#allocation13_spill] sm:$0xff] %v5696_v30  ;;  %11363 = vst [vmem:[#allocation19_spill] sm:$0xff] %v5698_v4  ;;  %v5715_v55 = vmax.f32 %v984_v36, 0.0  ;;  %v5717_v16 = vmax.f32 %v983_v1, 0.0  ;;  %v5719_v61 = vmax.f32 %v986_v21, 0.0  ;;  %v992_v2 = vadd.f32 %v5648_v18, %v11371_v0  ;;  %v11377_v36 = vld [vmem:[#allocation14_spill] sm:$0xff] }
 0x2f5   : > { %11365 = vst [vmem:[#allocation17_spill] sm:$0xff] %v5702_v17  ;;  %11366 = vst [vmem:[#allocation58_spill] sm:$0xff] %v5704_v51  ;;  %1222 = vrot.lane.b32.xlu0 %v5628_v33, %s4398_s20  ;;  %1220 = vrot.lane.b32.xlu1 %v5630_v8, %s4398_s20  ;;  %v5723_v14 = vmax.f32 %v985_v40, 0.0  ;;  %v5725_v12 = vmax.f32 %v988_v54, 0.0  ;;  %v5727_v25 = vmax.f32 %v987_v5, 0.0  ;;  %v991_v33 = vadd.f32 %v5648_v18, %v11375_v42  ;;  %v11382_v42 = vld [vmem:[#allocation67_spill] sm:$0xff] }
 0x2f6   : > { %11368 = vst [vmem:[#allocation59_spill] sm:$0xff] %v5715_v55  ;;  %11369 = vst [vmem:[#allocation60_spill] sm:$0xff] %v5717_v16  ;;  %v5731_v57 = vmax.f32 %v990_v44, 0.0  ;;  %v994_v1 = vadd.f32 %v5648_v18, %v11377_v36  ;;  %v993_v21 = vadd.f32 %v5648_v18, %v5292_v3  ;;  %v5738_v8 = vadd.s32 1408, %v5145_v9  ;;  %v11380_v3 = vld [vmem:[#allocation66_spill] sm:$0xff] }
 0x2f7   : > { %11370 = vst [vmem:[#allocation61_spill] sm:$0xff] %v5719_v61  ;;  %11372 = vst [vmem:[#allocation62_spill] sm:$0xff] %v5723_v14  ;;  %v5740_v40 = vmax.f32 %v989_v22, 0.0  ;;  %v996_v54 = vadd.f32 %v5648_v18, %v5297_v52  ;;  %v688_v5 = vmul.f32 0.017857144, %v5596_v13  ;;  %v5750_v44 = vmax.f32 %v992_v2, 0.0 }
 0x2f8   : > { %11373 = vst [vmem:[#allocation117_spill] sm:$0xff] %v5725_v12  ;;  %11374 = vst [vmem:[#allocation118_spill] sm:$0xff] %v5727_v25  ;;  %v995_v0 = vadd.f32 %v5648_v18, %v11380_v3  ;;  %v711_v22 = vfloor.f32 %v5559_v6  ;;  %v689_v36 = vmul.f32 0.017857144, %v5610_v46  ;;  %v5756_v52 = vmax.f32 %v991_v33, 0.0 }
 0x2f9   : > { %11376 = vst [vmem:[#allocation63_spill] sm:$0xff] %v5731_v57  ;;  %11378 = vst [vmem:[#allocation14_spill] sm:$0xff] %v5740_v40  ;;  %1226 = vrot.lane.b32.xlu0 %v5640_v63, %s4398_s20  ;;  %1224 = vrot.lane.b32.xlu1 %v5642_v59, %s4398_s20  ;;  %v998_v13 = vadd.f32 %v5648_v18, %v5312_v23  ;;  %v997_v63 = vadd.f32 %v5648_v18, %v11382_v42  ;;  %v712_v40 = vfloor.f32 %v5568_v37 }
 0x2fa   : > { %11379 = vst [vmem:[#allocation119_spill] sm:$0xff] %v5750_v44  ;;  %11381 = vst [vmem:[#allocation66_spill] sm:$0xff] %v5756_v52  ;;  %v5763_v59 = vmax.f32 %v994_v1, 0.0  ;;  %v5765_v2 = vmax.f32 %v993_v21, 0.0  ;;  %v1000_v3 = vadd.f32 %v5648_v18, %v5321_v7  ;;  %v5770_v46 = vmax.f32 %v996_v54, 0.0  ;;  %v11387_v7 = vld [vmem:[#allocation70_spill] sm:$0xff] }
 0x2fb   : > { %v999_v33 = vadd.f32 %v5648_v18, %v5325_v31  ;;  %v713_v23 = vfloor.f32 %v688_v5  ;;  %v11386_v52 = vcvt.s32.f32 %v5709_v62  ;;  %v736_v37 = vmul.f32 56.0, %v711_v22 }
 0x2fc   : > { %11383 = vst [vmem:[#allocation67_spill] sm:$0xff] %v5763_v59  ;;  %11384 = vst [vmem:[#allocation120_spill] sm:$0xff] %v5765_v2  ;;  %v714_v1 = vfloor.f32 %v689_v36  ;;  %v1002_v21 = vadd.f32 %v5648_v18, %v11387_v7  ;;  %v5783_v54 = vadd.s32 1536, %v5145_v9  ;;  %v5785_v6 = vmax.f32 %v995_v0, 0.0 }
 0x2fd   : > { %11385 = vst [vmem:[#allocation121_spill] sm:$0xff] %v5770_v46  ;;  %v665_v42 = vadd.f32 0.5, %v11386_v52  ;;  %1230 = vrot.lane.b32.xlu0 %v5644_v56, %s4398_s20  ;;  %1228 = vrot.lane.b32.xlu1 %v5650_v32, %s4398_s20  ;;  %v5787_v31 = vmax.f32 %v998_v13, 0.0  ;;  %v737_v5 = vmul.f32 56.0, %v712_v40  ;;  %v11390_v52 = vld [vmem:[#allocation71_spill] sm:$0xff]  ;;  %v5791_v2 = vmax.f32 %v997_v63, 0.0 }
 0x2fe   : > { %11388 = vst [vmem:[#allocation70_spill] sm:$0xff] %v5785_v6  ;;  %v1001_v46 = vadd.f32 %v5648_v18, %v11390_v52  ;;  %v5793_v59 = vmax.f32 %v1000_v3, 0.0  ;;  %v11393_v22 = vcvt.s32.f32 %v5738_v8  ;;  %v5798_v7 = vadd.s32 1664, %v5145_v9 }
 0x2ff   : > { %11389 = vst [vmem:[#allocation122_spill] sm:$0xff] %v5787_v31  ;;  %11391 = vst [vmem:[#allocation71_spill] sm:$0xff] %v5791_v2  ;;  %v5800_v56 = vmax.f32 %v999_v33, 0.0  ;;  %v738_v0 = vmul.f32 56.0, %v713_v23  ;;  %v690_v6 = vmul.f32 0.017857144, %v665_v42  ;;  %v11395_v63 = vcvt.s32.f32 %v5425_v19 }
 0x300   : > { %11392 = vst [vmem:[#allocation123_spill] sm:$0xff] %v5793_v59  ;;  %v666_v36 = vadd.f32 0.5, %v11393_v22  ;;  %v5803_v13 = vadd.s32 1792, %v5145_v9  ;;  %v739_v3 = vmul.f32 56.0, %v714_v1  ;;  %v5813_v52 = vmax.f32 %v1002_v21, 0.0  ;;  %v11404_v21 = vld [vmem:[#allocation31_spill] sm:$0xff] }
 0x301   : > { %11394 = vst [vmem:[#allocation124_spill] sm:$0xff] %v5800_v56  ;;  %1234 = vrot.lane.b32.xlu0 %v5652_v50, %s4398_s20  ;;  %1232 = vrot.lane.b32.xlu1 %v5654_v58, %s4398_s20  ;;  %v5811_v40 = vsub.f32 %v11395_v63, %v736_v37  ;;  %v11398_v23 = vcvt.s32.f32 %v5432_v24  ;;  %v5820_v22 = vmax.f32 %v1001_v46, 0.0  ;;  %v11401_v56 = vld [vmem:[#allocation72_spill] sm:$0xff]  ;;  %v5825_v2 = vadd.s32 1920, %v5145_v9  ;;  %v11402_v37 = vld [vmem:[#allocation65_spill] sm:$0xff] }
 0x302   : > { %11397 = vst [vmem:[#allocation126_spill] sm:$0xff] %v5813_v52  ;;  %v1004_v59 = vadd.f32 %v5648_v18, %v11401_v56  ;;  %v691_v19 = vmul.f32 0.017857144, %v666_v36  ;;  %v5829_v1 = vmul.f32 %v11293_v29, %v11402_v37  ;;  %v1003_v63 = vadd.f32 %v5648_v18, %v11404_v21  ;;  %v11407_v33 = vld [vmem:[#allocation64_spill] sm:$0xff]  ;;  %v11427_v52 = vld [vmem:[#allocation33_spill] sm:$0xff] }
 0x303   : > { %11396 = vst [vmem:[#allocation125_spill] sm:$0xff] %v5811_v40  ;;  %v5818_v42 = vsub.f32 %v11398_v23, %v737_v5  ;;  %11400 = vst [vmem:[#allocation128_spill] sm:$0xff] %v5820_v22  ;;  %v11405_v5 = vcvt.s32.f32 %v5499_v38  ;;  %v715_v23 = vfloor.f32 %v690_v6  ;;  %v5840_v56 = vmul.f32 %v11293_v29, %v11407_v33 }
 0x304   : > { %11403 = vst [vmem:[#allocation72_spill] sm:$0xff] %v5829_v1  ;;  %v11409_v21 = vcvt.s32.f32 %v5512_v11  ;;  %v5853_v38 = vmul.f32 %v4981_v48, %v11402_v37  ;;  %v11412_v6 = vcvt.s32.f32 %v5783_v54  ;;  %v5862_v36 = vmul.f32 %v4981_v48, %v11407_v33  ;;  %v11417_v1 = vld [vmem:[#allocation69_spill] sm:$0xff]  ;;  %v11419_v33 = vld [vmem:[#allocation68_spill] sm:$0xff] }
 0x305   : > { %11399 = vst [vmem:[#allocation127_spill] sm:$0xff] %v5818_v42  ;;  %v5836_v46 = vsub.f32 %v11405_v5, %v738_v0  ;;  %11408 = vst [vmem:[#allocation129_spill] sm:$0xff] %v5840_v56  ;;  %1238 = vrot.lane.b32.xlu0 %v5658_v34, %s4398_s20  ;;  %1236 = vrot.lane.b32.xlu1 %v5666_v10, %s4398_s20  ;;  %v5858_v5 = vadd.s32 2048, %v5145_v9  ;;  %v5864_v56 = vmax.f32 %v1004_v59, 0.0  ;;  %v5870_v37 = vmax.f32 %v1003_v63, 0.0 }
 0x306   : > { %v5849_v24 = vsub.f32 %v11409_v21, %v739_v3  ;;  %11411 = vst [vmem:[#allocation131_spill] sm:$0xff] %v5853_v38  ;;  %v667_v0 = vadd.f32 0.5, %v11412_v6  ;;  %11413 = vst [vmem:[#allocation132_spill] sm:$0xff] %v5862_v36  ;;  %v5868_v3 = vadd.s32 2176, %v5145_v9  ;;  %v716_v21 = vfloor.f32 %v691_v19 }
 0x307   : > { %11406 = vst [vmem:[#allocation31_spill] sm:$0xff] %v5836_v46  ;;  %11414 = vst [vmem:[#allocation133_spill] sm:$0xff] %v5864_v56  ;;  %v11416_v38 = vcvt.s32.f32 %v5798_v7  ;;  %v740_v46 = vmul.f32 56.0, %v715_v23  ;;  %v5880_v59 = vmul.f32 %v11293_v29, %v11419_v33  ;;  %v11421_v11 = vcvt.s32.f32 %v5803_v13 }
 0x308   : > { %11410 = vst [vmem:[#allocation130_spill] sm:$0xff] %v5849_v24  ;;  %11415 = vst [vmem:[#allocation134_spill] sm:$0xff] %v5870_v37  ;;  %v5876_v24 = vmul.f32 %v11293_v29, %v11417_v1  ;;  %v5885_v56 = vadd.s32 2304, %v5145_v9  ;;  %v692_v19 = vmul.f32 0.017857144, %v667_v0  ;;  %v5893_v63 = vmul.f32 %v4981_v48, %v11417_v1 }
 0x309   : > { %v668_v6 = vadd.f32 0.5, %v11416_v38  ;;  %11420 = vst [vmem:[#allocation136_spill] sm:$0xff] %v5880_v59  ;;  %v669_v36 = vadd.f32 0.5, %v11421_v11  ;;  %1242 = vrot.lane.b32.xlu0 %v5668_v41, %s4398_s20  ;;  %1240 = vrot.lane.b32.xlu1 %v5678_v43, %s4398_s20  ;;  %v5897_v38 = vadd.s32 2432, %v5145_v9  ;;  %v5901_v11 = vmul.f32 %v4981_v48, %v11419_v33 }
 0x30a   : > { %11418 = vst [vmem:[#allocation135_spill] sm:$0xff] %v5876_v24  ;;  %11422 = vst [vmem:[#allocation137_spill] sm:$0xff] %v5893_v63  ;;  %v11424_v59 = vcvt.s32.f32 %v5825_v2  ;;  %v5907_v0 = vadd.s32 2560, %v5145_v9  ;;  %v741_v42 = vmul.f32 56.0, %v716_v21  ;;  %v5911_v23 = vadd.f32 %v5648_v18, %v5365_v26 }
 0x30b   : > { %11423 = vst [vmem:[#allocation138_spill] sm:$0xff] %v5901_v11  ;;  %v693_v1 = vmul.f32 0.017857144, %v668_v6  ;;  %v5914_v63 = vadd.s32 2688, %v5145_v9  ;;  %v11425_v33 = vcvt.s32.f32 %v5709_v62  ;;  %v694_v37 = vmul.f32 0.017857144, %v669_v36 }
 0x30c   : > { %v670_v24 = vadd.f32 0.5, %v11424_v59  ;;  %v5922_v59 = vadd.f32 %v5648_v18, %v11427_v52  ;;  %v717_v26 = vfloor.f32 %v692_v19  ;;  %v11428_v21 = vcvt.s32.f32 %v5858_v5 }
 0x30d   : > { %v5918_v11 = vsub.f32 %v11425_v33, %v740_v46  ;;  %1246 = vrot.lane.b32.xlu0 %v5686_v27, %s4398_s20  ;;  %1244 = vrot.lane.b32.xlu1 %v5694_v15, %s4398_s20  ;;  %v5933_v33 = vadd.s32 2816, %v5145_v9  ;;  %v11429_v46 = vcvt.s32.f32 %v5868_v3  ;;  %v11430_v40 = vcvt.s32.f32 %v5738_v8  ;;  %v11434_v15 = vld [vmem:[#allocation32_spill] sm:$0xff] }
 0x30e   : > { %v671_v6 = vadd.f32 0.5, %v11428_v21  ;;  %v695_v52 = vmul.f32 0.017857144, %v670_v24  ;;  %v718_v31 = vfloor.f32 %v693_v1  ;;  %v11432_v21 = vld [vmem:[#allocation73_spill] sm:$0xff]  ;;  %v719_v24 = vfloor.f32 %v694_v37 }
 0x30f   : > { %11426 = vst [vmem:[#allocation139_spill] sm:$0xff] %v5918_v11  ;;  %v672_v36 = vadd.f32 0.5, %v11429_v46  ;;  %v5939_v11 = vadd.s32 2944, %v5145_v9  ;;  %v5943_v19 = vsub.f32 %v11430_v40, %v741_v42  ;;  %v5947_v62 = vmul.f32 %v11293_v29, %v11432_v21 }
 0x310   : > { %v5952_v46 = vmul.f32 %v11293_v29, %v11434_v15  ;;  %v5956_v22 = vmul.f32 %v4981_v48, %v11432_v21  ;;  %v11437_v8 = vcvt.s32.f32 %v5885_v56  ;;  %v742_v42 = vmul.f32 56.0, %v717_v26 }
 0x311   : > { %11431 = vst [vmem:[#allocation33_spill] sm:$0xff] %v5943_v19  ;;  %11433 = vst [vmem:[#allocation140_spill] sm:$0xff] %v5947_v62  ;;  %1250 = vrot.lane.b32.xlu0 %v5696_v30, %s4398_s20  ;;  %1248 = vrot.lane.b32.xlu1 %v5698_v4, %s4398_s20  ;;  %v696_v1 = vmul.f32 0.017857144, %v671_v6  ;;  %v11438_v37 = vcvt.s32.f32 %v5897_v38  ;;  %v720_v62 = vfloor.f32 %v695_v52  ;;  %v697_v19 = vmul.f32 0.017857144, %v672_v36 }
 0x312   : > { %11435 = vst [vmem:[#allocation141_spill] sm:$0xff] %v5952_v46  ;;  %11436 = vst [vmem:[#allocation142_spill] sm:$0xff] %v5956_v22  ;;  %v673_v40 = vadd.f32 0.5, %v11437_v8  ;;  %v11439_v21 = vcvt.s32.f32 %v5907_v0  ;;  %v743_v41 = vmul.f32 56.0, %v718_v31  ;;  %v5972_v30 = vmul.f32 %v4981_v48, %v11434_v15  ;;  %v11442_v46 = vld [vmem:[#allocation74_spill] sm:$0xff] }
 0x313   : > { %v674_v27 = vadd.f32 0.5, %v11438_v37  ;;  %v11441_v26 = vcvt.s32.f32 %v5914_v63  ;;  %v5977_v4 = vadd.s32 3072, %v5145_v9  ;;  %v744_v37 = vmul.f32 56.0, %v719_v24  ;;  %v11444_v36 = vld [vmem:[#allocation34_spill] sm:$0xff] }
 0x314   : > { %v675_v22 = vadd.f32 0.5, %v11439_v21  ;;  %11440 = vst [vmem:[#allocation143_spill] sm:$0xff] %v5972_v30  ;;  %v5981_v52 = vadd.f32 %v5648_v18, %v11442_v46  ;;  %v5985_v21 = vadd.f32 %v5648_v18, %v11444_v36  ;;  %v698_v31 = vmul.f32 0.017857144, %v673_v40 }
 0x315   : > { %v676_v6 = vadd.f32 0.5, %v11441_v26  ;;  %1254 = vrot.lane.b32.xlu0 %v5702_v17, %s4398_s20  ;;  %1252 = vrot.lane.b32.xlu1 %v5704_v51, %s4398_s20  ;;  %v11446_v26 = vcvt.s32.f32 %v5783_v54  ;;  %v721_v24 = vfloor.f32 %v696_v1  ;;  %v699_v8 = vmul.f32 0.017857144, %v674_v27 }
 0x316   : > { %11443 = vst [vmem:[#allocation74_spill] sm:$0xff] %v5981_v52  ;;  %11445 = vst [vmem:[#allocation34_spill] sm:$0xff] %v5985_v21  ;;  %v11448_v46 = vcvt.s32.f32 %v5933_v33  ;;  %v745_v30 = vmul.f32 56.0, %v720_v62  ;;  %v722_v52 = vfloor.f32 %v697_v19  ;;  %v700_v36 = vmul.f32 0.017857144, %v675_v22 }
 0x317   : > { %v5993_v9 = vsub.f32 %v11446_v26, %v742_v42  ;;  %v11449_v40 = vcvt.s32.f32 %v5939_v11  ;;  %v11450_v17 = vcvt.s32.f32 %v5798_v7  ;;  %v6005_v54 = vmul.f32 %v11293_v29, %v5404_v49 }
 0x318   : > { %v677_v15 = vadd.f32 0.5, %v11448_v46  ;;  %v701_v42 = vmul.f32 0.017857144, %v676_v6  ;;  %v11452_v1 = vcvt.s32.f32 %v5803_v13  ;;  %v6014_v22 = vmul.f32 %v11293_v29, %v5402_v35 }
 0x319   : > { %11447 = vst [vmem:[#allocation144_spill] sm:$0xff] %v5993_v9  ;;  %v678_v21 = vadd.f32 0.5, %v11449_v40  ;;  %v6001_v43 = vsub.f32 %v11450_v17, %v743_v41  ;;  %v6018_v7 = vmul.f32 %v4981_v48, %v5404_v49  ;;  %v723_v41 = vfloor.f32 %v698_v31  ;;  %1258 = vrot.lane.b32.xlu0 %v5715_v55, %s4398_s20  ;;  %1256 = vrot.lane.b32.xlu1 %v5717_v16, %s4398_s20 }
 0x31a   : > { %v6010_v26 = vsub.f32 %v11452_v1, %v744_v37  ;;  %v746_v17 = vmul.f32 56.0, %v721_v24  ;;  %v6026_v13 = vmul.f32 %v4981_v48, %v5402_v35  ;;  %v724_v62 = vfloor.f32 %v699_v8  ;;  %v11456_v1 = vld [vmem:[#allocation36_spill] sm:$0xff] }
 0x31b   : > { %11451 = vst [vmem:[#allocation145_spill] sm:$0xff] %v6001_v43  ;;  %v702_v19 = vmul.f32 0.017857144, %v677_v15  ;;  %v11454_v6 = vcvt.s32.f32 %v5825_v2  ;;  %v747_v46 = vmul.f32 56.0, %v722_v52  ;;  %v725_v40 = vfloor.f32 %v700_v36 }
 0x31c   : > { %11453 = vst [vmem:[#allocation146_spill] sm:$0xff] %v6010_v26  ;;  %v703_v31 = vmul.f32 0.017857144, %v678_v21  ;;  %v6034_v27 = vadd.f32 %v5648_v18, %v11456_v1  ;;  %v6038_v24 = vmul.f32 %v11293_v29, %v5422_v39  ;;  %v726_v49 = vfloor.f32 %v701_v42 }
 0x31d   : > { %v6030_v37 = vsub.f32 %v11454_v6, %v745_v30  ;;  %v11457_v35 = vcvt.s32.f32 %v5977_v4  ;;  %v748_v15 = vmul.f32 56.0, %v723_v41  ;;  %v6044_v30 = vmul.f32 %v11293_v29, %v5420_v28  ;;  %1262 = vrot.lane.b32.xlu0 %v5719_v61, %s4398_s20  ;;  %1260 = vrot.lane.b32.xlu1 %v5723_v14, %s4398_s20 }
 0x31e   : > { %v6048_v2 = vmul.f32 %v4981_v48, %v5422_v39  ;;  %v6052_v18 = vmul.f32 %v4981_v48, %v5420_v28  ;;  %v749_v21 = vmul.f32 56.0, %v724_v62  ;;  %v6064_v36 = vmul.f32 %v11293_v29, %v5434_v45 }
 0x31f   : > { %11455 = vst [vmem:[#allocation147_spill] sm:$0xff] %v6030_v37  ;;  %v679_v8 = vadd.f32 0.5, %v11457_v35  ;;  %11458 = vst [vmem:[#allocation36_spill] sm:$0xff] %v6044_v30  ;;  %v11461_v35 = vcvt.s32.f32 %v5858_v5  ;;  %v727_v42 = vfloor.f32 %v702_v19  ;;  %v11464_v41 = vcvt.s32.f32 %v5868_v3 }
 0x320   : > { %11459 = vst [vmem:[#allocation148_spill] sm:$0xff] %v6048_v2  ;;  %11460 = vst [vmem:[#allocation149_spill] sm:$0xff] %v6052_v18  ;;  %v750_v1 = vmul.f32 56.0, %v725_v40  ;;  %v6072_v28 = vmul.f32 %v11293_v29, %v5427_v60  ;;  %v728_v39 = vfloor.f32 %v703_v31  ;;  %v751_v18 = vmul.f32 56.0, %v726_v49 }
 0x321   : > { %v6060_v52 = vsub.f32 %v11461_v35, %v746_v17  ;;  %11463 = vst [vmem:[#allocation151_spill] sm:$0xff] %v6064_v36  ;;  %v6068_v6 = vsub.f32 %v11464_v41, %v747_v46  ;;  %v6076_v5 = vmul.f32 %v4981_v48, %v5434_v45  ;;  %v6080_v17 = vmul.f32 %v4981_v48, %v5427_v60  ;;  %v11476_v35 = vld [vmem:[#allocation40_spill] sm:$0xff]  ;;  %v11480_v45 = vld [vmem:[#allocation10_spill] sm:$0xff] }
 0x322   : > { %11465 = vst [vmem:[#allocation152_spill] sm:$0xff] %v6072_v28  ;;  %v704_v62 = vmul.f32 0.017857144, %v679_v8  ;;  %v11468_v3 = vcvt.s32.f32 %v5885_v56  ;;  %v6088_v46 = vmul.f32 %v11293_v29, %v5438_v20  ;;  %v6092_v49 = vmul.f32 %v11293_v29, %v5436_v53  ;;  %1266 = vrot.lane.b32.xlu0 %v5725_v12, %s4398_s20  ;;  %1264 = vrot.lane.b32.xlu1 %v5727_v25, %s4398_s20 }
 0x323   : > { %11462 = vst [vmem:[#allocation150_spill] sm:$0xff] %v6060_v52  ;;  %11466 = vst [vmem:[#allocation153_spill] sm:$0xff] %v6076_v5  ;;  %v6096_v40 = vmul.f32 %v4981_v48, %v5438_v20  ;;  %v11473_v56 = vcvt.s32.f32 %v5897_v38  ;;  %v752_v8 = vmul.f32 56.0, %v727_v42  ;;  %v6112_v41 = vmul.f32 %v11476_v35, %v5578_v47  ;;  %v11482_v38 = vld [vmem:[#allocation87_spill] sm:$0xff] }
 0x324   : > { %11467 = vst [vmem:[#allocation154_spill] sm:$0xff] %v6080_v17  ;;  %v6084_v19 = vsub.f32 %v11468_v3, %v748_v15  ;;  %11470 = vst [vmem:[#allocation156_spill] sm:$0xff] %v6088_v46  ;;  %v6108_v15 = vmul.f32 %v4981_v48, %v5436_v53  ;;  %v11478_v3 = vcvt.s32.f32 %v5907_v0  ;;  %v753_v20 = vmul.f32 56.0, %v728_v39  ;;  %v11487_v0 = vld [vmem:[#allocation27_spill] sm:$0xff]  ;;  %v11633_v46 = vld [vmem:[#allocation41_spill] sm:$0xff] }
 0x325   : > { %11471 = vst [vmem:[#allocation157_spill] sm:$0xff] %v6092_v49  ;;  %11472 = vst [vmem:[#allocation158_spill] sm:$0xff] %v6096_v40  ;;  %v6104_v31 = vsub.f32 %v11473_v56, %v749_v21  ;;  %v6120_v40 = vmul.f32 %v11480_v45, %v5578_v47  ;;  %v6124_v21 = vmul.f32 %v11293_v29, %v11482_v38  ;;  %v11484_v42 = vcvt.s32.f32 %v5914_v63  ;;  %v11636_v17 = vld [vmem:[#allocation85_spill] sm:$0xff] }
 0x326   : > { %11469 = vst [vmem:[#allocation155_spill] sm:$0xff] %v6084_v19  ;;  %11475 = vst [vmem:[#allocation160_spill] sm:$0xff] %v6108_v15  ;;  %v6116_v60 = vsub.f32 %v11478_v3, %v750_v1  ;;  %v729_v53 = vfloor.f32 %v704_v62  ;;  %v6136_v39 = vmul.f32 %v11476_v35, %v11487_v0  ;;  %v11489_v1 = vld [vmem:[#allocation18_spill] sm:$0xff]  ;;  %v6144_v29 = vmul.f32 %v11480_v45, %v11487_v0  ;;  %v11626_v15 = vld [vmem:[#allocation55_spill] sm:$0xff] }
 0x327   : > { %11474 = vst [vmem:[#allocation159_spill] sm:$0xff] %v6104_v31  ;;  %11477 = vst [vmem:[#allocation40_spill] sm:$0xff] %v6112_v41  ;;  %v6128_v56 = vsub.f32 %v11484_v42, %v751_v18  ;;  %v6132_v41 = vmul.f32 %v4981_v48, %v11482_v38  ;;  %v6140_v3 = vmul.f32 %v11476_v35, %v11489_v1  ;;  %v11493_v18 = vld [vmem:[#allocation30_spill] sm:$0xff]  ;;  %1270 = vrot.lane.b32.xlu0 %v5731_v57, %s4398_s20  ;;  %v11499_v38 = vld [vmem:[#allocation29_spill] sm:$0xff] }
 0x328   : > { %11479 = vst [vmem:[#allocation161_spill] sm:$0xff] %v6116_v60  ;;  %11481 = vst [vmem:[#allocation10_spill] sm:$0xff] %v6120_v40  ;;  %v6148_v63 = vmul.f32 %v11480_v45, %v11489_v1  ;;  %v6152_v48 = vmul.f32 %v11476_v35, %v11493_v18  ;;  %v11495_v62 = vld [vmem:[#allocation14_spill] sm:$0xff]  ;;  %v6159_v42 = vmax.f32 %v5911_v23, 0.0  ;;  %v11497_v47 = vcvt.s32.f32 %v5933_v33  ;;  %v11507_v33 = vld [vmem:[#allocation109_spill] sm:$0xff] }
 0x329   : > { %11483 = vst [vmem:[#allocation162_spill] sm:$0xff] %v6124_v21  ;;  %11485 = vst [vmem:[#allocation163_spill] sm:$0xff] %v6128_v56  ;;  %1268 = vrot.lane.b32.xlu1 %v11495_v62, %s4398_s20  ;;  %v6167_v1 = vmul.f32 %v11476_v35, %v11499_v38  ;;  %v6179_v23 = vmul.f32 %v11480_v45, %v11499_v38  ;;  %v11513_v38 = vld [vmem:[#allocation111_spill] sm:$0xff]  ;;  %v11622_v21 = vld [vmem:[#allocation134_spill] sm:$0xff]  ;;  %vm11015_vm14 = vcmp.ge.f32.partialorder %v5993_v9, 0.5  ;;  %vm11013_vm15 = vcmp.ge.f32.partialorder %v6001_v43, 0.5 }
 0x32a   : > { %11486 = vst [vmem:[#allocation164_spill] sm:$0xff] %v6132_v41  ;;  %11488 = vst [vmem:[#allocation165_spill] sm:$0xff] %v6136_v39  ;;  %v6163_v0 = vsub.f32 %v11497_v47, %v752_v8  ;;  %v6187_v8 = vmul.f32 %v11476_v35, %v11507_v33  ;;  %vm11012_vm0 = vcmp.ge.f32.partialorder %v6010_v26, 0.5 }
 0x32b   : > { %11490 = vst [vmem:[#allocation166_spill] sm:$0xff] %v6140_v3  ;;  %11491 = vst [vmem:[#allocation167_spill] sm:$0xff] %v6144_v29  ;;  %v11505_v29 = vld [vmem:[#allocation110_spill] sm:$0xff]  ;;  %1274 = vrot.lane.b32.xlu0 %v5750_v44, %s4398_s20 }
 0x32c   : > { %11492 = vst [vmem:[#allocation168_spill] sm:$0xff] %v6148_v63  ;;  %11494 = vst [vmem:[#allocation169_spill] sm:$0xff] %v6152_v48  ;;  %v6171_v48 = vmul.f32 %v11480_v45, %v11493_v18  ;;  %v11502_v63 = vcvt.s32.f32 %v5939_v11  ;;  %v6183_v47 = vmul.f32 %v11476_v35, %v11505_v29  ;;  %v6191_v18 = vmul.f32 %v11480_v45, %v11505_v29  ;;  %v11511_v11 = vld [vmem:[#allocation112_spill] sm:$0xff]  ;;  %v11518_v29 = vld [vmem:[#allocation66_spill] sm:$0xff] }
 0x32d   : > { %11496 = vst [vmem:[#allocation170_spill] sm:$0xff] %v6159_v42  ;;  %11498 = vst [vmem:[#allocation171_spill] sm:$0xff] %v6163_v0  ;;  %1272 = vrot.lane.b32.xlu1 %v11518_v29, %s4398_s20 }
 0x32e   : > { %11500 = vst [vmem:[#allocation172_spill] sm:$0xff] %v6167_v1  ;;  %11501 = vst [vmem:[#allocation173_spill] sm:$0xff] %v6171_v48  ;;  %v6175_v3 = vsub.f32 %v11502_v63, %v753_v20  ;;  %v754_v1 = vmul.f32 56.0, %v729_v53  ;;  %v6195_v20 = vmul.f32 %v11480_v45, %v11507_v33  ;;  %v6199_v63 = vmul.f32 %v11476_v35, %v11511_v11 }
 0x32f   : > { %11504 = vst [vmem:[#allocation175_spill] sm:$0xff] %v6179_v23  ;;  %11506 = vst [vmem:[#allocation176_spill] sm:$0xff] %v6183_v47  ;;  %v6203_v47 = vmul.f32 %v11476_v35, %v11513_v38  ;;  %v6211_v53 = vmul.f32 %v11480_v45, %v11513_v38  ;;  %v6215_v33 = vmul.f32 %v11476_v35, %v5650_v32  ;;  %v11555_v23 = vld [vmem:[#allocation84_spill] sm:$0xff] }
 0x330   : > { %11503 = vst [vmem:[#allocation174_spill] sm:$0xff] %v6175_v3  ;;  %11508 = vst [vmem:[#allocation177_spill] sm:$0xff] %v6187_v8  ;;  %v6207_v8 = vmul.f32 %v11480_v45, %v11511_v11  ;;  %v6230_v38 = vmul.f32 %v11480_v45, %v5650_v32  ;;  %v6250_v32 = vmul.f32 %v11480_v45, %v5652_v50  ;;  %vm781_vm3 = vcmp.ge.f32.partialorder %v11555_v23, 0.5 }
 0x331   : > { %11509 = vst [vmem:[#allocation178_spill] sm:$0xff] %v6191_v18  ;;  %11510 = vst [vmem:[#allocation179_spill] sm:$0xff] %v6195_v20  ;;  %v11553_v18 = vld [vmem:[#allocation13_spill] sm:$0xff] }
 0x332   : > { %11512 = vst [vmem:[#allocation180_spill] sm:$0xff] %v6199_v63  ;;  %11514 = vst [vmem:[#allocation181_spill] sm:$0xff] %v6203_v47  ;;  %v6222_v47 = vmax.f32 %v5922_v59, 0.0  ;;  %v11520_v63 = vld [vmem:[#allocation113_spill] sm:$0xff]  ;;  %v6242_v59 = vmul.f32 %v11476_v35, %v5652_v50  ;;  %v6270_v50 = vmul.f32 %v11480_v45, %v5666_v10 }
 0x333   : > { %11515 = vst [vmem:[#allocation182_spill] sm:$0xff] %v6207_v8  ;;  %11516 = vst [vmem:[#allocation183_spill] sm:$0xff] %v6211_v53  ;;  %v6226_v11 = vmul.f32 %v11476_v35, %v11520_v63  ;;  %v6238_v53 = vmul.f32 %v11476_v35, %v5654_v58  ;;  %v6246_v8 = vmul.f32 %v11480_v45, %v5654_v58 }
 0x334   : > { %11517 = vst [vmem:[#allocation184_spill] sm:$0xff] %v6215_v33  ;;  %11519 = vst [vmem:[#allocation185_spill] sm:$0xff] %v6222_v47  ;;  %v6234_v33 = vmul.f32 %v11480_v45, %v11520_v63  ;;  %v6254_v63 = vpop.permute.xlu1 %1160  ;;  %v6266_v58 = vmul.f32 %v11476_v35, %v5658_v34 }
 0x335   : > { %11521 = vst [vmem:[#allocation186_spill] sm:$0xff] %v6226_v11  ;;  %11522 = vst [vmem:[#allocation187_spill] sm:$0xff] %v6230_v38  ;;  %v6252_v38 = vpop.permute.xlu0 %1162  ;;  %v11546_v11 = vld [vmem:[#allocation7_spill] sm:$0xff] }
 0x336   : > { %11523 = vst [vmem:[#allocation188_spill] sm:$0xff] %v6234_v33  ;;  %11524 = vst [vmem:[#allocation189_spill] sm:$0xff] %v6238_v53  ;;  %v11528_v33 = vcvt.s32.f32 %v5977_v4 }
 0x337   : > { %11525 = vst [vmem:[#allocation190_spill] sm:$0xff] %v6242_v59  ;;  %11526 = vst [vmem:[#allocation191_spill] sm:$0xff] %v6246_v8  ;;  %v6262_v59 = vmul.f32 %v11476_v35, %v5666_v10  ;;  %v11534_v8 = vld [vmem:[#allocation6_spill] sm:$0xff]  ;;  %v11540_v10 = vld [vmem:[#allocation120_spill] sm:$0xff] }
 0x338   : > { %11527 = vst [vmem:[#allocation192_spill] sm:$0xff] %v6250_v32  ;;  %v6258_v53 = vsub.f32 %v11528_v33, %v754_v1  ;;  %11531 = vst [vmem:[#allocation195_spill] sm:$0xff] %v6266_v58  ;;  %v6274_v32 = vmul.f32 %v11480_v45, %v5658_v34  ;;  %v6278_v4 = vmul.f32 %v11476_v35, %v11534_v8  ;;  %v11536_v1 = vld [vmem:[#allocation4_spill] sm:$0xff]  ;;  %v11539_v58 = vld [vmem:[#allocation67_spill] sm:$0xff]  ;;  %1276 = vrot.lane.b32.xlu1 %v11540_v10, %s4398_s20  ;;  %v6327_v48 = vpop.permute.xlu1 %1164 }
 0x339   : > { %11530 = vst [vmem:[#allocation194_spill] sm:$0xff] %v6262_v59  ;;  %11532 = vst [vmem:[#allocation196_spill] sm:$0xff] %v6270_v50  ;;  %v6282_v33 = vmul.f32 %v11476_v35, %v11536_v1  ;;  %v6286_v59 = vmul.f32 %v11480_v45, %v11534_v8  ;;  %1278 = vrot.lane.b32.xlu0 %v11539_v58, %s4398_s20  ;;  %v11541_v34 = vld [vmem:[#allocation74_spill] sm:$0xff]  ;;  %v11544_v50 = vld [vmem:[#allocation15_spill] sm:$0xff]  ;;  %v6305_v8 = vmul.f32 %v11476_v35, %v11546_v11 }
 0x33a   : > { %11529 = vst [vmem:[#allocation193_spill] sm:$0xff] %v6258_v53  ;;  %11533 = vst [vmem:[#allocation197_spill] sm:$0xff] %v6274_v32  ;;  %v6293_v32 = vmax.f32 %v11541_v34, 0.0  ;;  %v6310_v20 = vmul.f32 %v11480_v45, %v11544_v50  ;;  %v6314_v34 = vmul.f32 %v11480_v45, %v11546_v11  ;;  %v6335_v11 = vmul.f32 %v11480_v45, %v11553_v18 }
 0x33b   : > { %11535 = vst [vmem:[#allocation198_spill] sm:$0xff] %v6278_v4  ;;  %11537 = vst [vmem:[#allocation199_spill] sm:$0xff] %v6282_v33  ;;  %v6297_v4 = vmul.f32 %v11480_v45, %v11536_v1  ;;  %v6301_v33 = vmul.f32 %v11476_v35, %v11544_v50  ;;  %v11551_v1 = vld [vmem:[#allocation19_spill] sm:$0xff] }
 0x33c   : > { %11538 = vst [vmem:[#allocation200_spill] sm:$0xff] %v6286_v59  ;;  %11542 = vst [vmem:[#allocation74_spill] sm:$0xff] %v6293_v32  ;;  %v11548_v59 = vld [vmem:[#allocation83_spill] sm:$0xff]  ;;  %v6331_v50 = vmul.f32 %v11480_v45, %v11551_v1 }
 0x33d   : > { %11543 = vst [vmem:[#allocation201_spill] sm:$0xff] %v6297_v4  ;;  %11545 = vst [vmem:[#allocation202_spill] sm:$0xff] %v6301_v33  ;;  %vm780_vm2 = vcmp.ge.f32.partialorder %v11548_v59, 0.5  ;;  %v6318_v4 = vmul.f32 %v11476_v35, %v11551_v1  ;;  %v6322_v33 = vmul.f32 %v11476_v35, %v11553_v18  ;;  %v6355_v18 = vmul.f32 %v11476_v35, %v5717_v16  ;;  %v11640_v59 = vld [vmem:[#allocation130_spill] sm:$0xff] }
 0x33e   : > { %11547 = vst [vmem:[#allocation203_spill] sm:$0xff] %v6305_v8  ;;  %11549 = vst [vmem:[#allocation204_spill] sm:$0xff] %v6310_v20  ;;  %v6325_v8 = vpop.permute.xlu0 %1166  ;;  %v6347_v20 = vmul.f32 %v11480_v45, %v5704_v51  ;;  %vm11005_vm11 = vcmp.ge.f32.partialorder %v11640_v59, 0.5 }
 0x33f   : > { %11550 = vst [vmem:[#allocation205_spill] sm:$0xff] %v6314_v34  ;;  %11552 = vst [vmem:[#allocation206_spill] sm:$0xff] %v6318_v4  ;;  %v6339_v4 = vmul.f32 %v11476_v35, %v5704_v51  ;;  %v11559_v34 = vld [vmem:[#allocation17_spill] sm:$0xff]  ;;  %v11567_v51 = vld [vmem:[#allocation34_spill] sm:$0xff] }
 0x340   : > { %11554 = vst [vmem:[#allocation207_spill] sm:$0xff] %v6322_v33  ;;  %11556 = vst [vmem:[#allocation208_spill] sm:$0xff] %v6331_v50  ;;  %v6343_v33 = vmul.f32 %v11476_v35, %v11559_v34  ;;  %v6351_v1 = vmul.f32 %v11480_v45, %v11559_v34  ;;  %v6370_v34 = vmul.f32 %v11480_v45, %v5717_v16 }
 0x341   : > { %11557 = vst [vmem:[#allocation209_spill] sm:$0xff] %v6335_v11  ;;  %11558 = vst [vmem:[#allocation210_spill] sm:$0xff] %v6339_v4  ;;  %v6359_v11 = vmul.f32 %v11476_v35, %v5715_v55  ;;  %v11565_v4 = vld [vmem:[#allocation121_spill] sm:$0xff]  ;;  %v11571_v35 = vld [vmem:[#allocation43_spill] sm:$0xff] }
 0x342   : > { %11560 = vst [vmem:[#allocation211_spill] sm:$0xff] %v6343_v33  ;;  %11561 = vst [vmem:[#allocation212_spill] sm:$0xff] %v6347_v20  ;;  %1282 = vrot.lane.b32.xlu0 %v11565_v4, %s4398_s20  ;;  %v11566_v33 = vld [vmem:[#allocation70_spill] sm:$0xff]  ;;  %v6366_v20 = vmax.f32 %v11567_v51, 0.0  ;;  %v6383_v50 = vmul.f32 %v11571_v35, %v5719_v61  ;;  %v11575_v51 = vld [vmem:[#allocation8_spill] sm:$0xff] }
 0x343   : > { %11562 = vst [vmem:[#allocation213_spill] sm:$0xff] %v6351_v1  ;;  %11563 = vst [vmem:[#allocation214_spill] sm:$0xff] %v6355_v18  ;;  %1280 = vrot.lane.b32.xlu1 %v11566_v33, %s4398_s20  ;;  %v6374_v18 = vmul.f32 %v11480_v45, %v5715_v55  ;;  %v11573_v1 = vld [vmem:[#allocation93_spill] sm:$0xff]  ;;  %v6387_v39 = vmul.f32 %v11575_v51, %v5723_v14  ;;  %v6391_v16 = vmul.f32 %v11575_v51, %v5719_v61  ;;  %v11579_v55 = vld [vmem:[#allocation96_spill] sm:$0xff] }
 0x344   : > { %11564 = vst [vmem:[#allocation215_spill] sm:$0xff] %v6359_v11  ;;  %11568 = vst [vmem:[#allocation34_spill] sm:$0xff] %v6366_v20  ;;  %v6378_v11 = vmul.f32 %v11571_v35, %v5723_v14  ;;  %vm782_vm4 = vcmp.ge.f32.partialorder %v11573_v1, 0.5  ;;  %v6395_v45 = vmul.f32 %v11571_v35, %v5727_v25  ;;  %vm783_vm5 = vcmp.ge.f32.partialorder %v11579_v55, 0.5 }
 0x345   : > { %11569 = vst [vmem:[#allocation216_spill] sm:$0xff] %v6370_v34  ;;  %11570 = vst [vmem:[#allocation217_spill] sm:$0xff] %v6374_v18  ;;  %v6400_v18 = vpop.permute.xlu1 %1168  ;;  %v6408_v14 = vmul.f32 %v11575_v51, %v5727_v25  ;;  %v6412_v61 = vmul.f32 %v11575_v51, %v5725_v12  ;;  %v6428_v25 = vmul.f32 %v11575_v51, %v5731_v57  ;;  %v11620_v34 = vld [vmem:[#allocation127_spill] sm:$0xff] }
 0x346   : > { %11572 = vst [vmem:[#allocation43_spill] sm:$0xff] %v6378_v11  ;;  %11574 = vst [vmem:[#allocation218_spill] sm:$0xff] %v6383_v50  ;;  %v6398_v11 = vpop.permute.xlu0 %1170  ;;  %v6404_v50 = vmul.f32 %v11571_v35, %v5725_v12  ;;  %v6432_v12 = vmul.f32 %v11571_v35, %v11518_v29  ;;  %vm11011_vm9 = vcmp.ge.f32.partialorder %v11620_v34, 0.5 }
 0x347   : > { %11576 = vst [vmem:[#allocation219_spill] sm:$0xff] %v6387_v39  ;;  %11577 = vst [vmem:[#allocation220_spill] sm:$0xff] %v6391_v16  ;;  %v6420_v16 = vmul.f32 %v11571_v35, %v5731_v57  ;;  %v6424_v39 = vmul.f32 %v11575_v51, %v11495_v62  ;;  %v6447_v57 = vmul.f32 %v11575_v51, %v11518_v29  ;;  %v11597_v29 = vld [vmem:[#allocation104_spill] sm:$0xff] }
 0x348   : > { %11578 = vst [vmem:[#allocation221_spill] sm:$0xff] %v6395_v45  ;;  %11580 = vst [vmem:[#allocation222_spill] sm:$0xff] %v6404_v50  ;;  %v6416_v45 = vmul.f32 %v11571_v35, %v11495_v62  ;;  %v6443_v62 = vmul.f32 %v11571_v35, %v5750_v44  ;;  %vm784_vm6 = vcmp.ge.f32.partialorder %v11597_v29, 0.5  ;;  %v11619_v50 = vld [vmem:[#allocation37_spill] sm:$0xff]  ;;  %v11654_v29 = vld [vmem:[#allocation92_spill] sm:$0xff] }
 0x349   : > { %11581 = vst [vmem:[#allocation223_spill] sm:$0xff] %v6408_v14  ;;  %11582 = vst [vmem:[#allocation224_spill] sm:$0xff] %v6412_v61  ;;  %v11588_v61 = vld [vmem:[#allocation122_spill] sm:$0xff]  ;;  %v6474_v14 = vpop.permute.xlu1 %1172 }
 0x34a   : > { %11583 = vst [vmem:[#allocation225_spill] sm:$0xff] %v6416_v45  ;;  %11584 = vst [vmem:[#allocation226_spill] sm:$0xff] %v6420_v16  ;;  %1286 = vrot.lane.b32.xlu0 %v11588_v61, %s4398_s20  ;;  %v11589_v45 = vld [vmem:[#allocation71_spill] sm:$0xff]  ;;  %v6439_v16 = vmax.f32 %v6034_v27, 0.0  ;;  %v6461_v27 = vmul.f32 %v11571_v35, %v11539_v58 }
 0x34b   : > { %11585 = vst [vmem:[#allocation227_spill] sm:$0xff] %v6424_v39  ;;  %11586 = vst [vmem:[#allocation228_spill] sm:$0xff] %v6428_v25  ;;  %1284 = vrot.lane.b32.xlu1 %v11589_v45, %s4398_s20  ;;  %v1458_v25 = vsel %vm1310_vm1, 0.0, %v6254_v63  ;;  %v6457_v39 = vmul.f32 %v11571_v35, %v11540_v10 }
 0x34c   : > { %11587 = vst [vmem:[#allocation229_spill] sm:$0xff] %v6432_v12  ;;  %11590 = vst [vmem:[#allocation230_spill] sm:$0xff] %v6439_v16  ;;  %v6451_v12 = vmul.f32 %v11575_v51, %v5750_v44  ;;  %v1311_v44 = vsel %vm1310_vm1, %v6254_v63, %v6252_v38  ;;  %v6490_v63 = vmul.f32 %v11575_v51, %v11566_v33 }
 0x34d   : > { %11591 = vst [vmem:[#allocation231_spill] sm:$0xff] %v6443_v62  ;;  %11592 = vst [vmem:[#allocation232_spill] sm:$0xff] %v6447_v57  ;;  %v6465_v62 = vmul.f32 %v11575_v51, %v11540_v10  ;;  %v6472_v57 = vpop.permute.xlu0 %1174  ;;  %v6482_v10 = vmul.f32 %v11571_v35, %v11566_v33  ;;  %v11607_v33 = vld [vmem:[#allocation124_spill] sm:$0xff] }
 0x34e   : > { %11593 = vst [vmem:[#allocation233_spill] sm:$0xff] %v6451_v12  ;;  %11594 = vst [vmem:[#allocation234_spill] sm:$0xff] %v6457_v39  ;;  %v11598_v12 = vld [vmem:[#allocation16_spill] sm:$0xff]  ;;  %v6478_v39 = vmul.f32 %v11575_v51, %v11539_v58  ;;  %v6498_v58 = vmul.f32 %v11571_v35, %v11589_v45 }
 0x34f   : > { %11595 = vst [vmem:[#allocation235_spill] sm:$0xff] %v6461_v27  ;;  %11596 = vst [vmem:[#allocation236_spill] sm:$0xff] %v6465_v62  ;;  %vm11019_vm7 = vcmp.ge.f32.partialorder %v11598_v12, 0.5  ;;  %v6486_v62 = vmul.f32 %v11571_v35, %v11565_v4  ;;  %v6494_v27 = vmul.f32 %v11575_v51, %v11565_v4  ;;  %1288 = vrot.lane.b32.xlu1 %v11607_v33, %s4398_s20 }
 0x350   : > { %11599 = vst [vmem:[#allocation237_spill] sm:$0xff] %v6478_v39  ;;  %11600 = vst [vmem:[#allocation238_spill] sm:$0xff] %v6482_v10  ;;  %v6502_v39 = vmul.f32 %v11571_v35, %v11588_v61  ;;  %v1511_v10 = vsel %vm780_vm2, %v1458_v25, 0.0  ;;  %v6512_v4 = vmul.f32 %v11575_v51, %v11589_v45  ;;  %v1512_v25 = vsel %vm781_vm3, %v1311_v44, 0.0  ;;  %v6541_v44 = vpop.permute.xlu1 %1176 }
 0x351   : > { %11601 = vst [vmem:[#allocation239_spill] sm:$0xff] %v6486_v62  ;;  %11602 = vst [vmem:[#allocation240_spill] sm:$0xff] %v6490_v63  ;;  %v11606_v62 = vld [vmem:[#allocation123_spill] sm:$0xff]  ;;  %v6533_v45 = vmul.f32 %v11575_v51, %v11607_v33  ;;  %v2851_v1 = vmul.f32 %v11626_v15, %v1512_v25 }
 0x352   : > { %11603 = vst [vmem:[#allocation241_spill] sm:$0xff] %v6494_v27  ;;  %11604 = vst [vmem:[#allocation242_spill] sm:$0xff] %v6498_v58  ;;  %1290 = vrot.lane.b32.xlu0 %v11606_v62, %s4398_s20  ;;  %v6516_v58 = vmul.f32 %v11575_v51, %v11588_v61  ;;  %v1312_v27 = vsel %vm1310_vm1, %v6252_v38, %v6327_v48  ;;  %v6529_v63 = vmul.f32 %v11571_v35, %v11606_v62 }
 0x353   : > { %11605 = vst [vmem:[#allocation243_spill] sm:$0xff] %v6502_v39  ;;  %11608 = vst [vmem:[#allocation244_spill] sm:$0xff] %v6512_v4  ;;  %v6520_v39 = vmul.f32 %v11571_v35, %v11607_v33  ;;  %v1313_v61 = vsel %vm1310_vm1, %v6327_v48, %v6325_v8  ;;  %v6545_v38 = vmul.f32 %v11575_v51, %v11606_v62  ;;  %v11615_v4 = vld [vmem:[#allocation128_spill] sm:$0xff]  ;;  %v11617_v33 = vld [vmem:[#allocation126_spill] sm:$0xff]  ;;  %v1513_v49 = vsel %vm782_vm4, %v1312_v27, 0.0 }
 0x354   : > { %11609 = vst [vmem:[#allocation245_spill] sm:$0xff] %v6516_v58  ;;  %11611 = vst [vmem:[#allocation247_spill] sm:$0xff] %v6529_v63  ;;  %v6539_v58 = vpop.permute.xlu0 %1178  ;;  %v6549_v63 = vmul.f32 %v11571_v35, %v11615_v4  ;;  %v2028_v48 = vmul.f32 %v11619_v50, %v1511_v10  ;;  %v6559_v41 = vmul.f32 %v11575_v51, %v11615_v4  ;;  %1292 = vrot.lane.b32.xlu1 %v11615_v4, %s4398_s20  ;;  %v11631_v4 = vld [vmem:[#allocation49_spill] sm:$0xff] }
 0x355   : > { %11610 = vst [vmem:[#allocation246_spill] sm:$0xff] %v6520_v39  ;;  %11612 = vst [vmem:[#allocation248_spill] sm:$0xff] %v6533_v45  ;;  %v11613_v39 = vld [vmem:[#allocation125_spill] sm:$0xff]  ;;  %v6553_v45 = vmul.f32 %v11571_v35, %v11617_v33  ;;  %v6563_v62 = vmul.f32 %v11571_v35, %v11622_v21  ;;  %v6579_v51 = vmul.f32 %v11571_v35, %v6222_v47 }
 0x356   : > { %vm11018_vm8 = vcmp.ge.f32.partialorder %v11613_v39, 0.5  ;;  %11614 = vst [vmem:[#allocation249_spill] sm:$0xff] %v6545_v38  ;;  %11616 = vst [vmem:[#allocation250_spill] sm:$0xff] %v6549_v63  ;;  %v11624_v38 = vld [vmem:[#allocation133_spill] sm:$0xff]  ;;  %v2029_v63 = vmul.f32 %v11619_v50, %v1512_v25  ;;  %1294 = vrot.lane.b32.xlu0 %v11617_v33, %s4398_s20  ;;  %v6589_v27 = vmul.f32 %v11571_v35, %v6366_v20 }
 0x357   : > { %11618 = vst [vmem:[#allocation251_spill] sm:$0xff] %v6553_v45  ;;  %11621 = vst [vmem:[#allocation37_spill] sm:$0xff] %v6559_v41  ;;  %v6567_v40 = vmul.f32 %v11571_v35, %v11624_v38  ;;  %v2850_v45 = vmul.f32 %v11626_v15, %v1511_v10  ;;  %v1514_v41 = vsel %vm783_vm5, %v1313_v61, 0.0  ;;  %v6593_v33 = vmul.f32 %v11571_v35, %v6293_v32 }
 0x358   : > { %11623 = vst [vmem:[#allocation252_spill] sm:$0xff] %v6563_v62  ;;  %11627 = vst [vmem:[#allocation55_spill] sm:$0xff] %v6579_v51  ;;  %v2439_v62 = vmul.f32 %v11631_v4, %v1511_v10  ;;  %v1314_v61 = vsel %vm1310_vm1, %v6325_v8, %v6400_v18  ;;  %v11632_v51 = vld [vmem:[#allocation31_spill] sm:$0xff]  ;;  %v6604_v55 = vpop.permute.xlu0 %1182  ;;  %v2440_v10 = vmul.f32 %v11631_v4, %v1512_v25  ;;  %1296 = vrot.lane.b32.xlu1 %v11622_v21, %s4398_s20 }
 0x359   : > { %11625 = vst [vmem:[#allocation253_spill] sm:$0xff] %v6567_v40  ;;  %v6585_v40 = vmul.f32 %v11571_v35, %v6159_v42  ;;  %11629 = vst [vmem:[#allocation255_spill] sm:$0xff] %v6589_v27  ;;  %vm11008_vm10 = vcmp.ge.f32.partialorder %v11632_v51, 0.5  ;;  %v6606_v27 = vpop.permute.xlu1 %1180  ;;  %v2030_v23 = vmul.f32 %v11619_v50, %v1513_v49  ;;  %v6615_v8 = vmul.f32 %v11571_v35, %v6439_v16 }
 0x35a   : > { %11630 = vst [vmem:[#allocation256_spill] sm:$0xff] %v6593_v33  ;;  %v6609_v33 = vadd.f32 %v11633_v46, %v2028_v48  ;;  %v6618_v5 = vadd.f32 %v11636_v17, %v2029_v63  ;;  %v2031_v36 = vmul.f32 %v11619_v50, %v1514_v41  ;;  %1298 = vrot.lane.b32.xlu0 %v11624_v38, %s4398_s20  ;;  %v1515_v17 = vsel %vm784_vm6, %v1314_v61, 0.0  ;;  %v11641_v63 = vld [vmem:[#allocation88_spill] sm:$0xff]  ;;  %v11643_v61 = vld [vmem:[#allocation89_spill] sm:$0xff] }
 0x35b   : > { %11628 = vst [vmem:[#allocation254_spill] sm:$0xff] %v6585_v40  ;;  %v1315_v40 = vsel %vm1310_vm1, %v6400_v18, %v6398_v11  ;;  %11635 = vst [vmem:[#allocation41_spill] sm:$0xff] %v6615_v8  ;;  %v11638_v18 = vld [vmem:[#allocation86_spill] sm:$0xff]  ;;  %v2852_v46 = vmul.f32 %v11626_v15, %v1513_v49  ;;  %v2853_v35 = vmul.f32 %v11626_v15, %v1514_v41 }
 0x35c   : > { %11634 = vst [vmem:[#allocation49_spill] sm:$0xff] %v6609_v33  ;;  %11637 = vst [vmem:[#allocation85_spill] sm:$0xff] %v6618_v5  ;;  %v6621_v28 = vadd.f32 %v11638_v18, %v2850_v45  ;;  %v1516_v45 = vsel %vm11019_vm7, %v1315_v40, 0.0  ;;  %v6636_v25 = vadd.f32 %v11641_v63, %v2851_v1  ;;  %v6639_v48 = vmul.f32 %v11631_v4, %v1513_v49  ;;  %v6647_v38 = vpop.permute.xlu0 %1186  ;;  %v11645_v49 = vld [vmem:[#allocation139_spill] sm:$0xff]  ;;  %v11646_v1 = vld [vmem:[#allocation25_spill] sm:$0xff] }
 0x35d   : > { %v6642_v18 = vmul.f32 %v11631_v4, %v1514_v41  ;;  %v6649_v33 = vpop.permute.xlu1 %1184  ;;  %v6652_v5 = vadd.f32 %v11643_v61, %v2030_v23  ;;  %v1317_v40 = vsel %vm1310_vm1, %v6474_v14, %v6472_v57  ;;  %vm11010_vm12 = vcmp.ge.f32.partialorder %v11645_v49, 0.5  ;;  %v11647_v41 = vld [vmem:[#allocation51_spill] sm:$0xff]  ;;  %v11651_v61 = vld [vmem:[#allocation33_spill] sm:$0xff]  ;;  %1300 = vrot.lane.b32.xlu1 %v6222_v47, %s4398_s20 }
 0x35e   : > { %11639 = vst [vmem:[#allocation86_spill] sm:$0xff] %v6621_v28  ;;  %11642 = vst [vmem:[#allocation88_spill] sm:$0xff] %v6636_v25  ;;  %v1316_v28 = vsel %vm1310_vm1, %v6398_v11, %v6474_v14  ;;  %v2526_v63 = vmul.f32 %v11647_v41, %v11646_v1  ;;  %v11648_v25 = vld [vmem:[#allocation11_spill] sm:$0xff]  ;;  %v11649_v11 = vld [vmem:[#allocation90_spill] sm:$0xff]  ;;  %v2032_v12 = vmul.f32 %v11619_v50, %v1515_v17  ;;  %vm11009_vm13 = vcmp.ge.f32.partialorder %v11651_v61, 0.5 }
 0x35f   : > { %11644 = vst [vmem:[#allocation89_spill] sm:$0xff] %v6652_v5  ;;  %v2527_v21 = vmul.f32 %v11647_v41, %v11648_v25  ;;  %v6663_v8 = vadd.f32 %v11649_v11, %v2031_v36  ;;  %v2033_v23 = vmul.f32 %v11619_v50, %v1516_v45  ;;  %1302 = vrot.lane.b32.xlu0 %v6159_v42, %s4398_s20  ;;  %v11652_v14 = vld [vmem:[#allocation91_spill] sm:$0xff]  ;;  %v1517_v11 = vsel %vm11018_vm8, %v1316_v28, 0.0 }
 0x360   : > { %v6673_v5 = vadd.f32 %v11652_v14, %v2852_v46  ;;  %v6676_v2 = vadd.f32 %v11654_v29, %v2853_v35  ;;  %v6679_v36 = vmul.f32 %v11631_v4, %v1515_v17  ;;  %v2855_v30 = vmul.f32 %v11626_v15, %v1516_v45  ;;  %v6690_v14 = vpop.permute.xlu0 %1190  ;;  %v11661_v47 = vld [vmem:[#allocation95_spill] sm:$0xff] }
 0x361   : > { %11650 = vst [vmem:[#allocation25_spill] sm:$0xff] %v6663_v8  ;;  %v2854_v8 = vmul.f32 %v11626_v15, %v1515_v17  ;;  %v1518_v42 = vsel %vm11011_vm9, %v1317_v40, 0.0  ;;  %v1318_v46 = vsel %vm1310_vm1, %v6472_v57, %v6541_v44  ;;  %v6692_v29 = vpop.permute.xlu1 %1188  ;;  %v6695_v35 = vmul.f32 %v11631_v4, %v1516_v45  ;;  %v11659_v40 = vld [vmem:[#allocation94_spill] sm:$0xff]  ;;  %1304 = vrot.lane.b32.xlu1 %v6366_v20, %s4398_s20 }
 0x362   : > { %11653 = vst [vmem:[#allocation11_spill] sm:$0xff] %v6673_v5  ;;  %11655 = vst [vmem:[#allocation90_spill] sm:$0xff] %v6676_v2  ;;  %v1319_v28 = vsel %vm1310_vm1, %v6541_v44, %v6539_v58  ;;  %v6700_v17 = vadd.f32 %v2526_v63, %v2439_v62  ;;  %v6702_v2 = vadd.f32 %v2527_v21, %v2440_v10  ;;  %v11663_v44 = vld [vmem:[#allocation97_spill] sm:$0xff]  ;;  %v11665_v45 = vld [vmem:[#allocation98_spill] sm:$0xff]  ;;  %vm11017_vm9 = vcmp.ge.f32.partialorder %v6104_v31, 0.5 }
 0x363   : > { %11656 = vst [vmem:[#allocation91_spill] sm:$0xff] %v6679_v36  ;;  %v6705_v5 = vadd.f32 %v11659_v40, %v2032_v12  ;;  %v6708_v57 = vadd.f32 %v11661_v47, %v2033_v23  ;;  %v2034_v36 = vmul.f32 %v11619_v50, %v1517_v11  ;;  %1306 = vrot.lane.b32.xlu0 %v6293_v32, %s4398_s20  ;;  %v1519_v47 = vsel %vm11008_vm10, %v1318_v46, 0.0 }
 0x364   : > { %11657 = vst [vmem:[#allocation92_spill] sm:$0xff] %v6700_v17  ;;  %11658 = vst [vmem:[#allocation257_spill] sm:$0xff] %v6702_v2  ;;  %v2035_v21 = vmul.f32 %v11619_v50, %v1518_v42  ;;  %v2856_v12 = vmul.f32 %v11626_v15, %v1517_v11  ;;  %v2857_v62 = vmul.f32 %v11626_v15, %v1518_v42  ;;  %v1520_v40 = vsel %vm11005_vm11, %v1319_v28, 0.0  ;;  %v6734_v32 = vpop.permute.xlu0 %1194 }
 0x365   : > { %11660 = vst [vmem:[#allocation94_spill] sm:$0xff] %v6705_v5  ;;  %11662 = vst [vmem:[#allocation95_spill] sm:$0xff] %v6708_v57  ;;  %v6724_v10 = vadd.f32 %v11663_v44, %v2854_v8  ;;  %v6727_v63 = vadd.f32 %v11665_v45, %v2855_v30  ;;  %v6730_v23 = vmul.f32 %v11631_v4, %v1517_v11  ;;  %v6736_v20 = vpop.permute.xlu1 %1192  ;;  %v11669_v11 = vld [vmem:[#allocation26_spill] sm:$0xff]  ;;  %v11670_v45 = vld [vmem:[#allocation99_spill] sm:$0xff]  ;;  %vm11014_vm11 = vcmp.ge.f32.partialorder %v6030_v37, 0.5 }
 0x366   : > { %v6739_v46 = vmul.f32 %v11631_v4, %v1518_v42  ;;  %v1320_v8 = vsel %vm1310_vm1, %v6539_v58, %v6606_v27  ;;  %v1321_v30 = vsel %vm1310_vm1, %v6606_v27, %v6604_v55  ;;  %v2528_v44 = vmul.f32 %v11647_v41, %v11669_v11  ;;  %1308 = vrot.lane.b32.xlu1 %v6439_v16, %s4398_s20  ;;  %v11672_v58 = vld [vmem:[#allocation12_spill] sm:$0xff]  ;;  %v11675_v5 = vld [vmem:[#allocation101_spill] sm:$0xff] }
 0x367   : > { %11664 = vst [vmem:[#allocation97_spill] sm:$0xff] %v6724_v10  ;;  %11666 = vst [vmem:[#allocation98_spill] sm:$0xff] %v6727_v63  ;;  %v6750_v28 = vadd.f32 %v11670_v45, %v2034_v36  ;;  %v2036_v63 = vmul.f32 %v11619_v50, %v1519_v47  ;;  %1586 = vrot.lane.b32.xlu0 %v11646_v1, %s4400_s21  ;;  %v2529_v42 = vmul.f32 %v11647_v41, %v11672_v58  ;;  %v11673_v27 = vld [vmem:[#allocation100_spill] sm:$0xff]  ;;  %v11677_v45 = vld [vmem:[#allocation102_spill] sm:$0xff] }
 0x368   : > { %11667 = vst [vmem:[#allocation258_spill] sm:$0xff] %v6730_v23  ;;  %11668 = vst [vmem:[#allocation259_spill] sm:$0xff] %v6739_v46  ;;  %v6761_v10 = vadd.f32 %v11673_v27, %v2035_v21  ;;  %v6764_v36 = vadd.f32 %v11675_v5, %v2856_v12  ;;  %v2037_v57 = vmul.f32 %v11619_v50, %v1520_v40  ;;  %v1521_v16 = vsel %vm11010_vm12, %v1320_v8, 0.0  ;;  %v6777_v21 = vpop.permute.xlu0 %1198  ;;  %v11683_v8 = vld [vmem:[#allocation103_spill] sm:$0xff]  ;;  %v11710_v46 = vld [vmem:[#allocation137_spill] sm:$0xff] }
 0x369   : > { %11671 = vst [vmem:[#allocation26_spill] sm:$0xff] %v6750_v28  ;;  %v6767_v28 = vadd.f32 %v11677_v45, %v2857_v62  ;;  %v2858_v2 = vmul.f32 %v11626_v15, %v1519_v47  ;;  %v2859_v1 = vmul.f32 %v11626_v15, %v1520_v40  ;;  %v1522_v17 = vsel %vm11009_vm13, %v1321_v30, 0.0  ;;  %v1197_v5 = vpop.permute.xlu1 %1196 }
 0x36a   : > { %11674 = vst [vmem:[#allocation99_spill] sm:$0xff] %v6761_v10  ;;  %11676 = vst [vmem:[#allocation12_spill] sm:$0xff] %v6764_v36  ;;  %vm796_vm10 = vcmp.ge.f32.partialorder %v6060_v52, 0.5  ;;  %v6780_v12 = vmul.f32 %v11631_v4, %v1519_v47  ;;  %v6783_v62 = vmul.f32 %v11631_v4, %v1520_v40  ;;  %v6786_v27 = vadd.f32 %v2528_v44, %v6639_v48 }
 0x36b   : > { %11678 = vst [vmem:[#allocation100_spill] sm:$0xff] %v6767_v28  ;;  %v6789_v45 = vadd.f32 %v2529_v42, %v6642_v18  ;;  %v6792_v28 = vadd.f32 %v11683_v8, %v2036_v63  ;;  %v1322_v30 = vsel %vm1310_vm1, %v6604_v55, %v6649_v33  ;;  %v1323_v47 = vsel %vm1310_vm1, %v6649_v33, %v6647_v38  ;;  %v11685_v33 = vld [vmem:[#allocation105_spill] sm:$0xff] }
 0x36c   : > { %11679 = vst [vmem:[#allocation101_spill] sm:$0xff] %v6780_v12  ;;  %11680 = vst [vmem:[#allocation102_spill] sm:$0xff] %v6783_v62  ;;  %vm797_vm13 = vcmp.ge.f32.partialorder %v6068_v6, 0.5  ;;  %1590 = vrot.lane.b32.xlu0 %v11669_v11, %s4400_s21  ;;  %1588 = vrot.lane.b32.xlu1 %v11648_v25, %s4400_s21  ;;  %v2038_v48 = vmul.f32 %v11619_v50, %v1521_v16  ;;  %v2039_v18 = vmul.f32 %v11619_v50, %v1522_v17  ;;  %v11687_v11 = vld [vmem:[#allocation106_spill] sm:$0xff]  ;;  %v11689_v25 = vld [vmem:[#allocation107_spill] sm:$0xff]  ;;  %v6825_v36 = vpop.permute.xlu0 %1202 }
 0x36d   : > { %11681 = vst [vmem:[#allocation260_spill] sm:$0xff] %v6786_v27  ;;  %11682 = vst [vmem:[#allocation261_spill] sm:$0xff] %v6789_v45  ;;  %v2860_v63 = vmul.f32 %v11626_v15, %v1521_v16  ;;  %v1324_v55 = vsel %vm1310_vm1, %v6647_v38, %v6692_v29  ;;  %vm798_vm12 = vcmp.ge.f32.partialorder %v6084_v19, 0.5  ;;  %v6814_v40 = vadd.f32 %v11685_v33, %v2037_v57  ;;  %v1201_v38 = vpop.permute.xlu1 %1200  ;;  %v11693_v33 = vld [vmem:[#allocation24_spill] sm:$0xff] }
 0x36e   : > { %11684 = vst [vmem:[#allocation103_spill] sm:$0xff] %v6792_v28  ;;  %v6817_v44 = vadd.f32 %v11687_v11, %v2858_v2  ;;  %v6820_v42 = vadd.f32 %v11689_v25, %v2859_v1  ;;  %v1325_v8 = vsel %vm1310_vm1, %v6692_v29, %v6690_v14  ;;  %v6828_v28 = vmul.f32 %v11631_v4, %v1521_v16  ;;  %v11697_v25 = vld [vmem:[#allocation129_spill] sm:$0xff]  ;;  %v11706_v62 = vld [vmem:[#allocation136_spill] sm:$0xff] }
 0x36f   : > { %11686 = vst [vmem:[#allocation105_spill] sm:$0xff] %v6814_v40  ;;  %v2861_v10 = vmul.f32 %v11626_v15, %v1522_v17  ;;  %v1523_v57 = vsel %vm11015_vm14, %v1322_v30, 0.0  ;;  %v1524_v2 = vsel %vm11013_vm15, %v1323_v47, 0.0  ;;  %v6836_v1 = vmul.f32 %v11631_v4, %v1522_v17  ;;  %v11694_v30 = vld [vmem:[#allocation21_spill] sm:$0xff]  ;;  %v11695_v47 = vld [vmem:[#allocation72_spill] sm:$0xff] }
 0x370   : > { %11688 = vst [vmem:[#allocation106_spill] sm:$0xff] %v6817_v44  ;;  %11690 = vst [vmem:[#allocation107_spill] sm:$0xff] %v6820_v42  ;;  %v1525_v29 = vsel %vm11012_vm0, %v1324_v55, 0.0  ;;  %1594 = vrot.lane.b32.xlu0 %v11693_v33, %s4400_s21  ;;  %1592 = vrot.lane.b32.xlu1 %v11672_v58, %s4400_s21  ;;  %v6846_v16 = vmul.f32 %v11647_v41, %v11693_v33  ;;  %v6850_v11 = vmul.f32 %v11647_v41, %v11694_v30  ;;  %v11699_v55 = vld [vmem:[#allocation131_spill] sm:$0xff] }
 0x371   : > { %11691 = vst [vmem:[#allocation262_spill] sm:$0xff] %v6828_v28  ;;  %11692 = vst [vmem:[#allocation263_spill] sm:$0xff] %v6836_v1  ;;  %v6853_v17 = vadd.f32 %v11695_v47, %v2038_v48  ;;  %v6856_v42 = vadd.f32 %v11697_v25, %v2039_v18  ;;  %v6859_v44 = vadd.f32 %v11699_v55, %v2860_v63  ;;  %v1526_v58 = vsel %vm11014_vm11, %v1325_v8, 0.0  ;;  %v6873_v18 = vpop.permute.xlu0 %1206  ;;  %v1205_v63 = vpop.permute.xlu1 %1204  ;;  %v11701_v8 = vld [vmem:[#allocation132_spill] sm:$0xff]  ;;  %v11704_v1 = vld [vmem:[#allocation135_spill] sm:$0xff] }
 0x372   : > { %v2040_v40 = vmul.f32 %v11619_v50, %v1523_v57  ;;  %v2041_v33 = vmul.f32 %v11619_v50, %v1524_v2  ;;  %v1326_v45 = vsel %vm1310_vm1, %v6690_v14, %v6736_v20  ;;  %v1327_v48 = vsel %vm1310_vm1, %v6736_v20, %v6734_v32 }
 0x373   : > { %11696 = vst [vmem:[#allocation24_spill] sm:$0xff] %v6853_v17  ;;  %11698 = vst [vmem:[#allocation21_spill] sm:$0xff] %v6856_v42  ;;  %vm800_vm0 = vcmp.ge.f32.partialorder %v6116_v60, 0.5  ;;  %vm801_vm15 = vcmp.ge.f32.partialorder %v6128_v56, 0.5  ;;  %v6876_v47 = vadd.f32 %v11701_v8, %v2861_v10  ;;  %v2862_v25 = vmul.f32 %v11626_v15, %v1523_v57  ;;  %v11703_v42 = vld [vmem:[#allocation2_spill] sm:$0xff] }
 0x374   : > { %11700 = vst [vmem:[#allocation72_spill] sm:$0xff] %v6859_v44  ;;  %v2863_v55 = vmul.f32 %v11626_v15, %v1524_v2  ;;  %v2042_v14 = vmul.f32 %v11619_v50, %v1525_v29  ;;  %v2043_v44 = vmul.f32 %v11619_v50, %v1526_v58  ;;  %v2864_v20 = vmul.f32 %v11626_v15, %v1525_v29 }
 0x375   : > { %11702 = vst [vmem:[#allocation129_spill] sm:$0xff] %v6876_v47  ;;  %v2865_v17 = vmul.f32 %v11626_v15, %v1526_v58  ;;  %vm802_vm11 = vcmp.ge.f32.partialorder %v6163_v0, 0.5  ;;  %1598 = vrot.lane.b32.xlu0 %v11703_v42, %s4400_s21  ;;  %1596 = vrot.lane.b32.xlu1 %v11694_v30, %s4400_s21  ;;  %v1527_v10 = vsel %vm796_vm10, %v1326_v45, 0.0  ;;  %v1528_v8 = vsel %vm797_vm13, %v1327_v48, 0.0  ;;  %v6910_v48 = vpop.permute.xlu0 %1210 }
 0x376   : > { %v1328_v47 = vsel %vm1310_vm1, %v6734_v32, %v1197_v5  ;;  %v1329_v27 = vsel %vm1310_vm1, %v1197_v5, %v6777_v21  ;;  %vm803_vm14 = vcmp.ge.f32.partialorder %v6175_v3, 0.5  ;;  %v6899_v28 = vadd.f32 %v11704_v1, %v2040_v40  ;;  %v1209_v32 = vpop.permute.xlu1 %1208  ;;  %v11712_v5 = vld [vmem:[#allocation138_spill] sm:$0xff]  ;;  %v12115_v3 = vld [vmem:[#allocation121_spill] sm:$0xff] }
 0x377   : > { %v6902_v12 = vadd.f32 %v11706_v62, %v2041_v33  ;;  %v6905_v30 = vmul.f32 %v11631_v4, %v1523_v57  ;;  %v6908_v45 = vmul.f32 %v11631_v4, %v1524_v2  ;;  %v6913_v23 = vadd.f32 %v11710_v46, %v2862_v25  ;;  %v11716_v33 = vld [vmem:[#allocation57_spill] sm:$0xff]  ;;  %v11717_v25 = vld [vmem:[#allocation3_spill] sm:$0xff] }
 0x378   : > { %11705 = vst [vmem:[#allocation131_spill] sm:$0xff] %v6899_v28  ;;  %v6916_v41 = vadd.f32 %v11712_v5, %v2863_v55  ;;  %v6919_v40 = vmul.f32 %v11631_v4, %v1525_v29  ;;  %v6922_v62 = vmul.f32 %v11631_v4, %v1526_v58  ;;  %v2044_v57 = vmul.f32 %v11619_v50, %v1527_v10  ;;  %v11718_v29 = vld [vmem:[#allocation140_spill] sm:$0xff]  ;;  %v11720_v58 = vld [vmem:[#allocation141_spill] sm:$0xff]  ;;  %v11724_v28 = vld [vmem:[#allocation143_spill] sm:$0xff] }
 0x379   : > { %11707 = vst [vmem:[#allocation132_spill] sm:$0xff] %v6902_v12  ;;  %11708 = vst [vmem:[#allocation2_spill] sm:$0xff] %v6905_v30  ;;  %v2045_v2 = vmul.f32 %v11619_v50, %v1528_v8  ;;  %v1529_v1 = vsel %vm798_vm12, %v1328_v47, 0.0  ;;  %v1530_v46 = vsel %vm11017_vm9, %v1329_v27, 0.0  ;;  %1602 = vrot.lane.b32.xlu0 %v11716_v33, %s4400_s21  ;;  %1600 = vrot.lane.b32.xlu1 %v11717_v25, %s4400_s21  ;;  %vm804_vm9 = vcmp.ge.f32.partialorder %v6258_v53, 0.5  ;;  %v11762_v30 = vld [vmem:[#allocation84_spill] sm:$0xff] }
 0x37a   : > { %11709 = vst [vmem:[#allocation135_spill] sm:$0xff] %v6908_v45  ;;  %11711 = vst [vmem:[#allocation136_spill] sm:$0xff] %v6913_v23  ;;  %v6935_v55 = vadd.f32 %v11718_v29, %v2042_v14  ;;  %v6938_v5 = vadd.f32 %v11720_v58, %v2043_v44  ;;  %v6944_v47 = vadd.f32 %v11724_v28, %v2865_v17  ;;  %v6952_v29 = vpop.permute.xlu0 %1214  ;;  %v1213_v44 = vpop.permute.xlu1 %1212 }
 0x37b   : > { %11713 = vst [vmem:[#allocation137_spill] sm:$0xff] %v6916_v41  ;;  %11714 = vst [vmem:[#allocation138_spill] sm:$0xff] %v6919_v40  ;;  %v11722_v41 = vld [vmem:[#allocation142_spill] sm:$0xff]  ;;  %v2866_v27 = vmul.f32 %v11626_v15, %v1527_v10  ;;  %v2867_v12 = vmul.f32 %v11626_v15, %v1528_v8  ;;  %v1331_v14 = vsel %vm1310_vm1, %v1201_v38, %v6825_v36 }
 0x37c   : > { %11715 = vst [vmem:[#allocation264_spill] sm:$0xff] %v6922_v62  ;;  %11719 = vst [vmem:[#allocation57_spill] sm:$0xff] %v6935_v55  ;;  %v6941_v23 = vadd.f32 %v11722_v41, %v2864_v20  ;;  %v1330_v62 = vsel %vm1310_vm1, %v6777_v21, %v1201_v38  ;;  %v6955_v58 = vmul.f32 %v11631_v4, %v1527_v10  ;;  %v11730_v10 = vld [vmem:[#allocation65_spill] sm:$0xff] }
 0x37d   : > { %11721 = vst [vmem:[#allocation3_spill] sm:$0xff] %v6938_v5  ;;  %11725 = vst [vmem:[#allocation141_spill] sm:$0xff] %v6944_v47  ;;  %v6958_v41 = vmul.f32 %v11631_v4, %v1528_v8  ;;  %v2046_v28 = vmul.f32 %v11619_v50, %v1529_v1  ;;  %v2047_v17 = vmul.f32 %v11619_v50, %v1530_v46  ;;  %1606 = vrot.lane.b32.xlu0 %v11730_v10, %s4400_s21  ;;  %v11731_v8 = vld [vmem:[#allocation28_spill] sm:$0xff] }
 0x37e   : > { %11723 = vst [vmem:[#allocation140_spill] sm:$0xff] %v6941_v23  ;;  %11726 = vst [vmem:[#allocation142_spill] sm:$0xff] %v6955_v58  ;;  %v6963_v20 = vadd.f32 %v6005_v54, %v2044_v57  ;;  %v6966_v21 = vadd.f32 %v6014_v22, %v2045_v2  ;;  %v1332_v38 = vsel %vm1310_vm1, %v6825_v36, %v1205_v63  ;;  %1604 = vrot.lane.b32.xlu1 %v11731_v8, %s4400_s21  ;;  %v11753_v58 = vld [vmem:[#allocation68_spill] sm:$0xff] }
 0x37f   : > { %11727 = vst [vmem:[#allocation143_spill] sm:$0xff] %v6958_v41  ;;  %v2868_v47 = vmul.f32 %v11626_v15, %v1529_v1  ;;  %v1531_v54 = vsel %vm800_vm0, %v1330_v62, 0.0  ;;  %v1532_v22 = vsel %vm801_vm15, %v1331_v14, 0.0  ;;  %v1333_v57 = vsel %vm1310_vm1, %v1205_v63, %v6873_v18  ;;  %v1217_v62 = vpop.permute.xlu1 %1216  ;;  %v11736_v14 = vld [vmem:[#allocation36_spill] sm:$0xff]  ;;  %v11747_v41 = vld [vmem:[#allocation83_spill] sm:$0xff] }
 0x380   : > { %11728 = vst [vmem:[#allocation265_spill] sm:$0xff] %v6963_v20  ;;  %11729 = vst [vmem:[#allocation266_spill] sm:$0xff] %v6966_v21  ;;  %v6983_v36 = vadd.f32 %v6018_v7, %v2866_v27  ;;  %v6986_v2 = vadd.f32 %v6026_v13, %v2867_v12  ;;  %v6989_v23 = vmul.f32 %v11631_v4, %v1529_v1  ;;  %v6992_v21 = vpop.permute.xlu0 %1218  ;;  %v1533_v13 = vsel %vm802_vm11, %v1332_v38, 0.0  ;;  %v11739_v27 = vld [vmem:[#allocation69_spill] sm:$0xff] }
 0x381   : > { %v2869_v20 = vmul.f32 %v11626_v15, %v1530_v46  ;;  %v6995_v55 = vadd.f32 %v6038_v24, %v2046_v28  ;;  %v6998_v5 = vadd.f32 %v11736_v14, %v2047_v17  ;;  %v7001_v7 = vmul.f32 %v11631_v4, %v1530_v46  ;;  %1610 = vrot.lane.b32.xlu0 %v11739_v27, %s4400_s21  ;;  %v11740_v28 = vld [vmem:[#allocation64_spill] sm:$0xff] }
 0x382   : > { %11732 = vst [vmem:[#allocation65_spill] sm:$0xff] %v6983_v36  ;;  %11733 = vst [vmem:[#allocation28_spill] sm:$0xff] %v6986_v2  ;;  %v2048_v12 = vmul.f32 %v11619_v50, %v1531_v54  ;;  %v2049_v63 = vmul.f32 %v11619_v50, %v1532_v22  ;;  %v1534_v1 = vsel %vm803_vm14, %v1333_v57, 0.0  ;;  %v1459_v24 = vsel %vm1310_vm1, 0.0, %v6910_v48  ;;  %1608 = vrot.lane.b32.xlu1 %v11740_v28, %s4400_s21  ;;  %v11741_v46 = vld [vmem:[#allocation148_spill] sm:$0xff]  ;;  %v11743_v57 = vld [vmem:[#allocation149_spill] sm:$0xff] }
 0x383   : > { %11734 = vst [vmem:[#allocation267_spill] sm:$0xff] %v6989_v23  ;;  %11735 = vst [vmem:[#allocation268_spill] sm:$0xff] %v6995_v55  ;;  %v7016_v17 = vadd.f32 %v11741_v46, %v2868_v47  ;;  %v2870_v38 = vmul.f32 %v11626_v15, %v1531_v54  ;;  %v2871_v14 = vmul.f32 %v11626_v15, %v1532_v22  ;;  %v1221_v46 = vpop.permute.xlu1 %1220  ;;  %v11771_v27 = vld [vmem:[#allocation76_spill] sm:$0xff] }
 0x384   : > { %11737 = vst [vmem:[#allocation36_spill] sm:$0xff] %v6998_v5  ;;  %11738 = vst [vmem:[#allocation269_spill] sm:$0xff] %v7001_v7  ;;  %v1334_v2 = vsel %vm1310_vm1, %v6873_v18, %v1209_v32  ;;  %v7023_v36 = vadd.f32 %v11743_v57, %v2869_v20  ;;  %v7026_v55 = vmul.f32 %v11631_v4, %v1531_v54  ;;  %v1223_v47 = vpop.permute.xlu0 %1222  ;;  %v1536_v18 = vsel %vm780_vm2, %v1459_v24, 0.0  ;;  %v11748_v20 = vld [vmem:[#allocation151_spill] sm:$0xff]  ;;  %v11750_v57 = vld [vmem:[#allocation152_spill] sm:$0xff] }
 0x385   : > { %11742 = vst [vmem:[#allocation64_spill] sm:$0xff] %v7016_v17  ;;  %v7029_v5 = vmul.f32 %v11631_v4, %v1532_v22  ;;  %v2050_v7 = vmul.f32 %v11619_v50, %v1533_v13  ;;  %v2051_v17 = vmul.f32 %v11619_v50, %v1534_v1  ;;  %v2872_v23 = vmul.f32 %v11626_v15, %v1533_v13  ;;  %v11754_v24 = vld [vmem:[#allocation153_spill] sm:$0xff] }
 0x386   : > { %11744 = vst [vmem:[#allocation148_spill] sm:$0xff] %v7023_v36  ;;  %11745 = vst [vmem:[#allocation149_spill] sm:$0xff] %v7026_v55  ;;  %v1335_v32 = vsel %vm1310_vm1, %v6910_v48, %v1213_v44  ;;  %v7039_v54 = vadd.f32 %v11748_v20, %v2048_v12  ;;  %v7042_v22 = vadd.f32 %v11750_v57, %v2049_v63  ;;  %v11752_v55 = vld [vmem:[#allocation73_spill] sm:$0xff]  ;;  %1612 = vrot.lane.b32.xlu1 %v11753_v58, %s4400_s21  ;;  %v11756_v48 = vld [vmem:[#allocation154_spill] sm:$0xff] }
 0x387   : > { %11746 = vst [vmem:[#allocation270_spill] sm:$0xff] %v7029_v5  ;;  %v2873_v36 = vmul.f32 %v11626_v15, %v1534_v1  ;;  %v1535_v5 = vsel %vm804_vm9, %v1334_v2, 0.0  ;;  %1614 = vrot.lane.b32.xlu0 %v11752_v55, %s4400_s21  ;;  %v7052_v40 = vadd.f32 %v11754_v24, %v2870_v38  ;;  %v7055_v12 = vadd.f32 %v11756_v48, %v2871_v14  ;;  %v11760_v57 = vld [vmem:[#allocation38_spill] sm:$0xff]  ;;  %v1225_v14 = vpop.permute.xlu1 %1224  ;;  %v11763_v48 = vld [vmem:[#allocation156_spill] sm:$0xff] }
 0x388   : > { %11749 = vst [vmem:[#allocation151_spill] sm:$0xff] %v7039_v54  ;;  %11751 = vst [vmem:[#allocation152_spill] sm:$0xff] %v7042_v22  ;;  %v7058_v63 = vmul.f32 %v11631_v4, %v1533_v13  ;;  %v7061_v20 = vmul.f32 %v11631_v4, %v1534_v1  ;;  %v2053_v2 = vmul.f32 %v11760_v57, %v1536_v18  ;;  %v11761_v54 = vld [vmem:[#allocation22_spill] sm:$0xff]  ;;  %v1537_v38 = vsel %vm781_vm3, %v1335_v32, 0.0  ;;  %v7069_v24 = vpop.permute.xlu0 %1226  ;;  %v11765_v13 = vld [vmem:[#allocation157_spill] sm:$0xff] }
 0x389   : > { %11755 = vst [vmem:[#allocation153_spill] sm:$0xff] %v7052_v40  ;;  %11757 = vst [vmem:[#allocation154_spill] sm:$0xff] %v7055_v12  ;;  %v2875_v22 = vmul.f32 %v11761_v54, %v1536_v18  ;;  %v1336_v45 = vsel %vm1310_vm1, %v1213_v44, %v6952_v29  ;;  %v7072_v12 = vadd.f32 %v11763_v48, %v2050_v7  ;;  %v11767_v1 = vld [vmem:[#allocation158_spill] sm:$0xff]  ;;  %v11769_v55 = vld [vmem:[#allocation160_spill] sm:$0xff] }
 0x38a   : > { %11758 = vst [vmem:[#allocation271_spill] sm:$0xff] %v7058_v63  ;;  %11759 = vst [vmem:[#allocation272_spill] sm:$0xff] %v7061_v20  ;;  %v7075_v40 = vadd.f32 %v11765_v13, %v2051_v17  ;;  %v7078_v20 = vadd.f32 %v11767_v1, %v2872_v23  ;;  %v2052_v63 = vmul.f32 %v11619_v50, %v1535_v5  ;;  %v11772_v7 = vld [vmem:[#allocation32_spill] sm:$0xff]  ;;  %v11773_v17 = vld [vmem:[#allocation93_spill] sm:$0xff]  ;;  %v1538_v23 = vsel %vm782_vm4, %v1336_v45, 0.0 }
 0x38b   : > { %11764 = vst [vmem:[#allocation38_spill] sm:$0xff] %v7072_v12  ;;  %v7082_v58 = vadd.f32 %v11769_v55, %v2873_v36  ;;  %v2874_v44 = vmul.f32 %v11626_v15, %v1535_v5  ;;  %v1337_v32 = vsel %vm1310_vm1, %v6952_v29, %v1217_v62  ;;  %1618 = vrot.lane.b32.xlu0 %v11771_v27, %s4400_s21  ;;  %v11774_v15 = vld [vmem:[#allocation40_spill] sm:$0xff]  ;;  %v11778_v1 = vld [vmem:[#allocation10_spill] sm:$0xff]  ;;  %v1229_v12 = vpop.permute.xlu1 %1228 }
 0x38c   : > { %11766 = vst [vmem:[#allocation22_spill] sm:$0xff] %v7075_v40  ;;  %11768 = vst [vmem:[#allocation156_spill] sm:$0xff] %v7078_v20  ;;  %1616 = vrot.lane.b32.xlu1 %v11772_v7, %s4400_s21  ;;  %v2054_v48 = vmul.f32 %v11760_v57, %v1537_v38  ;;  %v2876_v50 = vmul.f32 %v11761_v54, %v1537_v38  ;;  %v1338_v55 = vsel %vm1310_vm1, %v1217_v62, %v6992_v21  ;;  %v11776_v29 = vld [vmem:[#allocation44_spill] sm:$0xff]  ;;  %v1231_v45 = vpop.permute.xlu0 %1230  ;;  %v11781_v40 = vld [vmem:[#allocation162_spill] sm:$0xff] }
 0x38d   : > { %11770 = vst [vmem:[#allocation157_spill] sm:$0xff] %v7082_v58  ;;  %v7098_v36 = vadd.f32 %v11774_v15, %v2053_v2  ;;  %v7101_v13 = vmul.f32 %v11776_v29, %v1536_v18  ;;  %v7104_v58 = vadd.f32 %v11778_v1, %v2875_v22  ;;  %v7107_v20 = vmul.f32 %v11631_v4, %v1535_v5  ;;  %v11783_v7 = vld [vmem:[#allocation96_spill] sm:$0xff] }
 0x38e   : > { %v7110_v27 = vadd.f32 %v11781_v40, %v2052_v63  ;;  %v1539_v62 = vsel %vm783_vm5, %v1337_v32, 0.0  ;;  %v1339_v2 = vsel %vm1310_vm1, %v6992_v21, %v1221_v46  ;;  %v1340_v18 = vsel %vm1310_vm1, %v1221_v46, %v1223_v47  ;;  %v11784_v15 = vld [vmem:[#allocation164_spill] sm:$0xff]  ;;  %v11787_v40 = vld [vmem:[#allocation78_spill] sm:$0xff]  ;;  %v11788_v63 = vld [vmem:[#allocation75_spill] sm:$0xff] }
 0x38f   : > { %11775 = vst [vmem:[#allocation158_spill] sm:$0xff] %v7098_v36  ;;  %11777 = vst [vmem:[#allocation160_spill] sm:$0xff] %v7101_v13  ;;  %v7118_v36 = vadd.f32 %v11784_v15, %v2874_v44  ;;  %v2055_v22 = vmul.f32 %v11760_v57, %v1538_v23  ;;  %v2877_v4 = vmul.f32 %v11761_v54, %v1538_v23  ;;  %v11786_v5 = vld [vmem:[#allocation104_spill] sm:$0xff]  ;;  %v1540_v1 = vsel %vm784_vm6, %v1338_v55, 0.0  ;;  %v11789_v32 = vld [vmem:[#allocation165_spill] sm:$0xff] }
 0x390   : > { %11779 = vst [vmem:[#allocation40_spill] sm:$0xff] %v7104_v58  ;;  %11780 = vst [vmem:[#allocation44_spill] sm:$0xff] %v7107_v20  ;;  %1622 = vrot.lane.b32.xlu0 %v11787_v40, %s4400_s21  ;;  %1620 = vrot.lane.b32.xlu1 %v11788_v63, %s4400_s21  ;;  %v7129_v21 = vadd.f32 %v11789_v32, %v2054_v48  ;;  %v7132_v46 = vmul.f32 %v11776_v29, %v1537_v38  ;;  %v11793_v15 = vld [vmem:[#allocation167_spill] sm:$0xff]  ;;  %v1541_v58 = vsel %vm11019_vm7, %v1339_v2, 0.0  ;;  %v1235_v32 = vpop.permute.xlu0 %1234  ;;  %v11798_v2 = vld [vmem:[#allocation168_spill] sm:$0xff] }
 0x391   : > { %11782 = vst [vmem:[#allocation10_spill] sm:$0xff] %v7110_v27  ;;  %11785 = vst [vmem:[#allocation162_spill] sm:$0xff] %v7118_v36  ;;  %v7135_v44 = vmul.f32 %v11776_v29, %v1538_v23  ;;  %v7138_v36 = vadd.f32 %v11793_v15, %v2876_v50  ;;  %v2056_v55 = vmul.f32 %v11760_v57, %v1539_v62  ;;  %v11795_v27 = vld [vmem:[#allocation16_spill] sm:$0xff]  ;;  %v1542_v20 = vsel %vm11018_vm8, %v1340_v18, 0.0  ;;  %v11796_v15 = vld [vmem:[#allocation166_spill] sm:$0xff] }
 0x392   : > { %11790 = vst [vmem:[#allocation164_spill] sm:$0xff] %v7129_v21  ;;  %11791 = vst [vmem:[#allocation165_spill] sm:$0xff] %v7132_v46  ;;  %v1341_v48 = vsel %vm1310_vm1, %v1223_v47, %v1225_v14  ;;  %v1233_v21 = vpop.permute.xlu1 %1232  ;;  %v2057_v38 = vmul.f32 %v11760_v57, %v1540_v1  ;;  %v2878_v23 = vmul.f32 %v11761_v54, %v1539_v62  ;;  %v11801_v47 = vld [vmem:[#allocation80_spill] sm:$0xff]  ;;  %v11802_v13 = vld [vmem:[#allocation77_spill] sm:$0xff]  ;;  %vm11804_vm8 = vcmp.ge.f32.partialorder %v11620_v34, 0.5 }
 0x393   : > { %11792 = vst [vmem:[#allocation273_spill] sm:$0xff] %v7135_v44  ;;  %11794 = vst [vmem:[#allocation167_spill] sm:$0xff] %v7138_v36  ;;  %v2879_v44 = vmul.f32 %v11761_v54, %v1540_v1  ;;  %v1342_v50 = vsel %vm1310_vm1, %v1225_v14, %v7069_v24  ;;  %v7152_v36 = vadd.f32 %v11796_v15, %v2055_v22  ;;  %v11805_v15 = vld [vmem:[#allocation169_spill] sm:$0xff]  ;;  %vm11807_vm7 = vcmp.ge.f32.partialorder %v11632_v51, 0.5  ;;  %v11812_v34 = vld [vmem:[#allocation175_spill] sm:$0xff] }
 0x394   : > { %v7155_v46 = vadd.f32 %v11798_v2, %v2877_v4  ;;  %v7158_v18 = vmul.f32 %v11776_v29, %v1539_v62  ;;  %1626 = vrot.lane.b32.xlu0 %v11801_v47, %s4400_s21  ;;  %1624 = vrot.lane.b32.xlu1 %v11802_v13, %s4400_s21  ;;  %v7165_v40 = vmul.f32 %v11776_v29, %v1540_v1  ;;  %v1543_v4 = vsel %vm11804_vm8, %v1341_v48, 0.0  ;;  %v11810_v13 = vld [vmem:[#allocation173_spill] sm:$0xff]  ;;  %v11815_v51 = vld [vmem:[#allocation82_spill] sm:$0xff] }
 0x395   : > { %11797 = vst [vmem:[#allocation166_spill] sm:$0xff] %v7152_v36  ;;  %v2058_v14 = vmul.f32 %v11760_v57, %v1541_v58  ;;  %v2059_v22 = vmul.f32 %v11760_v57, %v1542_v20  ;;  %v7172_v2 = vadd.f32 %v11805_v15, %v2056_v55  ;;  %v2880_v62 = vmul.f32 %v11761_v54, %v1541_v58 }
 0x396   : > { %11799 = vst [vmem:[#allocation168_spill] sm:$0xff] %v7155_v46  ;;  %11800 = vst [vmem:[#allocation274_spill] sm:$0xff] %v7158_v18  ;;  %v2881_v46 = vmul.f32 %v11761_v54, %v1542_v20  ;;  %v1544_v36 = vsel %vm11807_vm7, %v1342_v50, 0.0  ;;  %v1239_v18 = vpop.permute.xlu0 %1238  ;;  %v1237_v1 = vpop.permute.xlu1 %1236  ;;  %v7182_v63 = vadd.f32 %v11810_v13, %v2878_v23  ;;  %v7185_v48 = vadd.f32 %v11812_v34, %v2879_v44  ;;  %v11817_v13 = vld [vmem:[#allocation176_spill] sm:$0xff]  ;;  %v11819_v34 = vld [vmem:[#allocation177_spill] sm:$0xff] }
 0x397   : > { %11803 = vst [vmem:[#allocation275_spill] sm:$0xff] %v7165_v40  ;;  %11806 = vst [vmem:[#allocation169_spill] sm:$0xff] %v7172_v2  ;;  %v11808_v40 = vld [vmem:[#allocation172_spill] sm:$0xff]  ;;  %v7188_v55 = vmul.f32 %v11776_v29, %v1541_v58  ;;  %v2060_v15 = vmul.f32 %v11760_v57, %v1543_v4  ;;  %v1343_v2 = vsel %vm1310_vm1, %v7069_v24, %v1229_v12  ;;  %v11822_v24 = vld [vmem:[#allocation178_spill] sm:$0xff]  ;;  %vm11826_vm7 = vcmp.ge.f32.partialorder %v11640_v59, 0.5 }
 0x398   : > { %v7179_v47 = vadd.f32 %v11808_v40, %v2057_v38  ;;  %11811 = vst [vmem:[#allocation173_spill] sm:$0xff] %v7182_v63  ;;  %11813 = vst [vmem:[#allocation175_spill] sm:$0xff] %v7185_v48  ;;  %v1344_v50 = vsel %vm1310_vm1, %v1229_v12, %v1231_v45  ;;  %1630 = vrot.lane.b32.xlu0 %v11815_v51, %s4400_s21  ;;  %v11816_v40 = vld [vmem:[#allocation79_spill] sm:$0xff]  ;;  %v7199_v38 = vadd.f32 %v11817_v13, %v2058_v14 }
 0x399   : > { %11814 = vst [vmem:[#allocation276_spill] sm:$0xff] %v7188_v55  ;;  %1628 = vrot.lane.b32.xlu1 %v11816_v40, %s4400_s21  ;;  %v7202_v44 = vadd.f32 %v11819_v34, %v2059_v22  ;;  %v7205_v58 = vmul.f32 %v11776_v29, %v1542_v20  ;;  %v2061_v23 = vmul.f32 %v11760_v57, %v1544_v36  ;;  %v11824_v12 = vld [vmem:[#allocation179_spill] sm:$0xff]  ;;  %v1545_v20 = vsel %vm11826_vm7, %v1343_v2, 0.0  ;;  %v11854_v40 = vld [vmem:[#allocation188_spill] sm:$0xff] }
 0x39a   : > { %11809 = vst [vmem:[#allocation172_spill] sm:$0xff] %v7179_v47  ;;  %11818 = vst [vmem:[#allocation176_spill] sm:$0xff] %v7199_v38  ;;  %v7209_v48 = vadd.f32 %v11822_v24, %v2880_v62  ;;  %v7212_v63 = vadd.f32 %v11824_v12, %v2881_v46  ;;  %v1345_v47 = vsel %vm1310_vm1, %v1231_v45, %v1233_v21  ;;  %v1243_v14 = vpop.permute.xlu0 %1242  ;;  %v1241_v13 = vpop.permute.xlu1 %1240  ;;  %vm11827_vm8 = vcmp.ge.f32.partialorder %v11645_v49, 0.5  ;;  %v11828_v24 = vld [vmem:[#allocation180_spill] sm:$0xff]  ;;  %v11833_v12 = vld [vmem:[#allocation81_spill] sm:$0xff] }
 0x39b   : > { %11820 = vst [vmem:[#allocation177_spill] sm:$0xff] %v7202_v44  ;;  %11821 = vst [vmem:[#allocation277_spill] sm:$0xff] %v7205_v58  ;;  %v1346_v55 = vsel %vm1310_vm1, %v1233_v21, %v1235_v32  ;;  %v2882_v22 = vmul.f32 %v11761_v54, %v1543_v4  ;;  %v2883_v34 = vmul.f32 %v11761_v54, %v1544_v36  ;;  %v1546_v62 = vsel %vm11827_vm8, %v1344_v50, 0.0  ;;  %v11832_v21 = vld [vmem:[#allocation87_spill] sm:$0xff] }
 0x39c   : > { %11823 = vst [vmem:[#allocation178_spill] sm:$0xff] %v7209_v48  ;;  %11825 = vst [vmem:[#allocation179_spill] sm:$0xff] %v7212_v63  ;;  %v7223_v48 = vadd.f32 %v11828_v24, %v2060_v15  ;;  %v7226_v46 = vmul.f32 %v11776_v29, %v1543_v4  ;;  %v7229_v45 = vmul.f32 %v11776_v29, %v1544_v36  ;;  %1634 = vrot.lane.b32.xlu0 %v11832_v21, %s4400_s21  ;;  %v11834_v63 = vld [vmem:[#allocation181_spill] sm:$0xff] }
 0x39d   : > { %1632 = vrot.lane.b32.xlu1 %v11833_v12, %s4400_s21  ;;  %v7236_v2 = vadd.f32 %v11834_v63, %v2061_v23  ;;  %vm11836_vm7 = vcmp.ge.f32.partialorder %v11651_v61, 0.5  ;;  %vm11837_vm8 = vcmp.ge.f32.partialorder %v5993_v9, 0.5  ;;  %v1347_v4 = vsel %vm1310_vm1, %v1235_v32, %v1237_v1  ;;  %v11838_v63 = vld [vmem:[#allocation182_spill] sm:$0xff] }
 0x39e   : > { %11829 = vst [vmem:[#allocation180_spill] sm:$0xff] %v7223_v48  ;;  %11830 = vst [vmem:[#allocation278_spill] sm:$0xff] %v7226_v46  ;;  %v1547_v50 = vsel %vm11836_vm7, %v1345_v47, 0.0  ;;  %v1548_v15 = vsel %vm11837_vm8, %v1346_v55, 0.0  ;;  %v2062_v36 = vmul.f32 %v11760_v57, %v1545_v20  ;;  %v2063_v24 = vmul.f32 %v11760_v57, %v1546_v62  ;;  %v1247_v38 = vpop.permute.xlu0 %1246  ;;  %v1245_v44 = vpop.permute.xlu1 %1244 }
 0x39f   : > { %11831 = vst [vmem:[#allocation279_spill] sm:$0xff] %v7229_v45  ;;  %11835 = vst [vmem:[#allocation181_spill] sm:$0xff] %v7236_v2  ;;  %v2884_v48 = vmul.f32 %v11761_v54, %v1545_v20  ;;  %v1348_v45 = vsel %vm1310_vm1, %v1237_v1, %v1239_v18  ;;  %v7248_v23 = vadd.f32 %v11838_v63, %v2882_v22  ;;  %v11840_v2 = vld [vmem:[#allocation183_spill] sm:$0xff]  ;;  %vm11844_vm7 = vcmp.ge.f32.partialorder %v6001_v43, 0.5 }
 0x3a0   : > { %v7251_v47 = vadd.f32 %v11840_v2, %v2883_v34  ;;  %v7254_v55 = vmul.f32 %v11776_v29, %v1545_v20  ;;  %v2885_v32 = vmul.f32 %v11761_v54, %v1546_v62  ;;  %v7258_v46 = vmul.f32 %v11776_v29, %v1546_v62  ;;  %v11845_v22 = vld [vmem:[#allocation27_spill] sm:$0xff]  ;;  %v11846_v34 = vld [vmem:[#allocation108_spill] sm:$0xff] }
 0x3a1   : > { %11839 = vst [vmem:[#allocation182_spill] sm:$0xff] %v7248_v23  ;;  %v2064_v58 = vmul.f32 %v11760_v57, %v1547_v50  ;;  %v2065_v1 = vmul.f32 %v11760_v57, %v1548_v15  ;;  %v1549_v21 = vsel %vm11844_vm7, %v1347_v4, 0.0  ;;  %1638 = vrot.lane.b32.xlu0 %v11845_v22, %s4400_s21  ;;  %1636 = vrot.lane.b32.xlu1 %v11846_v34, %s4400_s21  ;;  %vm11847_vm8 = vcmp.ge.f32.partialorder %v6010_v26, 0.5 }
 0x3a2   : > { %11841 = vst [vmem:[#allocation183_spill] sm:$0xff] %v7251_v47  ;;  %11842 = vst [vmem:[#allocation280_spill] sm:$0xff] %v7254_v55  ;;  %v2886_v20 = vmul.f32 %v11761_v54, %v1547_v50  ;;  %v2887_v2 = vmul.f32 %v11761_v54, %v1548_v15  ;;  %v1550_v62 = vsel %vm11847_vm8, %v1348_v45, 0.0  ;;  %v1349_v63 = vsel %vm1310_vm1, %v1239_v18, %v1241_v13  ;;  %v11848_v47 = vld [vmem:[#allocation184_spill] sm:$0xff]  ;;  %v11852_v55 = vld [vmem:[#allocation187_spill] sm:$0xff]  ;;  %v1251_v12 = vpop.permute.xlu0 %1250  ;;  %v1249_v51 = vpop.permute.xlu1 %1248 }
 0x3a3   : > { %11843 = vst [vmem:[#allocation281_spill] sm:$0xff] %v7258_v46  ;;  %v7274_v23 = vadd.f32 %v11848_v47, %v2062_v36  ;;  %v11850_v46 = vld [vmem:[#allocation186_spill] sm:$0xff]  ;;  %v7280_v22 = vadd.f32 %v11852_v55, %v2884_v48  ;;  %v1350_v34 = vsel %vm1310_vm1, %v1241_v13, %v1243_v14  ;;  %v7284_v43 = vadd.f32 %v11854_v40, %v2885_v32  ;;  %v11865_v32 = vld [vmem:[#allocation191_spill] sm:$0xff] }
 0x3a4   : > { %v7277_v4 = vadd.f32 %v11850_v46, %v2063_v24  ;;  %v7287_v45 = vmul.f32 %v11776_v29, %v1547_v50  ;;  %v7290_v18 = vmul.f32 %v11776_v29, %v1548_v15  ;;  %v2066_v36 = vmul.f32 %v11760_v57, %v1549_v21  ;;  %v11858_v46 = vld [vmem:[#allocation189_spill] sm:$0xff]  ;;  %v11861_v40 = vld [vmem:[#allocation30_spill] sm:$0xff] }
 0x3a5   : > { %11849 = vst [vmem:[#allocation184_spill] sm:$0xff] %v7274_v23  ;;  %11853 = vst [vmem:[#allocation187_spill] sm:$0xff] %v7280_v22  ;;  %v7294_v24 = vadd.f32 %v11858_v46, %v2064_v58  ;;  %v2067_v48 = vmul.f32 %v11760_v57, %v1550_v62  ;;  %v2888_v13 = vmul.f32 %v11761_v54, %v1549_v21  ;;  %vm11860_vm7 = vcmp.ge.f32.partialorder %v6030_v37, 0.5  ;;  %v11862_v50 = vld [vmem:[#allocation18_spill] sm:$0xff]  ;;  %v11867_v58 = vld [vmem:[#allocation192_spill] sm:$0xff] }
 0x3a6   : > { %11851 = vst [vmem:[#allocation186_spill] sm:$0xff] %v7277_v4  ;;  %11855 = vst [vmem:[#allocation188_spill] sm:$0xff] %v7284_v43  ;;  %v1551_v47 = vsel %vm11860_vm7, %v1349_v63, 0.0  ;;  %1642 = vrot.lane.b32.xlu0 %v11861_v40, %s4400_s21  ;;  %1640 = vrot.lane.b32.xlu1 %v11862_v50, %s4400_s21  ;;  %v11863_v15 = vld [vmem:[#allocation190_spill] sm:$0xff]  ;;  %v7308_v43 = vadd.f32 %v11865_v32, %v2886_v20  ;;  %v7311_v46 = vadd.f32 %v11867_v58, %v2887_v2  ;;  %v11875_v58 = vld [vmem:[#allocation195_spill] sm:$0xff] }
 0x3a7   : > { %11856 = vst [vmem:[#allocation282_spill] sm:$0xff] %v7287_v45  ;;  %11857 = vst [vmem:[#allocation283_spill] sm:$0xff] %v7290_v18  ;;  %v7305_v55 = vadd.f32 %v11863_v15, %v2065_v1  ;;  %v1552_v22 = vsel %vm796_vm10, %v1350_v34, 0.0  ;;  %v7316_v63 = vmul.f32 %v11776_v29, %v1549_v21  ;;  %v2889_v18 = vmul.f32 %v11761_v54, %v1550_v62  ;;  %v1255_v1 = vpop.permute.xlu0 %1254  ;;  %v1253_v15 = vpop.permute.xlu1 %1252  ;;  %v11873_v34 = vld [vmem:[#allocation91_spill] sm:$0xff] }
 0x3a8   : > { %11859 = vst [vmem:[#allocation189_spill] sm:$0xff] %v7294_v24  ;;  %11866 = vst [vmem:[#allocation18_spill] sm:$0xff] %v7308_v43  ;;  %v1351_v45 = vsel %vm1310_vm1, %v1243_v14, %v1245_v44  ;;  %v1352_v24 = vsel %vm1310_vm1, %v1245_v44, %v1247_v38  ;;  %v7325_v2 = vmul.f32 %v11776_v29, %v1550_v62  ;;  %v11877_v14 = vld [vmem:[#allocation196_spill] sm:$0xff]  ;;  %v11880_v62 = vld [vmem:[#allocation29_spill] sm:$0xff]  ;;  %vm11897_vm8 = vcmp.ge.f32.partialorder %v6104_v31, 0.5 }
 0x3a9   : > { %11864 = vst [vmem:[#allocation30_spill] sm:$0xff] %v7305_v55  ;;  %11868 = vst [vmem:[#allocation190_spill] sm:$0xff] %v7311_v46  ;;  %v11870_v55 = vld [vmem:[#allocation194_spill] sm:$0xff]  ;;  %v2068_v32 = vmul.f32 %v11760_v57, %v1551_v47  ;;  %v7330_v21 = vadd.f32 %v6846_v16, %v11873_v34  ;;  %v7333_v46 = vadd.f32 %v11875_v58, %v2067_v48  ;;  %v1553_v16 = vsel %vm797_vm13, %v1351_v45, 0.0 }
 0x3aa   : > { %11869 = vst [vmem:[#allocation191_spill] sm:$0xff] %v7316_v63  ;;  %v7322_v20 = vadd.f32 %v11870_v55, %v2066_v36  ;;  %11872 = vst [vmem:[#allocation194_spill] sm:$0xff] %v7325_v2  ;;  %v7336_v43 = vadd.f32 %v11877_v14, %v2888_v13  ;;  %v2069_v44 = vmul.f32 %v11760_v57, %v1552_v22  ;;  %v11879_v36 = vld [vmem:[#allocation110_spill] sm:$0xff]  ;;  %1644 = vrot.lane.b32.xlu1 %v11880_v62, %s4400_s21  ;;  %v11881_v13 = vld [vmem:[#allocation197_spill] sm:$0xff] }
 0x3ab   : > { %11874 = vst [vmem:[#allocation91_spill] sm:$0xff] %v7330_v21  ;;  %11876 = vst [vmem:[#allocation195_spill] sm:$0xff] %v7333_v46  ;;  %1646 = vrot.lane.b32.xlu0 %v11879_v36, %s4400_s21  ;;  %v2890_v55 = vmul.f32 %v11761_v54, %v1551_v47  ;;  %v2891_v2 = vmul.f32 %v11761_v54, %v1552_v22  ;;  %v1554_v48 = vsel %vm798_vm12, %v1352_v24, 0.0  ;;  %v1259_v63 = vpop.permute.xlu0 %1258  ;;  %v11885_v46 = vld [vmem:[#allocation198_spill] sm:$0xff]  ;;  %vm12021_vm7 = vcmp.ge.f32.partialorder %v11645_v49, 0.5 }
 0x3ac   : > { %11871 = vst [vmem:[#allocation192_spill] sm:$0xff] %v7322_v20  ;;  %11878 = vst [vmem:[#allocation196_spill] sm:$0xff] %v7336_v43  ;;  %v7350_v34 = vadd.f32 %v11881_v13, %v2889_v18  ;;  %v7353_v58 = vmul.f32 %v11776_v29, %v1551_v47  ;;  %v7356_v14 = vmul.f32 %v11776_v29, %v1552_v22  ;;  %v1257_v20 = vpop.permute.xlu1 %1256  ;;  %v11888_v18 = vld [vmem:[#allocation51_spill] sm:$0xff]  ;;  %v11912_v21 = vld [vmem:[#allocation258_spill] sm:$0xff] }
 0x3ad   : > { %v1353_v43 = vsel %vm1310_vm1, %v1247_v38, %v1249_v51  ;;  %v7360_v23 = vadd.f32 %v11885_v46, %v2068_v32  ;;  %v1354_v45 = vsel %vm1310_vm1, %v1249_v51, %v1251_v12  ;;  %v7365_v24 = vadd.f32 %v6850_v11, %v6695_v35  ;;  %v11889_v13 = vld [vmem:[#allocation199_spill] sm:$0xff]  ;;  %v11892_v46 = vld [vmem:[#allocation109_spill] sm:$0xff]  ;;  %v11893_v51 = vld [vmem:[#allocation200_spill] sm:$0xff] }
 0x3ae   : > { %11882 = vst [vmem:[#allocation110_spill] sm:$0xff] %v7350_v34  ;;  %11883 = vst [vmem:[#allocation29_spill] sm:$0xff] %v7353_v58  ;;  %v2532_v47 = vmul.f32 %v11888_v18, %v11703_v42  ;;  %v7370_v34 = vadd.f32 %v11889_v13, %v2069_v44  ;;  %v2070_v22 = vmul.f32 %v11760_v57, %v1553_v16  ;;  %1648 = vrot.lane.b32.xlu1 %v11892_v46, %s4400_s21  ;;  %v11895_v35 = vld [vmem:[#allocation201_spill] sm:$0xff] }
 0x3af   : > { %11884 = vst [vmem:[#allocation197_spill] sm:$0xff] %v7356_v14  ;;  %11886 = vst [vmem:[#allocation198_spill] sm:$0xff] %v7360_v23  ;;  %v2071_v38 = vmul.f32 %v11760_v57, %v1554_v48  ;;  %v11891_v14 = vld [vmem:[#allocation112_spill] sm:$0xff]  ;;  %v7379_v32 = vadd.f32 %v11893_v51, %v2890_v55  ;;  %v7382_v11 = vadd.f32 %v11895_v35, %v2891_v2  ;;  %v1555_v44 = vsel %vm11897_vm8, %v1353_v43, 0.0  ;;  %v7394_v55 = vpop.permute.xlu0 %1262 }
 0x3b0   : > { %11887 = vst [vmem:[#allocation284_spill] sm:$0xff] %v7365_v24  ;;  %11890 = vst [vmem:[#allocation51_spill] sm:$0xff] %v7370_v34  ;;  %1650 = vrot.lane.b32.xlu0 %v11891_v14, %s4400_s21  ;;  %v2892_v42 = vmul.f32 %v11761_v54, %v1553_v16  ;;  %v7388_v13 = vmul.f32 %v11776_v29, %v1553_v16  ;;  %v2893_v58 = vmul.f32 %v11761_v54, %v1554_v48  ;;  %v1261_v51 = vpop.permute.xlu1 %1260 }
 0x3b1   : > { %11894 = vst [vmem:[#allocation199_spill] sm:$0xff] %v7379_v32  ;;  %11896 = vst [vmem:[#allocation109_spill] sm:$0xff] %v7382_v11  ;;  %v1556_v23 = vsel %vm800_vm0, %v1354_v45, 0.0  ;;  %v1355_v34 = vsel %vm1310_vm1, %v1251_v12, %v1253_v15  ;;  %v7397_v2 = vmul.f32 %v11776_v29, %v1554_v48  ;;  %v1356_v35 = vsel %vm1310_vm1, %v1253_v15, %v1255_v1  ;;  %v11900_v11 = vld [vmem:[#allocation202_spill] sm:$0xff]  ;;  %v11902_v45 = vld [vmem:[#allocation203_spill] sm:$0xff] }
 0x3b2   : > { %11898 = vst [vmem:[#allocation200_spill] sm:$0xff] %v7388_v13  ;;  %v2533_v43 = vmul.f32 %v11888_v18, %v11717_v25  ;;  %v7404_v16 = vmul.f32 %v11888_v18, %v11716_v33  ;;  %v7407_v32 = vadd.f32 %v11900_v11, %v2070_v22  ;;  %v7410_v12 = vadd.f32 %v11902_v45, %v2071_v38  ;;  %v11904_v48 = vld [vmem:[#allocation35_spill] sm:$0xff]  ;;  %v11908_v38 = vld [vmem:[#allocation205_spill] sm:$0xff] }
 0x3b3   : > { %11899 = vst [vmem:[#allocation201_spill] sm:$0xff] %v7397_v2  ;;  %v2072_v13 = vmul.f32 %v11760_v57, %v1555_v44  ;;  %v11905_v15 = vld [vmem:[#allocation111_spill] sm:$0xff]  ;;  %v11906_v2 = vld [vmem:[#allocation204_spill] sm:$0xff]  ;;  %v2073_v33 = vmul.f32 %v11760_v57, %v1556_v23  ;;  %v2894_v4 = vmul.f32 %v11761_v54, %v1555_v44  ;;  %v1557_v22 = vsel %vm801_vm15, %v1355_v34, 0.0 }
 0x3b4   : > { %11901 = vst [vmem:[#allocation202_spill] sm:$0xff] %v7407_v32  ;;  %11903 = vst [vmem:[#allocation203_spill] sm:$0xff] %v7410_v12  ;;  %1654 = vrot.lane.b32.xlu0 %v11904_v48, %s4400_s21  ;;  %1652 = vrot.lane.b32.xlu1 %v11905_v15, %s4400_s21  ;;  %v7418_v25 = vadd.f32 %v11906_v2, %v2892_v42  ;;  %v7425_v11 = vadd.f32 %v11908_v38, %v2893_v58  ;;  %v1558_v12 = vsel %vm802_vm11, %v1356_v35, 0.0  ;;  %v1267_v42 = vpop.permute.xlu0 %1266  ;;  %v1265_v2 = vpop.permute.xlu1 %1264  ;;  %v11914_v38 = vld [vmem:[#allocation206_spill] sm:$0xff]  ;;  %v11917_v35 = vld [vmem:[#allocation113_spill] sm:$0xff] }
 0x3b5   : > { %v7428_v45 = vmul.f32 %v11776_v29, %v1555_v44  ;;  %v2895_v32 = vmul.f32 %v11761_v54, %v1556_v23  ;;  %v1357_v24 = vsel %vm1310_vm1, %v1255_v1, %v1257_v20  ;;  %v1358_v34 = vsel %vm1310_vm1, %v1257_v20, %v1259_v63  ;;  %v11920_v1 = vld [vmem:[#allocation207_spill] sm:$0xff]  ;;  %v11922_v63 = vld [vmem:[#allocation208_spill] sm:$0xff] }
 0x3b6   : > { %11907 = vst [vmem:[#allocation204_spill] sm:$0xff] %v7418_v25  ;;  %11909 = vst [vmem:[#allocation205_spill] sm:$0xff] %v7425_v11  ;;  %v7434_v25 = vmul.f32 %v11776_v29, %v1556_v23  ;;  %v7439_v58 = vadd.f32 %v2532_v47, %v11912_v21  ;;  %v7442_v44 = vadd.f32 %v11914_v38, %v2072_v13  ;;  %v11918_v23 = vld [vmem:[#allocation259_spill] sm:$0xff]  ;;  %v11924_v13 = vld [vmem:[#allocation209_spill] sm:$0xff]  ;;  %vm12023_vm8 = vcmp.ge.f32.partialorder %v11651_v61, 0.5 }
 0x3b7   : > { %11910 = vst [vmem:[#allocation285_spill] sm:$0xff] %v7428_v45  ;;  %v2074_v11 = vmul.f32 %v11760_v57, %v1557_v22  ;;  %v11916_v45 = vld [vmem:[#allocation115_spill] sm:$0xff]  ;;  %v7453_v48 = vadd.f32 %v11920_v1, %v2073_v33  ;;  %v7456_v20 = vadd.f32 %v11922_v63, %v2894_v4  ;;  %v2075_v21 = vmul.f32 %v11760_v57, %v1558_v12 }
 0x3b8   : > { %11911 = vst [vmem:[#allocation286_spill] sm:$0xff] %v7434_v25  ;;  %11913 = vst [vmem:[#allocation258_spill] sm:$0xff] %v7439_v58  ;;  %1658 = vrot.lane.b32.xlu0 %v11916_v45, %s4400_s21  ;;  %1656 = vrot.lane.b32.xlu1 %v11917_v35, %s4400_s21  ;;  %v7450_v25 = vadd.f32 %v2533_v43, %v11918_v23  ;;  %v2896_v47 = vmul.f32 %v11761_v54, %v1557_v22  ;;  %v1559_v43 = vsel %vm803_vm14, %v1357_v24, 0.0  ;;  %v7470_v23 = vpop.permute.xlu0 %1270  ;;  %v1269_v4 = vpop.permute.xlu1 %1268  ;;  %v11930_v24 = vld [vmem:[#allocation5_spill] sm:$0xff]  ;;  %v11981_v35 = vld [vmem:[#allocation223_spill] sm:$0xff] }
 0x3b9   : > { %11915 = vst [vmem:[#allocation206_spill] sm:$0xff] %v7442_v44  ;;  %11921 = vst [vmem:[#allocation207_spill] sm:$0xff] %v7453_v48  ;;  %v7461_v38 = vadd.f32 %v11924_v13, %v2895_v32  ;;  %v7464_v44 = vmul.f32 %v11776_v29, %v1557_v22  ;;  %v1560_v33 = vsel %vm804_vm9, %v1358_v34, 0.0  ;;  %v7473_v1 = vmul.f32 %v11776_v29, %v1558_v12  ;;  %v11928_v13 = vld [vmem:[#allocation210_spill] sm:$0xff] }
 0x3ba   : > { %11919 = vst [vmem:[#allocation259_spill] sm:$0xff] %v7450_v25  ;;  %11923 = vst [vmem:[#allocation208_spill] sm:$0xff] %v7456_v20  ;;  %v2897_v63 = vmul.f32 %v11761_v54, %v1558_v12  ;;  %v1359_v32 = vsel %vm1310_vm1, %v1261_v51, %v7394_v55  ;;  %v1460_v22 = vsel %vm1310_vm1, 0.0, %v1261_v51  ;;  %v11931_v34 = vld [vmem:[#allocation114_spill] sm:$0xff]  ;;  %v2535_v20 = vmul.f32 %v11888_v18, %v11731_v8  ;;  %v11934_v51 = vld [vmem:[#allocation212_spill] sm:$0xff] }
 0x3bb   : > { %11925 = vst [vmem:[#allocation209_spill] sm:$0xff] %v7461_v38  ;;  %11926 = vst [vmem:[#allocation287_spill] sm:$0xff] %v7464_v44  ;;  %v7480_v38 = vadd.f32 %v11928_v13, %v2074_v11  ;;  %v7490_v12 = vmul.f32 %v11888_v18, %v11730_v10  ;;  %v7496_v48 = vadd.f32 %v11934_v51, %v2896_v47  ;;  %v1561_v8 = vsel %vm780_vm2, %v1460_v22, 0.0 }
 0x3bc   : > { %11927 = vst [vmem:[#allocation288_spill] sm:$0xff] %v7473_v1  ;;  %1662 = vrot.lane.b32.xlu0 %v11930_v24, %s4400_s21  ;;  %1660 = vrot.lane.b32.xlu1 %v11931_v34, %s4400_s21  ;;  %v11932_v1 = vld [vmem:[#allocation211_spill] sm:$0xff]  ;;  %v2076_v11 = vmul.f32 %v11760_v57, %v1559_v43  ;;  %v2077_v13 = vmul.f32 %v11760_v57, %v1560_v33  ;;  %v1562_v10 = vsel %vm781_vm3, %v1359_v32, 0.0  ;;  %v7506_v58 = vpop.permute.xlu0 %1274  ;;  %vm11968_vm2 = vcmp.ge.f32.partialorder %v11795_v27, 0.5 }
 0x3bd   : > { %11929 = vst [vmem:[#allocation210_spill] sm:$0xff] %v7480_v38  ;;  %v7493_v44 = vadd.f32 %v11932_v1, %v2075_v21  ;;  %11935 = vst [vmem:[#allocation212_spill] sm:$0xff] %v7496_v48  ;;  %v2898_v38 = vmul.f32 %v11761_v54, %v1559_v43  ;;  %v2899_v25 = vmul.f32 %v11761_v54, %v1560_v33  ;;  %v1273_v21 = vpop.permute.xlu1 %1272  ;;  %v11936_v1 = vld [vmem:[#allocation213_spill] sm:$0xff]  ;;  %v11940_v48 = vld [vmem:[#allocation6_spill] sm:$0xff]  ;;  %vm11985_vm3 = vcmp.ge.f32.partialorder %v11613_v39, 0.5 }
 0x3be   : > { %v7509_v47 = vadd.f32 %v11936_v1, %v2897_v63  ;;  %v7512_v51 = vmul.f32 %v11776_v29, %v1559_v43  ;;  %v7515_v57 = vmul.f32 %v11776_v29, %v1560_v33  ;;  %v7519_v54 = vmul.f32 %v11888_v18, %v11740_v28  ;;  %v11941_v63 = vld [vmem:[#allocation116_spill] sm:$0xff]  ;;  %v11942_v43 = vld [vmem:[#allocation69_spill] sm:$0xff]  ;;  %v11943_v29 = vld [vmem:[#allocation214_spill] sm:$0xff] }
 0x3bf   : > { %11933 = vst [vmem:[#allocation211_spill] sm:$0xff] %v7493_v44  ;;  %v1360_v22 = vsel %vm1310_vm1, %v7394_v55, %v1265_v2  ;;  %v1361_v32 = vsel %vm1310_vm1, %v1265_v2, %v1267_v42  ;;  %v7530_v1 = vmul.f32 %v11888_v18, %v11942_v43  ;;  %v7533_v33 = vadd.f32 %v11943_v29, %v2076_v11  ;;  %v11945_v28 = vld [vmem:[#allocation39_spill] sm:$0xff]  ;;  %v11946_v55 = vld [vmem:[#allocation56_spill] sm:$0xff] }
 0x3c0   : > { %11937 = vst [vmem:[#allocation213_spill] sm:$0xff] %v7509_v47  ;;  %11938 = vst [vmem:[#allocation289_spill] sm:$0xff] %v7512_v51  ;;  %1666 = vrot.lane.b32.xlu0 %v11940_v48, %s4400_s21  ;;  %1664 = vrot.lane.b32.xlu1 %v11941_v63, %s4400_s21  ;;  %v2078_v47 = vmul.f32 %v11945_v28, %v1561_v8  ;;  %v2900_v51 = vmul.f32 %v11946_v55, %v1561_v8  ;;  %v11947_v2 = vld [vmem:[#allocation215_spill] sm:$0xff]  ;;  %v11949_v48 = vld [vmem:[#allocation216_spill] sm:$0xff]  ;;  %v7548_v45 = vpop.permute.xlu0 %1278  ;;  %v1563_v29 = vsel %vm782_vm4, %v1360_v22, 0.0 }
 0x3c1   : > { %11939 = vst [vmem:[#allocation290_spill] sm:$0xff] %v7515_v57  ;;  %11944 = vst [vmem:[#allocation69_spill] sm:$0xff] %v7533_v33  ;;  %v2079_v57 = vmul.f32 %v11945_v28, %v1562_v10  ;;  %v7539_v44 = vadd.f32 %v11947_v2, %v2077_v13  ;;  %v7542_v24 = vadd.f32 %v11949_v48, %v2898_v38  ;;  %v11951_v63 = vld [vmem:[#allocation217_spill] sm:$0xff]  ;;  %v1277_v11 = vpop.permute.xlu1 %1276  ;;  %v1564_v33 = vsel %vm783_vm5, %v1361_v32, 0.0  ;;  %v11953_v38 = vld [vmem:[#allocation50_spill] sm:$0xff] }
 0x3c2   : > { %v7545_v34 = vadd.f32 %v11951_v63, %v2899_v25  ;;  %v2901_v43 = vmul.f32 %v11946_v55, %v1562_v10  ;;  %v1362_v13 = vsel %vm1310_vm1, %v1267_v42, %v1269_v4  ;;  %v1363_v48 = vsel %vm1310_vm1, %v1269_v4, %v7470_v23  ;;  %v11956_v63 = vld [vmem:[#allocation15_spill] sm:$0xff]  ;;  %v11958_v22 = vld [vmem:[#allocation101_spill] sm:$0xff]  ;;  %v11962_v4 = vld [vmem:[#allocation218_spill] sm:$0xff] }
 0x3c3   : > { %11948 = vst [vmem:[#allocation214_spill] sm:$0xff] %v7539_v44  ;;  %11950 = vst [vmem:[#allocation39_spill] sm:$0xff] %v7542_v24  ;;  %v7558_v2 = vmul.f32 %v11953_v38, %v1561_v8  ;;  %v7561_v25 = vmul.f32 %v11953_v38, %v1562_v10  ;;  %v7569_v32 = vadd.f32 %v7404_v16, %v11958_v22  ;;  %v11960_v42 = vld [vmem:[#allocation43_spill] sm:$0xff]  ;;  %v11966_v10 = vld [vmem:[#allocation102_spill] sm:$0xff]  ;;  %v1565_v16 = vsel %vm784_vm6, %v1362_v13, 0.0 }
 0x3c4   : > { %11952 = vst [vmem:[#allocation215_spill] sm:$0xff] %v7545_v34  ;;  %1670 = vrot.lane.b32.xlu0 %v11956_v63, %s4400_s21  ;;  %v11957_v34 = vld [vmem:[#allocation4_spill] sm:$0xff]  ;;  %v7572_v24 = vadd.f32 %v11960_v42, %v2078_v47  ;;  %v7575_v44 = vadd.f32 %v11962_v4, %v2079_v57  ;;  %v11964_v8 = vld [vmem:[#allocation219_spill] sm:$0xff]  ;;  %v2080_v63 = vmul.f32 %v11945_v28, %v1563_v29  ;;  %v1566_v47 = vsel %vm11968_vm2, %v1363_v48, 0.0  ;;  %v7589_v22 = vpop.permute.xlu0 %1282 }
 0x3c5   : > { %11954 = vst [vmem:[#allocation216_spill] sm:$0xff] %v7558_v2  ;;  %11955 = vst [vmem:[#allocation217_spill] sm:$0xff] %v7561_v25  ;;  %1668 = vrot.lane.b32.xlu1 %v11957_v34, %s4400_s21  ;;  %v7578_v2 = vadd.f32 %v11964_v8, %v2900_v51  ;;  %v7581_v25 = vadd.f32 %v2535_v20, %v11966_v10  ;;  %v2081_v34 = vmul.f32 %v11945_v28, %v1564_v33  ;;  %v1281_v57 = vpop.permute.xlu1 %1280  ;;  %v11969_v42 = vld [vmem:[#allocation220_spill] sm:$0xff]  ;;  %v11973_v48 = vld [vmem:[#allocation19_spill] sm:$0xff] }
 0x3c6   : > { %11959 = vst [vmem:[#allocation50_spill] sm:$0xff] %v7569_v32  ;;  %11961 = vst [vmem:[#allocation101_spill] sm:$0xff] %v7572_v24  ;;  %v7592_v4 = vadd.f32 %v11969_v42, %v2901_v43  ;;  %v7595_v51 = vmul.f32 %v11953_v38, %v1563_v29  ;;  %v2902_v20 = vmul.f32 %v11946_v55, %v1563_v29  ;;  %v11975_v43 = vld [vmem:[#allocation68_spill] sm:$0xff]  ;;  %vm12006_vm6 = vcmp.ge.f32.partialorder %v11640_v59, 0.5 }
 0x3c7   : > { %11963 = vst [vmem:[#allocation43_spill] sm:$0xff] %v7575_v44  ;;  %11965 = vst [vmem:[#allocation218_spill] sm:$0xff] %v7578_v2  ;;  %v2903_v8 = vmul.f32 %v11946_v55, %v1564_v33  ;;  %v7600_v10 = vmul.f32 %v11953_v38, %v1564_v33  ;;  %v1364_v13 = vsel %vm1310_vm1, %v7470_v23, %v1273_v21  ;;  %v11974_v2 = vld [vmem:[#allocation7_spill] sm:$0xff]  ;;  %v11979_v44 = vld [vmem:[#allocation222_spill] sm:$0xff]  ;;  %vm12038_vm2 = vcmp.ge.f32.partialorder %v5993_v9, 0.5 }
 0x3c8   : > { %11967 = vst [vmem:[#allocation219_spill] sm:$0xff] %v7581_v25  ;;  %11970 = vst [vmem:[#allocation102_spill] sm:$0xff] %v7592_v4  ;;  %1674 = vrot.lane.b32.xlu0 %v11973_v48, %s4400_s21  ;;  %v7610_v42 = vmul.f32 %v11888_v18, %v11975_v43  ;;  %v2082_v29 = vmul.f32 %v11945_v28, %v1565_v16  ;;  %v2083_v4 = vmul.f32 %v11945_v28, %v1566_v47  ;;  %v7628_v48 = vpop.permute.xlu0 %1286 }
 0x3c9   : > { %11971 = vst [vmem:[#allocation220_spill] sm:$0xff] %v7595_v51  ;;  %11972 = vst [vmem:[#allocation291_spill] sm:$0xff] %v7600_v10  ;;  %1672 = vrot.lane.b32.xlu1 %v11974_v2, %s4400_s21  ;;  %v1365_v33 = vsel %vm1310_vm1, %v1273_v21, %v7506_v58  ;;  %v11976_v10 = vld [vmem:[#allocation73_spill] sm:$0xff]  ;;  %v7624_v25 = vadd.f32 %v11979_v44, %v2081_v34  ;;  %v2904_v43 = vmul.f32 %v11946_v55, %v1565_v16  ;;  %v1285_v2 = vpop.permute.xlu1 %1284  ;;  %v11983_v21 = vld [vmem:[#allocation224_spill] sm:$0xff] }
 0x3ca   : > { %v7618_v23 = vmul.f32 %v11888_v18, %v11976_v10  ;;  %v11977_v51 = vld [vmem:[#allocation221_spill] sm:$0xff]  ;;  %v2905_v32 = vmul.f32 %v11946_v55, %v1566_v47  ;;  %v7631_v15 = vadd.f32 %v11981_v35, %v2902_v20  ;;  %v7634_v14 = vadd.f32 %v11983_v21, %v2903_v8  ;;  %v11988_v10 = vld [vmem:[#allocation127_spill] sm:$0xff]  ;;  %v11990_v20 = vld [vmem:[#allocation58_spill] sm:$0xff] }
 0x3cb   : > { %v7621_v24 = vadd.f32 %v11977_v51, %v2080_v63  ;;  %11980 = vst [vmem:[#allocation73_spill] sm:$0xff] %v7624_v25  ;;  %v1567_v63 = vsel %vm11985_vm3, %v1364_v13, 0.0  ;;  %v1366_v44 = vsel %vm1310_vm1, %v7506_v58, %v1277_v11  ;;  %v7641_v34 = vmul.f32 %v11953_v38, %v1565_v16  ;;  %v11991_v8 = vld [vmem:[#allocation13_spill] sm:$0xff]  ;;  %v11994_v16 = vld [vmem:[#allocation226_spill] sm:$0xff] }
 0x3cc   : > { %11982 = vst [vmem:[#allocation221_spill] sm:$0xff] %v7631_v15  ;;  %11984 = vst [vmem:[#allocation222_spill] sm:$0xff] %v7634_v14  ;;  %v7644_v51 = vmul.f32 %v11953_v38, %v1566_v47  ;;  %vm11989_vm4 = vcmp.ge.f32.partialorder %v11988_v10, 0.5  ;;  %v1367_v35 = vsel %vm1310_vm1, %v1277_v11, %v7548_v45  ;;  %1678 = vrot.lane.b32.xlu0 %v11990_v20, %s4400_s21  ;;  %v11992_v13 = vld [vmem:[#allocation225_spill] sm:$0xff]  ;;  %v11996_v47 = vld [vmem:[#allocation262_spill] sm:$0xff] }
 0x3cd   : > { %11978 = vst [vmem:[#allocation68_spill] sm:$0xff] %v7621_v24  ;;  %11986 = vst [vmem:[#allocation223_spill] sm:$0xff] %v7641_v34  ;;  %v1568_v24 = vsel %vm11989_vm4, %v1365_v33, 0.0  ;;  %1676 = vrot.lane.b32.xlu1 %v11991_v8, %s4400_s21  ;;  %v7655_v58 = vadd.f32 %v11992_v13, %v2082_v29  ;;  %v7658_v21 = vadd.f32 %v11994_v16, %v2083_v4  ;;  %v11998_v33 = vld [vmem:[#allocation263_spill] sm:$0xff]  ;;  %v12002_v34 = vld [vmem:[#allocation228_spill] sm:$0xff]  ;;  %v7677_v16 = vpop.permute.xlu0 %1290  ;;  %vm12050_vm4 = vcmp.ge.f32.partialorder %v6010_v26, 0.5 }
 0x3ce   : > { %11987 = vst [vmem:[#allocation224_spill] sm:$0xff] %v7644_v51  ;;  %v7662_v14 = vadd.f32 %v7490_v12, %v11996_v47  ;;  %v7666_v15 = vadd.f32 %v7519_v54, %v11998_v33  ;;  %v12000_v11 = vld [vmem:[#allocation227_spill] sm:$0xff]  ;;  %v7672_v25 = vadd.f32 %v12002_v34, %v2905_v32  ;;  %v2084_v29 = vmul.f32 %v11945_v28, %v1567_v63  ;;  %v12009_v33 = vld [vmem:[#allocation60_spill] sm:$0xff] }
 0x3cf   : > { %11993 = vst [vmem:[#allocation225_spill] sm:$0xff] %v7655_v58  ;;  %11995 = vst [vmem:[#allocation226_spill] sm:$0xff] %v7658_v21  ;;  %v7669_v51 = vadd.f32 %v12000_v11, %v2904_v43  ;;  %v12004_v13 = vld [vmem:[#allocation31_spill] sm:$0xff]  ;;  %v1289_v58 = vpop.permute.xlu1 %1288  ;;  %v2085_v12 = vmul.f32 %v11945_v28, %v1568_v24  ;;  %v2906_v47 = vmul.f32 %v11946_v55, %v1567_v63  ;;  %v1570_v43 = vsel %vm12006_vm6, %v1367_v35, 0.0  ;;  %v12010_v11 = vld [vmem:[#allocation17_spill] sm:$0xff] }
 0x3d0   : > { %11997 = vst [vmem:[#allocation262_spill] sm:$0xff] %v7662_v14  ;;  %11999 = vst [vmem:[#allocation263_spill] sm:$0xff] %v7666_v15  ;;  %vm12005_vm5 = vcmp.ge.f32.partialorder %v12004_v13, 0.5  ;;  %v2907_v54 = vmul.f32 %v11946_v55, %v1568_v24  ;;  %v7685_v32 = vmul.f32 %v11953_v38, %v1567_v63  ;;  %v7688_v34 = vmul.f32 %v11953_v38, %v1568_v24  ;;  %v12012_v24 = vld [vmem:[#allocation76_spill] sm:$0xff]  ;;  %v12015_v14 = vld [vmem:[#allocation231_spill] sm:$0xff] }
 0x3d1   : > { %12001 = vst [vmem:[#allocation227_spill] sm:$0xff] %v7669_v51  ;;  %12003 = vst [vmem:[#allocation228_spill] sm:$0xff] %v7672_v25  ;;  %v1569_v4 = vsel %vm12005_vm5, %v1366_v44, 0.0  ;;  %v1368_v44 = vsel %vm1310_vm1, %v7548_v45, %v1281_v57  ;;  %1682 = vrot.lane.b32.xlu0 %v12009_v33, %s4400_s21  ;;  %1680 = vrot.lane.b32.xlu1 %v12010_v11, %s4400_s21  ;;  %v1369_v35 = vsel %vm1310_vm1, %v1281_v57, %v7589_v22  ;;  %v12011_v51 = vld [vmem:[#allocation32_spill] sm:$0xff]  ;;  %v12013_v45 = vld [vmem:[#allocation229_spill] sm:$0xff]  ;;  %v7713_v15 = vpop.permute.xlu0 %1294 }
 0x3d2   : > { %12007 = vst [vmem:[#allocation292_spill] sm:$0xff] %v7685_v32  ;;  %12008 = vst [vmem:[#allocation293_spill] sm:$0xff] %v7688_v34  ;;  %v2086_v25 = vmul.f32 %v11945_v28, %v1569_v4  ;;  %v7701_v63 = vmul.f32 %v11888_v18, %v12011_v51  ;;  %v7705_v34 = vmul.f32 %v11888_v18, %v12012_v24  ;;  %v12017_v51 = vld [vmem:[#allocation232_spill] sm:$0xff]  ;;  %v12019_v24 = vld [vmem:[#allocation233_spill] sm:$0xff]  ;;  %vm12057_vm5 = vcmp.ge.f32.partialorder %v6030_v37, 0.5 }
 0x3d3   : > { %v7708_v32 = vadd.f32 %v12013_v45, %v2084_v29  ;;  %v2087_v21 = vmul.f32 %v11945_v28, %v1570_v43  ;;  %v2908_v33 = vmul.f32 %v11946_v55, %v1569_v4  ;;  %v2909_v11 = vmul.f32 %v11946_v55, %v1570_v43  ;;  %v1293_v57 = vpop.permute.xlu1 %1292 }
 0x3d4   : > { %v7716_v20 = vadd.f32 %v12015_v14, %v2085_v12  ;;  %v7719_v8 = vadd.f32 %v12017_v51, %v2906_v47  ;;  %v7722_v59 = vadd.f32 %v12019_v24, %v2907_v54  ;;  %v1571_v29 = vsel %vm12021_vm7, %v1368_v44, 0.0  ;;  %v12024_v12 = vld [vmem:[#allocation62_spill] sm:$0xff]  ;;  %v12025_v47 = vld [vmem:[#allocation59_spill] sm:$0xff] }
 0x3d5   : > { %12014 = vst [vmem:[#allocation32_spill] sm:$0xff] %v7708_v32  ;;  %v7727_v45 = vmul.f32 %v11953_v38, %v1569_v4  ;;  %v1572_v32 = vsel %vm12023_vm8, %v1369_v35, 0.0  ;;  %v1370_v13 = vsel %vm1310_vm1, %v7589_v22, %v1285_v2  ;;  %v1371_v14 = vsel %vm1310_vm1, %v1285_v2, %v7628_v48  ;;  %1686 = vrot.lane.b32.xlu0 %v12024_v12, %s4400_s21  ;;  %v12026_v54 = vld [vmem:[#allocation234_spill] sm:$0xff]  ;;  %v12029_v51 = vld [vmem:[#allocation75_spill] sm:$0xff] }
 0x3d6   : > { %12016 = vst [vmem:[#allocation76_spill] sm:$0xff] %v7716_v20  ;;  %12018 = vst [vmem:[#allocation229_spill] sm:$0xff] %v7719_v8  ;;  %1684 = vrot.lane.b32.xlu1 %v12025_v47, %s4400_s21  ;;  %v7740_v44 = vadd.f32 %v12026_v54, %v2086_v25  ;;  %v7743_v4 = vmul.f32 %v11953_v38, %v1570_v43  ;;  %v7747_v35 = vmul.f32 %v11888_v18, %v12029_v51  ;;  %v12030_v22 = vld [vmem:[#allocation78_spill] sm:$0xff]  ;;  %v12031_v2 = vld [vmem:[#allocation235_spill] sm:$0xff]  ;;  %v7763_v54 = vpop.permute.xlu0 %1298 }
 0x3d7   : > { %12020 = vst [vmem:[#allocation231_spill] sm:$0xff] %v7722_v59  ;;  %12022 = vst [vmem:[#allocation232_spill] sm:$0xff] %v7727_v45  ;;  %v7751_v24 = vmul.f32 %v11888_v18, %v12030_v22  ;;  %v7754_v59 = vadd.f32 %v12031_v2, %v2087_v21  ;;  %v12033_v8 = vld [vmem:[#allocation236_spill] sm:$0xff]  ;;  %v12035_v20 = vld [vmem:[#allocation237_spill] sm:$0xff]  ;;  %v2088_v43 = vmul.f32 %v11945_v28, %v1571_v29  ;;  %v1573_v21 = vsel %vm12038_vm2, %v1370_v13, 0.0 }
 0x3d8   : > { %12027 = vst [vmem:[#allocation233_spill] sm:$0xff] %v7740_v44  ;;  %12028 = vst [vmem:[#allocation234_spill] sm:$0xff] %v7743_v4  ;;  %v7757_v45 = vadd.f32 %v12033_v8, %v2908_v33  ;;  %v7760_v25 = vadd.f32 %v12035_v20, %v2909_v11  ;;  %v1297_v4 = vpop.permute.xlu1 %1296  ;;  %v2089_v51 = vmul.f32 %v11945_v28, %v1572_v32  ;;  %v12039_v22 = vld [vmem:[#allocation145_spill] sm:$0xff]  ;;  %v12041_v2 = vld [vmem:[#allocation118_spill] sm:$0xff]  ;;  %vm11072_vm6 = vcmp.le.f32.partialorder %v11747_v41, 54.5 }
 0x3d9   : > { %12032 = vst [vmem:[#allocation75_spill] sm:$0xff] %v7754_v59  ;;  %v7767_v44 = vmul.f32 %v11953_v38, %v1571_v29  ;;  %vm12040_vm3 = vcmp.ge.f32.partialorder %v12039_v22, 0.5  ;;  %v2910_v33 = vmul.f32 %v11946_v55, %v1571_v29  ;;  %v2911_v20 = vmul.f32 %v11946_v55, %v1572_v32  ;;  %1690 = vrot.lane.b32.xlu0 %v12041_v2, %s4400_s21 }
 0x3da   : > { %12034 = vst [vmem:[#allocation78_spill] sm:$0xff] %v7757_v45  ;;  %12036 = vst [vmem:[#allocation235_spill] sm:$0xff] %v7760_v25  ;;  %v1574_v8 = vsel %vm12040_vm3, %v1371_v14, 0.0  ;;  %v1372_v11 = vsel %vm1310_vm1, %v7628_v48, %v1289_v58  ;;  %v12042_v25 = vld [vmem:[#allocation61_spill] sm:$0xff]  ;;  %v7782_v45 = vmul.f32 %v11953_v38, %v1572_v32  ;;  %v1373_v13 = vsel %vm1310_vm1, %v1289_v58, %v7677_v16  ;;  %v12044_v14 = vld [vmem:[#allocation2_spill] sm:$0xff] }
 0x3db   : > { %12037 = vst [vmem:[#allocation236_spill] sm:$0xff] %v7767_v44  ;;  %1688 = vrot.lane.b32.xlu1 %v12042_v25, %s4400_s21  ;;  %v7788_v29 = vadd.f32 %v7530_v1, %v12044_v14  ;;  %v12046_v44 = vld [vmem:[#allocation135_spill] sm:$0xff]  ;;  %v12048_v48 = vld [vmem:[#allocation238_spill] sm:$0xff]  ;;  %v2090_v2 = vmul.f32 %v11945_v28, %v1573_v21  ;;  %v2091_v25 = vmul.f32 %v11945_v28, %v1574_v8  ;;  %v1575_v1 = vsel %vm12050_vm4, %v1372_v11, 0.0 }
 0x3dc   : > { %12043 = vst [vmem:[#allocation237_spill] sm:$0xff] %v7782_v45  ;;  %v7792_v59 = vadd.f32 %v7610_v42, %v12046_v44  ;;  %v7795_v12 = vadd.f32 %v12048_v48, %v2088_v43  ;;  %v2912_v32 = vmul.f32 %v11946_v55, %v1573_v21  ;;  %v7800_v45 = vpop.permute.xlu0 %1302  ;;  %v1301_v58 = vpop.permute.xlu1 %1300  ;;  %v2913_v47 = vmul.f32 %v11946_v55, %v1574_v8  ;;  %v12051_v43 = vld [vmem:[#allocation239_spill] sm:$0xff]  ;;  %v12053_v48 = vld [vmem:[#allocation240_spill] sm:$0xff]  ;;  %v12058_v11 = vld [vmem:[#allocation14_spill] sm:$0xff] }
 0x3dd   : > { %12045 = vst [vmem:[#allocation2_spill] sm:$0xff] %v7788_v29  ;;  %v1374_v42 = vsel %vm1310_vm1, %v7677_v16, %v1293_v57  ;;  %v1375_v44 = vsel %vm1310_vm1, %v1293_v57, %v7713_v15  ;;  %v7810_v14 = vadd.f32 %v12051_v43, %v2089_v51  ;;  %v1576_v9 = vsel %vm12057_vm5, %v1373_v13, 0.0  ;;  %1694 = vrot.lane.b32.xlu0 %v12058_v11, %s4400_s21  ;;  %v12059_v16 = vld [vmem:[#allocation117_spill] sm:$0xff]  ;;  %v12064_v43 = vld [vmem:[#allocation242_spill] sm:$0xff] }
 0x3de   : > { %12047 = vst [vmem:[#allocation135_spill] sm:$0xff] %v7792_v59  ;;  %12049 = vst [vmem:[#allocation238_spill] sm:$0xff] %v7795_v12  ;;  %v7813_v12 = vadd.f32 %v12053_v48, %v2910_v33  ;;  %v12055_v59 = vld [vmem:[#allocation241_spill] sm:$0xff]  ;;  %v7825_v57 = vmul.f32 %v11953_v38, %v1573_v21  ;;  %v7828_v51 = vmul.f32 %v11953_v38, %v1574_v8  ;;  %vm806_vm7 = vcmp.le.f32.partialorder %v11762_v30, 54.5  ;;  %v12114_v30 = vld [vmem:[#allocation71_spill] sm:$0xff] }
 0x3df   : > { %12052 = vst [vmem:[#allocation239_spill] sm:$0xff] %v7810_v14  ;;  %v7816_v29 = vadd.f32 %v12055_v59, %v2911_v20  ;;  %1692 = vrot.lane.b32.xlu1 %v12059_v16, %s4400_s21  ;;  %v12062_v59 = vld [vmem:[#allocation77_spill] sm:$0xff]  ;;  %v12063_v20 = vld [vmem:[#allocation80_spill] sm:$0xff]  ;;  %v7841_v48 = vadd.f32 %v12064_v43, %v2090_v2  ;;  %v2092_v21 = vmul.f32 %v11945_v28, %v1575_v1  ;;  %v7846_v8 = vsel %vm796_vm10, %v1374_v42, 0.0 }
 0x3e0   : > { %12054 = vst [vmem:[#allocation240_spill] sm:$0xff] %v7813_v12  ;;  %12060 = vst [vmem:[#allocation294_spill] sm:$0xff] %v7825_v57  ;;  %v7834_v33 = vmul.f32 %v11888_v18, %v12062_v59  ;;  %v7838_v13 = vmul.f32 %v11888_v18, %v12063_v20  ;;  %v7852_v12 = vpop.permute.xlu0 %1306  ;;  %v1305_v59 = vpop.permute.xlu1 %1304  ;;  %v12070_v20 = vld [vmem:[#allocation244_spill] sm:$0xff]  ;;  %v12072_v2 = vld [vmem:[#allocation245_spill] sm:$0xff]  ;;  %v7865_v42 = vmul.f32 %v11953_v38, %v1575_v1  ;;  %vm1736_vm10 = vcmask 1039360  }
 0x3e1   : > { %12056 = vst [vmem:[#allocation241_spill] sm:$0xff] %v7816_v29  ;;  %12061 = vst [vmem:[#allocation295_spill] sm:$0xff] %v7828_v51  ;;  %v7850_v29 = vsel %vm797_vm13, %v1375_v44, 0.0  ;;  %v12068_v51 = vld [vmem:[#allocation243_spill] sm:$0xff]  ;;  %v7858_v14 = vadd.f32 %v12070_v20, %v2912_v32  ;;  %v7861_v43 = vadd.f32 %v12072_v2, %v2913_v47  ;;  %v1376_v44 = vsel %vm1310_vm1, %v7713_v15, %v1297_v4 }
 0x3e2   : > { %12065 = vst [vmem:[#allocation77_spill] sm:$0xff] %v7841_v48  ;;  %12066 = vst [vmem:[#allocation80_spill] sm:$0xff] %v7846_v8  ;;  %v7855_v57 = vadd.f32 %v12068_v51, %v2091_v25  ;;  %v2093_v48 = vmul.f32 %v11945_v28, %v1576_v9  ;;  %v1377_v11 = vsel %vm1310_vm1, %v1297_v4, %v7763_v54  ;;  %v12075_v25 = vld [vmem:[#allocation66_spill] sm:$0xff]  ;;  %v12076_v32 = vld [vmem:[#allocation63_spill] sm:$0xff]  ;;  %vm807_vm13 = vcmp.le.f32.partialorder %v11773_v17, 54.5 }
 0x3e3   : > { %12067 = vst [vmem:[#allocation242_spill] sm:$0xff] %v7850_v29  ;;  %12071 = vst [vmem:[#allocation244_spill] sm:$0xff] %v7858_v14  ;;  %1698 = vrot.lane.b32.xlu0 %v12075_v25, %s4400_s21  ;;  %1696 = vrot.lane.b32.xlu1 %v12076_v32, %s4400_s21  ;;  %v7876_v47 = vmul.f32 %v11953_v38, %v1576_v9  ;;  %v7879_v51 = vmul.f32 %v11946_v55, %v1575_v1  ;;  %v12079_v4 = vld [vmem:[#allocation246_spill] sm:$0xff]  ;;  %v12084_v25 = vld [vmem:[#allocation247_spill] sm:$0xff]  ;;  %vm12087_vm8 = vcmp.ge.f32.partialorder %v6104_v31, 0.5 }
 0x3e4   : > { %12069 = vst [vmem:[#allocation243_spill] sm:$0xff] %v7855_v57  ;;  %12073 = vst [vmem:[#allocation245_spill] sm:$0xff] %v7861_v43  ;;  %v2094_v20 = vmul.f32 %v11945_v28, %v7846_v8  ;;  %v2095_v15 = vmul.f32 %v11945_v28, %v7850_v29  ;;  %v7887_v2 = vadd.f32 %v12079_v4, %v2092_v21  ;;  %v1587_v14 = vpop.permute.xlu0 %1586  ;;  %v7905_v21 = vsel %vm798_vm12, %v1376_v44, 0.0  ;;  %v12092_v44 = vld [vmem:[#allocation119_spill] sm:$0xff] }
 0x3e5   : > { %12074 = vst [vmem:[#allocation296_spill] sm:$0xff] %v7865_v42  ;;  %12077 = vst [vmem:[#allocation297_spill] sm:$0xff] %v7876_v47  ;;  %v7890_v43 = vmul.f32 %v11946_v55, %v1576_v9  ;;  %v1309_v42 = vpop.permute.xlu1 %1308  ;;  %v12082_v47 = vld [vmem:[#allocation79_spill] sm:$0xff]  ;;  %v7901_v32 = vadd.f32 %v12084_v25, %v2093_v48  ;;  %v7909_v9 = vsel %vm12087_vm8, %v1377_v11, 0.0  ;;  %v1378_v4 = vsel %vm1310_vm1, %v7763_v54, %v1301_v58  ;;  %v12091_v48 = vld [vmem:[#allocation120_spill] sm:$0xff] }
 0x3e6   : > { %12078 = vst [vmem:[#allocation298_spill] sm:$0xff] %v7879_v51  ;;  %12080 = vst [vmem:[#allocation246_spill] sm:$0xff] %v7887_v2  ;;  %v7894_v1 = vmul.f32 %v11888_v18, %v12082_v47  ;;  %v12083_v51 = vld [vmem:[#allocation82_spill] sm:$0xff]  ;;  %v7915_v47 = vmul.f32 %v11953_v38, %v7846_v8  ;;  %vm808_vm12 = vcmp.le.f32.partialorder %v11783_v7, 54.5  ;;  %v12096_v55 = vld [vmem:[#allocation251_spill] sm:$0xff]  ;;  %vm11050_vm2 = vcmp.le.f32.partialorder %v11645_v49, 54.5 }
 0x3e7   : > { %12081 = vst [vmem:[#allocation299_spill] sm:$0xff] %v7890_v43  ;;  %v7898_v57 = vmul.f32 %v11888_v18, %v12083_v51  ;;  %12085 = vst [vmem:[#allocation79_spill] sm:$0xff] %v7901_v32  ;;  %v7919_v51 = vmul.f32 %v11953_v38, %v7850_v29  ;;  %1702 = vrot.lane.b32.xlu0 %v12091_v48, %s4400_s21  ;;  %1700 = vrot.lane.b32.xlu1 %v12092_v44, %s4400_s21  ;;  %v12093_v11 = vld [vmem:[#allocation138_spill] sm:$0xff]  ;;  %v12110_v2 = vld [vmem:[#allocation252_spill] sm:$0xff]  ;;  %vm11049_vm3 = vcmp.le.f32.partialorder %v11651_v61, 54.5 }
 0x3e8   : > { %12086 = vst [vmem:[#allocation82_spill] sm:$0xff] %v7905_v21  ;;  %12088 = vst [vmem:[#allocation247_spill] sm:$0xff] %v7909_v9  ;;  %v7928_v25 = vadd.f32 %v7618_v23, %v12093_v11  ;;  %v12094_v54 = vld [vmem:[#allocation250_spill] sm:$0xff]  ;;  %v7934_v8 = vadd.f32 %v12096_v55, %v2095_v15  ;;  %v1379_v29 = vsel %vm1310_vm1, %v1301_v58, %v7800_v45  ;;  %v7952_v55 = vsel %vm800_vm0, %v1378_v4, 0.0  ;;  %v1591_v15 = vpop.permute.xlu0 %1590 }
 0x3e9   : > { %12089 = vst [vmem:[#allocation300_spill] sm:$0xff] %v7915_v47  ;;  %12090 = vst [vmem:[#allocation301_spill] sm:$0xff] %v7919_v51  ;;  %v7931_v43 = vadd.f32 %v12094_v54, %v2094_v20  ;;  %v12098_v51 = vld [vmem:[#allocation264_spill] sm:$0xff]  ;;  %v2096_v48 = vmul.f32 %v11945_v28, %v7905_v21  ;;  %v2097_v23 = vmul.f32 %v11945_v28, %v7909_v9  ;;  %v1589_v58 = vpop.permute.xlu1 %1588  ;;  %v7966_v4 = vsel %vm801_vm15, %v1379_v29, 0.0 }
 0x3ea   : > { %12097 = vst [vmem:[#allocation250_spill] sm:$0xff] %v7934_v8  ;;  %v7940_v47 = vadd.f32 %v7701_v63, %v12098_v51  ;;  %v7948_v20 = vmul.f32 %v11953_v38, %v7905_v21  ;;  %12101 = vst [vmem:[#allocation302_spill] sm:$0xff] %v7952_v55  ;;  %v1380_v63 = vsel %vm1310_vm1, %v7800_v45, %v1305_v59  ;;  %v12109_v8 = vld [vmem:[#allocation46_spill] sm:$0xff]  ;;  %vm809_vm0 = vcmp.le.f32.partialorder %v11786_v5, 54.5 }
 0x3eb   : > { %12095 = vst [vmem:[#allocation138_spill] sm:$0xff] %v7931_v43  ;;  %v1381_v51 = vsel %vm1310_vm1, %v1305_v59, %v7852_v12  ;;  %v1737_v11 = vsel %vm1736_vm10, %v1587_v14, %v1589_v58  ;;  %v1738_v54 = vsel %vm1736_vm10, %v1589_v58, %v1591_v15  ;;  %v7962_v21 = vmul.f32 %v11953_v38, %v7909_v9  ;;  %v12104_v14 = vld [vmem:[#allocation70_spill] sm:$0xff]  ;;  %v12105_v59 = vld [vmem:[#allocation67_spill] sm:$0xff]  ;;  %v12106_v58 = vld [vmem:[#allocation53_spill] sm:$0xff] }
 0x3ec   : > { %12099 = vst [vmem:[#allocation251_spill] sm:$0xff] %v7940_v47  ;;  %12100 = vst [vmem:[#allocation264_spill] sm:$0xff] %v7948_v20  ;;  %v7970_v20 = vsel %vm11072_vm6, %v1737_v11, 0.0  ;;  %v7974_v45 = vsel %vm806_vm7, %v1738_v54, 0.0  ;;  %1706 = vrot.lane.b32.xlu0 %v12104_v14, %s4400_s21  ;;  %1704 = vrot.lane.b32.xlu1 %v12105_v59, %s4400_s21  ;;  %v12108_v43 = vld [vmem:[#allocation108_spill] sm:$0xff]  ;;  %v7993_v32 = vadd.f32 %v12110_v2, %v2096_v48  ;;  %v7999_v59 = vsel %vm802_vm11, %v1380_v63, 0.0 }
 0x3ed   : > { %12102 = vst [vmem:[#allocation303_spill] sm:$0xff] %v7962_v21  ;;  %12103 = vst [vmem:[#allocation304_spill] sm:$0xff] %v7966_v4  ;;  %v2688_v9 = vmul.f32 %v12106_v58, %v7970_v20  ;;  %v2689_v29 = vmul.f32 %v12106_v58, %v7974_v45  ;;  %v12107_v21 = vld [vmem:[#allocation81_spill] sm:$0xff]  ;;  %v7990_v54 = vmul.f32 %v12109_v8, %v12108_v43  ;;  %v8003_v44 = vsel %vm803_vm14, %v1381_v51, 0.0  ;;  %v1593_v16 = vpop.permute.xlu1 %1592 }
 0x3ee   : > { %v7986_v11 = vmul.f32 %v11888_v18, %v12107_v21  ;;  %12111 = vst [vmem:[#allocation53_spill] sm:$0xff] %v7993_v32  ;;  %v2098_v14 = vmul.f32 %v11945_v28, %v7952_v55  ;;  %12112 = vst [vmem:[#allocation81_spill] sm:$0xff] %v7999_v59  ;;  %v1595_v21 = vpop.permute.xlu0 %1594  ;;  %v2099_v43 = vmul.f32 %v11945_v28, %v7966_v4  ;;  %vm11078_vm11 = vcmp.le.f32.partialorder %v11988_v10, 54.5 }
 0x3ef   : > { %12113 = vst [vmem:[#allocation108_spill] sm:$0xff] %v8003_v44  ;;  %v1382_v2 = vsel %vm1310_vm1, %v7852_v12, %v1309_v42  ;;  %v1739_v48 = vsel %vm1736_vm10, %v1591_v15, %v1593_v16  ;;  %v1740_v32 = vsel %vm1736_vm10, %v1593_v16, %v1595_v21  ;;  %v12116_v12 = vld [vmem:[#allocation92_spill] sm:$0xff]  ;;  %v12118_v16 = vld [vmem:[#allocation257_spill] sm:$0xff]  ;;  %v8069_v7 = vmul.f32 %v11953_v38, %v7999_v59 }
 0x3f0   : > { %v8013_v63 = vsel %vm807_vm13, %v1739_v48, 0.0  ;;  %v8017_v51 = vsel %vm808_vm12, %v1740_v32, 0.0  ;;  %1710 = vrot.lane.b32.xlu0 %v12114_v30, %s4400_s21  ;;  %1708 = vrot.lane.b32.xlu1 %v12115_v3, %s4400_s21  ;;  %v8025_v42 = vadd.f32 %v2688_v9, %v12116_v12  ;;  %v8028_v15 = vadd.f32 %v2689_v29, %v12118_v16  ;;  %v12120_v48 = vld [vmem:[#allocation253_spill] sm:$0xff] }
 0x3f1   : > { %v8031_v17 = vadd.f32 %v12120_v48, %v2097_v23  ;;  %v8035_v32 = vmul.f32 %v11953_v38, %v7952_v55  ;;  %v2100_v30 = vmul.f32 %v11945_v28, %v7999_v59  ;;  %v2101_v3 = vmul.f32 %v11945_v28, %v8003_v44  ;;  %v1597_v48 = vpop.permute.xlu1 %1596  ;;  %v12127_v55 = vld [vmem:[#allocation254_spill] sm:$0xff]  ;;  %v12140_v59 = vld [vmem:[#allocation27_spill] sm:$0xff] }
 0x3f2   : > { %12117 = vst [vmem:[#allocation46_spill] sm:$0xff] %v8025_v42  ;;  %12119 = vst [vmem:[#allocation252_spill] sm:$0xff] %v8028_v15  ;;  %v8043_v9 = vmul.f32 %v11953_v38, %v7966_v4  ;;  %v8047_v29 = vsel %vm804_vm9, %v1382_v2, 0.0  ;;  %v2690_v23 = vmul.f32 %v12106_v58, %v8013_v63  ;;  %v2691_v12 = vmul.f32 %v12106_v58, %v8017_v51  ;;  %v1599_v16 = vpop.permute.xlu0 %1598  ;;  %v12125_v15 = vld [vmem:[#allocation55_spill] sm:$0xff]  ;;  %v12129_v4 = vld [vmem:[#allocation142_spill] sm:$0xff] }
 0x3f3   : > { %12121 = vst [vmem:[#allocation92_spill] sm:$0xff] %v8031_v17  ;;  %12122 = vst [vmem:[#allocation257_spill] sm:$0xff] %v8035_v32  ;;  %v8054_v42 = vadd.f32 %v12125_v15, %v2098_v14  ;;  %v8057_v32 = vadd.f32 %v12127_v55, %v2099_v43  ;;  %v12130_v2 = vld [vmem:[#allocation143_spill] sm:$0xff]  ;;  %v8073_v47 = vmul.f32 %v11953_v38, %v8003_v44  ;;  %vm810_vm1 = vcmp.le.f32.partialorder %v11795_v27, 54.5  ;;  %v12133_v55 = vld [vmem:[#allocation124_spill] sm:$0xff] }
 0x3f4   : > { %12123 = vst [vmem:[#allocation253_spill] sm:$0xff] %v8043_v9  ;;  %12124 = vst [vmem:[#allocation305_spill] sm:$0xff] %v8047_v29  ;;  %v8061_v9 = vadd.f32 %v7705_v34, %v12129_v4  ;;  %v8065_v17 = vadd.f32 %v7747_v35, %v12130_v2  ;;  %1714 = vrot.lane.b32.xlu0 %v12133_v55, %s4400_s21  ;;  %v12134_v34 = vld [vmem:[#allocation122_spill] sm:$0xff]  ;;  %v12135_v4 = vld [vmem:[#allocation87_spill] sm:$0xff]  ;;  %v2102_v44 = vmul.f32 %v11945_v28, %v8047_v29 }
 0x3f5   : > { %12126 = vst [vmem:[#allocation55_spill] sm:$0xff] %v8054_v42  ;;  %12128 = vst [vmem:[#allocation254_spill] sm:$0xff] %v8057_v32  ;;  %1712 = vrot.lane.b32.xlu1 %v12134_v34, %s4400_s21  ;;  %v8082_v35 = vmul.f32 %v11888_v18, %v12135_v4  ;;  %v12136_v14 = vld [vmem:[#allocation255_spill] sm:$0xff]  ;;  %v12138_v15 = vld [vmem:[#allocation256_spill] sm:$0xff]  ;;  %vm11077_vm9 = vcmp.le.f32.partialorder %v11613_v39, 54.5  ;;  %v1601_v42 = vpop.permute.xlu1 %1600  ;;  %v8109_v28 = vmul.f32 %v12109_v8, %v11861_v40  ;;  %vm11053_vm4 = vcmp.le.f32.partialorder %v12039_v22, 54.5 }
 0x3f6   : > { %12131 = vst [vmem:[#allocation142_spill] sm:$0xff] %v8069_v7  ;;  %12132 = vst [vmem:[#allocation143_spill] sm:$0xff] %v8073_v47  ;;  %v8085_v43 = vadd.f32 %v12136_v14, %v2100_v30  ;;  %v8088_v2 = vadd.f32 %v12138_v15, %v2101_v3  ;;  %v8095_v47 = vmul.f32 %v12109_v8, %v12140_v59  ;;  %v1603_v7 = vpop.permute.xlu0 %1602  ;;  %v12142_v32 = vld [vmem:[#allocation260_spill] sm:$0xff]  ;;  %v12144_v4 = vld [vmem:[#allocation261_spill] sm:$0xff]  ;;  %vm11061_vm8 = vcmp.le.f32.partialorder %v6010_v26, 54.5 }
 0x3f7   : > { %v8098_v18 = vadd.f32 %v2690_v23, %v12142_v32  ;;  %v8101_v30 = vadd.f32 %v2691_v12, %v12144_v4  ;;  %v8105_v3 = vmul.f32 %v12109_v8, %v11862_v50  ;;  %12147 = vst [vmem:[#allocation306_spill] sm:$0xff] %v8109_v28  ;;  %v8113_v59 = vmul.f32 %v11953_v38, %v8047_v29  ;;  %v12152_v38 = vld [vmem:[#allocation128_spill] sm:$0xff]  ;;  %v12156_v15 = vld [vmem:[#allocation41_spill] sm:$0xff]  ;;  %v12168_v55 = vld [vmem:[#allocation267_spill] sm:$0xff] }
 0x3f8   : > { %12137 = vst [vmem:[#allocation87_spill] sm:$0xff] %v8085_v43  ;;  %12139 = vst [vmem:[#allocation255_spill] sm:$0xff] %v8088_v2  ;;  %v8117_v14 = vmul.f32 %v12109_v8, %v11880_v62  ;;  %v8121_v32 = vmul.f32 %v12109_v8, %v11879_v36  ;;  %v8125_v50 = vmul.f32 %v12109_v8, %v11892_v46  ;;  %1718 = vrot.lane.b32.xlu0 %v12152_v38, %s4400_s21  ;;  %v12153_v62 = vld [vmem:[#allocation123_spill] sm:$0xff]  ;;  %v12154_v12 = vld [vmem:[#allocation112_spill] sm:$0xff] }
 0x3f9   : > { %12141 = vst [vmem:[#allocation256_spill] sm:$0xff] %v8095_v47  ;;  %12143 = vst [vmem:[#allocation27_spill] sm:$0xff] %v8098_v18  ;;  %v1741_v23 = vsel %vm1736_vm10, %v1595_v21, %v1597_v48  ;;  %v1742_v40 = vsel %vm1736_vm10, %v1597_v48, %v1599_v16  ;;  %1716 = vrot.lane.b32.xlu1 %v12153_v62, %s4400_s21  ;;  %v8136_v36 = vmul.f32 %v12109_v8, %v12154_v12  ;;  %v12158_v46 = vld [vmem:[#allocation45_spill] sm:$0xff]  ;;  %v12160_v18 = vld [vmem:[#allocation111_spill] sm:$0xff] }
 0x3fa   : > { %12145 = vst [vmem:[#allocation260_spill] sm:$0xff] %v8101_v30  ;;  %12146 = vst [vmem:[#allocation261_spill] sm:$0xff] %v8105_v3  ;;  %v8139_v4 = vadd.f32 %v12156_v15, %v2102_v44  ;;  %v2277_v21 = vmul.f32 %v12158_v46, %v7970_v20  ;;  %v2278_v48 = vmul.f32 %v12158_v46, %v7974_v45  ;;  %v12159_v30 = vld [vmem:[#allocation31_spill] sm:$0xff]  ;;  %v1607_v12 = vpop.permute.xlu0 %1606  ;;  %v1605_v15 = vpop.permute.xlu1 %1604  ;;  %v12166_v38 = vld [vmem:[#allocation113_spill] sm:$0xff] }
 0x3fb   : > { %12148 = vst [vmem:[#allocation307_spill] sm:$0xff] %v8113_v59  ;;  %12149 = vst [vmem:[#allocation308_spill] sm:$0xff] %v8117_v14  ;;  %vm11064_vm14 = vcmp.le.f32.partialorder %v12159_v30, 54.5  ;;  %v8148_v29 = vmul.f32 %v12109_v8, %v12160_v18  ;;  %v12162_v59 = vld [vmem:[#allocation20_spill] sm:$0xff]  ;;  %v8164_v62 = vmul.f32 %v12109_v8, %v12166_v38  ;;  %v1942_v18 = vsel %vm809_vm0, %v1741_v23, 0.0  ;;  %v12169_v34 = vld [vmem:[#allocation269_spill] sm:$0xff] }
 0x3fc   : > { %12150 = vst [vmem:[#allocation309_spill] sm:$0xff] %v8121_v32  ;;  %12151 = vst [vmem:[#allocation310_spill] sm:$0xff] %v8125_v50  ;;  %v8152_v43 = vmul.f32 %v12162_v59, %v7970_v20  ;;  %v8156_v44 = vmul.f32 %v12162_v59, %v7974_v45  ;;  %v1943_v20 = vsel %vm810_vm1, %v1742_v40, 0.0  ;;  %v8172_v45 = vadd.f32 %v7751_v24, %v12168_v55  ;;  %v12170_v23 = vld [vmem:[#allocation130_spill] sm:$0xff]  ;;  %v12174_v27 = vld [vmem:[#allocation49_spill] sm:$0xff] }
 0x3fd   : > { %12155 = vst [vmem:[#allocation112_spill] sm:$0xff] %v8136_v36  ;;  %12157 = vst [vmem:[#allocation41_spill] sm:$0xff] %v8139_v4  ;;  %v12164_v4 = vld [vmem:[#allocation35_spill] sm:$0xff]  ;;  %v2280_v38 = vmul.f32 %v12158_v46, %v8017_v51  ;;  %vm11046_vm15 = vcmp.le.f32.partialorder %v12170_v23, 54.5  ;;  %v12171_v40 = vld [vmem:[#allocation134_spill] sm:$0xff]  ;;  %v1743_v55 = vsel %vm1736_vm10, %v1599_v16, %v1601_v42  ;;  %v8199_v36 = vadd.f32 %v2277_v21, %v12174_v27 }
 0x3fe   : > { %12161 = vst [vmem:[#allocation45_spill] sm:$0xff] %v8148_v29  ;;  %12163 = vst [vmem:[#allocation111_spill] sm:$0xff] %v8156_v44  ;;  %v8160_v2 = vmul.f32 %v12109_v8, %v12164_v4  ;;  %v8176_v29 = vadd.f32 %v7834_v33, %v12169_v34  ;;  %v2279_v4 = vmul.f32 %v12158_v46, %v8013_v63  ;;  %1722 = vrot.lane.b32.xlu0 %v12171_v40, %s4400_s21  ;;  %v12172_v24 = vld [vmem:[#allocation126_spill] sm:$0xff]  ;;  %v12173_v34 = vld [vmem:[#allocation85_spill] sm:$0xff]  ;;  %v8207_v5 = vpop.permute.xlu0 %1610 }
 0x3ff   : > { %12167 = vst [vmem:[#allocation35_spill] sm:$0xff] %v8164_v62  ;;  %v1744_v62 = vsel %vm1736_vm10, %v1601_v42, %v1603_v7  ;;  %1720 = vrot.lane.b32.xlu1 %v12172_v24, %s4400_s21  ;;  %v8190_v33 = vmul.f32 %v12162_v59, %v8013_v63  ;;  %v8203_v40 = vmul.f32 %v12162_v59, %v8017_v51  ;;  %v1609_v42 = vpop.permute.xlu1 %1608  ;;  %v12176_v16 = vld [vmem:[#allocation115_spill] sm:$0xff]  ;;  %v12178_v51 = vld [vmem:[#allocation114_spill] sm:$0xff]  ;;  %v1944_v32 = vsel %vm11077_vm9, %v1743_v55, 0.0  ;;  %v12180_v14 = vld [vmem:[#allocation185_spill] sm:$0xff] }
 0x400   : > { %12165 = vst [vmem:[#allocation20_spill] sm:$0xff] %v8160_v2  ;;  %v8196_v2 = vadd.f32 %v2278_v48, %v12173_v34  ;;  %v2692_v24 = vmul.f32 %v12106_v58, %v1942_v18  ;;  %v2693_v63 = vmul.f32 %v12106_v58, %v1943_v20  ;;  %v8211_v50 = vmul.f32 %v12109_v8, %v12176_v16  ;;  %v12181_v16 = vld [vmem:[#allocation133_spill] sm:$0xff]  ;;  %v12210_v30 = vld [vmem:[#allocation15_spill] sm:$0xff] }
 0x401   : > { %12175 = vst [vmem:[#allocation113_spill] sm:$0xff] %v8203_v40  ;;  %v2281_v48 = vmul.f32 %v12158_v46, %v1942_v18  ;;  %v2282_v27 = vmul.f32 %v12158_v46, %v1943_v20  ;;  %v1945_v21 = vsel %vm11078_vm11, %v1744_v62, 0.0  ;;  %v8219_v34 = vmul.f32 %v12109_v8, %v12178_v51  ;;  %v12183_v40 = vld [vmem:[#allocation89_spill] sm:$0xff] }
 0x402   : > { %12177 = vst [vmem:[#allocation267_spill] sm:$0xff] %v8211_v50  ;;  %1726 = vrot.lane.b32.xlu0 %v12180_v14, %s4400_s21  ;;  %v12182_v50 = vld [vmem:[#allocation25_spill] sm:$0xff]  ;;  %v8231_v3 = vadd.f32 %v2279_v4, %v12183_v40  ;;  %v8238_v51 = vmul.f32 %v12162_v59, %v1942_v18  ;;  %v1745_v55 = vsel %vm1736_vm10, %v1603_v7, %v1605_v15  ;;  %v8251_v40 = vpop.permute.xlu0 %1614 }
 0x403   : > { %12179 = vst [vmem:[#allocation269_spill] sm:$0xff] %v8219_v34  ;;  %1724 = vrot.lane.b32.xlu1 %v12181_v16, %s4400_s21  ;;  %v8228_v28 = vadd.f32 %v2280_v38, %v12182_v50  ;;  %v12184_v62 = vld [vmem:[#allocation5_spill] sm:$0xff]  ;;  %v1746_v14 = vsel %vm1736_vm10, %v1605_v15, %v1607_v12  ;;  %v12187_v16 = vld [vmem:[#allocation116_spill] sm:$0xff]  ;;  %v8248_v4 = vmul.f32 %v12162_v59, %v1943_v20  ;;  %v1613_v18 = vpop.permute.xlu1 %1612  ;;  %v12196_v20 = vld [vmem:[#allocation94_spill] sm:$0xff] }
 0x404   : > { %v8235_v10 = vmul.f32 %v12109_v8, %v12184_v62  ;;  %12186 = vst [vmem:[#allocation49_spill] sm:$0xff] %v8238_v51  ;;  %v8245_v50 = vmul.f32 %v12109_v8, %v12187_v16  ;;  %v2284_v38 = vmul.f32 %v12158_v46, %v1945_v21  ;;  %v12190_v62 = vld [vmem:[#allocation144_spill] sm:$0xff]  ;;  %v2283_v39 = vmul.f32 %v12158_v46, %v1944_v32  ;;  %v12195_v16 = vld [vmem:[#allocation95_spill] sm:$0xff]  ;;  %v12197_v51 = vld [vmem:[#allocation149_spill] sm:$0xff] }
 0x405   : > { %12189 = vst [vmem:[#allocation114_spill] sm:$0xff] %v8248_v4  ;;  %vm11055_vm5 = vcmp.le.f32.partialorder %v12190_v62, 54.5  ;;  %v12193_v15 = vld [vmem:[#allocation284_spill] sm:$0xff]  ;;  %v8265_v4 = vadd.f32 %v2281_v48, %v12196_v20  ;;  %v8269_v47 = vadd.f32 %v7838_v13, %v12197_v51  ;;  %v2694_v44 = vmul.f32 %v12106_v58, %v1944_v32  ;;  %v12200_v48 = vld [vmem:[#allocation270_spill] sm:$0xff] }
 0x406   : > { %12185 = vst [vmem:[#allocation85_spill] sm:$0xff] %v8235_v10  ;;  %12188 = vst [vmem:[#allocation115_spill] sm:$0xff] %v8245_v50  ;;  %v12191_v10 = vld [vmem:[#allocation91_spill] sm:$0xff]  ;;  %v8258_v34 = vadd.f32 %v2693_v63, %v12193_v15  ;;  %v8262_v50 = vadd.f32 %v2282_v27, %v12195_v16  ;;  %v12198_v63 = vld [vmem:[#allocation34_spill] sm:$0xff]  ;;  %v8282_v15 = vadd.f32 %v7894_v1, %v12200_v48  ;;  %v8294_v20 = vpop.permute.xlu0 %1618 }
 0x407   : > { %v8255_v7 = vadd.f32 %v2692_v24, %v12191_v10  ;;  %v1946_v10 = vsel %vm11064_vm14, %v1745_v55, 0.0  ;;  %v1947_v24 = vsel %vm11046_vm15, %v1746_v14, 0.0  ;;  %1730 = vrot.lane.b32.xlu0 %v12198_v63, %s4400_s21  ;;  %v12199_v27 = vld [vmem:[#allocation170_spill] sm:$0xff]  ;;  %v2695_v13 = vmul.f32 %v12106_v58, %v1945_v21  ;;  %v1617_v1 = vpop.permute.xlu1 %1616  ;;  %v12204_v48 = vld [vmem:[#allocation99_spill] sm:$0xff] }
 0x408   : > { %12194 = vst [vmem:[#allocation89_spill] sm:$0xff] %v8258_v34  ;;  %1728 = vrot.lane.b32.xlu1 %v12199_v27, %s4400_s21  ;;  %12201 = vst [vmem:[#allocation5_spill] sm:$0xff] %v8282_v15  ;;  %v8286_v51 = vmul.f32 %v12162_v59, %v1944_v32  ;;  %v1747_v55 = vsel %vm1736_vm10, %v1607_v12, %v1609_v42  ;;  %v1748_v14 = vsel %vm1736_vm10, %v1609_v42, %v8207_v5  ;;  %v12205_v32 = vld [vmem:[#allocation6_spill] sm:$0xff]  ;;  %v12207_v12 = vld [vmem:[#allocation4_spill] sm:$0xff] }
 0x409   : > { %12192 = vst [vmem:[#allocation25_spill] sm:$0xff] %v8255_v7  ;;  %v8292_v16 = vmul.f32 %v12162_v59, %v1945_v21  ;;  %vm11056_vm15 = vcmp.le.f32.partialorder %v6030_v37, 54.5  ;;  %v8299_v34 = vadd.f32 %v2284_v38, %v12204_v48  ;;  %v8303_v7 = vmul.f32 %v12109_v8, %v12205_v32  ;;  %v12209_v27 = vld [vmem:[#allocation26_spill] sm:$0xff]  ;;  %v12244_v37 = vld [vmem:[#allocation17_spill] sm:$0xff] }
 0x40a   : > { %12202 = vst [vmem:[#allocation116_spill] sm:$0xff] %v8286_v51  ;;  %v8307_v42 = vmul.f32 %v12109_v8, %v12207_v12  ;;  %v2285_v21 = vmul.f32 %v12158_v46, %v1946_v10  ;;  %v2286_v63 = vmul.f32 %v12158_v46, %v1947_v24  ;;  %v8312_v23 = vadd.f32 %v2283_v39, %v12209_v27  ;;  %v12212_v12 = vld [vmem:[#allocation230_spill] sm:$0xff]  ;;  %v12214_v39 = vld [vmem:[#allocation7_spill] sm:$0xff]  ;;  %v12224_v51 = vld [vmem:[#allocation105_spill] sm:$0xff] }
 0x40b   : > { %12203 = vst [vmem:[#allocation91_spill] sm:$0xff] %v8292_v16  ;;  %12206 = vst [vmem:[#allocation284_spill] sm:$0xff] %v8303_v7  ;;  %v8316_v16 = vmul.f32 %v12109_v8, %v12210_v30  ;;  %v2696_v38 = vmul.f32 %v12106_v58, %v1946_v10  ;;  %v1948_v48 = vsel %vm11050_vm2, %v1747_v55, 0.0  ;;  %v1949_v32 = vsel %vm11049_vm3, %v1748_v14, 0.0  ;;  %1734 = vrot.lane.b32.xlu0 %v12212_v12, %s4400_s21 }
 0x40c   : > { %12208 = vst [vmem:[#allocation95_spill] sm:$0xff] %v8307_v42  ;;  %v12213_v42 = vld [vmem:[#allocation74_spill] sm:$0xff]  ;;  %v8329_v27 = vmul.f32 %v12109_v8, %v12214_v39  ;;  %v2697_v30 = vmul.f32 %v12106_v58, %v1947_v24  ;;  %v8336_v55 = vmul.f32 %v12162_v59, %v1947_v24  ;;  %v1750_v14 = vsel %vm1736_vm10, %v1613_v18, %v8251_v40  ;;  %v8344_v39 = vpop.permute.xlu0 %1622  ;;  %v12222_v24 = vld [vmem:[#allocation19_spill] sm:$0xff] }
 0x40d   : > { %12211 = vst [vmem:[#allocation94_spill] sm:$0xff] %v8316_v16  ;;  %1732 = vrot.lane.b32.xlu1 %v12213_v42, %s4400_s21  ;;  %v8333_v16 = vmul.f32 %v12162_v59, %v1946_v10  ;;  %vm11063_vm3 = vcmp.le.f32.partialorder %v6060_v52, 54.5  ;;  %vm11062_vm2 = vcmp.le.f32.partialorder %v6068_v6, 54.5  ;;  %v1749_v12 = vsel %vm1736_vm10, %v8207_v5, %v1613_v18  ;;  %v1621_v42 = vpop.permute.xlu1 %1620  ;;  %v12220_v10 = vld [vmem:[#allocation259_spill] sm:$0xff] }
 0x40e   : > { %12215 = vst [vmem:[#allocation149_spill] sm:$0xff] %v8329_v27  ;;  %12217 = vst [vmem:[#allocation99_spill] sm:$0xff] %v8336_v55  ;;  %v12218_v27 = vld [vmem:[#allocation258_spill] sm:$0xff]  ;;  %v8350_v61 = vadd.f32 %v2695_v13, %v12220_v10  ;;  %v8354_v49 = vmul.f32 %v12109_v8, %v12222_v24  ;;  %v2287_v55 = vmul.f32 %v12158_v46, %v1948_v48  ;;  %v12225_v5 = vld [vmem:[#allocation103_spill] sm:$0xff]  ;;  %v1951_v13 = vsel %vm11053_vm4, %v1750_v14, 0.0 }
 0x40f   : > { %12216 = vst [vmem:[#allocation270_spill] sm:$0xff] %v8333_v16  ;;  %v8347_v7 = vadd.f32 %v2694_v44, %v12218_v27  ;;  %v2288_v16 = vmul.f32 %v12158_v46, %v1949_v32  ;;  %v8359_v15 = vadd.f32 %v2286_v63, %v12224_v51  ;;  %v8362_v18 = vadd.f32 %v2285_v21, %v12225_v5  ;;  %v12226_v27 = vld [vmem:[#allocation13_spill] sm:$0xff]  ;;  %v12228_v63 = vld [vmem:[#allocation58_spill] sm:$0xff] }
 0x410   : > { %12221 = vst [vmem:[#allocation4_spill] sm:$0xff] %v8350_v61  ;;  %12223 = vst [vmem:[#allocation26_spill] sm:$0xff] %v8354_v49  ;;  %v2698_v44 = vmul.f32 %v12106_v58, %v1948_v48  ;;  %3326 = vrot.lane.b32.xlu0 %v8196_v2, %s4401_s22  ;;  %v8373_v10 = vmul.f32 %v12109_v8, %v12226_v27  ;;  %v8377_v51 = vmul.f32 %v12109_v8, %v12228_v63  ;;  %v8392_v27 = vpop.permute.xlu0 %1626  ;;  %v12230_v61 = vld [vmem:[#allocation50_spill] sm:$0xff] }
 0x411   : > { %12219 = vst [vmem:[#allocation6_spill] sm:$0xff] %v8347_v7  ;;  %3324 = vrot.lane.b32.xlu1 %v8199_v36, %s4401_s22  ;;  %v2699_v21 = vmul.f32 %v12106_v58, %v1949_v32  ;;  %v8381_v24 = vmul.f32 %v12162_v59, %v1948_v48  ;;  %v8384_v14 = vmul.f32 %v12162_v59, %v1949_v32  ;;  %v1950_v2 = vsel %vm11055_vm5, %v1749_v12, 0.0  ;;  %v1625_v63 = vpop.permute.xlu1 %1624  ;;  %v12232_v48 = vld [vmem:[#allocation219_spill] sm:$0xff]  ;;  %v12234_v12 = vld [vmem:[#allocation21_spill] sm:$0xff] }
 0x412   : > { %12227 = vst [vmem:[#allocation15_spill] sm:$0xff] %v8373_v10  ;;  %12229 = vst [vmem:[#allocation7_spill] sm:$0xff] %v8377_v51  ;;  %v1751_v36 = vsel %vm1736_vm10, %v8251_v40, %v1617_v1  ;;  %v1752_v5 = vsel %vm1736_vm10, %v1617_v1, %v8294_v20  ;;  %v8395_v7 = vadd.f32 %v2696_v38, %v12230_v61  ;;  %vm823_vm4 = vcmp.le.f32.partialorder %v6084_v19, 54.5  ;;  %v12235_v40 = vld [vmem:[#allocation24_spill] sm:$0xff]  ;;  %v12236_v1 = vld [vmem:[#allocation271_spill] sm:$0xff] }
 0x413   : > { %v8398_v51 = vadd.f32 %v2697_v30, %v12232_v48  ;;  %v2290_v32 = vmul.f32 %v12158_v46, %v1951_v13  ;;  %v8403_v10 = vadd.f32 %v2288_v16, %v12234_v12  ;;  %v8406_v49 = vadd.f32 %v2287_v55, %v12235_v40  ;;  %v12237_v16 = vld [vmem:[#allocation272_spill] sm:$0xff] }
 0x414   : > { %12231 = vst [vmem:[#allocation258_spill] sm:$0xff] %v8395_v7  ;;  %v8410_v22 = vadd.f32 %v7898_v57, %v12236_v1  ;;  %v2289_v61 = vmul.f32 %v12158_v46, %v1950_v2  ;;  %v2700_v38 = vmul.f32 %v12106_v58, %v1950_v2  ;;  %vm824_vm5 = vcmp.le.f32.partialorder %v6104_v31, 54.5  ;;  %3330 = vrot.lane.b32.xlu0 %v8228_v28, %s4401_s22  ;;  %v8435_v40 = vpop.permute.xlu0 %1630  ;;  %v12238_v1 = vld [vmem:[#allocation262_spill] sm:$0xff]  ;;  %v12243_v7 = vld [vmem:[#allocation160_spill] sm:$0xff] }
 0x415   : > { %12233 = vst [vmem:[#allocation259_spill] sm:$0xff] %v8398_v51  ;;  %3328 = vrot.lane.b32.xlu1 %v8231_v3, %s4401_s22  ;;  %v8421_v30 = vadd.f32 %v7986_v11, %v12237_v16  ;;  %v1952_v57 = vsel %vm11061_vm8, %v1751_v36, 0.0  ;;  %v1953_v55 = vsel %vm11056_vm15, %v1752_v5, 0.0  ;;  %v1753_v48 = vsel %vm1736_vm10, %v8294_v20, %v1621_v42  ;;  %v1629_v11 = vpop.permute.xlu1 %1628  ;;  %v12240_v36 = vld [vmem:[#allocation263_spill] sm:$0xff]  ;;  %v12242_v20 = vld [vmem:[#allocation132_spill] sm:$0xff]  ;;  %v12273_v31 = vld [vmem:[#allocation118_spill] sm:$0xff] }
 0x416   : > { %v1754_v12 = vsel %vm1736_vm10, %v1621_v42, %v8344_v39  ;;  %v2701_v28 = vmul.f32 %v12106_v58, %v1951_v13  ;;  %v8433_v3 = vmul.f32 %v12162_v59, %v1950_v2  ;;  %v8438_v16 = vadd.f32 %v2698_v44, %v12238_v1 }
 0x417   : > { %v8441_v51 = vadd.f32 %v2699_v21, %v12240_v36  ;;  %v8444_v5 = vmul.f32 %v12162_v59, %v1951_v13  ;;  %vm825_vm15 = vcmp.le.f32.partialorder %v6116_v60, 54.5  ;;  %v8448_v42 = vadd.f32 %v2290_v32, %v12242_v20  ;;  %v12247_v32 = vld [vmem:[#allocation60_spill] sm:$0xff]  ;;  %v12275_v60 = vld [vmem:[#allocation174_spill] sm:$0xff] }
 0x418   : > { %12239 = vst [vmem:[#allocation19_spill] sm:$0xff] %v8438_v16  ;;  %v8452_v2 = vadd.f32 %v7990_v54, %v12243_v7  ;;  %v8456_v26 = vmul.f32 %v12109_v8, %v12244_v37  ;;  %v2291_v44 = vmul.f32 %v12158_v46, %v1952_v57  ;;  %v2292_v21 = vmul.f32 %v12158_v46, %v1953_v55  ;;  %v12246_v54 = vld [vmem:[#allocation131_spill] sm:$0xff]  ;;  %v12251_v16 = vld [vmem:[#allocation2_spill] sm:$0xff] }
 0x419   : > { %12241 = vst [vmem:[#allocation105_spill] sm:$0xff] %v8441_v51  ;;  %v1954_v13 = vsel %vm11063_vm3, %v1753_v48, 0.0  ;;  %v1955_v1 = vsel %vm11062_vm2, %v1754_v12, 0.0  ;;  %vm826_vm8 = vcmp.le.f32.partialorder %v6128_v56, 54.5  ;;  %3334 = vrot.lane.b32.xlu0 %v8262_v50, %s4401_s22  ;;  %3332 = vrot.lane.b32.xlu1 %v8265_v4, %s4401_s22  ;;  %v2702_v37 = vmul.f32 %v12106_v58, %v1952_v57  ;;  %v12249_v48 = vld [vmem:[#allocation59_spill] sm:$0xff]  ;;  %v1635_v51 = vpop.permute.xlu0 %1634  ;;  %v1633_v4 = vpop.permute.xlu1 %1632 }
 0x41a   : > { %12245 = vst [vmem:[#allocation103_spill] sm:$0xff] %v8456_v26  ;;  %v8471_v7 = vadd.f32 %v2289_v61, %v12246_v54  ;;  %v8475_v36 = vmul.f32 %v12109_v8, %v12247_v32  ;;  %v8479_v12 = vmul.f32 %v12109_v8, %v12249_v48  ;;  %v2703_v20 = vmul.f32 %v12106_v58, %v1953_v55  ;;  %v12253_v61 = vld [vmem:[#allocation135_spill] sm:$0xff] }
 0x41b   : > { %v8483_v50 = vmul.f32 %v12162_v59, %v1952_v57  ;;  %v8486_v26 = vadd.f32 %v2700_v38, %v12251_v16  ;;  %v8489_v54 = vadd.f32 %v2701_v28, %v12253_v61  ;;  %v2293_v32 = vmul.f32 %v12158_v46, %v1954_v13  ;;  %v12255_v38 = vld [vmem:[#allocation3_spill] sm:$0xff]  ;;  %v12256_v16 = vld [vmem:[#allocation57_spill] sm:$0xff] }
 0x41c   : > { %12248 = vst [vmem:[#allocation13_spill] sm:$0xff] %v8475_v36  ;;  %12250 = vst [vmem:[#allocation58_spill] sm:$0xff] %v8479_v12  ;;  %v2294_v36 = vmul.f32 %v12158_v46, %v1955_v1  ;;  %v1755_v8 = vsel %vm1736_vm10, %v8344_v39, %v1625_v63  ;;  %v1756_v48 = vsel %vm1736_vm10, %v1625_v63, %v8392_v27  ;;  %vm1884_vm2 = vcmask 515072   ;;  %v12260_v12 = vld [vmem:[#allocation61_spill] sm:$0xff] }
 0x41d   : > { %12252 = vst [vmem:[#allocation50_spill] sm:$0xff] %v8486_v26  ;;  %12254 = vst [vmem:[#allocation219_spill] sm:$0xff] %v8489_v54  ;;  %v8498_v57 = vmul.f32 %v12162_v59, %v1953_v55  ;;  %vm827_vm3 = vcmp.le.f32.partialorder %v6163_v0, 54.5  ;;  %3338 = vrot.lane.b32.xlu0 %v8299_v34, %s4401_s22  ;;  %3336 = vrot.lane.b32.xlu1 %v8312_v23, %s4401_s22  ;;  %v8506_v28 = vadd.f32 %v2292_v21, %v12255_v38  ;;  %v12257_v55 = vld [vmem:[#allocation62_spill] sm:$0xff]  ;;  %v12258_v54 = vld [vmem:[#allocation52_spill] sm:$0xff] }
 0x41e   : > { %v8509_v39 = vadd.f32 %v2291_v44, %v12256_v16  ;;  %v2704_v63 = vmul.f32 %v12106_v58, %v1954_v13  ;;  %v2705_v61 = vmul.f32 %v12106_v58, %v1955_v1  ;;  %v8515_v26 = vmul.f32 %v12258_v54, %v12257_v55  ;;  %v8532_v16 = vpop.permute.xlu0 %1638  ;;  %v1637_v55 = vpop.permute.xlu1 %1636 }
 0x41f   : > { %v8519_v34 = vmul.f32 %v12258_v54, %v12260_v12  ;;  %v8522_v23 = vmul.f32 %v12162_v59, %v1954_v13  ;;  %v8525_v21 = vmul.f32 %v12162_v59, %v1955_v1  ;;  %v1956_v44 = vsel %vm823_vm4, %v1755_v8, 0.0 }
 0x420   : > { %12259 = vst [vmem:[#allocation21_spill] sm:$0xff] %v8515_v26  ;;  %v1957_v38 = vsel %vm824_vm5, %v1756_v48, 0.0  ;;  %vm829_vm14 = vcmp.le.f32.partialorder %v6258_v53, 54.5  ;;  %v1757_v12 = vsel %vm1736_vm10, %v8392_v27, %v1629_v11  ;;  %v1761_v13 = vsel %vm1736_vm10, %v1637_v55, %v8532_v16  ;;  %v12263_v26 = vld [vmem:[#allocation265_spill] sm:$0xff] }
 0x421   : > { %12261 = vst [vmem:[#allocation24_spill] sm:$0xff] %v8519_v34  ;;  %v12262_v34 = vld [vmem:[#allocation266_spill] sm:$0xff]  ;;  %v8542_v19 = vadd.f32 %v2293_v32, %v12263_v26  ;;  %v1758_v8 = vsel %vm1736_vm10, %v1629_v11, %v8435_v40  ;;  %v8548_v48 = vsel %vm11072_vm6, %v1761_v13, 0.0  ;;  %3342 = vrot.lane.b32.xlu0 %v8359_v15, %s4401_s22  ;;  %3340 = vrot.lane.b32.xlu1 %v8362_v18, %s4401_s22  ;;  %v12267_v32 = vld [vmem:[#allocation23_spill] sm:$0xff]  ;;  %v12268_v13 = vld [vmem:[#allocation44_spill] sm:$0xff]  ;;  %vm828_vm6 = vcmp.le.f32.partialorder %v12275_v60, 54.5 }
 0x422   : > { %v8539_v1 = vadd.f32 %v2294_v36, %v12262_v34  ;;  %v8555_v27 = vadd.f32 %v2702_v37, %v7928_v25  ;;  %v12265_v36 = vld [vmem:[#allocation251_spill] sm:$0xff]  ;;  %v2296_v26 = vmul.f32 %v12158_v46, %v1957_v38  ;;  %v2706_v11 = vmul.f32 %v12106_v58, %v1956_v44  ;;  %v8571_v18 = vpop.permute.xlu0 %1642  ;;  %v1641_v37 = vpop.permute.xlu1 %1640 }
 0x423   : > { %v8558_v34 = vadd.f32 %v2703_v20, %v12265_v36  ;;  %v3124_v55 = vmul.f32 %v12267_v32, %v8548_v48  ;;  %v8566_v41 = vadd.f32 %v8082_v35, %v12268_v13  ;;  %v2707_v15 = vmul.f32 %v12106_v58, %v1957_v38  ;;  %v12271_v13 = vld [vmem:[#allocation40_spill] sm:$0xff] }
 0x424   : > { %12264 = vst [vmem:[#allocation271_spill] sm:$0xff] %v8555_v27  ;;  %v1958_v25 = vsel %vm825_vm15, %v1757_v12, 0.0  ;;  %v8574_v20 = vadd.f32 %v2704_v63, %v8061_v9  ;;  %v8577_v36 = vadd.f32 %v2705_v61, %v8065_v17  ;;  %v1959_v35 = vsel %vm826_vm8, %v1758_v8, 0.0  ;;  %v12276_v63 = vld [vmem:[#allocation86_spill] sm:$0xff] }
 0x425   : > { %12266 = vst [vmem:[#allocation272_spill] sm:$0xff] %v8558_v34  ;;  %v2295_v34 = vmul.f32 %v12158_v46, %v1956_v44  ;;  %v8583_v27 = vadd.f32 %v3124_v55, %v12271_v13  ;;  %v8587_v12 = vmul.f32 %v12258_v54, %v12273_v31  ;;  %v1759_v9 = vsel %vm1736_vm10, %v8435_v40, %v1633_v4  ;;  %v12278_v55 = vld [vmem:[#allocation36_spill] sm:$0xff] }
 0x426   : > { %12269 = vst [vmem:[#allocation262_spill] sm:$0xff] %v8574_v20  ;;  %12270 = vst [vmem:[#allocation263_spill] sm:$0xff] %v8577_v36  ;;  %v1760_v17 = vsel %vm1736_vm10, %v1633_v4, %v1635_v51  ;;  %3346 = vrot.lane.b32.xlu0 %v8403_v10, %s4401_s22  ;;  %3344 = vrot.lane.b32.xlu1 %v8406_v49, %s4401_s22  ;;  %v8599_v61 = vadd.f32 %v8152_v43, %v12276_v63  ;;  %v1885_v13 = vsel %vm1884_vm2, %v1635_v51, 0.0  ;;  %v8613_v49 = vpop.permute.xlu0 %1646  ;;  %v1645_v36 = vpop.permute.xlu1 %1644 }
 0x427   : > { %12272 = vst [vmem:[#allocation132_spill] sm:$0xff] %v8583_v27  ;;  %12274 = vst [vmem:[#allocation160_spill] sm:$0xff] %v8587_v12  ;;  %v8602_v31 = vmul.f32 %v12162_v59, %v1956_v44  ;;  %v8605_v8 = vmul.f32 %v12162_v59, %v1957_v38  ;;  %v2708_v40 = vmul.f32 %v12106_v58, %v1958_v25  ;;  %v1960_v63 = vsel %vm827_vm3, %v1759_v9, 0.0 }
 0x428   : > { %12277 = vst [vmem:[#allocation17_spill] sm:$0xff] %v8599_v61  ;;  %v8609_v4 = vadd.f32 %v2296_v26, %v12278_v55  ;;  %v2709_v10 = vmul.f32 %v12106_v58, %v1959_v35  ;;  %v8616_v43 = vadd.f32 %v2706_v11, %v8172_v45  ;;  %v8619_v44 = vadd.f32 %v2707_v15, %v8176_v29  ;;  %v12281_v55 = vld [vmem:[#allocation268_spill] sm:$0xff]  ;;  %v12282_v29 = vld [vmem:[#allocation11_spill] sm:$0xff] }
 0x429   : > { %v2298_v38 = vmul.f32 %v12158_v46, %v1959_v35  ;;  %v1961_v26 = vsel %vm828_vm6, %v1760_v17, 0.0  ;;  %v2370_v20 = vadd.f32 %v2295_v34, %v12281_v55  ;;  %v2297_v51 = vmul.f32 %v12158_v46, %v1958_v25  ;;  %v12284_v11 = vld [vmem:[#allocation88_spill] sm:$0xff]  ;;  %v12285_v15 = vld [vmem:[#allocation111_spill] sm:$0xff]  ;;  %v12287_v55 = vld [vmem:[#allocation165_spill] sm:$0xff] }
 0x42a   : > { %12279 = vst [vmem:[#allocation131_spill] sm:$0xff] %v8616_v43  ;;  %12280 = vst [vmem:[#allocation60_spill] sm:$0xff] %v8619_v44  ;;  %3350 = vrot.lane.b32.xlu0 %v8448_v42, %s4401_s22  ;;  %3348 = vrot.lane.b32.xlu1 %v8471_v7, %s4401_s22  ;;  %v8634_v45 = vadd.f32 %v8190_v33, %v12282_v29  ;;  %v8638_v9 = vadd.f32 %v12285_v15, %v12284_v11  ;;  %v1962_v34 = vsel %vm829_vm14, %v1885_v13, 0.0  ;;  %v12288_v44 = vld [vmem:[#allocation256_spill] sm:$0xff]  ;;  %v12289_v43 = vld [vmem:[#allocation273_spill] sm:$0xff]  ;;  %v8655_v11 = vpop.permute.xlu0 %1650  ;;  %v1649_v15 = vpop.permute.xlu1 %1648 }
 0x42b   : > { %v8641_v17 = vmul.f32 %v12162_v59, %v1958_v25  ;;  %v8647_v42 = vadd.f32 %v12288_v44, %v12287_v55  ;;  %v12290_v7 = vld [vmem:[#allocation261_spill] sm:$0xff]  ;;  %v2710_v33 = vmul.f32 %v12106_v58, %v1960_v63  ;;  %v2711_v29 = vmul.f32 %v12106_v58, %v1961_v26 }
 0x42c   : > { %12283 = vst [vmem:[#allocation59_spill] sm:$0xff] %v8634_v45  ;;  %12286 = vst [vmem:[#allocation2_spill] sm:$0xff] %v8638_v9  ;;  %v8651_v27 = vadd.f32 %v12290_v7, %v12289_v43  ;;  %v8658_v25 = vadd.f32 %v2708_v40, %v8269_v47  ;;  %v12292_v9 = vld [vmem:[#allocation5_spill] sm:$0xff]  ;;  %v8664_v44 = vmul.f32 %v12162_v59, %v1959_v35  ;;  %v12294_v7 = vld [vmem:[#allocation152_spill] sm:$0xff] }
 0x42d   : > { %v8661_v13 = vadd.f32 %v2709_v10, %v12292_v9  ;;  %v2299_v55 = vmul.f32 %v12158_v46, %v1960_v63  ;;  %v2300_v43 = vmul.f32 %v12158_v46, %v1961_v26  ;;  %v2373_v45 = vadd.f32 %v2298_v38, %v12294_v7  ;;  %v12295_v47 = vld [vmem:[#allocation151_spill] sm:$0xff]  ;;  %v12297_v10 = vld [vmem:[#allocation49_spill] sm:$0xff]  ;;  %v12299_v35 = vld [vmem:[#allocation90_spill] sm:$0xff] }
 0x42e   : > { %12291 = vst [vmem:[#allocation135_spill] sm:$0xff] %v8658_v25  ;;  %3354 = vrot.lane.b32.xlu0 %v8506_v28, %s4401_s22  ;;  %3352 = vrot.lane.b32.xlu1 %v8509_v39, %s4401_s22  ;;  %v2372_v40 = vadd.f32 %v2297_v51, %v12295_v47  ;;  %v12296_v25 = vld [vmem:[#allocation97_spill] sm:$0xff]  ;;  %v2301_v12 = vmul.f32 %v12158_v46, %v1962_v34  ;;  %v8695_v47 = vpop.permute.xlu0 %1654 }
 0x42f   : > { %12293 = vst [vmem:[#allocation3_spill] sm:$0xff] %v8661_v13  ;;  %v8676_v9 = vadd.f32 %v12297_v10, %v12296_v25  ;;  %v12300_v13 = vld [vmem:[#allocation113_spill] sm:$0xff]  ;;  %v8684_v38 = vmul.f32 %v12162_v59, %v1962_v34  ;;  %v1762_v28 = vsel %vm1736_vm10, %v8532_v16, %v1641_v37  ;;  %v1763_v39 = vsel %vm1736_vm10, %v1641_v37, %v8571_v18  ;;  %v12302_v25 = vld [vmem:[#allocation48_spill] sm:$0xff]  ;;  %v12306_v37 = vld [vmem:[#allocation42_spill] sm:$0xff] }
 0x430   : > { %v8680_v61 = vadd.f32 %v12300_v13, %v12299_v35  ;;  %v8691_v51 = vmul.f32 %v12162_v59, %v1960_v63  ;;  %v2713_v7 = vmul.f32 %v12302_v25, %v8548_v48  ;;  %v1653_v13 = vpop.permute.xlu1 %1652  ;;  %v8698_v46 = vadd.f32 %v2710_v33, %v8410_v22  ;;  %v12307_v63 = vld [vmem:[#allocation22_spill] sm:$0xff] }
 0x431   : > { %12298 = vst [vmem:[#allocation57_spill] sm:$0xff] %v8676_v9  ;;  %v8701_v10 = vadd.f32 %v2711_v29, %v8421_v30  ;;  %v8704_v16 = vmul.f32 %v12162_v59, %v1961_v26  ;;  %v2302_v35 = vmul.f32 %v12306_v37, %v8548_v48  ;;  %v12308_v9 = vld [vmem:[#allocation38_spill] sm:$0xff]  ;;  %v1964_v53 = vsel %vm806_vm7, %v1762_v28, 0.0  ;;  %v12311_v59 = vld [vmem:[#allocation12_spill] sm:$0xff] }
 0x432   : > { %12301 = vst [vmem:[#allocation62_spill] sm:$0xff] %v8680_v61  ;;  %12303 = vst [vmem:[#allocation61_spill] sm:$0xff] %v8698_v46  ;;  %v8709_v61 = vadd.f32 %v2300_v43, %v12307_v63  ;;  %v8712_v54 = vadd.f32 %v2299_v55, %v12308_v9  ;;  %v1965_v33 = vsel %vm807_vm13, %v1763_v39, 0.0  ;;  %3358 = vrot.lane.b32.xlu0 %v8539_v1, %s4401_s22  ;;  %3356 = vrot.lane.b32.xlu1 %v8542_v19, %s4401_s22  ;;  %v12312_v30 = vld [vmem:[#allocation116_spill] sm:$0xff]  ;;  %v12314_v26 = vld [vmem:[#allocation98_spill] sm:$0xff] }
 0x433   : > { %12304 = vst [vmem:[#allocation266_spill] sm:$0xff] %v8701_v10  ;;  %12305 = vst [vmem:[#allocation265_spill] sm:$0xff] %v8704_v16  ;;  %v8724_v48 = vadd.f32 %v12312_v30, %v12311_v59  ;;  %v12315_v29 = vld [vmem:[#allocation114_spill] sm:$0xff]  ;;  %v1764_v43 = vsel %vm1736_vm10, %v8571_v18, %v1645_v36  ;;  %v1765_v9 = vsel %vm1736_vm10, %v1645_v36, %v8613_v49  ;;  %v8739_v10 = vpop.permute.xlu0 %1658  ;;  %v12324_v18 = vld [vmem:[#allocation309_spill] sm:$0xff] }
 0x434   : > { %v8728_v55 = vadd.f32 %v12315_v29, %v12314_v26  ;;  %v12317_v28 = vld [vmem:[#allocation10_spill] sm:$0xff]  ;;  %v1657_v59 = vpop.permute.xlu1 %1656  ;;  %v8742_v30 = vadd.f32 %v2713_v7, %v8452_v2  ;;  %v12321_v26 = vld [vmem:[#allocation275_spill] sm:$0xff]  ;;  %v12322_v29 = vld [vmem:[#allocation308_spill] sm:$0xff]  ;;  %v2715_v2 = vmul.f32 %v12302_v25, %v1965_v33 }
 0x435   : > { %12313 = vst [vmem:[#allocation251_spill] sm:$0xff] %v8724_v48  ;;  %v8735_v39 = vadd.f32 %v2301_v12, %v12317_v28  ;;  %v12318_v1 = vld [vmem:[#allocation274_spill] sm:$0xff]  ;;  %v2630_v46 = vadd.f32 %v12322_v29, %v12321_v26  ;;  %v12325_v36 = vld [vmem:[#allocation277_spill] sm:$0xff]  ;;  %v1966_v26 = vsel %vm808_vm12, %v1764_v43, 0.0  ;;  %v1767_v43 = vsel %vm1736_vm10, %v1649_v15, %v8655_v11  ;;  %v12334_v29 = vld [vmem:[#allocation112_spill] sm:$0xff] }
 0x436   : > { %12316 = vst [vmem:[#allocation23_spill] sm:$0xff] %v8728_v55  ;;  %v12319_v63 = vld [vmem:[#allocation306_spill] sm:$0xff]  ;;  %12320 = vst [vmem:[#allocation44_spill] sm:$0xff] %v8742_v30  ;;  %v12323_v55 = vld [vmem:[#allocation276_spill] sm:$0xff]  ;;  %3362 = vrot.lane.b32.xlu0 %v8609_v4, %s4401_s22  ;;  %3360 = vrot.lane.b32.xlu1 %v2370_v20, %s4401_s22  ;;  %v1766_v30 = vsel %vm1736_vm10, %v8613_v49, %v1649_v15  ;;  %v8782_v20 = vmul.f32 %v12267_v32, %v1964_v53 }
 0x437   : > { %v2629_v19 = vadd.f32 %v12319_v63, %v12318_v1  ;;  %v8748_v48 = vadd.f32 %v12324_v18, %v12323_v55  ;;  %v12326_v22 = vld [vmem:[#allocation310_spill] sm:$0xff]  ;;  %v2304_v1 = vmul.f32 %v12306_v37, %v1965_v33  ;;  %v2714_v63 = vmul.f32 %v12302_v25, %v1964_v53  ;;  %v8787_v4 = vpop.permute.xlu0 %1662  ;;  %v12338_v49 = vld [vmem:[#allocation100_spill] sm:$0xff]  ;;  %v12354_v16 = vld [vmem:[#allocation31_spill] sm:$0xff] }
 0x438   : > { %v8752_v12 = vadd.f32 %v12326_v22, %v12325_v36  ;;  %v12327_v28 = vld [vmem:[#allocation158_spill] sm:$0xff]  ;;  %v1967_v55 = vsel %vm809_vm0, %v1765_v9, 0.0  ;;  %12335 = vst [vmem:[#allocation118_spill] sm:$0xff] %v8782_v20 }
 0x439   : > { %v8755_v60 = vadd.f32 %v2302_v35, %v12327_v28  ;;  %v2712_v35 = vmul.f32 %v12106_v58, %v1962_v34  ;;  %v12330_v22 = vld [vmem:[#allocation106_spill] sm:$0xff]  ;;  %v2303_v28 = vmul.f32 %v12306_v37, %v1964_v53  ;;  %v8785_v58 = vmul.f32 %v12267_v32, %v1965_v33  ;;  %v1661_v34 = vpop.permute.xlu1 %1660 }
 0x43a   : > { %v12331_v18 = vld [vmem:[#allocation270_spill] sm:$0xff]  ;;  %v2306_v15 = vmul.f32 %v12306_v37, %v1967_v55  ;;  %v2717_v53 = vmul.f32 %v12302_v25, %v1967_v55  ;;  %3366 = vrot.lane.b32.xlu0 %v2373_v45, %s4401_s22  ;;  %3364 = vrot.lane.b32.xlu1 %v2372_v40, %s4401_s22  ;;  %v8821_v45 = vmul.f32 %v12267_v32, %v1966_v26 }
 0x43b   : > { %v8770_v36 = vadd.f32 %v12331_v18, %v12330_v22  ;;  %v12333_v9 = vld [vmem:[#allocation278_spill] sm:$0xff]  ;;  %12336 = vst [vmem:[#allocation86_spill] sm:$0xff] %v8785_v58  ;;  %v8790_v22 = vadd.f32 %v2712_v35, %v8566_v41  ;;  %v12339_v18 = vld [vmem:[#allocation91_spill] sm:$0xff]  ;;  %v1968_v58 = vsel %vm810_vm1, %v1766_v30, 0.0  ;;  %v1969_v41 = vsel %vm11077_vm9, %v1767_v43, 0.0 }
 0x43c   : > { %v8779_v7 = vadd.f32 %v12334_v29, %v12333_v9  ;;  %v2716_v29 = vmul.f32 %v12302_v25, %v1966_v26  ;;  %v12341_v9 = vld [vmem:[#allocation166_spill] sm:$0xff]  ;;  %v8809_v35 = vadd.f32 %v2714_v63, %v8647_v42  ;;  %v1769_v30 = vsel %vm1736_vm10, %v1653_v13, %v8695_v47  ;;  %v8826_v42 = vpop.permute.xlu0 %1666  ;;  %v12347_v63 = vld [vmem:[#allocation72_spill] sm:$0xff] }
 0x43d   : > { %12332 = vst [vmem:[#allocation40_spill] sm:$0xff] %v8770_v36  ;;  %12337 = vst [vmem:[#allocation36_spill] sm:$0xff] %v8790_v22  ;;  %v8794_v36 = vadd.f32 %v12339_v18, %v12338_v49  ;;  %v8800_v20 = vadd.f32 %v2304_v1, %v12341_v9  ;;  %v8812_v49 = vadd.f32 %v2715_v2, %v8651_v27  ;;  %v12346_v9 = vld [vmem:[#allocation164_spill] sm:$0xff]  ;;  %v8828_v27 = vpop.permute.xlu1 %1664  ;;  %v12353_v22 = vld [vmem:[#allocation127_spill] sm:$0xff]  ;;  %vm12355_vm9 = vcmp.le.f32.partialorder %v12354_v16, 54.5 }
 0x43e   : > { %12344 = vst [vmem:[#allocation11_spill] sm:$0xff] %v8809_v35  ;;  %v2305_v18 = vmul.f32 %v12306_v37, %v1966_v26  ;;  %v1768_v1 = vsel %vm1736_vm10, %v8655_v11, %v1653_v13  ;;  %v2378_v43 = vadd.f32 %v2303_v28, %v12346_v9  ;;  %v8824_v40 = vmul.f32 %v12267_v32, %v1967_v55  ;;  %v12349_v11 = vld [vmem:[#allocation107_spill] sm:$0xff]  ;;  %v12352_v55 = vld [vmem:[#allocation172_spill] sm:$0xff] }
 0x43f   : > { %12340 = vst [vmem:[#allocation268_spill] sm:$0xff] %v8794_v36  ;;  %12345 = vst [vmem:[#allocation88_spill] sm:$0xff] %v8812_v49  ;;  %v8832_v2 = vadd.f32 %v8381_v24, %v12347_v63  ;;  %v12350_v49 = vld [vmem:[#allocation99_spill] sm:$0xff]  ;;  %v2308_v13 = vmul.f32 %v12306_v37, %v1969_v41  ;;  %v2718_v26 = vmul.f32 %v12302_v25, %v1968_v58  ;;  %v1970_v36 = vsel %vm11078_vm11, %v1768_v1, 0.0 }
 0x440   : > { %v8836_v35 = vadd.f32 %v12350_v49, %v12349_v11  ;;  %v2719_v28 = vmul.f32 %v12302_v25, %v1969_v41  ;;  %v2381_v9 = vadd.f32 %v2306_v15, %v12352_v55  ;;  %v1971_v33 = vsel %vm12355_vm9, %v1769_v30, 0.0  ;;  %3370 = vrot.lane.b32.xlu0 %v8709_v61, %s4401_s22  ;;  %3368 = vrot.lane.b32.xlu1 %v8712_v54, %s4401_s22  ;;  %v12358_v11 = vld [vmem:[#allocation169_spill] sm:$0xff]  ;;  %v8866_v54 = vpop.permute.xlu0 %1670 }
 0x441   : > { %12348 = vst [vmem:[#allocation111_spill] sm:$0xff] %v8832_v2  ;;  %v8850_v24 = vadd.f32 %v2716_v29, %v2629_v19  ;;  %v8852_v49 = vadd.f32 %v2717_v53, %v2630_v46  ;;  %v2307_v63 = vmul.f32 %v12306_v37, %v1968_v58  ;;  %v1770_v15 = vsel %vm1736_vm10, %v8695_v47, %v1657_v59  ;;  %v1669_v46 = vpop.permute.xlu1 %1668  ;;  %v12359_v19 = vld [vmem:[#allocation136_spill] sm:$0xff]  ;;  %v12361_v53 = vld [vmem:[#allocation129_spill] sm:$0xff] }
 0x442   : > { %12351 = vst [vmem:[#allocation165_spill] sm:$0xff] %v8836_v35  ;;  %v1771_v1 = vsel %vm1736_vm10, %v1657_v59, %v8739_v10  ;;  %v2380_v30 = vadd.f32 %v2305_v18, %v12358_v11  ;;  %v8861_v55 = vmul.f32 %v12267_v32, %v1968_v58  ;;  %v8864_v61 = vmul.f32 %v12267_v32, %v1969_v41  ;;  %v12363_v11 = vld [vmem:[#allocation177_spill] sm:$0xff]  ;;  %v12366_v35 = vld [vmem:[#allocation139_spill] sm:$0xff] }
 0x443   : > { %12356 = vst [vmem:[#allocation256_spill] sm:$0xff] %v8850_v24  ;;  %12357 = vst [vmem:[#allocation273_spill] sm:$0xff] %v8852_v49  ;;  %v8870_v29 = vadd.f32 %v8433_v3, %v12359_v19  ;;  %v8874_v47 = vadd.f32 %v8384_v14, %v12361_v53  ;;  %v2310_v59 = vmul.f32 %v12306_v37, %v1971_v33  ;;  %v12364_v49 = vld [vmem:[#allocation130_spill] sm:$0xff]  ;;  %vm12367_vm11 = vcmp.le.f32.partialorder %v12366_v35, 54.5  ;;  %v12370_v53 = vld [vmem:[#allocation176_spill] sm:$0xff] }
 0x444   : > { %v2720_v18 = vmul.f32 %v12302_v25, %v1970_v36  ;;  %v2721_v58 = vmul.f32 %v12302_v25, %v1971_v33  ;;  %v8880_v41 = vadd.f32 %v2308_v13, %v12363_v11  ;;  %vm12365_vm9 = vcmp.le.f32.partialorder %v12364_v49, 54.5  ;;  %3372 = vrot.lane.b32.xlu1 %v8735_v39, %s4401_s22  ;;  %3374 = vrot.lane.b32.xlu0 %v8755_v60, %s4401_s22  ;;  %v8905_v60 = vpop.permute.xlu0 %1674  ;;  %v12378_v2 = vld [vmem:[#allocation33_spill] sm:$0xff] }
 0x445   : > { %12360 = vst [vmem:[#allocation261_spill] sm:$0xff] %v8870_v29  ;;  %12362 = vst [vmem:[#allocation5_spill] sm:$0xff] %v8874_v47  ;;  %v1972_v24 = vsel %vm12365_vm9, %v1770_v15, 0.0  ;;  %v1973_v3 = vsel %vm12367_vm11, %v1771_v1, 0.0  ;;  %v8891_v14 = vadd.f32 %v2718_v26, %v8748_v48  ;;  %v8894_v19 = vadd.f32 %v2719_v28, %v8752_v12  ;;  %v1673_v48 = vpop.permute.xlu1 %1672  ;;  %v12371_v26 = vld [vmem:[#allocation140_spill] sm:$0xff]  ;;  %v12373_v28 = vld [vmem:[#allocation137_spill] sm:$0xff] }
 0x446   : > { %v2309_v13 = vmul.f32 %v12306_v37, %v1970_v36  ;;  %v1772_v15 = vsel %vm1736_vm10, %v8739_v10, %v1661_v34  ;;  %v1773_v1 = vsel %vm1736_vm10, %v1661_v34, %v8787_v4  ;;  %v2382_v11 = vadd.f32 %v2307_v63, %v12370_v53  ;;  %v12375_v10 = vld [vmem:[#allocation279_spill] sm:$0xff]  ;;  %v12377_v53 = vld [vmem:[#allocation181_spill] sm:$0xff] }
 0x447   : > { %12368 = vst [vmem:[#allocation152_spill] sm:$0xff] %v8891_v14  ;;  %12369 = vst [vmem:[#allocation151_spill] sm:$0xff] %v8894_v19  ;;  %v8903_v39 = vmul.f32 %v12267_v32, %v1970_v36  ;;  %v8909_v12 = vadd.f32 %v8483_v50, %v12371_v26  ;;  %v8913_v19 = vadd.f32 %v8444_v5, %v12373_v28  ;;  %v12376_v14 = vld [vmem:[#allocation45_spill] sm:$0xff]  ;;  %vm12379_vm11 = vcmp.le.f32.partialorder %v12378_v2, 54.5  ;;  %v12383_v28 = vld [vmem:[#allocation180_spill] sm:$0xff] }
 0x448   : > { %v2634_v47 = vadd.f32 %v12376_v14, %v12375_v10  ;;  %v8918_v34 = vmul.f32 %v12267_v32, %v1971_v33  ;;  %v2311_v36 = vmul.f32 %v12306_v37, %v1972_v24  ;;  %v2312_v63 = vmul.f32 %v12306_v37, %v1973_v3  ;;  %3378 = vrot.lane.b32.xlu0 %v8800_v20, %s4401_s22 }
 0x449   : > { %12372 = vst [vmem:[#allocation97_spill] sm:$0xff] %v8909_v12  ;;  %12374 = vst [vmem:[#allocation49_spill] sm:$0xff] %v8913_v19  ;;  %v8923_v29 = vadd.f32 %v2310_v59, %v12377_v53  ;;  %v1974_v50 = vsel %vm12379_vm11, %v1772_v15, 0.0  ;;  %vm12380_vm9 = vcmp.le.f32.partialorder %v12190_v62, 54.5  ;;  %3376 = vrot.lane.b32.xlu1 %v2378_v43, %s4401_s22  ;;  %v8933_v33 = vadd.f32 %v2720_v18, %v8779_v7  ;;  %v8949_v7 = vpop.permute.xlu0 %1678  ;;  %v8951_v43 = vpop.permute.xlu1 %1676  ;;  %v12395_v12 = vld [vmem:[#allocation35_spill] sm:$0xff] }
 0x44a   : > { %v1975_v5 = vsel %vm12380_vm9, %v1773_v1, 0.0  ;;  %v8935_v14 = vadd.f32 %v2721_v58, %v2634_v47  ;;  %v2722_v26 = vmul.f32 %v12302_v25, %v1972_v24  ;;  %v2723_v59 = vmul.f32 %v12302_v25, %v1973_v3  ;;  %v12384_v47 = vld [vmem:[#allocation65_spill] sm:$0xff] }
 0x44b   : > { %12381 = vst [vmem:[#allocation90_spill] sm:$0xff] %v8933_v33  ;;  %v1775_v15 = vsel %vm1736_vm10, %v8828_v27, %v8826_v42  ;;  %v2384_v1 = vadd.f32 %v2309_v13, %v12383_v28  ;;  %v8944_v10 = vmul.f32 %v12267_v32, %v1972_v24  ;;  %v8947_v20 = vmul.f32 %v12267_v32, %v1973_v3  ;;  %v12386_v58 = vld [vmem:[#allocation141_spill] sm:$0xff]  ;;  %v12388_v28 = vld [vmem:[#allocation186_spill] sm:$0xff] }
 0x44c   : > { %12382 = vst [vmem:[#allocation113_spill] sm:$0xff] %v8935_v14  ;;  %v8955_v18 = vadd.f32 %v8522_v23, %v12384_v47  ;;  %v8959_v53 = vadd.f32 %v8498_v57, %v12386_v58  ;;  %v2313_v13 = vmul.f32 %v12306_v37, %v1974_v50  ;;  %v2314_v24 = vmul.f32 %v12306_v37, %v1975_v5  ;;  %v12389_v33 = vld [vmem:[#allocation146_spill] sm:$0xff]  ;;  %v12391_v23 = vld [vmem:[#allocation184_spill] sm:$0xff] }
 0x44d   : > { %v1774_v3 = vsel %vm1736_vm10, %v8787_v4, %v8828_v27  ;;  %v2387_v14 = vadd.f32 %v2312_v63, %v12388_v28  ;;  %vm12390_vm11 = vcmp.le.f32.partialorder %v12389_v33, 54.5  ;;  %3382 = vrot.lane.b32.xlu0 %v2381_v9, %s4401_s22  ;;  %3380 = vrot.lane.b32.xlu1 %v2380_v30, %s4401_s22  ;;  %v2386_v57 = vadd.f32 %v2311_v36, %v12391_v23  ;;  %v12392_v47 = vld [vmem:[#allocation280_spill] sm:$0xff]  ;;  %v12396_v36 = vld [vmem:[#allocation145_spill] sm:$0xff]  ;;  %v1681_v28 = vpop.permute.xlu1 %1680  ;;  %v12402_v33 = vld [vmem:[#allocation147_spill] sm:$0xff] }
 0x44e   : > { %12385 = vst [vmem:[#allocation48_spill] sm:$0xff] %v8955_v18  ;;  %12387 = vst [vmem:[#allocation42_spill] sm:$0xff] %v8959_v53  ;;  %v1977_v19 = vsel %vm12390_vm11, %v1775_v15, 0.0  ;;  %v12393_v58 = vld [vmem:[#allocation20_spill] sm:$0xff]  ;;  %v12394_v18 = vld [vmem:[#allocation281_spill] sm:$0xff]  ;;  %v2724_v2 = vmul.f32 %v12302_v25, %v1974_v50  ;;  %v2725_v4 = vmul.f32 %v12302_v25, %v1975_v5  ;;  %v1776_v27 = vsel %vm1736_vm10, %v8826_v42, %v1669_v46  ;;  %v8987_v15 = vpop.permute.xlu0 %1682 }
 0x44f   : > { %v2635_v53 = vadd.f32 %v12393_v58, %v12392_v47  ;;  %v2636_v62 = vadd.f32 %v12395_v12, %v12394_v18  ;;  %v1777_v9 = vsel %vm1736_vm10, %v1669_v46, %v8866_v54  ;;  %v8983_v30 = vmul.f32 %v12267_v32, %v1974_v50  ;;  %v12400_v47 = vld [vmem:[#allocation30_spill] sm:$0xff]  ;;  %v12401_v50 = vld [vmem:[#allocation189_spill] sm:$0xff] }
 0x450   : > { %vm12397_vm9 = vcmp.le.f32.partialorder %v12396_v36, 54.5  ;;  %v8994_v23 = vmul.f32 %v12267_v32, %v1975_v5  ;;  %v2316_v42 = vmul.f32 %v12306_v37, %v1977_v19  ;;  %v8998_v46 = vadd.f32 %v2314_v24, %v12400_v47  ;;  %v12410_v47 = vld [vmem:[#allocation267_spill] sm:$0xff] }
 0x451   : > { %v1976_v63 = vsel %vm12397_vm9, %v1774_v3, 0.0  ;;  %v8989_v12 = vadd.f32 %v2722_v26, %v2635_v53  ;;  %v8991_v18 = vadd.f32 %v2723_v59, %v2636_v62  ;;  %v2388_v58 = vadd.f32 %v2313_v13, %v12401_v50  ;;  %3386 = vrot.lane.b32.xlu0 %v8880_v41, %s4401_s22  ;;  %3384 = vrot.lane.b32.xlu1 %v2382_v11, %s4401_s22  ;;  %v12405_v62 = vld [vmem:[#allocation64_spill] sm:$0xff] }
 0x452   : > { %vm12403_vm11 = vcmp.le.f32.partialorder %v12402_v33, 54.5  ;;  %vm12404_vm9 = vcmp.le.f32.partialorder %v6060_v52, 54.5  ;;  %v9010_v5 = vadd.f32 %v8602_v31, %v12405_v62  ;;  %v12407_v26 = vld [vmem:[#allocation28_spill] sm:$0xff]  ;;  %v2315_v53 = vmul.f32 %v12306_v37, %v1976_v63  ;;  %v9026_v31 = vpop.permute.xlu0 %1686  ;;  %v12411_v62 = vld [vmem:[#allocation283_spill] sm:$0xff] }
 0x453   : > { %12398 = vst [vmem:[#allocation22_spill] sm:$0xff] %v8989_v12  ;;  %12399 = vst [vmem:[#allocation38_spill] sm:$0xff] %v8991_v18  ;;  %v1978_v3 = vsel %vm12403_vm11, %v1776_v27, 0.0  ;;  %v1979_v36 = vsel %vm12404_vm9, %v1777_v9, 0.0  ;;  %v9014_v59 = vadd.f32 %v8525_v21, %v12407_v26  ;;  %v2726_v13 = vmul.f32 %v12302_v25, %v1976_v63  ;;  %v9028_v9 = vpop.permute.xlu1 %1684  ;;  %v12409_v21 = vld [vmem:[#allocation282_spill] sm:$0xff]  ;;  %v12412_v26 = vld [vmem:[#allocation269_spill] sm:$0xff] }
 0x454   : > { %12406 = vst [vmem:[#allocation12_spill] sm:$0xff] %v9010_v5  ;;  %v1778_v24 = vsel %vm1736_vm10, %v8866_v54, %v1673_v48  ;;  %v1779_v41 = vsel %vm1736_vm10, %v1673_v48, %v8905_v60  ;;  %v2727_v11 = vmul.f32 %v12302_v25, %v1977_v19  ;;  %v9024_v27 = vmul.f32 %v12267_v32, %v1976_v63 }
 0x455   : > { %12408 = vst [vmem:[#allocation116_spill] sm:$0xff] %v9014_v59  ;;  %v2637_v50 = vadd.f32 %v12410_v47, %v12409_v21  ;;  %v2638_v18 = vadd.f32 %v12412_v26, %v12411_v62  ;;  %v9035_v54 = vmul.f32 %v12267_v32, %v1977_v19  ;;  %v2317_v48 = vmul.f32 %v12306_v37, %v1978_v3  ;;  %v12414_v59 = vld [vmem:[#allocation195_spill] sm:$0xff] }
 0x456   : > { %v2318_v12 = vmul.f32 %v12306_v37, %v1979_v36  ;;  %v2391_v63 = vadd.f32 %v2316_v42, %v12414_v59  ;;  %vm12415_vm11 = vcmp.le.f32.partialorder %v6068_v6, 54.5  ;;  %v1981_v33 = vsel %vm823_vm4, %v1779_v41, 0.0  ;;  %3390 = vrot.lane.b32.xlu0 %v8923_v29, %s4401_s22  ;;  %3388 = vrot.lane.b32.xlu1 %v2384_v1, %s4401_s22  ;;  %v12420_v59 = vld [vmem:[#allocation192_spill] sm:$0xff] }
 0x457   : > { %12413 = vst [vmem:[#allocation98_spill] sm:$0xff] %v9035_v54  ;;  %v1980_v5 = vsel %vm12415_vm11, %v1778_v24, 0.0  ;;  %v9047_v21 = vadd.f32 %v2724_v2, %v2637_v50  ;;  %v9049_v19 = vadd.f32 %v2725_v4, %v2638_v18  ;;  %v2728_v47 = vmul.f32 %v12302_v25, %v1978_v3  ;;  %v9063_v2 = vpop.permute.xlu0 %1690  ;;  %v9065_v1 = vpop.permute.xlu1 %1688  ;;  %v12422_v4 = vld [vmem:[#allocation153_spill] sm:$0xff]  ;;  %v12424_v50 = vld [vmem:[#allocation148_spill] sm:$0xff] }
 0x458   : > { %v2729_v62 = vmul.f32 %v12302_v25, %v1979_v36  ;;  %v9054_v42 = vmul.f32 %v12267_v32, %v1978_v3  ;;  %v2390_v24 = vadd.f32 %v2315_v53, %v12420_v59  ;;  %v9058_v41 = vmul.f32 %v12267_v32, %v1979_v36  ;;  %v12426_v59 = vld [vmem:[#allocation51_spill] sm:$0xff] }
 0x459   : > { %12417 = vst [vmem:[#allocation114_spill] sm:$0xff] %v9047_v21  ;;  %12418 = vst [vmem:[#allocation10_spill] sm:$0xff] %v9049_v19  ;;  %v1781_v29 = vsel %vm1736_vm10, %v8951_v43, %v8949_v7  ;;  %v9069_v18 = vadd.f32 %v8641_v17, %v12422_v4  ;;  %v9073_v3 = vadd.f32 %v8605_v8, %v12424_v50  ;;  %v12427_v17 = vld [vmem:[#allocation198_spill] sm:$0xff]  ;;  %v12428_v21 = vld [vmem:[#allocation191_spill] sm:$0xff] }
 0x45a   : > { %12419 = vst [vmem:[#allocation274_spill] sm:$0xff] %v9054_v42  ;;  %12421 = vst [vmem:[#allocation306_spill] sm:$0xff] %v9058_v41  ;;  %v2319_v53 = vmul.f32 %v12306_v37, %v1980_v5  ;;  %v2320_v36 = vmul.f32 %v12306_v37, %v1981_v33  ;;  %v1780_v26 = vsel %vm1736_vm10, %v8905_v60, %v8951_v43  ;;  %3394 = vrot.lane.b32.xlu0 %v2387_v14, %s4401_s22  ;;  %v12430_v50 = vld [vmem:[#allocation194_spill] sm:$0xff]  ;;  %v12606_v43 = vld [vmem:[#allocation121_spill] sm:$0xff] }
 0x45b   : > { %12423 = vst [vmem:[#allocation275_spill] sm:$0xff] %v9069_v18  ;;  %12425 = vst [vmem:[#allocation308_spill] sm:$0xff] %v9073_v3  ;;  %v2393_v19 = vadd.f32 %v2318_v12, %v12426_v59  ;;  %3392 = vrot.lane.b32.xlu1 %v2386_v57, %s4401_s22  ;;  %v2392_v4 = vadd.f32 %v2317_v48, %v12427_v17  ;;  %v12429_v18 = vld [vmem:[#allocation85_spill] sm:$0xff]  ;;  %v12431_v3 = vld [vmem:[#allocation115_spill] sm:$0xff]  ;;  %v2730_v41 = vmul.f32 %v12302_v25, %v1980_v5  ;;  %v9098_v48 = vpop.permute.xlu0 %1694 }
 0x45c   : > { %v2639_v8 = vadd.f32 %v12429_v18, %v12428_v21  ;;  %v2640_v52 = vadd.f32 %v12431_v3, %v12430_v50  ;;  %v2731_v54 = vmul.f32 %v12302_v25, %v1981_v33  ;;  %v1983_v60 = vsel %vm825_vm15, %v1781_v29, 0.0  ;;  %v9100_v21 = vpop.permute.xlu1 %1692  ;;  %v12436_v17 = vld [vmem:[#allocation203_spill] sm:$0xff] }
 0x45d   : > { %v1783_v14 = vsel %vm1736_vm10, %v1681_v28, %v8987_v15  ;;  %v1982_v57 = vsel %vm824_vm5, %v1780_v26, 0.0  ;;  %v1782_v12 = vsel %vm1736_vm10, %v8949_v7, %v1681_v28  ;;  %v9107_v59 = vmul.f32 %v12267_v32, %v1980_v5  ;;  %v12437_v26 = vld [vmem:[#allocation202_spill] sm:$0xff] }
 0x45e   : > { %v9102_v18 = vadd.f32 %v2726_v13, %v2639_v8  ;;  %v9104_v3 = vadd.f32 %v2727_v11, %v2640_v52  ;;  %v9110_v29 = vmul.f32 %v12267_v32, %v1981_v33  ;;  %v9113_v50 = vadd.f32 %v2320_v36, %v12436_v17  ;;  %3398 = vrot.lane.b32.xlu0 %v8998_v46, %s4401_s22  ;;  %v12438_v52 = vld [vmem:[#allocation156_spill] sm:$0xff]  ;;  %v12440_v33 = vld [vmem:[#allocation154_spill] sm:$0xff] }
 0x45f   : > { %v2394_v42 = vadd.f32 %v2319_v53, %v12437_v26  ;;  %v2322_v7 = vmul.f32 %v12306_v37, %v1983_v60  ;;  %v1985_v28 = vsel %vm827_vm3, %v1783_v14, 0.0  ;;  %3396 = vrot.lane.b32.xlu1 %v2388_v58, %s4401_s22  ;;  %v9124_v5 = vadd.f32 %v8691_v51, %v12438_v52  ;;  %v9135_v46 = vpop.permute.xlu0 %1698  ;;  %v12442_v14 = vld [vmem:[#allocation29_spill] sm:$0xff]  ;;  %v12443_v51 = vld [vmem:[#allocation284_spill] sm:$0xff]  ;;  %v12445_v52 = vld [vmem:[#allocation95_spill] sm:$0xff] }
 0x460   : > { %12434 = vst [vmem:[#allocation276_spill] sm:$0xff] %v9102_v18  ;;  %12435 = vst [vmem:[#allocation309_spill] sm:$0xff] %v9104_v3  ;;  %v9128_v13 = vadd.f32 %v8664_v44, %v12440_v33  ;;  %v2321_v11 = vmul.f32 %v12306_v37, %v1982_v57  ;;  %v2732_v53 = vmul.f32 %v12302_v25, %v1982_v57  ;;  %v1984_v8 = vsel %vm826_vm8, %v1782_v12, 0.0  ;;  %v9137_v58 = vpop.permute.xlu1 %1696  ;;  %v12444_v26 = vld [vmem:[#allocation197_spill] sm:$0xff]  ;;  %v12446_v33 = vld [vmem:[#allocation162_spill] sm:$0xff] }
 0x461   : > { %12439 = vst [vmem:[#allocation277_spill] sm:$0xff] %v9124_v5  ;;  %v2733_v36 = vmul.f32 %v12302_v25, %v1983_v60  ;;  %v2641_v17 = vadd.f32 %v12443_v51, %v12442_v14  ;;  %v2642_v44 = vadd.f32 %v12445_v52, %v12444_v26  ;;  %v9145_v3 = vadd.f32 %v8684_v38, %v12446_v33  ;;  %v12448_v18 = vld [vmem:[#allocation157_spill] sm:$0xff]  ;;  %v12452_v38 = vld [vmem:[#allocation207_spill] sm:$0xff]  ;;  %v12455_v52 = vld [vmem:[#allocation206_spill] sm:$0xff] }
 0x462   : > { %12441 = vst [vmem:[#allocation310_spill] sm:$0xff] %v9128_v13  ;;  %v12449_v13 = vld [vmem:[#allocation265_spill] sm:$0xff]  ;;  %v9152_v12 = vmul.f32 %v12267_v32, %v1982_v57  ;;  %v9155_v0 = vmul.f32 %v12267_v32, %v1983_v60  ;;  %v2324_v56 = vmul.f32 %v12306_v37, %v1985_v28  ;;  %v1886_v14 = vsel %vm1884_vm2, %v9028_v9, 0.0  ;;  %3402 = vrot.lane.b32.xlu0 %v2391_v63, %s4401_s22 }
 0x463   : > { %12447 = vst [vmem:[#allocation158_spill] sm:$0xff] %v9145_v3  ;;  %v9149_v5 = vadd.f32 %v12449_v13, %v12448_v18  ;;  %3400 = vrot.lane.b32.xlu1 %v2390_v24, %s4401_s22  ;;  %v2397_v51 = vadd.f32 %v2322_v7, %v12452_v38  ;;  %v9163_v26 = vadd.f32 %v2728_v47, %v2641_v17  ;;  %v1987_v63 = vsel %vm829_vm14, %v1886_v14, 0.0  ;;  %v9175_v24 = vpop.permute.xlu0 %1702  ;;  %v12457_v47 = vld [vmem:[#allocation200_spill] sm:$0xff]  ;;  %v12460_v38 = vld [vmem:[#allocation149_spill] sm:$0xff]  ;;  %v12462_v3 = vld [vmem:[#allocation118_spill] sm:$0xff] }
 0x464   : > { %12451 = vst [vmem:[#allocation270_spill] sm:$0xff] %v9155_v0  ;;  %v9165_v18 = vadd.f32 %v2729_v62, %v2642_v44  ;;  %v2323_v57 = vmul.f32 %v12306_v37, %v1984_v8  ;;  %v2734_v60 = vmul.f32 %v12302_v25, %v1984_v8  ;;  %v1784_v13 = vsel %vm1736_vm10, %v8987_v15, %v9028_v9  ;;  %v9177_v7 = vpop.permute.xlu1 %1700  ;;  %v12458_v62 = vld [vmem:[#allocation94_spill] sm:$0xff]  ;;  %v12459_v44 = vld [vmem:[#allocation201_spill] sm:$0xff]  ;;  %v12464_v14 = vld [vmem:[#allocation211_spill] sm:$0xff] }
 0x465   : > { %12450 = vst [vmem:[#allocation106_spill] sm:$0xff] %v9149_v5  ;;  %12453 = vst [vmem:[#allocation278_spill] sm:$0xff] %v9163_v26  ;;  %v2396_v33 = vadd.f32 %v2321_v11, %v12455_v52  ;;  %v2643_v17 = vadd.f32 %v12458_v62, %v12457_v47  ;;  %v12461_v26 = vld [vmem:[#allocation167_spill] sm:$0xff]  ;;  %v2735_v15 = vmul.f32 %v12302_v25, %v1985_v28  ;;  %v1986_v47 = vsel %vm828_vm6, %v1784_v13, 0.0 }
 0x466   : > { %12454 = vst [vmem:[#allocation112_spill] sm:$0xff] %v9165_v18  ;;  %v2644_v18 = vadd.f32 %v12460_v38, %v12459_v44  ;;  %v9185_v0 = vadd.f32 %v12462_v3, %v12461_v26  ;;  %v9189_v9 = vmul.f32 %v12267_v32, %v1984_v8  ;;  %v9192_v11 = vmul.f32 %v12267_v32, %v1985_v28  ;;  %v12468_v26 = vld [vmem:[#allocation285_spill] sm:$0xff]  ;;  %v12469_v44 = vld [vmem:[#allocation26_spill] sm:$0xff] }
 0x467   : > { %v2399_v52 = vadd.f32 %v2324_v56, %v12464_v14  ;;  %3406 = vrot.lane.b32.xlu0 %v2393_v19, %s4401_s22  ;;  %3404 = vrot.lane.b32.xlu1 %v2392_v4, %s4401_s22  ;;  %v9199_v62 = vadd.f32 %v2730_v41, %v2643_v17  ;;  %v2645_v8 = vadd.f32 %v12469_v44, %v12468_v26  ;;  %v12470_v19 = vld [vmem:[#allocation210_spill] sm:$0xff]  ;;  %v9213_v4 = vpop.permute.xlu0 %1706  ;;  %v12474_v26 = vld [vmem:[#allocation173_spill] sm:$0xff] }
 0x468   : > { %12463 = vst [vmem:[#allocation100_spill] sm:$0xff] %v9185_v0  ;;  %v9201_v3 = vadd.f32 %v2731_v54, %v2644_v18  ;;  %v2326_v38 = vmul.f32 %v12306_v37, %v1987_v63  ;;  %v1785_v56 = vsel %vm1736_vm10, %v9026_v31, %v9065_v1  ;;  %v1786_v28 = vsel %vm1736_vm10, %v9065_v1, %v9063_v2  ;;  %v9215_v41 = vpop.permute.xlu1 %1704  ;;  %v12471_v54 = vld [vmem:[#allocation286_spill] sm:$0xff]  ;;  %v12472_v18 = vld [vmem:[#allocation15_spill] sm:$0xff]  ;;  %v12476_v31 = vld [vmem:[#allocation168_spill] sm:$0xff] }
 0x469   : > { %12466 = vst [vmem:[#allocation91_spill] sm:$0xff] %v9199_v62  ;;  %v2398_v13 = vadd.f32 %v2323_v57, %v12470_v19  ;;  %v2646_v17 = vadd.f32 %v12472_v18, %v12471_v54  ;;  %v9219_v14 = vadd.f32 %v2732_v53, %v2645_v8  ;;  %v9223_v44 = vadd.f32 %v8821_v45, %v12474_v26  ;;  %v12479_v54 = vld [vmem:[#allocation83_spill] sm:$0xff] }
 0x46a   : > { %12467 = vst [vmem:[#allocation166_spill] sm:$0xff] %v9201_v3  ;;  %v12477_v3 = vld [vmem:[#allocation86_spill] sm:$0xff]  ;;  %v2325_v1 = vmul.f32 %v12306_v37, %v1986_v47  ;;  %v2736_v57 = vmul.f32 %v12302_v25, %v1986_v47  ;;  %v2737_v19 = vmul.f32 %v12302_v25, %v1987_v63  ;;  %v9233_v0 = vmul.f32 %v12267_v32, %v1986_v47  ;;  %v12483_v37 = vld [vmem:[#allocation287_spill] sm:$0xff] }
 0x46b   : > { %12473 = vst [vmem:[#allocation164_spill] sm:$0xff] %v9219_v14  ;;  %12475 = vst [vmem:[#allocation72_spill] sm:$0xff] %v9223_v44  ;;  %v9227_v62 = vadd.f32 %v12477_v3, %v12476_v31  ;;  %vm12480_vm9 = vcmp.le.f32.partialorder %v12479_v54, 54.5  ;;  %v1989_v45 = vsel %vm806_vm7, %v1786_v28, 0.0  ;;  %3410 = vrot.lane.b32.xlu0 %v9113_v50, %s4401_s22  ;;  %3408 = vrot.lane.b32.xlu1 %v2394_v42, %s4401_s22  ;;  %v12484_v18 = vld [vmem:[#allocation7_spill] sm:$0xff]  ;;  %v12485_v28 = vld [vmem:[#allocation214_spill] sm:$0xff]  ;;  %v9256_v31 = vpop.permute.xlu0 %1710 }
 0x46c   : > { %v1988_v53 = vsel %vm12480_vm9, %v1785_v56, 0.0  ;;  %v9242_v3 = vadd.f32 %v2733_v36, %v2646_v17  ;;  %v2647_v26 = vadd.f32 %v12484_v18, %v12483_v37  ;;  %v9247_v25 = vmul.f32 %v12267_v32, %v1987_v63  ;;  %v9258_v42 = vpop.permute.xlu1 %1708  ;;  %v12486_v36 = vld [vmem:[#allocation288_spill] sm:$0xff]  ;;  %v12487_v17 = vld [vmem:[#allocation103_spill] sm:$0xff]  ;;  %v12489_v32 = vld [vmem:[#allocation178_spill] sm:$0xff] }
 0x46d   : > { %12478 = vst [vmem:[#allocation107_spill] sm:$0xff] %v9227_v62  ;;  %v1787_v47 = vsel %vm1736_vm10, %v9063_v2, %v9100_v21  ;;  %v1788_v56 = vsel %vm1736_vm10, %v9100_v21, %v9098_v48  ;;  %v2401_v50 = vadd.f32 %v2326_v38, %v12485_v28  ;;  %v2648_v54 = vadd.f32 %v12487_v17, %v12486_v36  ;;  %v12491_v2 = vld [vmem:[#allocation175_spill] sm:$0xff]  ;;  %v12494_v28 = vld [vmem:[#allocation54_spill] sm:$0xff]  ;;  %v12495_v14 = vld [vmem:[#allocation69_spill] sm:$0xff] }
 0x46e   : > { %12482 = vst [vmem:[#allocation99_spill] sm:$0xff] %v9242_v3  ;;  %v9262_v8 = vadd.f32 %v2734_v60, %v2647_v26  ;;  %v9266_v63 = vadd.f32 %v8861_v55, %v12489_v32  ;;  %v9270_v37 = vadd.f32 %v8824_v40, %v12491_v2  ;;  %v12493_v21 = vld [vmem:[#allocation47_spill] sm:$0xff]  ;;  %v2738_v3 = vmul.f32 %v12494_v28, %v1988_v53  ;;  %v12498_v40 = vld [vmem:[#allocation289_spill] sm:$0xff] }
 0x46f   : > { %v2327_v18 = vmul.f32 %v12493_v21, %v1988_v53  ;;  %v2328_v38 = vmul.f32 %v12493_v21, %v1989_v45  ;;  %v2400_v62 = vadd.f32 %v2325_v1, %v12495_v14  ;;  %v2739_v36 = vmul.f32 %v12494_v28, %v1989_v45  ;;  %3414 = vrot.lane.b32.xlu0 %v2397_v51, %s4401_s22  ;;  %v12499_v17 = vld [vmem:[#allocation13_spill] sm:$0xff]  ;;  %v12509_v44 = vld [vmem:[#allocation43_spill] sm:$0xff] }
 0x470   : > { %12488 = vst [vmem:[#allocation172_spill] sm:$0xff] %v9262_v8  ;;  %12490 = vst [vmem:[#allocation127_spill] sm:$0xff] %v9266_v63  ;;  %v1991_v26 = vsel %vm808_vm12, %v1788_v56, 0.0  ;;  %3412 = vrot.lane.b32.xlu1 %v2396_v33, %s4401_s22  ;;  %v9281_v55 = vadd.f32 %v2735_v15, %v2648_v54  ;;  %v2649_v32 = vadd.f32 %v12499_v17, %v12498_v40  ;;  %v1990_v8 = vsel %vm807_vm13, %v1787_v47, 0.0  ;;  %v9296_v33 = vpop.permute.xlu0 %1714  ;;  %v9298_v15 = vpop.permute.xlu1 %1712  ;;  %v12501_v56 = vld [vmem:[#allocation290_spill] sm:$0xff]  ;;  %v12506_v17 = vld [vmem:[#allocation179_spill] sm:$0xff] }
 0x471   : > { %12492 = vst [vmem:[#allocation31_spill] sm:$0xff] %v9270_v37  ;;  %v1789_v14 = vsel %vm1736_vm10, %v9098_v48, %v9137_v58  ;;  %v1790_v1 = vsel %vm1736_vm10, %v9137_v58, %v9135_v46  ;;  %v1792_v51 = vsel %vm1736_vm10, %v9177_v7, %v9175_v24  ;;  %v12502_v54 = vld [vmem:[#allocation58_spill] sm:$0xff]  ;;  %v9310_v58 = vadd.f32 %v8864_v61, %v12506_v17  ;;  %v12508_v2 = vld [vmem:[#allocation9_spill] sm:$0xff] }
 0x472   : > { %12497 = vst [vmem:[#allocation169_spill] sm:$0xff] %v9281_v55  ;;  %v2650_v60 = vadd.f32 %v12502_v54, %v12501_v56  ;;  %v9302_v47 = vadd.f32 %v2736_v57, %v2649_v32  ;;  %v12504_v40 = vld [vmem:[#allocation182_spill] sm:$0xff]  ;;  %v9313_v55 = vmul.f32 %v12508_v2, %v1988_v53  ;;  %v9316_v37 = vmul.f32 %v12508_v2, %v1989_v45  ;;  %v12511_v61 = vld [vmem:[#allocation101_spill] sm:$0xff]  ;;  %v12513_v53 = vld [vmem:[#allocation216_spill] sm:$0xff] }
 0x473   : > { %v9306_v48 = vadd.f32 %v8903_v39, %v12504_v40  ;;  %12507 = vst [vmem:[#allocation177_spill] sm:$0xff] %v9310_v58  ;;  %v2330_v63 = vmul.f32 %v12493_v21, %v1991_v26  ;;  %v2403_v56 = vadd.f32 %v2328_v38, %v12509_v44  ;;  %v9322_v32 = vsel %vm810_vm1, %v1790_v1, 0.0  ;;  %3418 = vrot.lane.b32.xlu0 %v2399_v52, %s4401_s22  ;;  %v12514_v40 = vld [vmem:[#allocation21_spill] sm:$0xff]  ;;  %v12518_v1 = vld [vmem:[#allocation24_spill] sm:$0xff] }
 0x474   : > { %12503 = vst [vmem:[#allocation136_spill] sm:$0xff] %v9302_v47  ;;  %3416 = vrot.lane.b32.xlu1 %v2398_v13, %s4401_s22  ;;  %v2402_v39 = vadd.f32 %v2327_v18, %v12511_v61  ;;  %v9327_v54 = vadd.f32 %v2737_v19, %v2650_v60  ;;  %v2651_v45 = vadd.f32 %v12514_v40, %v12513_v53  ;;  %v9334_v44 = vsel %vm809_vm0, %v1789_v14, 0.0  ;;  %v9343_v13 = vpop.permute.xlu0 %1718  ;;  %v1717_v19 = vpop.permute.xlu1 %1716  ;;  %v12517_v18 = vld [vmem:[#allocation217_spill] sm:$0xff]  ;;  %v12520_v61 = vld [vmem:[#allocation187_spill] sm:$0xff] }
 0x475   : > { %12505 = vst [vmem:[#allocation129_spill] sm:$0xff] %v9306_v48  ;;  %v2329_v17 = vmul.f32 %v12493_v21, %v1990_v8  ;;  %v1791_v38 = vsel %vm1736_vm10, %v9135_v46, %v9177_v7  ;;  %vm12516_vm7 = vcmp.le.f32.partialorder %v12353_v22, 54.5  ;;  %v2652_v60 = vadd.f32 %v12518_v1, %v12517_v18  ;;  %v12522_v47 = vld [vmem:[#allocation183_spill] sm:$0xff]  ;;  %v12526_v40 = vld [vmem:[#allocation117_spill] sm:$0xff]  ;;  %v12582_v48 = vld [vmem:[#allocation238_spill] sm:$0xff] }
 0x476   : > { %12512 = vst [vmem:[#allocation130_spill] sm:$0xff] %v9327_v54  ;;  %v9341_v52 = vsel %vm12516_vm7, %v1792_v51, 0.0  ;;  %v9347_v57 = vadd.f32 %v2738_v3, %v2651_v45  ;;  %v9351_v14 = vadd.f32 %v8944_v10, %v12520_v61  ;;  %v9355_v53 = vadd.f32 %v8918_v34, %v12522_v47  ;;  %v12524_v51 = vld [vmem:[#allocation73_spill] sm:$0xff]  ;;  %v12527_v45 = vld [vmem:[#allocation52_spill] sm:$0xff] }
 0x477   : > { %v9358_v22 = vmul.f32 %v12508_v2, %v1990_v8  ;;  %v9361_v46 = vmul.f32 %v12508_v2, %v1991_v26  ;;  %v2332_v7 = vmul.f32 %v12493_v21, %v9322_v32  ;;  %v2405_v3 = vadd.f32 %v2330_v63, %v12524_v51  ;;  %3422 = vrot.lane.b32.xlu0 %v2401_v50, %s4401_s22  ;;  %v12528_v61 = vld [vmem:[#allocation125_spill] sm:$0xff] }
 0x478   : > { %12519 = vst [vmem:[#allocation139_spill] sm:$0xff] %v9347_v57  ;;  %12521 = vst [vmem:[#allocation176_spill] sm:$0xff] %v9351_v14  ;;  %v1793_v10 = vsel %vm1736_vm10, %v9175_v24, %v9215_v41  ;;  %3420 = vrot.lane.b32.xlu1 %v2400_v62, %s4401_s22  ;;  %v9371_v34 = vadd.f32 %v2739_v36, %v2652_v60  ;;  %v2579_v18 = vmul.f32 %v12527_v45, %v12526_v40  ;;  %v9386_v62 = vpop.permute.xlu0 %1722  ;;  %v9388_v50 = vpop.permute.xlu1 %1720  ;;  %v12530_v36 = vld [vmem:[#allocation220_spill] sm:$0xff]  ;;  %v12532_v40 = vld [vmem:[#allocation291_spill] sm:$0xff] }
 0x479   : > { %12523 = vst [vmem:[#allocation140_spill] sm:$0xff] %v9355_v53  ;;  %v2331_v1 = vmul.f32 %v12493_v21, %v9334_v44  ;;  %vm12529_vm13 = vcmp.le.f32.partialorder %v12528_v61, 54.5  ;;  %v2334_v63 = vmul.f32 %v12493_v21, %v9341_v52  ;;  %v1794_v24 = vsel %vm1736_vm10, %v9215_v41, %v9213_v4  ;;  %v12531_v60 = vld [vmem:[#allocation160_spill] sm:$0xff]  ;;  %v12549_v14 = vld [vmem:[#allocation63_spill] sm:$0xff] }
 0x47a   : > { %12525 = vst [vmem:[#allocation137_spill] sm:$0xff] %v9371_v34  ;;  %v9379_v47 = vsel %vm12529_vm13, %v1791_v38, 0.0  ;;  %v2653_v51 = vadd.f32 %v12531_v60, %v12530_v36  ;;  %v2654_v34 = vadd.f32 %v2579_v18, %v12532_v40  ;;  %v2740_v61 = vmul.f32 %v12494_v28, %v1990_v8  ;;  %v12535_v53 = vld [vmem:[#allocation68_spill] sm:$0xff]  ;;  %v12537_v8 = vld [vmem:[#allocation226_spill] sm:$0xff] }
 0x47b   : > { %v2741_v38 = vmul.f32 %v12494_v28, %v1991_v26  ;;  %v9397_v57 = vmul.f32 %v12508_v2, %v9334_v44  ;;  %v9401_v41 = vmul.f32 %v12508_v2, %v9322_v32  ;;  %vm12534_vm12 = vcmp.le.f32.partialorder %v12354_v16, 54.5  ;;  %3426 = vrot.lane.b32.xlu0 %v2403_v56, %s4401_s22  ;;  %v12542_v56 = vld [vmem:[#allocation225_spill] sm:$0xff] }
 0x47c   : > { %v9405_v54 = vsel %vm12534_vm12, %v1793_v10, 0.0  ;;  %v2404_v36 = vadd.f32 %v2329_v17, %v12535_v53  ;;  %vm12536_vm0 = vcmp.le.f32.partialorder %v12364_v49, 54.5  ;;  %3424 = vrot.lane.b32.xlu1 %v2402_v39, %s4401_s22  ;;  %v2407_v26 = vadd.f32 %v2332_v7, %v12537_v8  ;;  %v9432_v7 = vpop.permute.xlu0 %1726  ;;  %v9434_v10 = vpop.permute.xlu1 %1724 }
 0x47d   : > { %12533 = vst [vmem:[#allocation279_spill] sm:$0xff] %v9401_v41  ;;  %v9410_v18 = vsel %vm12536_vm0, %v1794_v24, 0.0  ;;  %v9415_v60 = vadd.f32 %v2740_v61, %v2653_v51  ;;  %v9417_v40 = vadd.f32 %v2741_v38, %v2654_v34  ;;  %v2333_v16 = vmul.f32 %v12493_v21, %v9379_v47  ;;  %v12543_v34 = vld [vmem:[#allocation76_spill] sm:$0xff]  ;;  %v12544_v51 = vld [vmem:[#allocation18_spill] sm:$0xff] }
 0x47e   : > { %v9423_v17 = vmul.f32 %v12508_v2, %v9379_v47  ;;  %v9427_v49 = vmul.f32 %v12508_v2, %v9341_v52  ;;  %v2406_v53 = vadd.f32 %v2331_v1, %v12542_v56  ;;  %v2335_v39 = vmul.f32 %v12493_v21, %v9405_v54  ;;  %v12546_v38 = vld [vmem:[#allocation188_spill] sm:$0xff] }
 0x47f   : > { %12538 = vst [vmem:[#allocation45_spill] sm:$0xff] %v9415_v60  ;;  %12539 = vst [vmem:[#allocation181_spill] sm:$0xff] %v9417_v40  ;;  %v2409_v24 = vadd.f32 %v2334_v63, %v12543_v34  ;;  %v9439_v61 = vadd.f32 %v8983_v30, %v12544_v51  ;;  %v9443_v8 = vadd.f32 %v8947_v20, %v12546_v38  ;;  %v12548_v40 = vld [vmem:[#allocation14_spill] sm:$0xff]  ;;  %3430 = vrot.lane.b32.xlu0 %v2405_v3, %s4401_s22  ;;  %v12551_v51 = vld [vmem:[#allocation224_spill] sm:$0xff] }
 0x480   : > { %12540 = vst [vmem:[#allocation180_spill] sm:$0xff] %v9423_v17  ;;  %12541 = vst [vmem:[#allocation65_spill] sm:$0xff] %v9427_v49  ;;  %v2336_v1 = vmul.f32 %v12493_v21, %v9410_v18  ;;  %v1795_v56 = vsel %vm1736_vm10, %v9213_v4, %v9258_v42  ;;  %v2580_v60 = vmul.f32 %v12527_v45, %v12548_v40  ;;  %3428 = vrot.lane.b32.xlu1 %v2404_v36, %s4401_s22  ;;  %v12550_v40 = vld [vmem:[#allocation223_spill] sm:$0xff]  ;;  %v12552_v36 = vld [vmem:[#allocation196_spill] sm:$0xff] }
 0x481   : > { %12545 = vst [vmem:[#allocation141_spill] sm:$0xff] %v9439_v61  ;;  %12547 = vst [vmem:[#allocation186_spill] sm:$0xff] %v9443_v8  ;;  %v2581_v63 = vmul.f32 %v12527_v45, %v12549_v14  ;;  %v1796_v30 = vsel %vm1736_vm10, %v9258_v42, %v9256_v31  ;;  %v1797_v20 = vsel %vm1736_vm10, %v9256_v31, %v9298_v15  ;;  %v9471_v8 = vpop.permute.xlu0 %1730  ;;  %v9473_v31 = vpop.permute.xlu1 %1728  ;;  %v12554_v61 = vld [vmem:[#allocation190_spill] sm:$0xff]  ;;  %vm12556_vm1 = vcmp.le.f32.partialorder %v12366_v35, 54.5  ;;  %v12565_v35 = vld [vmem:[#allocation32_spill] sm:$0xff] }
 0x482   : > { %v1798_v34 = vsel %vm1736_vm10, %v9298_v15, %v9296_v33  ;;  %v1799_v4 = vsel %vm1736_vm10, %v9296_v33, %v1717_v19  ;;  %v1800_v14 = vsel %vm1736_vm10, %v1717_v19, %v9343_v13  ;;  %v2655_v42 = vadd.f32 %v2580_v60, %v12550_v40  ;;  %v12585_v49 = vld [vmem:[#allocation150_spill] sm:$0xff] }
 0x483   : > { %v2656_v38 = vadd.f32 %v2581_v63, %v12551_v51  ;;  %v2742_v15 = vmul.f32 %v12494_v28, %v9334_v44  ;;  %v2743_v3 = vmul.f32 %v12494_v28, %v9322_v32  ;;  %v9481_v33 = vadd.f32 %v9024_v27, %v12552_v36  ;;  %v12557_v63 = vld [vmem:[#allocation33_spill] sm:$0xff]  ;;  %v12559_v44 = vld [vmem:[#allocation144_spill] sm:$0xff]  ;;  %v12563_v36 = vld [vmem:[#allocation147_spill] sm:$0xff]  ;;  %3434 = vrot.lane.b32.xlu0 %v2407_v26, %s4401_s22 }
 0x484   : > { %v9485_v19 = vadd.f32 %v8994_v23, %v12554_v61  ;;  %v9489_v60 = vsel %vm12556_vm1, %v1795_v56, 0.0  ;;  %vm12558_vm11 = vcmp.le.f32.partialorder %v12557_v63, 54.5  ;;  %vm12560_vm9 = vcmp.le.f32.partialorder %v12559_v44, 54.5  ;;  %v12561_v32 = vld [vmem:[#allocation145_spill] sm:$0xff]  ;;  %3432 = vrot.lane.b32.xlu1 %v2406_v53, %s4401_s22 }
 0x485   : > { %12553 = vst [vmem:[#allocation184_spill] sm:$0xff] %v9481_v33  ;;  %v9493_v40 = vsel %vm12558_vm11, %v1796_v30, 0.0  ;;  %v9497_v51 = vsel %vm12560_vm9, %v1797_v20, 0.0  ;;  %vm12562_vm7 = vcmp.le.f32.partialorder %v12561_v32, 54.5  ;;  %vm12564_vm13 = vcmp.le.f32.partialorder %v12563_v36, 54.5  ;;  %v12573_v32 = vld [vmem:[#allocation75_spill] sm:$0xff] }
 0x486   : > { %12555 = vst [vmem:[#allocation280_spill] sm:$0xff] %v9485_v19  ;;  %v9501_v27 = vsel %vm12562_vm7, %v1798_v34, 0.0  ;;  %v9505_v23 = vsel %vm12564_vm13, %v1800_v14, 0.0  ;;  %v2408_v61 = vadd.f32 %v2333_v16, %v12565_v35  ;;  %v9510_v56 = vadd.f32 %v2742_v15, %v2655_v42  ;;  %v12570_v14 = vld [vmem:[#allocation146_spill] sm:$0xff]  ;;  %v9537_v15 = vpop.permute.xlu0 %1734  ;;  %v12574_v35 = vld [vmem:[#allocation233_spill] sm:$0xff] }
 0x487   : > { %v9512_v30 = vadd.f32 %v2743_v3, %v2656_v38  ;;  %v9516_v20 = vmul.f32 %v12508_v2, %v9405_v54  ;;  %v9520_v34 = vmul.f32 %v12508_v2, %v9410_v18  ;;  %vm12571_vm12 = vcmp.le.f32.partialorder %v12570_v14, 54.5  ;;  %3438 = vrot.lane.b32.xlu0 %v2409_v24, %s4401_s22 }
 0x488   : > { %12566 = vst [vmem:[#allocation20_spill] sm:$0xff] %v9510_v56  ;;  %v9524_v63 = vsel %vm12571_vm12, %v1799_v4, 0.0  ;;  %v1802_v26 = vsel %vm1736_vm10, %v9388_v50, %v9386_v62  ;;  %v2337_v16 = vmul.f32 %v12493_v21, %v9489_v60  ;;  %v2338_v53 = vmul.f32 %v12493_v21, %v9493_v40  ;;  %v9539_v4 = vpop.permute.xlu1 %1732  ;;  %3436 = vrot.lane.b32.xlu1 %v2408_v61, %s4401_s22 }
 0x489   : > { %12567 = vst [vmem:[#allocation281_spill] sm:$0xff] %v9512_v30  ;;  %12568 = vst [vmem:[#allocation35_spill] sm:$0xff] %v9516_v20  ;;  %v2339_v42 = vmul.f32 %v12493_v21, %v9497_v51  ;;  %v2340_v38 = vmul.f32 %v12493_v21, %v9501_v27  ;;  %v9543_v3 = vmul.f32 %v12508_v2, %v9489_v60  ;;  %vm12576_vm0 = vcmp.le.f32.partialorder %v6068_v6, 54.5 }
 0x48a   : > { %12569 = vst [vmem:[#allocation30_spill] sm:$0xff] %v9520_v34  ;;  %v2342_v44 = vmul.f32 %v12493_v21, %v9505_v23  ;;  %v2411_v36 = vadd.f32 %v2336_v1, %v12573_v32  ;;  %v2410_v14 = vadd.f32 %v2335_v39, %v12574_v35  ;;  %v9551_v19 = vmul.f32 %v12508_v2, %v9493_v40  ;;  %v12577_v39 = vld [vmem:[#allocation66_spill] sm:$0xff]  ;;  %v12578_v32 = vld [vmem:[#allocation119_spill] sm:$0xff] }
 0x48b   : > { %12572 = vst [vmem:[#allocation189_spill] sm:$0xff] %v9543_v3  ;;  %v2341_v33 = vmul.f32 %v12493_v21, %v9524_v63  ;;  %v1801_v30 = vsel %vm1736_vm10, %v9343_v13, %v9388_v50  ;;  %v9560_v56 = vsel %vm12576_vm0, %v1802_v26, 0.0  ;;  %v2582_v1 = vmul.f32 %v12527_v45, %v12577_v39  ;;  %v9572_v50 = vpop.permute.xlu0 %3326  ;;  %v12581_v26 = vld [vmem:[#allocation239_spill] sm:$0xff]  ;;  %v12584_v39 = vld [vmem:[#allocation77_spill] sm:$0xff] }
 0x48c   : > { %12575 = vst [vmem:[#allocation64_spill] sm:$0xff] %v9551_v19  ;;  %v2583_v35 = vmul.f32 %v12527_v45, %v12578_v32  ;;  %v2744_v58 = vmul.f32 %v12494_v28, %v9379_v47  ;;  %v2745_v13 = vmul.f32 %v12494_v28, %v9341_v52  ;;  %12579 = vst [vmem:[#allocation28_spill] sm:$0xff] %v9572_v50  ;;  %v9574_v6 = vpop.permute.xlu1 %3324  ;;  %v12583_v19 = vld [vmem:[#allocation243_spill] sm:$0xff]  ;;  %vm12586_vm1 = vcmp.le.f32.partialorder %v12585_v49, 54.5  ;;  %v12588_v52 = vld [vmem:[#allocation292_spill] sm:$0xff] }
 0x48d   : > { %12580 = vst [vmem:[#allocation282_spill] sm:$0xff] %v9574_v6  ;;  %v2413_v24 = vadd.f32 %v2338_v53, %v12581_v26  ;;  %v2412_v61 = vadd.f32 %v2337_v16, %v12582_v48  ;;  %v2415_v34 = vadd.f32 %v2340_v38, %v12583_v19  ;;  %v2414_v3 = vadd.f32 %v2339_v42, %v12584_v39  ;;  %v12587_v47 = vld [vmem:[#allocation79_spill] sm:$0xff]  ;;  %v12589_v50 = vld [vmem:[#allocation293_spill] sm:$0xff]  ;;  %v12590_v49 = vld [vmem:[#allocation246_spill] sm:$0xff] }
 0x48e   : > { %v9582_v32 = vsel %vm12586_vm1, %v1801_v30, 0.0  ;;  %v9585_v20 = vadd.f32 %v2342_v44, %v12587_v47  ;;  %v2657_v41 = vadd.f32 %v2582_v1, %v12588_v52  ;;  %v2658_v17 = vadd.f32 %v2583_v35, %v12589_v50  ;;  %3442 = vrot.lane.b32.xlu0 %v2411_v36, %s4401_s22  ;;  %3440 = vrot.lane.b32.xlu1 %v2410_v14, %s4401_s22  ;;  %v12591_v42 = vld [vmem:[#allocation199_spill] sm:$0xff]  ;;  %v12592_v38 = vld [vmem:[#allocation274_spill] sm:$0xff]  ;;  %v12599_v52 = vld [vmem:[#allocation204_spill] sm:$0xff] }
 0x48f   : > { %v2344_v53 = vmul.f32 %v12493_v21, %v9560_v56  ;;  %v1804_v48 = vsel %vm1736_vm10, %v9434_v10, %v9432_v7  ;;  %v2416_v19 = vadd.f32 %v2341_v33, %v12590_v49  ;;  %v9603_v44 = vadd.f32 %v12592_v38, %v12591_v42  ;;  %v12593_v1 = vld [vmem:[#allocation110_spill] sm:$0xff]  ;;  %v9614_v33 = vpop.permute.xlu0 %3330  ;;  %v12637_v6 = vld [vmem:[#allocation128_spill] sm:$0xff] }
 0x490   : > { %v9597_v30 = vadd.f32 %v2744_v58, %v2657_v41  ;;  %v9599_v16 = vadd.f32 %v2745_v13, %v2658_v17  ;;  %v12594_v35 = vld [vmem:[#allocation98_spill] sm:$0xff]  ;;  %v2343_v26 = vmul.f32 %v12493_v21, %v9582_v32  ;;  %v1803_v36 = vsel %vm1736_vm10, %v9386_v62, %v9434_v10  ;;  %12595 = vst [vmem:[#allocation267_spill] sm:$0xff] %v9614_v33  ;;  %v9616_v58 = vpop.permute.xlu1 %3328  ;;  %v12597_v41 = vld [vmem:[#allocation120_spill] sm:$0xff]  ;;  %v12598_v13 = vld [vmem:[#allocation67_spill] sm:$0xff] }
 0x491   : > { %v9607_v50 = vadd.f32 %v12594_v35, %v12593_v1  ;;  %12596 = vst [vmem:[#allocation283_spill] sm:$0xff] %v9616_v58  ;;  %v2584_v17 = vmul.f32 %v12527_v45, %v12597_v41  ;;  %v2746_v14 = vmul.f32 %v12494_v28, %v9405_v54  ;;  %v2585_v39 = vmul.f32 %v12527_v45, %v12598_v13  ;;  %v12600_v62 = vld [vmem:[#allocation109_spill] sm:$0xff]  ;;  %v12601_v10 = vld [vmem:[#allocation306_spill] sm:$0xff] }
 0x492   : > { %v2747_v47 = vmul.f32 %v12494_v28, %v9410_v18  ;;  %v9628_v49 = vadd.f32 %v9107_v59, %v12599_v52  ;;  %v9632_v42 = vadd.f32 %v12601_v10, %v12600_v62  ;;  %v9636_v38 = vsel %vm824_vm5, %v1804_v48, 0.0  ;;  %3446 = vrot.lane.b32.xlu0 %v2413_v24, %s4401_s22  ;;  %3444 = vrot.lane.b32.xlu1 %v2412_v61, %s4401_s22  ;;  %v12602_v18 = vld [vmem:[#allocation250_spill] sm:$0xff]  ;;  %v12603_v59 = vld [vmem:[#allocation232_spill] sm:$0xff]  ;;  %v12636_v58 = vld [vmem:[#allocation297_spill] sm:$0xff] }
 0x493   : > { %v1806_v54 = vsel %vm1736_vm10, %v9473_v31, %v9471_v8  ;;  %v2419_v1 = vadd.f32 %v2344_v53, %v12602_v18  ;;  %v2659_v35 = vadd.f32 %v2584_v17, %v12603_v59  ;;  %v12604_v41 = vld [vmem:[#allocation234_spill] sm:$0xff]  ;;  %v2587_v48 = vmul.f32 %v12527_v45, %v12606_v43  ;;  %v9652_v33 = vpop.permute.xlu0 %3334  ;;  %v12609_v17 = vld [vmem:[#allocation208_spill] sm:$0xff]  ;;  %v12610_v18 = vld [vmem:[#allocation205_spill] sm:$0xff] }
 0x494   : > { %v2660_v13 = vadd.f32 %v2585_v39, %v12604_v41  ;;  %v12605_v52 = vld [vmem:[#allocation70_spill] sm:$0xff]  ;;  %v2748_v10 = vmul.f32 %v12494_v28, %v9489_v60  ;;  %12607 = vst [vmem:[#allocation269_spill] sm:$0xff] %v9652_v33  ;;  %v9654_v24 = vpop.permute.xlu1 %3332  ;;  %v2749_v53 = vmul.f32 %v12494_v28, %v9493_v40  ;;  %v9662_v39 = vadd.f32 %v9152_v12, %v12609_v17 }
 0x495   : > { %v2586_v62 = vmul.f32 %v12527_v45, %v12605_v52  ;;  %12608 = vst [vmem:[#allocation195_spill] sm:$0xff] %v9654_v24  ;;  %v9656_v61 = vadd.f32 %v2746_v14, %v2659_v35  ;;  %v9666_v59 = vadd.f32 %v9110_v29, %v12610_v18  ;;  %v2346_v60 = vmul.f32 %v12493_v21, %v9636_v38  ;;  %v12611_v41 = vld [vmem:[#allocation138_spill] sm:$0xff]  ;;  %v12612_v14 = vld [vmem:[#allocation236_spill] sm:$0xff] }
 0x496   : > { %v2418_v52 = vadd.f32 %v2343_v26, %v12611_v41  ;;  %v9671_v43 = vadd.f32 %v2747_v47, %v2660_v13  ;;  %v9676_v40 = vsel %vm823_vm4, %v1803_v36, 0.0  ;;  %v1805_v12 = vsel %vm1736_vm10, %v9432_v7, %v9473_v31  ;;  %3450 = vrot.lane.b32.xlu0 %v2415_v34, %s4401_s22  ;;  %3448 = vrot.lane.b32.xlu1 %v2414_v3, %s4401_s22  ;;  %v12615_v26 = vld [vmem:[#allocation237_spill] sm:$0xff]  ;;  %v12617_v33 = vld [vmem:[#allocation122_spill] sm:$0xff] }
 0x497   : > { %v2661_v35 = vadd.f32 %v2586_v62, %v12612_v14  ;;  %v9683_v29 = vsel %vm826_vm8, %v1806_v54, 0.0  ;;  %v2662_v47 = vadd.f32 %v2587_v48, %v12615_v26  ;;  %v12616_v62 = vld [vmem:[#allocation71_spill] sm:$0xff]  ;;  %v2589_v18 = vmul.f32 %v12527_v45, %v12617_v33  ;;  %v9696_v31 = vpop.permute.xlu0 %3338  ;;  %v12620_v48 = vld [vmem:[#allocation212_spill] sm:$0xff]  ;;  %v12621_v41 = vld [vmem:[#allocation209_spill] sm:$0xff] }
 0x498   : > { %v2588_v36 = vmul.f32 %v12527_v45, %v12616_v62  ;;  %v2750_v7 = vmul.f32 %v12494_v28, %v9497_v51  ;;  %12618 = vst [vmem:[#allocation192_spill] sm:$0xff] %v9696_v31  ;;  %v9698_v54 = vpop.permute.xlu1 %3336  ;;  %v2751_v3 = vmul.f32 %v12494_v28, %v9501_v27  ;;  %v12622_v14 = vld [vmem:[#allocation270_spill] sm:$0xff]  ;;  %v2345_v17 = vmul.f32 %v12493_v21, %v9676_v40  ;;  %v12623_v26 = vld [vmem:[#allocation92_spill] sm:$0xff] }
 0x499   : > { %v9688_v13 = vadd.f32 %v2748_v10, %v2661_v35  ;;  %12619 = vst [vmem:[#allocation153_spill] sm:$0xff] %v9698_v54  ;;  %v9700_v34 = vadd.f32 %v2749_v53, %v2662_v47  ;;  %v9706_v10 = vadd.f32 %v9189_v9, %v12620_v48  ;;  %v9710_v35 = vadd.f32 %v12622_v14, %v12621_v41  ;;  %v12624_v33 = vld [vmem:[#allocation294_spill] sm:$0xff]  ;;  %v12625_v53 = vld [vmem:[#allocation295_spill] sm:$0xff] }
 0x49a   : > { %v2421_v62 = vadd.f32 %v2346_v60, %v12623_v26  ;;  %v2663_v31 = vadd.f32 %v2588_v36, %v12624_v33  ;;  %v2664_v47 = vadd.f32 %v2589_v18, %v12625_v53  ;;  %v9719_v24 = vsel %vm825_vm15, %v1805_v12, 0.0  ;;  %3454 = vrot.lane.b32.xlu0 %v9585_v20, %s4401_s22  ;;  %3452 = vrot.lane.b32.xlu1 %v2416_v19, %s4401_s22  ;;  %v12627_v60 = vld [vmem:[#allocation124_spill] sm:$0xff]  ;;  %v12628_v12 = vld [vmem:[#allocation123_spill] sm:$0xff] }
 0x49b   : > { %v2348_v9 = vmul.f32 %v12493_v21, %v9683_v29  ;;  %v1808_v48 = vsel %vm1736_vm10, %v9539_v4, %v9537_v15  ;;  %v2590_v36 = vmul.f32 %v12527_v45, %v12627_v60  ;;  %v2591_v41 = vmul.f32 %v12527_v45, %v12628_v12  ;;  %v9739_v26 = vpop.permute.xlu0 %3342  ;;  %v12631_v20 = vld [vmem:[#allocation296_spill] sm:$0xff]  ;;  %v12632_v60 = vld [vmem:[#allocation39_spill] sm:$0xff]  ;;  %v12635_v12 = vld [vmem:[#allocation53_spill] sm:$0xff] }
 0x49c   : > { %v9731_v18 = vadd.f32 %v2750_v7, %v2663_v31  ;;  %v9733_v54 = vadd.f32 %v2751_v3, %v2664_v47  ;;  %v2752_v14 = vmul.f32 %v12494_v28, %v9524_v63  ;;  %12629 = vst [vmem:[#allocation148_spill] sm:$0xff] %v9739_v26  ;;  %v9741_v33 = vpop.permute.xlu1 %3340  ;;  %v2753_v19 = vmul.f32 %v12494_v28, %v9505_v23  ;;  %v12633_v31 = vld [vmem:[#allocation213_spill] sm:$0xff] }
 0x49d   : > { %12630 = vst [vmem:[#allocation51_spill] sm:$0xff] %v9741_v33  ;;  %v2665_v53 = vadd.f32 %v2590_v36, %v12631_v20  ;;  %v9748_v7 = vadd.f32 %v9233_v0, %v12632_v60  ;;  %v9752_v3 = vadd.f32 %v9192_v11, %v12633_v31  ;;  %v2347_v47 = vmul.f32 %v12493_v21, %v9719_v24 }
 0x49e   : > { %v2420_v26 = vadd.f32 %v2345_v17, %v12635_v12  ;;  %v2666_v33 = vadd.f32 %v2591_v41, %v12636_v58  ;;  %v2592_v36 = vmul.f32 %v12527_v45, %v12637_v6  ;;  %v1887_v20 = vsel %vm1884_vm2, %v9537_v15, 0.0  ;;  %3458 = vrot.lane.b32.xlu0 %v2419_v1, %s4401_s22  ;;  %3456 = vrot.lane.b32.xlu1 %v2418_v52, %s4401_s22  ;;  %v12638_v6 = vld [vmem:[#allocation126_spill] sm:$0xff]  ;;  %v12639_v15 = vld [vmem:[#allocation300_spill] sm:$0xff] }
 0x49f   : > { %12634 = vst [vmem:[#allocation198_spill] sm:$0xff] %v9752_v3  ;;  %v1807_v0 = vsel %vm1736_vm10, %v9471_v8, %v9539_v4  ;;  %v9767_v11 = vsel %vm828_vm6, %v1808_v48, 0.0  ;;  %v9771_v17 = vadd.f32 %v2752_v14, %v2665_v53  ;;  %v2593_v41 = vmul.f32 %v12527_v45, %v12638_v6  ;;  %v9780_v4 = vpop.permute.xlu0 %3346  ;;  %v12642_v48 = vld [vmem:[#allocation254_spill] sm:$0xff]  ;;  %v12645_v53 = vld [vmem:[#allocation215_spill] sm:$0xff] }
 0x4a0   : > { %v9773_v58 = vadd.f32 %v2753_v19, %v2666_v33  ;;  %v2667_v60 = vadd.f32 %v2592_v36, %v12639_v15  ;;  %v2754_v8 = vmul.f32 %v12494_v28, %v9582_v32  ;;  %12640 = vst [vmem:[#allocation191_spill] sm:$0xff] %v9780_v4  ;;  %v9782_v5 = vpop.permute.xlu1 %3344  ;;  %v2423_v1 = vadd.f32 %v2348_v9, %v12642_v48  ;;  %v12643_v14 = vld [vmem:[#allocation218_spill] sm:$0xff]  ;;  %v12648_v36 = vld [vmem:[#allocation301_spill] sm:$0xff] }
 0x4a1   : > { %12641 = vst [vmem:[#allocation85_spill] sm:$0xff] %v9782_v5  ;;  %v2755_v52 = vmul.f32 %v12494_v28, %v9560_v56  ;;  %v9789_v33 = vadd.f32 %v9313_v55, %v12643_v14  ;;  %v9793_v19 = vadd.f32 %v9247_v25, %v12645_v53  ;;  %v9797_v12 = vsel %vm827_vm3, %v1807_v0, 0.0  ;;  %v12649_v9 = vld [vmem:[#allocation134_spill] sm:$0xff]  ;;  %v12651_v25 = vld [vmem:[#allocation55_spill] sm:$0xff]  ;;  %v12652_v14 = vld [vmem:[#allocation133_spill] sm:$0xff] }
 0x4a2   : > { %v2668_v15 = vadd.f32 %v2593_v41, %v12648_v36  ;;  %v9800_v4 = vadd.f32 %v2754_v8, %v2667_v60  ;;  %v2594_v48 = vmul.f32 %v12527_v45, %v12649_v9  ;;  %v9806_v3 = vsel %vm829_vm14, %v1887_v20, 0.0  ;;  %3462 = vrot.lane.b32.xlu0 %v2421_v62, %s4401_s22  ;;  %3460 = vrot.lane.b32.xlu1 %v2420_v26, %s4401_s22  ;;  %v12654_v8 = vld [vmem:[#allocation264_spill] sm:$0xff] }
 0x4a3   : > { %12644 = vst [vmem:[#allocation194_spill] sm:$0xff] %v9789_v33  ;;  %12646 = vst [vmem:[#allocation115_spill] sm:$0xff] %v9793_v19  ;;  %v2350_v55 = vmul.f32 %v12493_v21, %v9767_v11  ;;  %v2422_v0 = vadd.f32 %v2347_v47, %v12651_v25  ;;  %v2595_v41 = vmul.f32 %v12527_v45, %v12652_v14  ;;  %v9824_v31 = vpop.permute.xlu0 %3350  ;;  %v12657_v47 = vld [vmem:[#allocation303_spill] sm:$0xff]  ;;  %v12658_v25 = vld [vmem:[#allocation221_spill] sm:$0xff]  ;;  %vm3474_vm6 = vcmask 457728  }
 0x4a4   : > { %v9815_v60 = vadd.f32 %v2755_v52, %v2668_v15  ;;  %v2669_v53 = vadd.f32 %v2594_v48, %v12654_v8  ;;  %v2756_v20 = vmul.f32 %v12494_v28, %v9676_v40  ;;  %v2757_v5 = vmul.f32 %v12494_v28, %v9636_v38  ;;  %12655 = vst [vmem:[#allocation203_spill] sm:$0xff] %v9824_v31  ;;  %v9826_v26 = vpop.permute.xlu1 %3348  ;;  %v12660_v15 = vld [vmem:[#allocation102_spill] sm:$0xff]  ;;  %v12663_v33 = vld [vmem:[#allocation185_spill] sm:$0xff] }
 0x4a5   : > { %v2349_v62 = vmul.f32 %v12493_v21, %v9797_v12  ;;  %12656 = vst [vmem:[#allocation202_spill] sm:$0xff] %v9826_v26  ;;  %v2670_v36 = vadd.f32 %v2595_v41, %v12657_v47  ;;  %v9831_v52 = vadd.f32 %v9358_v22, %v12658_v25  ;;  %v9835_v48 = vadd.f32 %v9316_v37, %v12660_v15  ;;  %v12665_v37 = vld [vmem:[#allocation255_spill] sm:$0xff] }
 0x4a6   : > { %12653 = vst [vmem:[#allocation159_spill] sm:$0xff] %v9815_v60  ;;  %v3161_v8 = vmul.f32 %v12508_v2, %v9497_v51  ;;  %v9839_v19 = vadd.f32 %v2756_v20, %v2669_v53  ;;  %v2596_v31 = vmul.f32 %v12527_v45, %v12663_v33  ;;  %v12664_v60 = vld [vmem:[#allocation170_spill] sm:$0xff]  ;;  %v2351_v41 = vmul.f32 %v12493_v21, %v9806_v3  ;;  %v12667_v51 = vld [vmem:[#allocation257_spill] sm:$0xff] }
 0x4a7   : > { %12659 = vst [vmem:[#allocation156_spill] sm:$0xff] %v9831_v52  ;;  %12661 = vst [vmem:[#allocation154_spill] sm:$0xff] %v9835_v48  ;;  %v2597_v26 = vmul.f32 %v12527_v45, %v12664_v60  ;;  %3466 = vrot.lane.b32.xlu0 %v2423_v1, %s4401_s22  ;;  %3464 = vrot.lane.b32.xlu1 %v2422_v0, %s4401_s22  ;;  %v2425_v22 = vadd.f32 %v2350_v55, %v12665_v37  ;;  %v12668_v20 = vld [vmem:[#allocation253_spill] sm:$0xff]  ;;  %v9858_v52 = vpop.permute.xlu0 %3354  ;;  %v12671_v1 = vld [vmem:[#allocation87_spill] sm:$0xff]  ;;  %vm3925_vm10 = vcmask 588800   ;;  %vm4073_vm14 = vcmask 64512  }
 0x4a8   : > { %12662 = vst [vmem:[#allocation29_spill] sm:$0xff] %v9839_v19  ;;  %v9850_v47 = vadd.f32 %v2757_v5, %v2670_v36  ;;  %v2671_v53 = vadd.f32 %v2596_v31, %v12667_v51  ;;  %v2758_v15 = vmul.f32 %v12494_v28, %v9719_v24  ;;  %v2759_v48 = vmul.f32 %v12494_v28, %v9683_v29  ;;  %v9860_v21 = vpop.permute.xlu1 %3352  ;;  %v12672_v19 = vld [vmem:[#allocation227_spill] sm:$0xff]  ;;  %v12674_v5 = vld [vmem:[#allocation222_spill] sm:$0xff] }
 0x4a9   : > { %v2672_v25 = vadd.f32 %v2597_v26, %v12668_v20  ;;  %12669 = vst [vmem:[#allocation197_spill] sm:$0xff] %v9858_v52  ;;  %12670 = vst [vmem:[#allocation95_spill] sm:$0xff] %v9860_v21  ;;  %v2424_v0 = vadd.f32 %v2349_v62, %v12671_v1  ;;  %v9865_v55 = vadd.f32 %v9397_v57, %v12672_v19  ;;  %v12676_v26 = vld [vmem:[#allocation34_spill] sm:$0xff]  ;;  %v12682_v21 = vld [vmem:[#allocation143_spill] sm:$0xff]  ;;  %vm12858_vm15 = vcmask 523264  }
 0x4aa   : > { %12666 = vst [vmem:[#allocation284_spill] sm:$0xff] %v9850_v47  ;;  %v9869_v31 = vadd.f32 %v9361_v46, %v12674_v5  ;;  %v2598_v36 = vmul.f32 %v12527_v45, %v12676_v26  ;;  %v3162_v37 = vmul.f32 %v12508_v2, %v9501_v27  ;;  %v9875_v51 = vadd.f32 %v2758_v15, %v2671_v53  ;;  %v12679_v52 = vld [vmem:[#allocation74_spill] sm:$0xff]  ;;  %v12680_v46 = vld [vmem:[#allocation41_spill] sm:$0xff]  ;;  %v12684_v15 = vld [vmem:[#allocation180_spill] sm:$0xff] }
 0x4ab   : > { %12673 = vst [vmem:[#allocation162_spill] sm:$0xff] %v9865_v55  ;;  %v9877_v20 = vadd.f32 %v2759_v48, %v2672_v25  ;;  %v2599_v62 = vmul.f32 %v12527_v45, %v12679_v52  ;;  %v3163_v57 = vmul.f32 %v12508_v2, %v9524_v63  ;;  %3470 = vrot.lane.b32.xlu0 %v2425_v22, %s4401_s22  ;;  %v12681_v1 = vld [vmem:[#allocation142_spill] sm:$0xff]  ;;  %v12683_v25 = vld [vmem:[#allocation229_spill] sm:$0xff]  ;;  %v9896_v63 = vpop.permute.xlu0 %3358  ;;  %v12693_v55 = vld [vmem:[#allocation35_spill] sm:$0xff] }
 0x4ac   : > { %12675 = vst [vmem:[#allocation157_spill] sm:$0xff] %v9869_v31  ;;  %12677 = vst [vmem:[#allocation265_spill] sm:$0xff] %v9875_v51  ;;  %3468 = vrot.lane.b32.xlu1 %v2424_v0, %s4401_s22  ;;  %v2426_v19 = vadd.f32 %v2351_v41, %v12680_v46  ;;  %v2673_v5 = vadd.f32 %v2598_v36, %v12681_v1  ;;  %v2760_v48 = vmul.f32 %v12494_v28, %v9797_v12  ;;  %v9898_v22 = vpop.permute.xlu1 %3356  ;;  %v12688_v0 = vld [vmem:[#allocation228_spill] sm:$0xff]  ;;  %v12689_v41 = vld [vmem:[#allocation279_spill] sm:$0xff] }
 0x4ad   : > { %12678 = vst [vmem:[#allocation207_spill] sm:$0xff] %v9877_v20  ;;  %v2674_v27 = vadd.f32 %v2599_v62, %v12682_v21  ;;  %v2761_v53 = vmul.f32 %v12494_v28, %v9767_v11  ;;  %v9894_v31 = vadd.f32 %v12684_v15, %v12683_v25  ;;  %12686 = vst [vmem:[#allocation200_spill] sm:$0xff] %v9896_v63  ;;  %v12691_v36 = vld [vmem:[#allocation230_spill] sm:$0xff]  ;;  %v12696_v15 = vld [vmem:[#allocation248_spill] sm:$0xff] }
 0x4ae   : > { %12687 = vst [vmem:[#allocation94_spill] sm:$0xff] %v9898_v22  ;;  %v9902_v46 = vadd.f32 %v12689_v41, %v12688_v0  ;;  %v2600_v21 = vmul.f32 %v12527_v45, %v12691_v36  ;;  %v2762_v62 = vmul.f32 %v12494_v28, %v9806_v3  ;;  %v12692_v1 = vld [vmem:[#allocation78_spill] sm:$0xff]  ;;  %v12697_v63 = vld [vmem:[#allocation80_spill] sm:$0xff]  ;;  %v9916_v47 = vadd.f32 %v2760_v48, %v2673_v5  ;;  %v12700_v41 = vld [vmem:[#allocation307_spill] sm:$0xff] }
 0x4af   : > { %12685 = vst [vmem:[#allocation206_spill] sm:$0xff] %v9894_v31  ;;  %v9910_v20 = vadd.f32 %v12693_v55, %v12692_v1  ;;  %v12695_v25 = vld [vmem:[#allocation298_spill] sm:$0xff]  ;;  %v12698_v51 = vld [vmem:[#allocation56_spill] sm:$0xff]  ;;  %v9918_v0 = vadd.f32 %v2761_v53, %v2674_v27  ;;  %v3164_v45 = vmul.f32 %v12508_v2, %v9505_v23  ;;  %v3165_v28 = vmul.f32 %v12508_v2, %v9582_v32  ;;  %v12699_v55 = vld [vmem:[#allocation17_spill] sm:$0xff] }
 0x4b0   : > { %12690 = vst [vmem:[#allocation201_spill] sm:$0xff] %v9902_v46  ;;  %v3076_v31 = vadd.f32 %v12696_v15, %v12695_v25  ;;  %v2916_v22 = vmul.f32 %v12698_v51, %v12697_v63  ;;  %3775 = vrot.lane.b32.xlu0 %v12699_v55, %s4402_s23  ;;  %3472 = vrot.lane.b32.xlu1 %v2426_v19, %s4401_s22  ;;  %v12701_v25 = vld [vmem:[#allocation231_spill] sm:$0xff]  ;;  %v12702_v63 = vld [vmem:[#allocation65_spill] sm:$0xff]  ;;  %v12704_v27 = vld [vmem:[#allocation240_spill] sm:$0xff]  ;;  %v9943_v55 = vpop.permute.xlu0 %3362  ;;  %v9945_v19 = vpop.permute.xlu1 %3360 }
 0x4b1   : > { %12694 = vst [vmem:[#allocation149_spill] sm:$0xff] %v9910_v20  ;;  %v2675_v1 = vadd.f32 %v2600_v21, %v12700_v41  ;;  %v9930_v5 = vadd.f32 %v12702_v63, %v12701_v25  ;;  %v12705_v48 = vld [vmem:[#allocation189_spill] sm:$0xff]  ;;  %v12706_v23 = vld [vmem:[#allocation235_spill] sm:$0xff]  ;;  %v12707_v15 = vld [vmem:[#allocation30_spill] sm:$0xff] }
 0x4b2   : > { %v9934_v53 = vadd.f32 %v12705_v48, %v12704_v27  ;;  %v9938_v20 = vadd.f32 %v12707_v15, %v12706_v23  ;;  %v12709_v32 = vld [vmem:[#allocation244_spill] sm:$0xff]  ;;  %12711 = vst [vmem:[#allocation174_spill] sm:$0xff] %v9943_v55  ;;  %12712 = vst [vmem:[#allocation285_spill] sm:$0xff] %v9945_v19  ;;  %v12713_v41 = vld [vmem:[#allocation241_spill] sm:$0xff] }
 0x4b3   : > { %12703 = vst [vmem:[#allocation167_spill] sm:$0xff] %v9930_v5  ;;  %v9941_v46 = vadd.f32 %v3161_v8, %v12709_v32  ;;  %v9947_v21 = vadd.f32 %v2762_v62, %v2675_v1  ;;  %v12714_v25 = vld [vmem:[#allocation64_spill] sm:$0xff]  ;;  %v9953_v5 = vadd.f32 %v3163_v57, %v3076_v31  ;;  %v12715_v27 = vld [vmem:[#allocation245_spill] sm:$0xff]  ;;  %v12716_v23 = vld [vmem:[#allocation242_spill] sm:$0xff] }
 0x4b4   : > { %12708 = vst [vmem:[#allocation118_spill] sm:$0xff] %v9938_v20  ;;  %v9951_v63 = vadd.f32 %v12714_v25, %v12713_v41  ;;  %v9956_v48 = vadd.f32 %v3162_v37, %v12715_v27  ;;  %v2917_v15 = vmul.f32 %v12698_v51, %v12716_v23  ;;  %v12717_v8 = vld [vmem:[#allocation299_spill] sm:$0xff]  ;;  %v12718_v32 = vld [vmem:[#allocation249_spill] sm:$0xff]  ;;  %v12720_v19 = vld [vmem:[#allocation82_spill] sm:$0xff]  ;;  %v3166_v25 = vmul.f32 %v12508_v2, %v9560_v56 }
 0x4b5   : > { %12710 = vst [vmem:[#allocation211_spill] sm:$0xff] %v9941_v46  ;;  %v3077_v46 = vadd.f32 %v12718_v32, %v12717_v8  ;;  %v12719_v55 = vld [vmem:[#allocation37_spill] sm:$0xff]  ;;  %v2918_v62 = vmul.f32 %v12698_v51, %v12720_v19  ;;  %v12721_v1 = vld [vmem:[#allocation59_spill] sm:$0xff]  ;;  %v12722_v31 = vld [vmem:[#allocation2_spill] sm:$0xff]  ;;  %v9979_v19 = vpop.permute.xlu1 %3364 }
 0x4b6   : > { %v3078_v20 = vadd.f32 %v12719_v55, %v2916_v22  ;;  %3779 = vrot.lane.b32.xlu0 %v12721_v1, %s4402_s23  ;;  %3777 = vrot.lane.b32.xlu1 %v12722_v31, %s4402_s23  ;;  %v12723_v37 = vld [vmem:[#allocation8_spill] sm:$0xff]  ;;  %v3167_v22 = vmul.f32 %v12508_v2, %v9676_v40  ;;  %v9977_v55 = vpop.permute.xlu0 %3366  ;;  %v12724_v32 = vld [vmem:[#allocation247_spill] sm:$0xff]  ;;  %v12726_v56 = vld [vmem:[#allocation57_spill] sm:$0xff] }
 0x4b7   : > { %v3004_v57 = vmul.f32 %v12723_v37, %v12638_v6  ;;  %v3005_v41 = vmul.f32 %v12723_v37, %v12649_v9  ;;  %v9983_v23 = vadd.f32 %v3164_v45, %v3077_v46  ;;  %v2919_v6 = vmul.f32 %v12698_v51, %v12724_v32  ;;  %v12725_v9 = vld [vmem:[#allocation302_spill] sm:$0xff]  ;;  %v12728_v32 = vld [vmem:[#allocation304_spill] sm:$0xff]  ;;  %vm12905_vm2 = vmmov %vm12858_vm15 }
 0x4b8   : > { %v9981_v27 = vadd.f32 %v3165_v28, %v3078_v20  ;;  %v2920_v31 = vmul.f32 %v12698_v51, %v12725_v9  ;;  %v12727_v40 = vld [vmem:[#allocation62_spill] sm:$0xff]  ;;  %v3006_v20 = vmul.f32 %v12723_v37, %v12652_v14  ;;  %v3007_v46 = vmul.f32 %v12723_v37, %v12663_v33  ;;  %v12729_v33 = vld [vmem:[#allocation81_spill] sm:$0xff]  ;;  %vm12910_vm3 = vmmov %vm12905_vm2 }
 0x4b9   : > { %v3079_v8 = vadd.f32 %v3004_v57, %v2917_v15  ;;  %v3080_v1 = vadd.f32 %v3005_v41, %v2918_v62  ;;  %v3168_v45 = vmul.f32 %v12508_v2, %v9636_v38  ;;  %v3169_v28 = vmul.f32 %v12508_v2, %v9719_v24  ;;  %v10003_v62 = vpop.permute.xlu1 %3368  ;;  %v12730_v38 = vld [vmem:[#allocation251_spill] sm:$0xff] }
 0x4ba   : > { %3783 = vrot.lane.b32.xlu0 %v12726_v56, %s4402_s23  ;;  %3781 = vrot.lane.b32.xlu1 %v12727_v40, %s4402_s23  ;;  %v10001_v15 = vpop.permute.xlu0 %3370  ;;  %v2921_v14 = vmul.f32 %v12698_v51, %v12728_v32  ;;  %v3081_v9 = vadd.f32 %v3006_v20, %v2919_v6  ;;  %v3082_v56 = vadd.f32 %v3007_v46, %v2920_v31  ;;  %v12731_v24 = vld [vmem:[#allocation23_spill] sm:$0xff] }
 0x4bb   : > { %v10005_v57 = vadd.f32 %v3167_v22, %v3080_v1  ;;  %v10007_v41 = vadd.f32 %v3166_v25, %v3079_v8  ;;  %v2922_v40 = vmul.f32 %v12698_v51, %v12729_v33  ;;  %v3008_v22 = vmul.f32 %v12723_v37, %v12664_v60  ;;  %v12732_v33 = vld [vmem:[#allocation108_spill] sm:$0xff] }
 0x4bc   : > { %v3009_v25 = vmul.f32 %v12723_v37, %v12676_v26  ;;  %v3170_v8 = vmul.f32 %v12508_v2, %v9683_v29  ;;  %v3171_v6 = vmul.f32 %v12508_v2, %v9797_v12  ;;  %v10029_v20 = vadd.f32 %v3169_v28, %v3082_v56  ;;  %v12733_v26 = vld [vmem:[#allocation305_spill] sm:$0xff]  ;;  %v12734_v29 = vld [vmem:[#allocation40_spill] sm:$0xff] }
 0x4bd   : > { %v10027_v31 = vpop.permute.xlu1 %3372  ;;  %v10031_v46 = vadd.f32 %v3168_v45, %v3081_v9  ;;  %v3083_v32 = vadd.f32 %v3008_v22, %v2921_v14  ;;  %v2923_v60 = vmul.f32 %v12698_v51, %v12732_v33  ;;  %v12735_v12 = vld [vmem:[#allocation268_spill] sm:$0xff]  ;;  %v3010_v28 = vmul.f32 %v12723_v37, %v12679_v52  ;;  %v12736_v52 = vld [vmem:[#allocation111_spill] sm:$0xff] }
 0x4be   : > { %3787 = vrot.lane.b32.xlu0 %v12730_v38, %s4402_s23  ;;  %3785 = vrot.lane.b32.xlu1 %v12731_v24, %s4402_s23  ;;  %v10025_v1 = vpop.permute.xlu0 %3374  ;;  %v3084_v38 = vadd.f32 %v3009_v25, %v2922_v40  ;;  %v2924_v24 = vmul.f32 %v12698_v51, %v12733_v26  ;;  %v3011_v45 = vmul.f32 %v12723_v37, %v12691_v36  ;;  %v12737_v36 = vld [vmem:[#allocation165_spill] sm:$0xff] }
 0x4bf   : > { %v3173_v14 = vmul.f32 %v12508_v2, %v9806_v3  ;;  %v3172_v9 = vmul.f32 %v12508_v2, %v9767_v11  ;;  %v10055_v22 = vadd.f32 %v3170_v8, %v3083_v32  ;;  %v3085_v25 = vadd.f32 %v3010_v28, %v2923_v60  ;;  %v12739_v8 = vld [vmem:[#allocation5_spill] sm:$0xff]  ;;  %v12745_v28 = vld [vmem:[#allocation42_spill] sm:$0xff] }
 0x4c0   : > { %v10053_v40 = vadd.f32 %v3171_v6, %v3084_v38  ;;  %v3086_v33 = vadd.f32 %v3011_v45, %v2924_v24  ;;  %v12738_v6 = vld [vmem:[#allocation261_spill] sm:$0xff] }
 0x4c1   : > { %v10051_v51 = vpop.permute.xlu1 %3376  ;;  %v10067_v11 = vadd.f32 %v3172_v9, %v3085_v25  ;;  %v12740_v38 = vld [vmem:[#allocation97_spill] sm:$0xff]  ;;  %v12748_v9 = vld [vmem:[#allocation12_spill] sm:$0xff] }
 0x4c2   : > { %3791 = vrot.lane.b32.xlu0 %v12734_v29, %s4402_s23  ;;  %3789 = vrot.lane.b32.xlu1 %v12735_v12, %s4402_s23  ;;  %v10049_v56 = vpop.permute.xlu0 %3378  ;;  %v10065_v2 = vadd.f32 %v3173_v14, %v3086_v33  ;;  %v12741_v26 = vld [vmem:[#allocation49_spill] sm:$0xff]  ;;  %v12744_v12 = vld [vmem:[#allocation48_spill] sm:$0xff] }
 0x4c3   : > { %v12749_v25 = vld [vmem:[#allocation116_spill] sm:$0xff] }
 0x4c5   : > { %v10063_v37 = vpop.permute.xlu1 %3380 }
 0x4c6   : > { %3795 = vrot.lane.b32.xlu0 %v12736_v52, %s4402_s23  ;;  %3793 = vrot.lane.b32.xlu1 %v12737_v36, %s4402_s23  ;;  %v10061_v3 = vpop.permute.xlu0 %3382  ;;  %v12752_v36 = vld [vmem:[#allocation275_spill] sm:$0xff] }
 0x4c9   : > { %v10075_v60 = vpop.permute.xlu1 %3384 }
 0x4ca   : > { %3799 = vrot.lane.b32.xlu0 %v12738_v6, %s4402_s23  ;;  %3797 = vrot.lane.b32.xlu1 %v12739_v8, %s4402_s23  ;;  %v10073_v32 = vpop.permute.xlu0 %3386  ;;  %v12753_v6 = vld [vmem:[#allocation308_spill] sm:$0xff] }
 0x4cd   : > { %v10083_v29 = vpop.permute.xlu1 %3388 }
 0x4ce   : > { %3803 = vrot.lane.b32.xlu0 %v12740_v38, %s4402_s23  ;;  %3801 = vrot.lane.b32.xlu1 %v12741_v26, %s4402_s23  ;;  %v10081_v24 = vpop.permute.xlu0 %3390  ;;  %12743 = vst [vmem:[#allocation210_spill] sm:$0xff] %v10083_v29  ;;  %v12756_v26 = vld [vmem:[#allocation277_spill] sm:$0xff]  ;;  %v12787_v29 = vld [vmem:[#allocation20_spill] sm:$0xff] }
 0x4cf   : > { %12742 = vst [vmem:[#allocation26_spill] sm:$0xff] %v10081_v24 }
 0x4d1   : > { %v10091_v14 = vpop.permute.xlu1 %3392 }
 0x4d2   : > { %3807 = vrot.lane.b32.xlu0 %v12744_v12, %s4402_s23  ;;  %3805 = vrot.lane.b32.xlu1 %v12745_v28, %s4402_s23  ;;  %v10089_v45 = vpop.permute.xlu0 %3394  ;;  %12747 = vst [vmem:[#allocation15_spill] sm:$0xff] %v10091_v14  ;;  %v12757_v12 = vld [vmem:[#allocation310_spill] sm:$0xff] }
 0x4d3   : > { %12746 = vst [vmem:[#allocation286_spill] sm:$0xff] %v10089_v45 }
 0x4d5   : > { %v10099_v52 = vpop.permute.xlu1 %3396 }
 0x4d6   : > { %3811 = vrot.lane.b32.xlu0 %v12748_v9, %s4402_s23  ;;  %3809 = vrot.lane.b32.xlu1 %v12749_v25, %s4402_s23  ;;  %v10097_v33 = vpop.permute.xlu0 %3398  ;;  %12751 = vst [vmem:[#allocation168_spill] sm:$0xff] %v10099_v52  ;;  %v12760_v25 = vld [vmem:[#allocation158_spill] sm:$0xff]  ;;  %v12783_v52 = vld [vmem:[#allocation181_spill] sm:$0xff] }
 0x4d7   : > { %12750 = vst [vmem:[#allocation173_spill] sm:$0xff] %v10097_v33  ;;  %v12782_v33 = vld [vmem:[#allocation45_spill] sm:$0xff] }
 0x4d9   : > { %v10107_v38 = vpop.permute.xlu1 %3400 }
 0x4da   : > { %3815 = vrot.lane.b32.xlu0 %v12752_v36, %s4402_s23  ;;  %3813 = vrot.lane.b32.xlu1 %v12753_v6, %s4402_s23  ;;  %v10105_v8 = vpop.permute.xlu0 %3402  ;;  %12755 = vst [vmem:[#allocation83_spill] sm:$0xff] %v10107_v38  ;;  %v12761_v36 = vld [vmem:[#allocation106_spill] sm:$0xff]  ;;  %v12764_v38 = vld [vmem:[#allocation100_spill] sm:$0xff] }
 0x4db   : > { %12754 = vst [vmem:[#allocation86_spill] sm:$0xff] %v10105_v8 }
 0x4dd   : > { %v10115_v9 = vpop.permute.xlu1 %3404 }
 0x4de   : > { %3819 = vrot.lane.b32.xlu0 %v12756_v26, %s4402_s23  ;;  %3817 = vrot.lane.b32.xlu1 %v12757_v12, %s4402_s23  ;;  %v10113_v28 = vpop.permute.xlu0 %3406  ;;  %12759 = vst [vmem:[#allocation287_spill] sm:$0xff] %v10115_v9  ;;  %v12765_v26 = vld [vmem:[#allocation132_spill] sm:$0xff] }
 0x4df   : > { %12758 = vst [vmem:[#allocation84_spill] sm:$0xff] %v10113_v28  ;;  %v12768_v9 = vld [vmem:[#allocation72_spill] sm:$0xff] }
 0x4e1   : > { %v10123_v8 = vpop.permute.xlu1 %3408 }
 0x4e2   : > { %3823 = vrot.lane.b32.xlu0 %v12760_v25, %s4402_s23  ;;  %3821 = vrot.lane.b32.xlu1 %v12761_v36, %s4402_s23  ;;  %v10121_v6 = vpop.permute.xlu0 %3410  ;;  %12763 = vst [vmem:[#allocation214_spill] sm:$0xff] %v10123_v8  ;;  %v12769_v25 = vld [vmem:[#allocation107_spill] sm:$0xff] }
 0x4e3   : > { %12762 = vst [vmem:[#allocation7_spill] sm:$0xff] %v10121_v6  ;;  %v12772_v8 = vld [vmem:[#allocation127_spill] sm:$0xff] }
 0x4e5   : > { %v10131_v28 = vpop.permute.xlu1 %3412 }
 0x4e6   : > { %3827 = vrot.lane.b32.xlu0 %v12764_v38, %s4402_s23  ;;  %3825 = vrot.lane.b32.xlu1 %v12765_v26, %s4402_s23  ;;  %v10129_v12 = vpop.permute.xlu0 %3414  ;;  %12767 = vst [vmem:[#allocation103_spill] sm:$0xff] %v10131_v28  ;;  %v12773_v38 = vld [vmem:[#allocation31_spill] sm:$0xff]  ;;  %v12776_v28 = vld [vmem:[#allocation129_spill] sm:$0xff] }
 0x4e7   : > { %12766 = vst [vmem:[#allocation288_spill] sm:$0xff] %v10129_v12 }
 0x4e9   : > { %v10139_v6 = vpop.permute.xlu1 %3416 }
 0x4ea   : > { %3831 = vrot.lane.b32.xlu0 %v12768_v9, %s4402_s23  ;;  %3829 = vrot.lane.b32.xlu1 %v12769_v25, %s4402_s23  ;;  %v10137_v36 = vpop.permute.xlu0 %3418  ;;  %12771 = vst [vmem:[#allocation175_spill] sm:$0xff] %v10139_v6  ;;  %v12777_v9 = vld [vmem:[#allocation177_spill] sm:$0xff]  ;;  %v12780_v6 = vld [vmem:[#allocation176_spill] sm:$0xff] }
 0x4eb   : > { %12770 = vst [vmem:[#allocation178_spill] sm:$0xff] %v10137_v36 }
 0x4ed   : > { %v10147_v12 = vpop.permute.xlu1 %3420 }
 0x4ee   : > { %3835 = vrot.lane.b32.xlu0 %v12772_v8, %s4402_s23  ;;  %3833 = vrot.lane.b32.xlu1 %v12773_v38, %s4402_s23  ;;  %v10145_v26 = vpop.permute.xlu0 %3422  ;;  %12775 = vst [vmem:[#allocation54_spill] sm:$0xff] %v10147_v12  ;;  %v12781_v8 = vld [vmem:[#allocation140_spill] sm:$0xff] }
 0x4ef   : > { %12774 = vst [vmem:[#allocation47_spill] sm:$0xff] %v10145_v26 }
 0x4f1   : > { %v10155_v36 = vpop.permute.xlu1 %3424 }
 0x4f2   : > { %3839 = vrot.lane.b32.xlu0 %v12776_v28, %s4402_s23  ;;  %3837 = vrot.lane.b32.xlu1 %v12777_v9, %s4402_s23  ;;  %v10153_v25 = vpop.permute.xlu0 %3426  ;;  %12779 = vst [vmem:[#allocation96_spill] sm:$0xff] %v10155_v36  ;;  %v12785_v36 = vld [vmem:[#allocation141_spill] sm:$0xff] }
 0x4f3   : > { %12778 = vst [vmem:[#allocation69_spill] sm:$0xff] %v10153_v25 }
 0x4f5   : > { %v3429_v26 = vpop.permute.xlu1 %3428 }
 0x4f6   : > { %3843 = vrot.lane.b32.xlu0 %v12780_v6, %s4402_s23  ;;  %3841 = vrot.lane.b32.xlu1 %v12781_v8, %s4402_s23  ;;  %v3431_v38 = vpop.permute.xlu0 %3430  ;;  %v3524_v12 = vsel %vm3474_vm6, %v10153_v25, %v3429_v26  ;;  %v12786_v6 = vld [vmem:[#allocation186_spill] sm:$0xff] }
 0x4f7   : > { %v3525_v28 = vsel %vm3474_vm6, %v3429_v26, %v3431_v38  ;;  %v10165_v9 = vadd.f32 %v3524_v12, %v12782_v33  ;;  %v12788_v33 = vld [vmem:[#allocation281_spill] sm:$0xff] }
 0x4f8   : > { %v10168_v45 = vadd.f32 %v3525_v28, %v12783_v52  ;;  %v12789_v52 = vld [vmem:[#allocation184_spill] sm:$0xff] }
 0x4f9   : > { %v3433_v14 = vpop.permute.xlu1 %3432 }
 0x4fa   : > { %12784 = vst [vmem:[#allocation289_spill] sm:$0xff] %v10168_v45  ;;  %3847 = vrot.lane.b32.xlu0 %v12785_v36, %s4402_s23  ;;  %3845 = vrot.lane.b32.xlu1 %v12786_v6, %s4402_s23  ;;  %v3435_v8 = vpop.permute.xlu0 %3434  ;;  %v3526_v24 = vsel %vm3474_vm6, %v3431_v38, %v3433_v14  ;;  %v12790_v36 = vld [vmem:[#allocation280_spill] sm:$0xff] }
 0x4fb   : > { %v3527_v25 = vsel %vm3474_vm6, %v3433_v14, %v3435_v8  ;;  %v10177_v26 = vadd.f32 %v3526_v24, %v12787_v29 }
 0x4fc   : > { %v10180_v12 = vadd.f32 %v3527_v25, %v12788_v33 }
 0x4fd   : > { %v3437_v6 = vpop.permute.xlu1 %3436 }
 0x4fe   : > { %3851 = vrot.lane.b32.xlu0 %v12789_v52, %s4402_s23  ;;  %3849 = vrot.lane.b32.xlu1 %v12790_v36, %s4402_s23  ;;  %v3439_v28 = vpop.permute.xlu0 %3438  ;;  %v3528_v45 = vsel %vm3474_vm6, %v3435_v8, %v3437_v6 }
 0x4ff   : > { %v3529_v38 = vsel %vm3474_vm6, %v3437_v6, %v3439_v28  ;;  %v10189_v14 = vadd.f32 %v3528_v45, %v9597_v30 }
 0x500   : > { %v10192_v24 = vadd.f32 %v3529_v38, %v9599_v16 }
 0x501   : > { %v3441_v25 = vpop.permute.xlu1 %3440 }
 0x502   : > { %3855 = vrot.lane.b32.xlu0 %v9603_v44, %s4402_s23  ;;  %3853 = vrot.lane.b32.xlu1 %v9607_v50, %s4402_s23  ;;  %v3443_v29 = vpop.permute.xlu0 %3442  ;;  %v3530_v33 = vsel %vm3474_vm6, %v3439_v28, %v3441_v25 }
 0x503   : > { %v3531_v8 = vsel %vm3474_vm6, %v3441_v25, %v3443_v29  ;;  %v10201_v52 = vadd.f32 %v3530_v33, %v9656_v61 }
 0x504   : > { %v10204_v30 = vadd.f32 %v3531_v8, %v9671_v43 }
 0x505   : > { %v3445_v44 = vpop.permute.xlu1 %3444 }
 0x506   : > { %3859 = vrot.lane.b32.xlu0 %v9628_v49, %s4402_s23  ;;  %3857 = vrot.lane.b32.xlu1 %v9632_v42, %s4402_s23  ;;  %v3447_v16 = vpop.permute.xlu0 %3446  ;;  %v3532_v50 = vsel %vm3474_vm6, %v3443_v29, %v3445_v44 }
 0x507   : > { %v3533_v45 = vsel %vm3474_vm6, %v3445_v44, %v3447_v16  ;;  %v10213_v36 = vadd.f32 %v3532_v50, %v9688_v13 }
 0x508   : > { %v10216_v61 = vadd.f32 %v3533_v45, %v9700_v34 }
 0x509   : > { %v3449_v42 = vpop.permute.xlu1 %3448 }
 0x50a   : > { %3863 = vrot.lane.b32.xlu0 %v9662_v39, %s4402_s23  ;;  %3861 = vrot.lane.b32.xlu1 %v9666_v59, %s4402_s23  ;;  %v3451_v49 = vpop.permute.xlu0 %3450  ;;  %v3534_v43 = vsel %vm3474_vm6, %v3447_v16, %v3449_v42 }
 0x50b   : > { %v3535_v28 = vsel %vm3474_vm6, %v3449_v42, %v3451_v49  ;;  %v10225_v6 = vadd.f32 %v3534_v43, %v9731_v18  ;;  %v12795_v42 = vld [vmem:[#allocation29_spill] sm:$0xff] }
 0x50c   : > { %v10228_v13 = vadd.f32 %v3535_v28, %v9733_v54 }
 0x50d   : > { %v3453_v59 = vpop.permute.xlu1 %3452 }
 0x50e   : > { %3867 = vrot.lane.b32.xlu0 %v9706_v10, %s4402_s23  ;;  %3865 = vrot.lane.b32.xlu1 %v9710_v35, %s4402_s23  ;;  %v3455_v39 = vpop.permute.xlu0 %3454  ;;  %v3536_v34 = vsel %vm3474_vm6, %v3451_v49, %v3453_v59  ;;  %v12791_v10 = vld [vmem:[#allocation198_spill] sm:$0xff] }
 0x50f   : > { %v3537_v38 = vsel %vm3474_vm6, %v3453_v59, %v3455_v39  ;;  %v10237_v29 = vadd.f32 %v3536_v34, %v9771_v17  ;;  %v12792_v17 = vld [vmem:[#allocation159_spill] sm:$0xff]  ;;  %v12798_v59 = vld [vmem:[#allocation154_spill] sm:$0xff] }
 0x510   : > { %v10240_v18 = vadd.f32 %v3537_v38, %v9773_v58  ;;  %v12793_v58 = vld [vmem:[#allocation194_spill] sm:$0xff] }
 0x511   : > { %v3457_v35 = vpop.permute.xlu1 %3456 }
 0x512   : > { %3871 = vrot.lane.b32.xlu0 %v9748_v7, %s4402_s23  ;;  %3869 = vrot.lane.b32.xlu1 %v12791_v10, %s4402_s23  ;;  %v3459_v54 = vpop.permute.xlu0 %3458  ;;  %v3538_v25 = vsel %vm3474_vm6, %v3455_v39, %v3457_v35  ;;  %v12794_v7 = vld [vmem:[#allocation115_spill] sm:$0xff]  ;;  %v12797_v39 = vld [vmem:[#allocation156_spill] sm:$0xff] }
 0x513   : > { %v3539_v33 = vsel %vm3474_vm6, %v3457_v35, %v3459_v54  ;;  %v10249_v8 = vadd.f32 %v3538_v25, %v9800_v4  ;;  %v12796_v4 = vld [vmem:[#allocation284_spill] sm:$0xff]  ;;  %v12799_v35 = vld [vmem:[#allocation265_spill] sm:$0xff] }
 0x514   : > { %v10252_v16 = vadd.f32 %v3539_v33, %v12792_v17  ;;  %v12800_v33 = vld [vmem:[#allocation207_spill] sm:$0xff] }
 0x515   : > { %v3461_v50 = vpop.permute.xlu1 %3460 }
 0x516   : > { %3875 = vrot.lane.b32.xlu0 %v12793_v58, %s4402_s23  ;;  %3873 = vrot.lane.b32.xlu1 %v12794_v7, %s4402_s23  ;;  %v3463_v44 = vpop.permute.xlu0 %3462  ;;  %v3540_v45 = vsel %vm3474_vm6, %v3459_v54, %v3461_v50  ;;  %v12801_v58 = vld [vmem:[#allocation162_spill] sm:$0xff]  ;;  %v12802_v7 = vld [vmem:[#allocation157_spill] sm:$0xff] }
 0x517   : > { %v3541_v49 = vsel %vm3474_vm6, %v3461_v50, %v3463_v44  ;;  %v10261_v43 = vadd.f32 %v3540_v45, %v12795_v42 }
 0x518   : > { %v10264_v28 = vadd.f32 %v3541_v49, %v12796_v4 }
 0x519   : > { %v3465_v38 = vpop.permute.xlu1 %3464 }
 0x51a   : > { %3879 = vrot.lane.b32.xlu0 %v12797_v39, %s4402_s23  ;;  %3877 = vrot.lane.b32.xlu1 %v12798_v59, %s4402_s23  ;;  %v3467_v34 = vpop.permute.xlu0 %3466  ;;  %v3542_v10 = vsel %vm3474_vm6, %v3463_v44, %v3465_v38  ;;  %v12805_v39 = vld [vmem:[#allocation206_spill] sm:$0xff]  ;;  %v12806_v59 = vld [vmem:[#allocation201_spill] sm:$0xff] }
 0x51b   : > { %v3543_v54 = vsel %vm3474_vm6, %v3465_v38, %v3467_v34  ;;  %v10273_v25 = vadd.f32 %v3542_v10, %v12799_v35  ;;  %v12808_v35 = vld [vmem:[#allocation282_spill] sm:$0xff] }
 0x51c   : > { %v10276_v17 = vadd.f32 %v3543_v54, %v12800_v33  ;;  %v12807_v54 = vld [vmem:[#allocation28_spill] sm:$0xff] }
 0x51e   : > { %3883 = vrot.lane.b32.xlu0 %v12801_v58, %s4402_s23  ;;  %3881 = vrot.lane.b32.xlu1 %v12802_v7, %s4402_s23  ;;  %v3471_v50 = vpop.permute.xlu0 %3470  ;;  %v3469_v45 = vpop.permute.xlu1 %3468  ;;  %v12810_v58 = vld [vmem:[#allocation149_spill] sm:$0xff]  ;;  %v12811_v7 = vld [vmem:[#allocation167_spill] sm:$0xff] }
 0x51f   : > { %v3544_v49 = vsel %vm3474_vm6, %v3467_v34, %v3469_v45  ;;  %v3545_v44 = vsel %vm3474_vm6, %v3469_v45, %v3471_v50  ;;  %v3475_v34 = vsel %vm3474_vm6, %v12808_v35, %v12807_v54  ;;  %v12812_v45 = vld [vmem:[#allocation46_spill] sm:$0xff] }
 0x520   : > { %v10285_v42 = vadd.f32 %v3544_v49, %v9916_v47  ;;  %v10288_v4 = vadd.f32 %v3545_v44, %v9918_v0  ;;  %v3622_v47 = vsel %vm3474_vm6, 0.0, %v12808_v35  ;;  %v12813_v44 = vld [vmem:[#allocation252_spill] sm:$0xff] }
 0x521   : > { %v3625_v49 = vadd.f32 %v3622_v47, %v12812_v45  ;;  %v12817_v45 = vld [vmem:[#allocation27_spill] sm:$0xff] }
 0x522   : > { %12803 = vst [vmem:[#allocation13_spill] sm:$0xff] %v10285_v42  ;;  %12804 = vst [vmem:[#allocation93_spill] sm:$0xff] %v10288_v4  ;;  %3887 = vrot.lane.b32.xlu0 %v12805_v39, %s4402_s23  ;;  %3885 = vrot.lane.b32.xlu1 %v12806_v59, %s4402_s23  ;;  %v3776_v38 = vpop.permute.xlu0 %3775  ;;  %v3473_v10 = vpop.permute.xlu1 %3472  ;;  %v3626_v39 = vadd.f32 %v3475_v34, %v12813_v44  ;;  %v12818_v42 = vld [vmem:[#allocation260_spill] sm:$0xff] }
 0x523   : > { %v3546_v33 = vsel %vm3474_vm6, %v3471_v50, %v3473_v10  ;;  %v12815_v10 = vld [vmem:[#allocation267_spill] sm:$0xff] }
 0x524   : > { %v10301_v0 = vadd.f32 %v3546_v33, %v9947_v21  ;;  %v12814_v21 = vld [vmem:[#allocation283_spill] sm:$0xff] }
 0x525   : > { %v3476_v50 = vsel %vm3474_vm6, %v12807_v54, %v12814_v21  ;;  %v3477_v35 = vsel %vm3474_vm6, %v12814_v21, %v12815_v10 }
 0x526   : > { %12809 = vst [vmem:[#allocation290_spill] sm:$0xff] %v10301_v0  ;;  %3891 = vrot.lane.b32.xlu0 %v12810_v58, %s4402_s23  ;;  %3889 = vrot.lane.b32.xlu1 %v12811_v7, %s4402_s23  ;;  %v12816_v7 = vld [vmem:[#allocation118_spill] sm:$0xff]  ;;  %v3627_v44 = vadd.f32 %v3476_v50, %v12817_v45  ;;  %v3628_v54 = vadd.f32 %v3477_v35, %v12818_v42  ;;  %v12819_v0 = vld [vmem:[#allocation195_spill] sm:$0xff]  ;;  %v12822_v35 = vld [vmem:[#allocation25_spill] sm:$0xff] }
 0x527   : > { %v12821_v42 = vld [vmem:[#allocation211_spill] sm:$0xff] }
 0x528   : > { %v3780_v59 = vpop.permute.xlu0 %3779  ;;  %v3778_v4 = vpop.permute.xlu1 %3777 }
 0x529   : > { %v3926_v34 = vsel %vm3925_vm10, %v3776_v38, %v3778_v4  ;;  %v3927_v47 = vsel %vm3925_vm10, %v3778_v4, %v3780_v59  ;;  %v3478_v4 = vsel %vm3474_vm6, %v12815_v10, %v12819_v0 }
 0x52a   : > { %v4077_v33 = vadd.f32 %v3926_v34, %v3625_v49  ;;  %v4078_v58 = vadd.f32 %v3927_v47, %v3626_v39  ;;  %3895 = vrot.lane.b32.xlu0 %v9934_v53, %s4402_s23  ;;  %3893 = vrot.lane.b32.xlu1 %v12816_v7, %s4402_s23  ;;  %v12820_v49 = vld [vmem:[#allocation269_spill] sm:$0xff] }
 0x52b   : > { %v3479_v53 = vsel %vm3474_vm6, %v12819_v0, %v12820_v49  ;;  %v12824_v7 = vld [vmem:[#allocation153_spill] sm:$0xff] }
 0x52c   : > { %4152 = vst [vmem:[%s10314_s26] sm:$0xff] %v4077_v33  ;;  %4153 = vst [vmem:[%s10314_s26 + $0x8] sm:$0xff] %v4078_v58  ;;  %v3784_v21 = vpop.permute.xlu0 %3783  ;;  %v3782_v38 = vpop.permute.xlu1 %3781  ;;  %v3629_v33 = vadd.f32 %v3478_v4, %v12822_v35  ;;  %v12823_v58 = vld [vmem:[#allocation89_spill] sm:$0xff]  ;;  %v3480_v45 = vsel %vm3474_vm6, %v12820_v49, %v12824_v7 }
 0x52d   : > { %v3928_v39 = vsel %vm3925_vm10, %v3780_v59, %v3782_v38  ;;  %v3929_v50 = vsel %vm3925_vm10, %v3782_v38, %v3784_v21  ;;  %v3630_v10 = vadd.f32 %v3479_v53, %v12823_v58  ;;  %v12826_v53 = vld [vmem:[#allocation6_spill] sm:$0xff] }
 0x52e   : > { %v4079_v34 = vadd.f32 %v3928_v39, %v3627_v44  ;;  %v4080_v47 = vadd.f32 %v3929_v50, %v3628_v54  ;;  %3899 = vrot.lane.b32.xlu0 %v12821_v42, %s4402_s23  ;;  %3897 = vrot.lane.b32.xlu1 %v9951_v63, %s4402_s23  ;;  %v12825_v44 = vld [vmem:[#allocation192_spill] sm:$0xff]  ;;  %v3631_v50 = vadd.f32 %v3480_v45, %v12826_v53  ;;  %v12828_v42 = vld [vmem:[#allocation51_spill] sm:$0xff] }
 0x52f   : > { %v3481_v54 = vsel %vm3474_vm6, %v12824_v7, %v12825_v44  ;;  %v3482_v35 = vsel %vm3474_vm6, %v12825_v44, %v12828_v42  ;;  %v12830_v7 = vld [vmem:[#allocation258_spill] sm:$0xff] }
 0x530   : > { %4154 = vst [vmem:[%s10314_s26 + $0x10] sm:$0xff] %v4079_v34  ;;  %4155 = vst [vmem:[%s10314_s26 + $0x18] sm:$0xff] %v4080_v47  ;;  %v3788_v0 = vpop.permute.xlu0 %3787  ;;  %v3786_v59 = vpop.permute.xlu1 %3785  ;;  %v12827_v34 = vld [vmem:[#allocation4_spill] sm:$0xff]  ;;  %v3633_v45 = vadd.f32 %v3482_v35, %v12830_v7 }
 0x531   : > { %v3930_v63 = vsel %vm3925_vm10, %v3784_v21, %v3786_v59  ;;  %v3931_v38 = vsel %vm3925_vm10, %v3786_v59, %v3788_v0  ;;  %v3632_v49 = vadd.f32 %v3481_v54, %v12827_v34  ;;  %v12831_v54 = vld [vmem:[#allocation259_spill] sm:$0xff] }
 0x532   : > { %v4081_v4 = vadd.f32 %v3930_v63, %v3629_v33  ;;  %v4082_v39 = vadd.f32 %v3931_v38, %v3630_v10  ;;  %3903 = vrot.lane.b32.xlu0 %v9953_v5, %s4402_s23  ;;  %3901 = vrot.lane.b32.xlu1 %v9956_v48, %s4402_s23  ;;  %v12829_v33 = vld [vmem:[#allocation148_spill] sm:$0xff]  ;;  %v12832_v38 = vld [vmem:[#allocation85_spill] sm:$0xff] }
 0x533   : > { %v3483_v5 = vsel %vm3474_vm6, %v12828_v42, %v12829_v33  ;;  %v12835_v42 = vld [vmem:[#allocation105_spill] sm:$0xff] }
 0x534   : > { %4156 = vst [vmem:[%s10314_s26 + $0x20] sm:$0xff] %v4081_v4  ;;  %4157 = vst [vmem:[%s10314_s26 + $0x28] sm:$0xff] %v4082_v39  ;;  %v3792_v47 = vpop.permute.xlu0 %3791  ;;  %v3790_v21 = vpop.permute.xlu1 %3789  ;;  %v3634_v44 = vadd.f32 %v3483_v5, %v12831_v54  ;;  %v3484_v4 = vsel %vm3474_vm6, %v12829_v33, %v12832_v38  ;;  %v12833_v39 = vld [vmem:[#allocation191_spill] sm:$0xff]  ;;  %v12836_v5 = vld [vmem:[#allocation202_spill] sm:$0xff] }
 0x535   : > { %v3932_v48 = vsel %vm3925_vm10, %v3788_v0, %v3790_v21  ;;  %v3933_v58 = vsel %vm3925_vm10, %v3790_v21, %v3792_v47 }
 0x536   : > { %v4083_v10 = vadd.f32 %v3932_v48, %v3631_v50  ;;  %v4084_v59 = vadd.f32 %v3933_v58, %v3632_v49  ;;  %3907 = vrot.lane.b32.xlu0 %v9981_v27, %s4402_s23  ;;  %3905 = vrot.lane.b32.xlu1 %v9983_v23, %s4402_s23  ;;  %v3485_v27 = vsel %vm3474_vm6, %v12832_v38, %v12833_v39  ;;  %v12834_v49 = vld [vmem:[#allocation19_spill] sm:$0xff] }
 0x537   : > { %v3635_v21 = vadd.f32 %v3484_v4, %v12834_v49  ;;  %v3636_v35 = vadd.f32 %v3485_v27, %v12835_v42  ;;  %v3486_v48 = vsel %vm3474_vm6, %v12833_v39, %v12836_v5  ;;  %v12837_v58 = vld [vmem:[#allocation203_spill] sm:$0xff]  ;;  %v12841_v27 = vld [vmem:[#allocation197_spill] sm:$0xff] }
 0x538   : > { %4158 = vst [vmem:[%s10314_s26 + $0x30] sm:$0xff] %v4083_v10  ;;  %4159 = vst [vmem:[%s10314_s26 + $0x38] sm:$0xff] %v4084_v59  ;;  %v3796_v63 = vpop.permute.xlu0 %3795  ;;  %v3794_v0 = vpop.permute.xlu1 %3793  ;;  %v12840_v4 = vld [vmem:[#allocation95_spill] sm:$0xff] }
 0x539   : > { %v3934_v23 = vsel %vm3925_vm10, %v3792_v47, %v3794_v0  ;;  %v3935_v53 = vsel %vm3925_vm10, %v3794_v0, %v3796_v63  ;;  %v3488_v39 = vsel %vm3474_vm6, %v12837_v58, %v12840_v4 }
 0x53a   : > { %v4085_v50 = vadd.f32 %v3934_v23, %v3633_v45  ;;  %v4086_v34 = vadd.f32 %v3935_v53, %v3634_v44  ;;  %3911 = vrot.lane.b32.xlu0 %v10005_v57, %s4402_s23  ;;  %3909 = vrot.lane.b32.xlu1 %v10007_v41, %s4402_s23  ;;  %v3487_v57 = vsel %vm3474_vm6, %v12836_v5, %v12837_v58  ;;  %v12838_v45 = vld [vmem:[#allocation50_spill] sm:$0xff]  ;;  %v12839_v44 = vld [vmem:[#allocation219_spill] sm:$0xff] }
 0x53b   : > { %v3637_v54 = vadd.f32 %v3486_v48, %v12838_v45  ;;  %v3638_v0 = vadd.f32 %v3487_v57, %v12839_v44  ;;  %v12845_v48 = vld [vmem:[#allocation200_spill] sm:$0xff] }
 0x53c   : > { %4160 = vst [vmem:[%s10314_s26 + $0x40] sm:$0xff] %v4085_v50  ;;  %4161 = vst [vmem:[%s10314_s26 + $0x48] sm:$0xff] %v4086_v34  ;;  %v3800_v33 = vpop.permute.xlu0 %3799  ;;  %v3798_v47 = vpop.permute.xlu1 %3797  ;;  %v12842_v34 = vld [vmem:[#allocation271_spill] sm:$0xff] }
 0x53d   : > { %v3936_v41 = vsel %vm3925_vm10, %v3796_v63, %v3798_v47  ;;  %v3937_v10 = vsel %vm3925_vm10, %v3798_v47, %v3800_v33  ;;  %v3639_v49 = vadd.f32 %v3488_v39, %v12842_v34  ;;  %v12844_v47 = vld [vmem:[#allocation94_spill] sm:$0xff] }
 0x53e   : > { %v4087_v59 = vadd.f32 %v3936_v41, %v3635_v21  ;;  %v4088_v7 = vadd.f32 %v3937_v10, %v3636_v35  ;;  %3915 = vrot.lane.b32.xlu0 %v10029_v20, %s4402_s23  ;;  %3913 = vrot.lane.b32.xlu1 %v10031_v46, %s4402_s23  ;;  %v3489_v20 = vsel %vm3474_vm6, %v12840_v4, %v12841_v27  ;;  %v12843_v21 = vld [vmem:[#allocation272_spill] sm:$0xff]  ;;  %v12846_v10 = vld [vmem:[#allocation262_spill] sm:$0xff] }
 0x53f   : > { %v3640_v42 = vadd.f32 %v3489_v20, %v12843_v21  ;;  %v3490_v5 = vsel %vm3474_vm6, %v12841_v27, %v12844_v47  ;;  %v12850_v20 = vld [vmem:[#allocation131_spill] sm:$0xff]  ;;  %v3495_v21 = vsel %vm3474_vm6, %v9979_v19, %v9977_v55 }
 0x540   : > { %4162 = vst [vmem:[%s10314_s26 + $0x50] sm:$0xff] %v4087_v59  ;;  %4163 = vst [vmem:[%s10314_s26 + $0x58] sm:$0xff] %v4088_v7  ;;  %v3804_v38 = vpop.permute.xlu0 %3803  ;;  %v3802_v63 = vpop.permute.xlu1 %3801  ;;  %v3641_v59 = vadd.f32 %v3490_v5, %v12846_v10  ;;  %v12847_v7 = vld [vmem:[#allocation263_spill] sm:$0xff]  ;;  %v3498_v10 = vsel %vm3474_vm6, %v10001_v15, %v10027_v31  ;;  %v3623_v31 = vsel %vm3474_vm6, 0.0, %v10025_v1 }
 0x541   : > { %v3938_v46 = vsel %vm3925_vm10, %v3800_v33, %v3802_v63  ;;  %v3939_v23 = vsel %vm3925_vm10, %v3802_v63, %v3804_v38  ;;  %v12849_v63 = vld [vmem:[#allocation174_spill] sm:$0xff]  ;;  %v12852_v5 = vld [vmem:[#allocation135_spill] sm:$0xff] }
 0x542   : > { %v4089_v53 = vadd.f32 %v3938_v46, %v3637_v54  ;;  %v4090_v50 = vadd.f32 %v3939_v23, %v3638_v0  ;;  %3919 = vrot.lane.b32.xlu0 %v10053_v40, %s4402_s23  ;;  %3917 = vrot.lane.b32.xlu1 %v10055_v22, %s4402_s23  ;;  %v3491_v40 = vsel %vm3474_vm6, %v12844_v47, %v12845_v48  ;;  %v12848_v0 = vld [vmem:[#allocation285_spill] sm:$0xff]  ;;  %v12851_v23 = vld [vmem:[#allocation60_spill] sm:$0xff] }
 0x543   : > { %v3642_v45 = vadd.f32 %v3491_v40, %v12847_v7  ;;  %v12853_v40 = vld [vmem:[#allocation3_spill] sm:$0xff] }
 0x544   : > { %4164 = vst [vmem:[%s10314_s26 + $0x60] sm:$0xff] %v4089_v53  ;;  %4165 = vst [vmem:[%s10314_s26 + $0x68] sm:$0xff] %v4090_v50  ;;  %v3808_v35 = vpop.permute.xlu0 %3807  ;;  %v3806_v33 = vpop.permute.xlu1 %3805 }
 0x545   : > { %v3940_v22 = vsel %vm3925_vm10, %v3804_v38, %v3806_v33  ;;  %v3941_v58 = vsel %vm3925_vm10, %v3806_v33, %v3808_v35  ;;  %v3492_v38 = vsel %vm3474_vm6, %v12845_v48, %v12848_v0 }
 0x546   : > { %v4091_v57 = vadd.f32 %v3940_v22, %v3639_v49  ;;  %v4092_v41 = vadd.f32 %v3941_v58, %v3640_v42  ;;  %3923 = vrot.lane.b32.xlu0 %v10065_v2, %s4402_s23  ;;  %3921 = vrot.lane.b32.xlu1 %v10067_v11, %s4402_s23  ;;  %v3493_v2 = vsel %vm3474_vm6, %v12848_v0, %v12849_v63  ;;  %v12855_v0 = vld [vmem:[#allocation266_spill] sm:$0xff] }
 0x547   : > { %v3643_v46 = vadd.f32 %v3492_v38, %v12850_v20  ;;  %v3644_v53 = vadd.f32 %v3493_v2, %v12851_v23  ;;  %v3494_v49 = vsel %vm3474_vm6, %v12849_v63, %v9979_v19  ;;  %v3646_v22 = vadd.f32 %v3495_v21, %v12853_v40  ;;  %v12856_v63 = vld [vmem:[#allocation36_spill] sm:$0xff] }
 0x548   : > { %4166 = vst [vmem:[%s10314_s26 + $0x70] sm:$0xff] %v4091_v57  ;;  %4167 = vst [vmem:[%s10314_s26 + $0x78] sm:$0xff] %v4092_v41  ;;  %v3812_v54 = vpop.permute.xlu0 %3811  ;;  %v3810_v44 = vpop.permute.xlu1 %3809  ;;  %v3645_v48 = vadd.f32 %v3494_v49, %v12852_v5  ;;  %v3496_v58 = vsel %vm3474_vm6, %v9977_v55, %v10003_v62  ;;  %v3497_v41 = vsel %vm3474_vm6, %v10003_v62, %v10001_v15  ;;  %v12854_v55 = vld [vmem:[#allocation61_spill] sm:$0xff]  ;;  %v12857_v23 = vld [vmem:[#allocation44_spill] sm:$0xff] }
 0x549   : > { %v3942_v4 = vsel %vm3925_vm10, %v3808_v35, %v3810_v44  ;;  %v3943_v11 = vsel %vm3925_vm10, %v3810_v44, %v3812_v54  ;;  %v3647_v44 = vadd.f32 %v3496_v58, %v12854_v55  ;;  %v3648_v38 = vadd.f32 %v3497_v41, %v12855_v0  ;;  %v12860_v5 = vld [vmem:[#allocation88_spill] sm:$0xff] }
 0x54a   : > { %v4093_v39 = vadd.f32 %v3942_v4, %v3641_v59  ;;  %v4094_v27 = vadd.f32 %v3943_v11, %v3642_v45  ;;  %v3649_v62 = vadd.f32 %v3498_v10, %v12856_v63  ;;  %v3499_v49 = vsel %vm3474_vm6, %v10025_v1, %v10051_v51  ;;  %v12861_v10 = vld [vmem:[#allocation256_spill] sm:$0xff] }
 0x54b   : > { %v3500_v21 = vsel %vm3474_vm6, %v10051_v51, %v10049_v56  ;;  %v3501_v1 = vsel %vm3474_vm6, %v10049_v56, %v10063_v37  ;;  %v3502_v51 = vsel %vm3474_vm6, %v10063_v37, %v10061_v3  ;;  %v3503_v37 = vsel %vm3474_vm6, %v10061_v3, %v10075_v60 }
 0x54c   : > { %4168 = vst [vmem:[%s10314_s26 + $0x80] sm:$0xff] %v4093_v39  ;;  %4169 = vst [vmem:[%s10314_s26 + $0x88] sm:$0xff] %v4094_v27  ;;  %v3816_v50 = vpop.permute.xlu0 %3815  ;;  %v3814_v34 = vpop.permute.xlu1 %3813  ;;  %v3504_v55 = vsel %vm3474_vm6, %v10075_v60, %v10073_v32 }
 0x54d   : > { %v3944_v42 = vsel %vm3925_vm10, %v3812_v54, %v3814_v34  ;;  %v3945_v35 = vsel %vm3925_vm10, %v3814_v34, %v3816_v50 }
 0x54e   : > { %v4095_v33 = vadd.f32 %v3944_v42, %v3643_v46  ;;  %v4096_v47 = vadd.f32 %v3945_v35, %v3644_v53  ;;  %v3650_v53 = vadd.f32 %v3623_v31, %v12857_v23 }
 0x550   : > { %4170 = vst [vmem:[%s10314_s26 + $0x90] sm:$0xff] %v4095_v33  ;;  %4171 = vst [vmem:[%s10314_s26 + $0x98] sm:$0xff] %v4096_v47  ;;  %v3820_v57 = vpop.permute.xlu0 %3819  ;;  %v3818_v19 = vpop.permute.xlu1 %3817  ;;  %v12859_v33 = vld [vmem:[#allocation11_spill] sm:$0xff] }
 0x551   : > { %v3946_v59 = vsel %vm3925_vm10, %v3816_v50, %v3818_v19  ;;  %v3947_v7 = vsel %vm3925_vm10, %v3818_v19, %v3820_v57  ;;  %v3651_v47 = vadd.f32 %v3499_v49, %v12859_v33  ;;  %v12868_v49 = vld [vmem:[#allocation113_spill] sm:$0xff] }
 0x552   : > { %v4097_v45 = vadd.f32 %v3946_v59, %v3645_v48  ;;  %v4098_v54 = vadd.f32 %v3947_v7, %v3646_v22  ;;  %v3652_v48 = vadd.f32 %v3500_v21, %v12860_v5  ;;  %v3653_v59 = vadd.f32 %v3501_v1, %v12861_v10  ;;  %v12862_v7 = vld [vmem:[#allocation273_spill] sm:$0xff] }
 0x554   : > { %4172 = vst [vmem:[%s10314_s26 + $0xa0] sm:$0xff] %v4097_v45  ;;  %4173 = vst [vmem:[%s10314_s26 + $0xa8] sm:$0xff] %v4098_v54  ;;  %v3824_v2 = vpop.permute.xlu0 %3823  ;;  %v3822_v15 = vpop.permute.xlu1 %3821  ;;  %v3654_v45 = vadd.f32 %v3502_v51, %v12862_v7  ;;  %v12871_v51 = vld [vmem:[#allocation22_spill] sm:$0xff] }
 0x555   : > { %v4074_v4 = vsel %vm4073_vm14, %v3824_v2, 0.0  ;;  %v3948_v11 = vsel %vm3925_vm10, %v3820_v57, %v3822_v15  ;;  %v3949_v39 = vsel %vm3925_vm10, %v3822_v15, %v3824_v2  ;;  %v12864_v15 = vld [vmem:[#allocation151_spill] sm:$0xff] }
 0x556   : > { %v4101_v27 = vadd.f32 %v4074_v4, %v3649_v62  ;;  %v4099_v20 = vadd.f32 %v3948_v11, %v3647_v44  ;;  %v4100_v46 = vadd.f32 %v3949_v39, %v3648_v38  ;;  %v12863_v62 = vld [vmem:[#allocation152_spill] sm:$0xff]  ;;  %v3656_v31 = vadd.f32 %v3504_v55, %v12864_v15  ;;  %v12865_v11 = vld [vmem:[#allocation210_spill] sm:$0xff] }
 0x557   : > { %v3655_v2 = vadd.f32 %v3503_v37, %v12863_v62  ;;  %v3505_v60 = vsel %vm3474_vm6, %v10073_v32, %v12865_v11  ;;  %v12866_v39 = vld [vmem:[#allocation26_spill] sm:$0xff] }
 0x558   : > { %4176 = vst.msk [vmem:[%s10314_s26 + $0xc0] sm:$0xff] %vm12858_vm15, %v4101_v27  ;;  %4174 = vst [vmem:[%s10314_s26 + $0xb0] sm:$0xff] %v4099_v20  ;;  %v3828_v50 = vpop.permute.xlu0 %3827  ;;  %v3826_v34 = vpop.permute.xlu1 %3825  ;;  %v3506_v27 = vsel %vm3474_vm6, %v12865_v11, %v12866_v39 }
 0x559   : > { %4175 = vst [vmem:[%s10314_s26 + $0xb8] sm:$0xff] %v4100_v46  ;;  %v3950_v42 = vsel %vm3925_vm10, %v3826_v34, %v3828_v50  ;;  %v3658_v21 = vadd.f32 %v3506_v27, %v12868_v49 }
 0x55a   : > { %v4102_v35 = vadd.f32 %v3950_v42, %v3650_v53 }
 0x55c   : > { %4177 = vst [vmem:[%s10314_s26 + $0xc8] sm:$0xff] %v4102_v35  ;;  %v3832_v40 = vpop.permute.xlu0 %3831  ;;  %v3830_v22 = vpop.permute.xlu1 %3829  ;;  %v12869_v35 = vld [vmem:[#allocation15_spill] sm:$0xff] }
 0x55d   : > { %v3951_v58 = vsel %vm3925_vm10, %v3828_v50, %v3830_v22  ;;  %v3952_v57 = vsel %vm3925_vm10, %v3830_v22, %v3832_v40  ;;  %v12867_v50 = vld [vmem:[#allocation90_spill] sm:$0xff]  ;;  %v3507_v33 = vsel %vm3474_vm6, %v12866_v39, %v12869_v35 }
 0x55e   : > { %v4103_v19 = vadd.f32 %v3951_v58, %v3651_v47  ;;  %v4104_v41 = vadd.f32 %v3952_v57, %v3652_v48  ;;  %v3657_v34 = vadd.f32 %v3505_v60, %v12867_v50  ;;  %v12870_v47 = vld [vmem:[#allocation286_spill] sm:$0xff]  ;;  %v3659_v58 = vadd.f32 %v3507_v33, %v12871_v51 }
 0x55f   : > { %v3508_v5 = vsel %vm3474_vm6, %v12869_v35, %v12870_v47  ;;  %v12872_v57 = vld [vmem:[#allocation38_spill] sm:$0xff] }
 0x560   : > { %4178 = vst [vmem:[%s10314_s26 + $0xd0] sm:$0xff] %v4103_v19  ;;  %4179 = vst [vmem:[%s10314_s26 + $0xd8] sm:$0xff] %v4104_v41  ;;  %v3836_v54 = vpop.permute.xlu0 %3835  ;;  %v3834_v56 = vpop.permute.xlu1 %3833  ;;  %v3660_v19 = vadd.f32 %v3508_v5, %v12872_v57 }
 0x561   : > { %v3953_v44 = vsel %vm3925_vm10, %v3832_v40, %v3834_v56  ;;  %v3954_v0 = vsel %vm3925_vm10, %v3834_v56, %v3836_v54 }
 0x562   : > { %v4105_v38 = vadd.f32 %v3953_v44, %v3653_v59  ;;  %v4106_v63 = vadd.f32 %v3954_v0, %v3654_v45  ;;  %v12873_v59 = vld [vmem:[#allocation168_spill] sm:$0xff]  ;;  %v12874_v45 = vld [vmem:[#allocation173_spill] sm:$0xff]  ;;  %v12875_v0 = vld [vmem:[#allocation114_spill] sm:$0xff] }
 0x563   : > { %v3509_v7 = vsel %vm3474_vm6, %v12870_v47, %v12873_v59 }
 0x564   : > { %4180 = vst [vmem:[%s10314_s26 + $0xe0] sm:$0xff] %v4105_v38  ;;  %4181 = vst [vmem:[%s10314_s26 + $0xe8] sm:$0xff] %v4106_v63  ;;  %v3840_v4 = vpop.permute.xlu0 %3839  ;;  %v3838_v3 = vpop.permute.xlu1 %3837  ;;  %v3661_v38 = vadd.f32 %v3509_v7, %v12875_v0  ;;  %v12876_v63 = vld [vmem:[#allocation10_spill] sm:$0xff] }
 0x565   : > { %v3955_v20 = vsel %vm3925_vm10, %v3836_v54, %v3838_v3  ;;  %v3956_v46 = vsel %vm3925_vm10, %v3838_v3, %v3840_v4  ;;  %v3510_v54 = vsel %vm3474_vm6, %v12873_v59, %v12874_v45  ;;  %v12878_v3 = vld [vmem:[#allocation86_spill] sm:$0xff] }
 0x566   : > { %v4107_v23 = vadd.f32 %v3955_v20, %v3655_v2  ;;  %v4108_v53 = vadd.f32 %v3956_v46, %v3656_v31  ;;  %v3662_v62 = vadd.f32 %v3510_v54, %v12876_v63  ;;  %v12877_v31 = vld [vmem:[#allocation83_spill] sm:$0xff]  ;;  %v12879_v46 = vld [vmem:[#allocation276_spill] sm:$0xff] }
 0x567   : > { %v3512_v11 = vsel %vm3474_vm6, %v12877_v31, %v12878_v3 }
 0x568   : > { %4182 = vst [vmem:[%s10314_s26 + $0xf0] sm:$0xff] %v4107_v23  ;;  %4183 = vst [vmem:[%s10314_s26 + $0xf8] sm:$0xff] %v4108_v53  ;;  %v3844_v42 = vpop.permute.xlu0 %3843  ;;  %v3842_v32 = vpop.permute.xlu1 %3841  ;;  %v12880_v53 = vld [vmem:[#allocation309_spill] sm:$0xff] }
 0x569   : > { %v3957_v48 = vsel %vm3925_vm10, %v3840_v4, %v3842_v32  ;;  %v3958_v40 = vsel %vm3925_vm10, %v3842_v32, %v3844_v42  ;;  %v3511_v4 = vsel %vm3474_vm6, %v12874_v45, %v12877_v31  ;;  %v3664_v50 = vadd.f32 %v3512_v11, %v12880_v53  ;;  %v12882_v32 = vld [vmem:[#allocation84_spill] sm:$0xff] }
 0x56a   : > { %v4109_v22 = vadd.f32 %v3957_v48, %v3657_v34  ;;  %v4110_v1 = vadd.f32 %v3958_v40, %v3658_v21  ;;  %v3663_v23 = vadd.f32 %v3511_v4, %v12879_v46  ;;  %v12881_v21 = vld [vmem:[#allocation287_spill] sm:$0xff]  ;;  %v12883_v40 = vld [vmem:[#allocation278_spill] sm:$0xff] }
 0x56b   : > { %v3514_v35 = vsel %vm3474_vm6, %v12881_v21, %v12882_v32 }
 0x56c   : > { %4184 = vst [vmem:[%s10314_s26 + $0x100] sm:$0xff] %v4109_v22  ;;  %4185 = vst [vmem:[%s10314_s26 + $0x108] sm:$0xff] %v4110_v1  ;;  %v3848_v41 = vpop.permute.xlu0 %3847  ;;  %v3846_v10 = vpop.permute.xlu1 %3845  ;;  %v12884_v1 = vld [vmem:[#allocation112_spill] sm:$0xff] }
 0x56d   : > { %v3959_v56 = vsel %vm3925_vm10, %v3844_v42, %v3846_v10  ;;  %v3960_v37 = vsel %vm3925_vm10, %v3846_v10, %v3848_v41  ;;  %v3513_v42 = vsel %vm3474_vm6, %v12878_v3, %v12881_v21  ;;  %v3666_v51 = vadd.f32 %v3514_v35, %v12884_v1  ;;  %v12886_v10 = vld [vmem:[#allocation7_spill] sm:$0xff] }
 0x56e   : > { %v4111_v55 = vadd.f32 %v3959_v56, %v3659_v58  ;;  %v4112_v44 = vadd.f32 %v3960_v37, %v3660_v19  ;;  %v3665_v22 = vadd.f32 %v3513_v42, %v12883_v40  ;;  %v12885_v19 = vld [vmem:[#allocation214_spill] sm:$0xff]  ;;  %v12887_v37 = vld [vmem:[#allocation91_spill] sm:$0xff] }
 0x56f   : > { %v3516_v59 = vsel %vm3474_vm6, %v12885_v19, %v12886_v10 }
 0x570   : > { %4186 = vst [vmem:[%s10314_s26 + $0x110] sm:$0xff] %v4111_v55  ;;  %4187 = vst [vmem:[%s10314_s26 + $0x118] sm:$0xff] %v4112_v44  ;;  %v3852_v2 = vpop.permute.xlu0 %3851  ;;  %v3850_v15 = vpop.permute.xlu1 %3849  ;;  %v12888_v44 = vld [vmem:[#allocation166_spill] sm:$0xff] }
 0x571   : > { %v3961_v60 = vsel %vm3925_vm10, %v3848_v41, %v3850_v15  ;;  %v3962_v39 = vsel %vm3925_vm10, %v3850_v15, %v3852_v2  ;;  %v3515_v41 = vsel %vm3474_vm6, %v12882_v32, %v12885_v19  ;;  %v3668_v0 = vadd.f32 %v3516_v59, %v12888_v44  ;;  %v12890_v15 = vld [vmem:[#allocation288_spill] sm:$0xff] }
 0x572   : > { %v4113_v27 = vadd.f32 %v3961_v60, %v3661_v38  ;;  %v4114_v20 = vadd.f32 %v3962_v39, %v3662_v62  ;;  %v3667_v55 = vadd.f32 %v3515_v41, %v12887_v37  ;;  %v12889_v62 = vld [vmem:[#allocation103_spill] sm:$0xff]  ;;  %v12891_v39 = vld [vmem:[#allocation164_spill] sm:$0xff] }
 0x573   : > { %v3518_v31 = vsel %vm3474_vm6, %v12889_v62, %v12890_v15 }
 0x574   : > { %4188 = vst [vmem:[%s10314_s26 + $0x120] sm:$0xff] %v4113_v27  ;;  %4189 = vst [vmem:[%s10314_s26 + $0x128] sm:$0xff] %v4114_v20  ;;  %v3856_v34 = vpop.permute.xlu0 %3855  ;;  %v3854_v49 = vpop.permute.xlu1 %3853  ;;  %v12892_v20 = vld [vmem:[#allocation99_spill] sm:$0xff] }
 0x575   : > { %v3963_v33 = vsel %vm3925_vm10, %v3852_v2, %v3854_v49  ;;  %v3964_v47 = vsel %vm3925_vm10, %v3854_v49, %v3856_v34  ;;  %v3517_v2 = vsel %vm3474_vm6, %v12886_v10, %v12889_v62  ;;  %v3670_v46 = vadd.f32 %v3518_v31, %v12892_v20  ;;  %v12894_v49 = vld [vmem:[#allocation178_spill] sm:$0xff] }
 0x576   : > { %v4115_v5 = vadd.f32 %v3963_v33, %v3663_v23  ;;  %v4116_v48 = vadd.f32 %v3964_v47, %v3664_v50  ;;  %v3669_v27 = vadd.f32 %v3517_v2, %v12891_v39  ;;  %v12893_v50 = vld [vmem:[#allocation175_spill] sm:$0xff]  ;;  %v12895_v47 = vld [vmem:[#allocation172_spill] sm:$0xff] }
 0x577   : > { %v3520_v21 = vsel %vm3474_vm6, %v12893_v50, %v12894_v49 }
 0x578   : > { %4190 = vst [vmem:[%s10314_s26 + $0x130] sm:$0xff] %v4115_v5  ;;  %4191 = vst [vmem:[%s10314_s26 + $0x138] sm:$0xff] %v4116_v48  ;;  %v3860_v58 = vpop.permute.xlu0 %3859  ;;  %v3858_v57 = vpop.permute.xlu1 %3857  ;;  %v12896_v48 = vld [vmem:[#allocation169_spill] sm:$0xff] }
 0x579   : > { %v3965_v7 = vsel %vm3925_vm10, %v3856_v34, %v3858_v57  ;;  %v3966_v45 = vsel %vm3925_vm10, %v3858_v57, %v3860_v58  ;;  %v3519_v34 = vsel %vm3474_vm6, %v12890_v15, %v12893_v50  ;;  %v3672_v40 = vadd.f32 %v3520_v21, %v12896_v48  ;;  %v12898_v57 = vld [vmem:[#allocation47_spill] sm:$0xff] }
 0x57a   : > { %v4117_v54 = vadd.f32 %v3965_v7, %v3665_v22  ;;  %v4118_v56 = vadd.f32 %v3966_v45, %v3666_v51  ;;  %v3671_v5 = vadd.f32 %v3519_v34, %v12895_v47  ;;  %v12897_v51 = vld [vmem:[#allocation54_spill] sm:$0xff]  ;;  %v12899_v45 = vld [vmem:[#allocation136_spill] sm:$0xff] }
 0x57b   : > { %v3522_v19 = vsel %vm3474_vm6, %v12897_v51, %v12898_v57 }
 0x57c   : > { %4192 = vst [vmem:[%s10314_s26 + $0x140] sm:$0xff] %v4117_v54  ;;  %4193 = vst [vmem:[%s10314_s26 + $0x148] sm:$0xff] %v4118_v56  ;;  %v3864_v38 = vpop.permute.xlu0 %3863  ;;  %v3862_v63 = vpop.permute.xlu1 %3861  ;;  %v12900_v56 = vld [vmem:[#allocation130_spill] sm:$0xff] }
 0x57d   : > { %v3967_v4 = vsel %vm3925_vm10, %v3860_v58, %v3862_v63  ;;  %v3968_v3 = vsel %vm3925_vm10, %v3862_v63, %v3864_v38  ;;  %v3521_v58 = vsel %vm3474_vm6, %v12894_v49, %v12897_v51  ;;  %v3674_v37 = vadd.f32 %v3522_v19, %v12900_v56 }
 0x57e   : > { %v4119_v11 = vadd.f32 %v3967_v4, %v3667_v55  ;;  %v4120_v60 = vadd.f32 %v3968_v3, %v3668_v0  ;;  %v3673_v54 = vadd.f32 %v3521_v58, %v12899_v45  ;;  %v12901_v0 = vld [vmem:[#allocation69_spill] sm:$0xff]  ;;  %v12903_v3 = vld [vmem:[#allocation139_spill] sm:$0xff] }
 0x580   : > { %4194 = vst [vmem:[%s10314_s26 + $0x150] sm:$0xff] %v4119_v11  ;;  %4195 = vst [vmem:[%s10314_s26 + $0x158] sm:$0xff] %v4120_v60  ;;  %v3868_v23 = vpop.permute.xlu0 %3867  ;;  %v3866_v53 = vpop.permute.xlu1 %3865  ;;  %v12904_v60 = vld [vmem:[#allocation137_spill] sm:$0xff] }
 0x581   : > { %v3969_v42 = vsel %vm3925_vm10, %v3864_v38, %v3866_v53  ;;  %v3970_v32 = vsel %vm3925_vm10, %v3866_v53, %v3868_v23  ;;  %v12902_v38 = vld [vmem:[#allocation96_spill] sm:$0xff] }
 0x582   : > { %v4121_v35 = vadd.f32 %v3969_v42, %v3669_v27  ;;  %v4122_v33 = vadd.f32 %v3970_v32, %v3670_v46  ;;  %v3523_v63 = vsel %vm3474_vm6, %v12902_v38, %v12901_v0  ;;  %v3624_v62 = vsel %vm3474_vm6, 0.0, %v12902_v38 }
 0x583   : > { %v3675_v11 = vadd.f32 %v3624_v62, %v12903_v3  ;;  %v3676_v39 = vadd.f32 %v3523_v63, %v12904_v60 }
 0x584   : > { %4196 = vst [vmem:[%s10314_s26 + $0x160] sm:$0xff] %v4121_v35  ;;  %4197 = vst [vmem:[%s10314_s26 + $0x168] sm:$0xff] %v4122_v33  ;;  %v3872_v22 = vpop.permute.xlu0 %3871  ;;  %v3870_v1 = vpop.permute.xlu1 %3869  ;;  %v12906_v35 = vld [vmem:[#allocation289_spill] sm:$0xff] }
 0x585   : > { %v3971_v41 = vsel %vm3925_vm10, %v3868_v23, %v3870_v1  ;;  %v3972_v10 = vsel %vm3925_vm10, %v3870_v1, %v3872_v22 }
 0x586   : > { %v4123_v59 = vadd.f32 %v3971_v41, %v3671_v5  ;;  %v4124_v7 = vadd.f32 %v3972_v10, %v3672_v40 }
 0x588   : > { %4198 = vst [vmem:[%s10314_s26 + $0x170] sm:$0xff] %v4123_v59  ;;  %4199 = vst [vmem:[%s10314_s26 + $0x178] sm:$0xff] %v4124_v7  ;;  %v3876_v55 = vpop.permute.xlu0 %3875  ;;  %v3874_v44 = vpop.permute.xlu1 %3873 }
 0x589   : > { %v3973_v2 = vsel %vm3925_vm10, %v3872_v22, %v3874_v44  ;;  %v4075_v15 = vsel %vm4073_vm14, %v3874_v44, 0.0 }
 0x58a   : > { %v4125_v31 = vadd.f32 %v3973_v2, %v3673_v54  ;;  %v4126_v4 = vadd.f32 %v4075_v15, %v3674_v37 }
 0x58c   : > { %4200 = vst [vmem:[%s10314_s26 + $0x180] sm:$0xff] %v4125_v31  ;;  %4201 = vst.msk [vmem:[%s10314_s26 + $0x188] sm:$0xff] %vm12905_vm2, %v4126_v4  ;;  %v3880_v27 = vpop.permute.xlu0 %3879  ;;  %v3878_v20 = vpop.permute.xlu1 %3877 }
 0x58d   : > { %v3974_v46 = vsel %vm3925_vm10, %v3876_v55, %v3878_v20  ;;  %v3975_v23 = vsel %vm3925_vm10, %v3878_v20, %v3880_v27 }
 0x58e   : > { %v4127_v53 = vadd.f32 %v3974_v46, %v3675_v11  ;;  %v4128_v50 = vadd.f32 %v3975_v23, %v3676_v39 }
 0x590   : > { %4202 = vst [vmem:[%s10314_s26 + $0x190] sm:$0xff] %v4127_v53  ;;  %4203 = vst [vmem:[%s10314_s26 + $0x198] sm:$0xff] %v4128_v50  ;;  %v3884_v34 = vpop.permute.xlu0 %3883  ;;  %v3882_v49 = vpop.permute.xlu1 %3881 }
 0x591   : > { %v3976_v21 = vsel %vm3925_vm10, %v3880_v27, %v3882_v49  ;;  %v3977_v42 = vsel %vm3925_vm10, %v3882_v49, %v3884_v34 }
 0x592   : > { %v4129_v32 = vadd.f32 %v3976_v21, %v10165_v9  ;;  %v4130_v33 = vadd.f32 %v3977_v42, %v12906_v35 }
 0x594   : > { %4204 = vst [vmem:[%s10314_s26 + $0x1a0] sm:$0xff] %v4129_v32  ;;  %4205 = vst [vmem:[%s10314_s26 + $0x1a8] sm:$0xff] %v4130_v33  ;;  %v3888_v47 = vpop.permute.xlu0 %3887  ;;  %v3886_v5 = vpop.permute.xlu1 %3885  ;;  %v12907_v32 = vld [vmem:[#allocation290_spill] sm:$0xff]  ;;  %v12908_v33 = vld [vmem:[#allocation13_spill] sm:$0xff] }
 0x595   : > { %v3978_v48 = vsel %vm3925_vm10, %v3884_v34, %v3886_v5  ;;  %v3979_v40 = vsel %vm3925_vm10, %v3886_v5, %v3888_v47  ;;  %v12909_v5 = vld [vmem:[#allocation93_spill] sm:$0xff] }
 0x596   : > { %v4131_v22 = vadd.f32 %v3978_v48, %v10177_v26  ;;  %v4132_v1 = vadd.f32 %v3979_v40, %v10180_v12 }
 0x598   : > { %4206 = vst [vmem:[%s10314_s26 + $0x1b0] sm:$0xff] %v4131_v22  ;;  %4207 = vst [vmem:[%s10314_s26 + $0x1b8] sm:$0xff] %v4132_v1  ;;  %v3892_v9 = vpop.permute.xlu0 %3891  ;;  %v3890_v51 = vpop.permute.xlu1 %3889 }
 0x599   : > { %v3980_v58 = vsel %vm3925_vm10, %v3888_v47, %v3890_v51  ;;  %v3981_v57 = vsel %vm3925_vm10, %v3890_v51, %v3892_v9 }
 0x59a   : > { %v4133_v19 = vadd.f32 %v3980_v58, %v10189_v14  ;;  %v4134_v41 = vadd.f32 %v3981_v57, %v10192_v24 }
 0x59c   : > { %4208 = vst [vmem:[%s10314_s26 + $0x1c0] sm:$0xff] %v4133_v19  ;;  %4209 = vst [vmem:[%s10314_s26 + $0x1c8] sm:$0xff] %v4134_v41  ;;  %v3896_v26 = vpop.permute.xlu0 %3895  ;;  %v3894_v12 = vpop.permute.xlu1 %3893 }
 0x59d   : > { %v3982_v10 = vsel %vm3925_vm10, %v3892_v9, %v3894_v12  ;;  %v3983_v59 = vsel %vm3925_vm10, %v3894_v12, %v3896_v26 }
 0x59e   : > { %v4135_v7 = vadd.f32 %v3982_v10, %v10201_v52  ;;  %v4136_v45 = vadd.f32 %v3983_v59, %v10204_v30 }
 0x5a0   : > { %4210 = vst [vmem:[%s10314_s26 + $0x1d0] sm:$0xff] %v4135_v7  ;;  %4211 = vst [vmem:[%s10314_s26 + $0x1d8] sm:$0xff] %v4136_v45  ;;  %v3900_v14 = vpop.permute.xlu0 %3899  ;;  %v3898_v24 = vpop.permute.xlu1 %3897 }
 0x5a1   : > { %v3984_v54 = vsel %vm3925_vm10, %v3896_v26, %v3898_v24  ;;  %v3985_v56 = vsel %vm3925_vm10, %v3898_v24, %v3900_v14 }
 0x5a2   : > { %v4137_v37 = vadd.f32 %v3984_v54, %v10213_v36  ;;  %v4138_v55 = vadd.f32 %v3985_v56, %v10216_v61 }
 0x5a4   : > { %4212 = vst [vmem:[%s10314_s26 + $0x1e0] sm:$0xff] %v4137_v37  ;;  %4213 = vst [vmem:[%s10314_s26 + $0x1e8] sm:$0xff] %v4138_v55  ;;  %v3904_v52 = vpop.permute.xlu0 %3903  ;;  %v3902_v30 = vpop.permute.xlu1 %3901 }
 0x5a5   : > { %v3986_v44 = vsel %vm3925_vm10, %v3900_v14, %v3902_v30  ;;  %v3987_v0 = vsel %vm3925_vm10, %v3902_v30, %v3904_v52 }
 0x5a6   : > { %v4139_v38 = vadd.f32 %v3986_v44, %v10225_v6  ;;  %v4140_v63 = vadd.f32 %v3987_v0, %v10228_v13 }
 0x5a8   : > { %4214 = vst [vmem:[%s10314_s26 + $0x1f0] sm:$0xff] %v4139_v38  ;;  %4215 = vst [vmem:[%s10314_s26 + $0x1f8] sm:$0xff] %v4140_v63  ;;  %v3908_v36 = vpop.permute.xlu0 %3907  ;;  %v3906_v61 = vpop.permute.xlu1 %3905 }
 0x5a9   : > { %v3988_v62 = vsel %vm3925_vm10, %v3904_v52, %v3906_v61  ;;  %v3989_v2 = vsel %vm3925_vm10, %v3906_v61, %v3908_v36 }
 0x5aa   : > { %v4141_v15 = vadd.f32 %v3988_v62, %v10237_v29  ;;  %v4142_v31 = vadd.f32 %v3989_v2, %v10240_v18 }
 0x5ac   : > { %4216 = vst [vmem:[%s10314_s26 + $0x200] sm:$0xff] %v4141_v15  ;;  %4217 = vst [vmem:[%s10314_s26 + $0x208] sm:$0xff] %v4142_v31  ;;  %v3912_v6 = vpop.permute.xlu0 %3911  ;;  %v3910_v13 = vpop.permute.xlu1 %3909 }
 0x5ad   : > { %v3990_v4 = vsel %vm3925_vm10, %v3908_v36, %v3910_v13  ;;  %v3991_v3 = vsel %vm3925_vm10, %v3910_v13, %v3912_v6 }
 0x5ae   : > { %v4143_v11 = vadd.f32 %v3990_v4, %v10249_v8  ;;  %v4144_v60 = vadd.f32 %v3991_v3, %v10252_v16 }
 0x5b0   : > { %4218 = vst [vmem:[%s10314_s26 + $0x210] sm:$0xff] %v4143_v11  ;;  %4219 = vst [vmem:[%s10314_s26 + $0x218] sm:$0xff] %v4144_v60  ;;  %v3916_v29 = vpop.permute.xlu0 %3915  ;;  %v3914_v18 = vpop.permute.xlu1 %3913 }
 0x5b1   : > { %v3992_v39 = vsel %vm3925_vm10, %v3912_v6, %v3914_v18  ;;  %v3993_v27 = vsel %vm3925_vm10, %v3914_v18, %v3916_v29 }
 0x5b2   : > { %v4145_v20 = vadd.f32 %v3992_v39, %v10261_v43  ;;  %v4146_v46 = vadd.f32 %v3993_v27, %v10264_v28 }
 0x5b4   : > { %4220 = vst [vmem:[%s10314_s26 + $0x220] sm:$0xff] %v4145_v20  ;;  %4221 = vst [vmem:[%s10314_s26 + $0x228] sm:$0xff] %v4146_v46  ;;  %v3920_v23 = vpop.permute.xlu0 %3919  ;;  %v3918_v8 = vpop.permute.xlu1 %3917 }
 0x5b5   : > { %v3994_v16 = vsel %vm3925_vm10, %v3916_v29, %v3918_v8  ;;  %v3995_v53 = vsel %vm3925_vm10, %v3918_v8, %v3920_v23 }
 0x5b6   : > { %v4147_v50 = vadd.f32 %v3994_v16, %v10273_v25  ;;  %v4148_v34 = vadd.f32 %v3995_v53, %v10276_v17 }
 0x5b8   : > { %4222 = vst [vmem:[%s10314_s26 + $0x230] sm:$0xff] %v4147_v50  ;;  %4223 = vst [vmem:[%s10314_s26 + $0x238] sm:$0xff] %v4148_v34  ;;  %v3924_v43 = vpop.permute.xlu0 %3923  ;;  %v3922_v49 = vpop.permute.xlu1 %3921 }
 0x5b9   : > { %v4076_v28 = vsel %vm4073_vm14, %v3924_v43, 0.0  ;;  %v3996_v21 = vsel %vm3925_vm10, %v3920_v23, %v3922_v49  ;;  %v3997_v42 = vsel %vm3925_vm10, %v3922_v49, %v3924_v43 }
 0x5ba   : > { %v4151_v35 = vadd.f32 %v4076_v28, %v12907_v32  ;;  %v4149_v47 = vadd.f32 %v3996_v21, %v12908_v33  ;;  %v4150_v48 = vadd.f32 %v3997_v42, %v12909_v5 }
 0x5bc   : > { %4226 = vst.msk [vmem:[%s10314_s26 + $0x250] sm:$0xff] %vm12910_vm3, %v4151_v35  ;;  %4224 = vst [vmem:[%s10314_s26 + $0x240] sm:$0xff] %v4149_v47 }
 0x5bd   : > { %4225 = vst [vmem:[%s10314_s26 + $0x248] sm:$0xff] %v4150_v48 }
 0x5be PF: > { %s12_s9 = sadd.s32 1, %s4386_s9  }
 0x5bf   : > { %p9_p4 = scmp.ge.s32.totalorder %s12_s9, 4  }
 0x5c1   :  { %11 = sbr.rel (!%p9_p4) target bundleno = 1 (0x1), region = 61 }

</bundles_post_ra>
